<compile_context>
chip_gen: v7x
topology: tpu7x:2x2x1
jax: 0.10.0
libtpu: 0.0.40
codegen_flags: <defaults>
</compile_context>

<pallas_src>
import numpy as np
import jax
import jax.numpy as jnp
from jax.experimental import pallas as pl
from jax.experimental.pallas import tpu as pltpu

LRELU_SLOPE = 0.2
BN_EPS = 1e-5
K = 4        # conv kernel size
STRIDE = 2
PAD = 1


def _vmem_spec():
    return pl.BlockSpec(memory_space=pltpu.MemorySpace.VMEM)


def _lrelu(x):
    return jnp.where(x > 0, x, LRELU_SLOPE * x)


# ------------------------------ fused kernel ------------------------------- #

def fused_discriminator_kernel(
        p1_ref, w1_ref,                        # layer 1: input patches, weight
        gm2_ref, w2_ref, gam2_ref, bet2_ref,   # layer 2: gather mats, weight, BN
        gm3_ref, w3_ref, gam3_ref, bet3_ref,   # layer 3
        wo_ref, sel_ref, bo_ref,               # folded final Linear
        out_ref):
    # ---- conv1 (bias-free) + LeakyReLU: (B*16*16, 3*16) @ (3*16, cd) ----
    h = jnp.dot(p1_ref[...], w1_ref[...], preferred_element_type=jnp.float32)
    h = _lrelu(h)                                            # (M1, cd)

    def conv_bn_lrelu(h_in, gm_ref, w_ref, gam_ref, bet_ref):
        # conv(k=4, s=2, p=1, bias=False) expressed as  sum_k (G_k @ h) @ W_k.
        # The 16 gather matrices are stacked row-wise in gm_ref; the 16 weight
        # slabs row-wise in w_ref.  Zero-padding is encoded as all-zero G rows.
        cin = w_ref.shape[0] // (K * K)
        mo = gm_ref.shape[0] // (K * K)
        cout = w_ref.shape[1]
        # One wide MXU gather; rows of `gathered` are ordered (tap k, out pos).
        gathered = jnp.dot(gm_ref[...], h_in,
                           preferred_element_type=jnp.float32)   # (16*Mo, Cin)
        w_all = w_ref[...]
        acc = jnp.zeros((mo, cout), jnp.float32)
        for k in range(K * K):          # static unroll: 16 small MXU matmuls
            acc = acc + jnp.dot(gathered[k * mo:(k + 1) * mo, :],
                                w_all[k * cin:(k + 1) * cin, :],
                                preferred_element_type=jnp.float32)
        # BatchNorm2d (training-mode batch stats over the N*H*W rows),
        # single pass: sum & sum-of-squares -> folded per-channel scale/shift.
        inv_m = 1.0 / mo
        mu = jnp.sum(acc, axis=0, keepdims=True) * inv_m
        ex2 = jnp.sum(acc * acc, axis=0, keepdims=True) * inv_m
        var = ex2 - mu * mu
        scale = gam_ref[...] * jax.lax.rsqrt(var + BN_EPS)
        shift = bet_ref[...] - mu * scale
        return _lrelu(acc * scale + shift)

    h = conv_bn_lrelu(h, gm2_ref, w2_ref, gam2_ref, bet2_ref)   # (B*64, 2cd)
    h = conv_bn_lrelu(h, gm3_ref, w3_ref, gam3_ref, bet3_ref)   # (B*16, 4cd)

    # ---- final Linear folded in: VPU multiply + per-sample reduction ----
    z = h * wo_ref[...]                                   # (B*16, 4cd)
    y = jnp.dot(sel_ref[...], z, preferred_element_type=jnp.float32)  # (B,4cd)
    out_ref[...] = jnp.sum(y, axis=1, keepdims=True) + bo_ref[...]


# ------------------------------- glue (JAX) -------------------------------- #

def im2col_input(x):
    """NCHW image -> (B*Ho*Wo, Cin*16) patch matrix, features ordered
    (Cin, kh, kw).  Used exactly once on the raw input; XLA fuses it."""
    B, C, H, W = x.shape
    Ho = (H + 2 * PAD - K) // STRIDE + 1
    Wo = (W + 2 * PAD - K) // STRIDE + 1
    xp = jnp.pad(x, ((0, 0), (0, 0), (PAD, PAD), (PAD, PAD)))
    cols = []
    for kh in range(K):
        for kw in range(K):
            cols.append(xp[:, :, kh:kh + STRIDE * Ho:STRIDE,
                               kw:kw + STRIDE * Wo:STRIDE])   # (B,C,Ho,Wo)
    p = jnp.stack(cols, axis=-1)                 # (B, C, Ho, Wo, 16)
    p = jnp.transpose(p, (0, 2, 3, 1, 4))        # (B, Ho, Wo, C, 16)
    return p.reshape(B * Ho * Wo, C * K * K)


def _gather_matrices(batch, hi, wi):
    """Stacked (16*Mo, Mi) 0/1 row-gather matrices: tap (kh,kw) of a stride-2
    4x4 conv over a (B*Hi*Wi, C) activation.  Padding -> all-zero rows."""
    ho = (hi + 2 * PAD - K) // STRIDE + 1
    wo = (wi + 2 * PAD - K) // STRIDE + 1
    mi, mo = batch * hi * wi, batch * ho * wo
    b_i, ho_i, wo_i = np.meshgrid(np.arange(batch), np.arange(ho),
                                  np.arange(wo), indexing="ij")
    mats = []
    for kh in range(K):
        for kw in range(K):
            h = STRIDE * ho_i + kh - PAD
            w = STRIDE * wo_i + kw - PAD
            valid = (h >= 0) & (h < hi) & (w >= 0) & (w < wi)
            src = b_i * hi * wi + np.clip(h, 0, hi - 1) * wi + np.clip(w, 0, wi - 1)
            g = np.zeros((mo, mi), np.float32)
            g[np.arange(mo), src.reshape(-1)] = valid.reshape(-1)
            mats.append(g)
    return jnp.asarray(np.concatenate(mats, axis=0))


def pack_params(params, batch):
    """One-time weight packing (outside the per-forward path)."""
    cd = params["w1"].shape[0]
    H1, H2, H3 = 16, 8, 4                      # spatial sizes after conv1/2/3

    def conv_w(w):                             # (Cout,Cin,4,4) -> (16*Cin,Cout)
        return jnp.transpose(w, (2, 3, 1, 0)).reshape(-1, w.shape[0])

    # PyTorch flattens NCHW -> feature f = c*16 + h*4 + w; our layer-3 rows are
    # (b, h*4 + w) with channels on lanes -> permute + tile the linear weight.
    wo_blk = (params["wo"].reshape(4 * cd, H3, H3)
              .transpose(1, 2, 0).reshape(H3 * H3, 4 * cd))
    sel = jnp.asarray(np.kron(np.eye(batch, dtype=np.float32),
                              np.ones((1, H3 * H3), np.float32)))
    return {
        "w1": params["w1"].reshape(cd, -1).T,          # (48, cd), rows (cin,kh,kw)
        "G2": _gather_matrices(batch, H1, H1),         # (16*B*64, B*256)
        "w2": conv_w(params["w2"]),                    # (16*cd, 2cd)
        "g2": params["g2"].reshape(1, -1),
        "b2": params["b2"].reshape(1, -1),
        "G3": _gather_matrices(batch, H2, H2),         # (16*B*16, B*64)
        "w3": conv_w(params["w3"]),                    # (16*2cd, 4cd)
        "g3": params["g3"].reshape(1, -1),
        "b3": params["b3"].reshape(1, -1),
        "wo": jnp.tile(wo_blk, (batch, 1)),            # (B*16, 4cd)
        "sel": sel,                                    # (B, B*16)
        "bo": params["bo"].reshape(1, 1),
    }


def discriminator_forward(packed, x):
    """Fused forward pass; x is NCHW (B, 3, 32, 32)."""
    B = x.shape[0]
    p1 = im2col_input(x)        # only plain-JAX glue in the traced forward
    return pl.pallas_call(
        fused_discriminator_kernel,
        out_shape=jax.ShapeDtypeStruct((B, 1), jnp.float32),
        in_specs=[_vmem_spec()] * 13,
        out_specs=_vmem_spec(),
        compiler_params=pltpu.CompilerParams(
            vmem_limit_bytes=32 * 1024 * 1024),
    )(p1, packed["w1"],
      packed["G2"], packed["w2"], packed["g2"], packed["b2"],
      packed["G3"], packed["w3"], packed["g3"], packed["b3"],
      packed["wo"], packed["sel"], packed["bo"])


# --------------------------- pure-JAX reference ----------------------------- #

def reference_forward(params, x):
    def conv2d(x, w):
        return jax.lax.conv_general_dilated(
            x, w, (STRIDE, STRIDE), ((PAD, PAD), (PAD, PAD)),
            dimension_numbers=("NCHW", "OIHW", "NCHW"))

    def bn(x, g, b):
        mean = x.mean(axis=(0, 2, 3), keepdims=True)
        var = ((x - mean) ** 2).mean(axis=(0, 2, 3), keepdims=True)
        return ((x - mean) * jax.lax.rsqrt(var + BN_EPS)
                * g.reshape(1, -1, 1, 1) + b.reshape(1, -1, 1, 1))

    cd = params["w1"].shape[0]
    h = _lrelu(conv2d(x, params["w1"]))
    h = _lrelu(bn(conv2d(h, params["w2"]), params["g2"], params["b2"]))
    h = _lrelu(bn(conv2d(h, params["w3"]), params["g3"], params["b3"]))
    h = h.reshape(-1, cd * 4 * 4 * 4)
    return h @ params["wo"].T + params["bo"]


# ---------------------------------- main ------------------------------------ #

def make_params(key, conv_dim=32):
    ks = jax.random.split(key, 8)
    return {
        "w1": jax.random.normal(ks[0], (conv_dim, 3, 4, 4), jnp.float32) * 0.05,
        "w2": jax.random.normal(ks[1], (conv_dim * 2, conv_dim, 4, 4), jnp.float32) * 0.05,
        "g2": 1.0 + 0.1 * jax.random.normal(ks[2], (conv_dim * 2,), jnp.float32),
        "b2": 0.1 * jax.random.normal(ks[3], (conv_dim * 2,), jnp.float32),
        "w3": jax.random.normal(ks[4], (conv_dim * 4, conv_dim * 2, 4, 4), jnp.float32) * 0.05,
        "g3": 1.0 + 0.1 * jax.random.normal(ks[5], (conv_dim * 4,), jnp.float32),
        "b3": 0.1 * jax.random.normal(ks[6], (conv_dim * 4,), jnp.float32),
        "wo": jax.random.normal(ks[7], (1, conv_dim * 4 * 4 * 4), jnp.float32) * 0.02,
        "bo": jnp.zeros((1,), jnp.float32),
    }


if __name__ == "__main__":
    key = jax.random.PRNGKey(0)
    k_param, k_x = jax.random.split(key)
    conv_dim, B = 32, 2
    # Linear expects conv_dim*4*4*4 features -> 4x4 after three stride-2 convs
    # -> 32x32 RGB input images.
    x = jax.random.normal(k_x, (B, 3, 32, 32), jnp.float32)
    params = make_params(k_param, conv_dim)
    packed = pack_params(params, batch=B)          # one-time packing

    fwd = jax.jit(discriminator_forward)
    out = jax.block_until_ready(fwd(packed, x))

    ref = jax.block_until_ready(reference_forward(params, x))
    assert out.shape == (B, 1), out.shape
    assert jnp.allclose(out, ref, atol=1e-3, rtol=1e-3), (out, ref)
    print("KERNEL_OK")
</pallas_src>

<mosaic_0001>
module attributes {stable_mosaic.version = 11 : i64} {
  func.func @fused_discriminator_kernel(%arg0: memref<512x48xf32, #tpu.memory_space<vmem>>, %arg1: memref<48x32xf32, #tpu.memory_space<vmem>>, %arg2: memref<2048x512xf32, #tpu.memory_space<vmem>>, %arg3: memref<512x64xf32, #tpu.memory_space<vmem>>, %arg4: memref<1x64xf32, #tpu.memory_space<vmem>>, %arg5: memref<1x64xf32, #tpu.memory_space<vmem>>, %arg6: memref<512x128xf32, #tpu.memory_space<vmem>>, %arg7: memref<1024x128xf32, #tpu.memory_space<vmem>>, %arg8: memref<1x128xf32, #tpu.memory_space<vmem>>, %arg9: memref<1x128xf32, #tpu.memory_space<vmem>>, %arg10: memref<32x128xf32, #tpu.memory_space<vmem>>, %arg11: memref<2x32xf32, #tpu.memory_space<vmem>>, %arg12: memref<1x1xf32, #tpu.memory_space<vmem>>, %arg13: memref<2x1xf32, #tpu.memory_space<vmem>>) attributes {dimension_semantics = [], scalar_prefetch = 0 : i64, scratch_operands = 0 : i64, tpu.core_type = #tpu.core_type<tc>} {
    %c0 = arith.constant 0 : index
    %c0_0 = arith.constant 0 : index
    %0 = vector.load %arg0[%c0, %c0_0] : memref<512x48xf32, #tpu.memory_space<vmem>>, vector<512x48xf32>
    %c0_1 = arith.constant 0 : index
    %c0_2 = arith.constant 0 : index
    %1 = vector.load %arg1[%c0_1, %c0_2] : memref<48x32xf32, #tpu.memory_space<vmem>>, vector<48x32xf32>
    %cst = arith.constant dense<0.000000e+00> : vector<512x32xf32>
    %2 = tpu.matmul %0, %1, %cst {dimension_numbers = #tpu.dot_dimension_numbers<[1], [0], [0], [1], [0, 0, 1, 1], [], []>} : vector<512x48xf32>, vector<48x32xf32>, vector<512x32xf32> -> vector<512x32xf32>
    %cst_3 = arith.constant 0.000000e+00 : f32
    %3 = vector.broadcast %cst_3 : f32 to vector<512x32xf32>
    %4 = arith.cmpf ogt, %2, %3 : vector<512x32xf32>
    %cst_4 = arith.constant 2.000000e-01 : f32
    %5 = vector.broadcast %cst_4 : f32 to vector<512x32xf32>
    %6 = arith.mulf %5, %2 : vector<512x32xf32>
    %7 = arith.select %4, %2, %6 : vector<512x32xi1>, vector<512x32xf32>
    %c0_5 = arith.constant 0 : index
    %c0_6 = arith.constant 0 : index
    %8 = vector.load %arg2[%c0_5, %c0_6] : memref<2048x512xf32, #tpu.memory_space<vmem>>, vector<2048x512xf32>
    %cst_7 = arith.constant dense<0.000000e+00> : vector<2048x32xf32>
    %9 = tpu.matmul %8, %7, %cst_7 {dimension_numbers = #tpu.dot_dimension_numbers<[1], [0], [0], [1], [0, 0, 1, 1], [], []>} : vector<2048x512xf32>, vector<512x32xf32>, vector<2048x32xf32> -> vector<2048x32xf32>
    %c0_8 = arith.constant 0 : index
    %c0_9 = arith.constant 0 : index
    %10 = vector.load %arg3[%c0_8, %c0_9] : memref<512x64xf32, #tpu.memory_space<vmem>>, vector<512x64xf32>
    %cst_10 = arith.constant 0.000000e+00 : f32
    %11 = vector.broadcast %cst_10 : f32 to vector<128x64xf32>
    %12 = vector.extract_strided_slice %9 {offsets = [0, 0], sizes = [128, 32], strides = [1, 1]} : vector<2048x32xf32> to vector<128x32xf32>
    %13 = vector.extract_strided_slice %10 {offsets = [0, 0], sizes = [32, 64], strides = [1, 1]} : vector<512x64xf32> to vector<32x64xf32>
    %cst_11 = arith.constant dense<0.000000e+00> : vector<128x64xf32>
    %14 = tpu.matmul %12, %13, %cst_11 {dimension_numbers = #tpu.dot_dimension_numbers<[1], [0], [0], [1], [0, 0, 1, 1], [], []>} : vector<128x32xf32>, vector<32x64xf32>, vector<128x64xf32> -> vector<128x64xf32>
    %15 = arith.addf %11, %14 : vector<128x64xf32>
    %16 = vector.extract_strided_slice %9 {offsets = [128, 0], sizes = [128, 32], strides = [1, 1]} : vector<2048x32xf32> to vector<128x32xf32>
    %17 = vector.extract_strided_slice %10 {offsets = [32, 0], sizes = [32, 64], strides = [1, 1]} : vector<512x64xf32> to vector<32x64xf32>
    %cst_12 = arith.constant dense<0.000000e+00> : vector<128x64xf32>
    %18 = tpu.matmul %16, %17, %cst_12 {dimension_numbers = #tpu.dot_dimension_numbers<[1], [0], [0], [1], [0, 0, 1, 1], [], []>} : vector<128x32xf32>, vector<32x64xf32>, vector<128x64xf32> -> vector<128x64xf32>
    %19 = arith.addf %15, %18 : vector<128x64xf32>
    %20 = vector.extract_strided_slice %9 {offsets = [256, 0], sizes = [128, 32], strides = [1, 1]} : vector<2048x32xf32> to vector<128x32xf32>
    %21 = vector.extract_strided_slice %10 {offsets = [64, 0], sizes = [32, 64], strides = [1, 1]} : vector<512x64xf32> to vector<32x64xf32>
    %cst_13 = arith.constant dense<0.000000e+00> : vector<128x64xf32>
    %22 = tpu.matmul %20, %21, %cst_13 {dimension_numbers = #tpu.dot_dimension_numbers<[1], [0], [0], [1], [0, 0, 1, 1], [], []>} : vector<128x32xf32>, vector<32x64xf32>, vector<128x64xf32> -> vector<128x64xf32>
    %23 = arith.addf %19, %22 : vector<128x64xf32>
    %24 = vector.extract_strided_slice %9 {offsets = [384, 0], sizes = [128, 32], strides = [1, 1]} : vector<2048x32xf32> to vector<128x32xf32>
    %25 = vector.extract_strided_slice %10 {offsets = [96, 0], sizes = [32, 64], strides = [1, 1]} : vector<512x64xf32> to vector<32x64xf32>
    %cst_14 = arith.constant dense<0.000000e+00> : vector<128x64xf32>
    %26 = tpu.matmul %24, %25, %cst_14 {dimension_numbers = #tpu.dot_dimension_numbers<[1], [0], [0], [1], [0, 0, 1, 1], [], []>} : vector<128x32xf32>, vector<32x64xf32>, vector<128x64xf32> -> vector<128x64xf32>
    %27 = arith.addf %23, %26 : vector<128x64xf32>
    %28 = vector.extract_strided_slice %9 {offsets = [512, 0], sizes = [128, 32], strides = [1, 1]} : vector<2048x32xf32> to vector<128x32xf32>
    %29 = vector.extract_strided_slice %10 {offsets = [128, 0], sizes = [32, 64], strides = [1, 1]} : vector<512x64xf32> to vector<32x64xf32>
    %cst_15 = arith.constant dense<0.000000e+00> : vector<128x64xf32>
    %30 = tpu.matmul %28, %29, %cst_15 {dimension_numbers = #tpu.dot_dimension_numbers<[1], [0], [0], [1], [0, 0, 1, 1], [], []>} : vector<128x32xf32>, vector<32x64xf32>, vector<128x64xf32> -> vector<128x64xf32>
    %31 = arith.addf %27, %30 : vector<128x64xf32>
    %32 = vector.extract_strided_slice %9 {offsets = [640, 0], sizes = [128, 32], strides = [1, 1]} : vector<2048x32xf32> to vector<128x32xf32>
    %33 = vector.extract_strided_slice %10 {offsets = [160, 0], sizes = [32, 64], strides = [1, 1]} : vector<512x64xf32> to vector<32x64xf32>
    %cst_16 = arith.constant dense<0.000000e+00> : vector<128x64xf32>
    %34 = tpu.matmul %32, %33, %cst_16 {dimension_numbers = #tpu.dot_dimension_numbers<[1], [0], [0], [1], [0, 0, 1, 1], [], []>} : vector<128x32xf32>, vector<32x64xf32>, vector<128x64xf32> -> vector<128x64xf32>
    %35 = arith.addf %31, %34 : vector<128x64xf32>
    %36 = vector.extract_strided_slice %9 {offsets = [768, 0], sizes = [128, 32], strides = [1, 1]} : vector<2048x32xf32> to vector<128x32xf32>
    %37 = vector.extract_strided_slice %10 {offsets = [192, 0], sizes = [32, 64], strides = [1, 1]} : vector<512x64xf32> to vector<32x64xf32>
    %cst_17 = arith.constant dense<0.000000e+00> : vector<128x64xf32>
    %38 = tpu.matmul %36, %37, %cst_17 {dimension_numbers = #tpu.dot_dimension_numbers<[1], [0], [0], [1], [0, 0, 1, 1], [], []>} : vector<128x32xf32>, vector<32x64xf32>, vector<128x64xf32> -> vector<128x64xf32>
    %39 = arith.addf %35, %38 : vector<128x64xf32>
    %40 = vector.extract_strided_slice %9 {offsets = [896, 0], sizes = [128, 32], strides = [1, 1]} : vector<2048x32xf32> to vector<128x32xf32>
    %41 = vector.extract_strided_slice %10 {offsets = [224, 0], sizes = [32, 64], strides = [1, 1]} : vector<512x64xf32> to vector<32x64xf32>
    %cst_18 = arith.constant dense<0.000000e+00> : vector<128x64xf32>
    %42 = tpu.matmul %40, %41, %cst_18 {dimension_numbers = #tpu.dot_dimension_numbers<[1], [0], [0], [1], [0, 0, 1, 1], [], []>} : vector<128x32xf32>, vector<32x64xf32>, vector<128x64xf32> -> vector<128x64xf32>
    %43 = arith.addf %39, %42 : vector<128x64xf32>
    %44 = vector.extract_strided_slice %9 {offsets = [1024, 0], sizes = [128, 32], strides = [1, 1]} : vector<2048x32xf32> to vector<128x32xf32>
    %45 = vector.extract_strided_slice %10 {offsets = [256, 0], sizes = [32, 64], strides = [1, 1]} : vector<512x64xf32> to vector<32x64xf32>
    %cst_19 = arith.constant dense<0.000000e+00> : vector<128x64xf32>
    %46 = tpu.matmul %44, %45, %cst_19 {dimension_numbers = #tpu.dot_dimension_numbers<[1], [0], [0], [1], [0, 0, 1, 1], [], []>} : vector<128x32xf32>, vector<32x64xf32>, vector<128x64xf32> -> vector<128x64xf32>
    %47 = arith.addf %43, %46 : vector<128x64xf32>
    %48 = vector.extract_strided_slice %9 {offsets = [1152, 0], sizes = [128, 32], strides = [1, 1]} : vector<2048x32xf32> to vector<128x32xf32>
    %49 = vector.extract_strided_slice %10 {offsets = [288, 0], sizes = [32, 64], strides = [1, 1]} : vector<512x64xf32> to vector<32x64xf32>
    %cst_20 = arith.constant dense<0.000000e+00> : vector<128x64xf32>
    %50 = tpu.matmul %48, %49, %cst_20 {dimension_numbers = #tpu.dot_dimension_numbers<[1], [0], [0], [1], [0, 0, 1, 1], [], []>} : vector<128x32xf32>, vector<32x64xf32>, vector<128x64xf32> -> vector<128x64xf32>
    %51 = arith.addf %47, %50 : vector<128x64xf32>
    %52 = vector.extract_strided_slice %9 {offsets = [1280, 0], sizes = [128, 32], strides = [1, 1]} : vector<2048x32xf32> to vector<128x32xf32>
    %53 = vector.extract_strided_slice %10 {offsets = [320, 0], sizes = [32, 64], strides = [1, 1]} : vector<512x64xf32> to vector<32x64xf32>
    %cst_21 = arith.constant dense<0.000000e+00> : vector<128x64xf32>
    %54 = tpu.matmul %52, %53, %cst_21 {dimension_numbers = #tpu.dot_dimension_numbers<[1], [0], [0], [1], [0, 0, 1, 1], [], []>} : vector<128x32xf32>, vector<32x64xf32>, vector<128x64xf32> -> vector<128x64xf32>
    %55 = arith.addf %51, %54 : vector<128x64xf32>
    %56 = vector.extract_strided_slice %9 {offsets = [1408, 0], sizes = [128, 32], strides = [1, 1]} : vector<2048x32xf32> to vector<128x32xf32>
    %57 = vector.extract_strided_slice %10 {offsets = [352, 0], sizes = [32, 64], strides = [1, 1]} : vector<512x64xf32> to vector<32x64xf32>
    %cst_22 = arith.constant dense<0.000000e+00> : vector<128x64xf32>
    %58 = tpu.matmul %56, %57, %cst_22 {dimension_numbers = #tpu.dot_dimension_numbers<[1], [0], [0], [1], [0, 0, 1, 1], [], []>} : vector<128x32xf32>, vector<32x64xf32>, vector<128x64xf32> -> vector<128x64xf32>
    %59 = arith.addf %55, %58 : vector<128x64xf32>
    %60 = vector.extract_strided_slice %9 {offsets = [1536, 0], sizes = [128, 32], strides = [1, 1]} : vector<2048x32xf32> to vector<128x32xf32>
    %61 = vector.extract_strided_slice %10 {offsets = [384, 0], sizes = [32, 64], strides = [1, 1]} : vector<512x64xf32> to vector<32x64xf32>
    %cst_23 = arith.constant dense<0.000000e+00> : vector<128x64xf32>
    %62 = tpu.matmul %60, %61, %cst_23 {dimension_numbers = #tpu.dot_dimension_numbers<[1], [0], [0], [1], [0, 0, 1, 1], [], []>} : vector<128x32xf32>, vector<32x64xf32>, vector<128x64xf32> -> vector<128x64xf32>
    %63 = arith.addf %59, %62 : vector<128x64xf32>
    %64 = vector.extract_strided_slice %9 {offsets = [1664, 0], sizes = [128, 32], strides = [1, 1]} : vector<2048x32xf32> to vector<128x32xf32>
    %65 = vector.extract_strided_slice %10 {offsets = [416, 0], sizes = [32, 64], strides = [1, 1]} : vector<512x64xf32> to vector<32x64xf32>
    %cst_24 = arith.constant dense<0.000000e+00> : vector<128x64xf32>
    %66 = tpu.matmul %64, %65, %cst_24 {dimension_numbers = #tpu.dot_dimension_numbers<[1], [0], [0], [1], [0, 0, 1, 1], [], []>} : vector<128x32xf32>, vector<32x64xf32>, vector<128x64xf32> -> vector<128x64xf32>
    %67 = arith.addf %63, %66 : vector<128x64xf32>
    %68 = vector.extract_strided_slice %9 {offsets = [1792, 0], sizes = [128, 32], strides = [1, 1]} : vector<2048x32xf32> to vector<128x32xf32>
    %69 = vector.extract_strided_slice %10 {offsets = [448, 0], sizes = [32, 64], strides = [1, 1]} : vector<512x64xf32> to vector<32x64xf32>
    %cst_25 = arith.constant dense<0.000000e+00> : vector<128x64xf32>
    %70 = tpu.matmul %68, %69, %cst_25 {dimension_numbers = #tpu.dot_dimension_numbers<[1], [0], [0], [1], [0, 0, 1, 1], [], []>} : vector<128x32xf32>, vector<32x64xf32>, vector<128x64xf32> -> vector<128x64xf32>
    %71 = arith.addf %67, %70 : vector<128x64xf32>
    %72 = vector.extract_strided_slice %9 {offsets = [1920, 0], sizes = [128, 32], strides = [1, 1]} : vector<2048x32xf32> to vector<128x32xf32>
    %73 = vector.extract_strided_slice %10 {offsets = [480, 0], sizes = [32, 64], strides = [1, 1]} : vector<512x64xf32> to vector<32x64xf32>
    %cst_26 = arith.constant dense<0.000000e+00> : vector<128x64xf32>
    %74 = tpu.matmul %72, %73, %cst_26 {dimension_numbers = #tpu.dot_dimension_numbers<[1], [0], [0], [1], [0, 0, 1, 1], [], []>} : vector<128x32xf32>, vector<32x64xf32>, vector<128x64xf32> -> vector<128x64xf32>
    %75 = arith.addf %71, %74 : vector<128x64xf32>
    %cst_27 = arith.constant dense<0.000000e+00> : vector<64xf32>
    %76 = vector.multi_reduction <add>, %75, %cst_27 [0] : vector<128x64xf32> to vector<64xf32>
    %77 = vector.shape_cast %76 : vector<64xf32> to vector<1x64xf32>
    %cst_28 = arith.constant 7.812500e-03 : f32
    %78 = vector.broadcast %cst_28 : f32 to vector<1x64xf32>
    %79 = arith.mulf %77, %78 : vector<1x64xf32>
    %80 = arith.mulf %75, %75 : vector<128x64xf32>
    %cst_29 = arith.constant dense<0.000000e+00> : vector<64xf32>
    %81 = vector.multi_reduction <add>, %80, %cst_29 [0] : vector<128x64xf32> to vector<64xf32>
    %82 = vector.shape_cast %81 : vector<64xf32> to vector<1x64xf32>
    %cst_30 = arith.constant 7.812500e-03 : f32
    %83 = vector.broadcast %cst_30 : f32 to vector<1x64xf32>
    %84 = arith.mulf %82, %83 : vector<1x64xf32>
    %85 = arith.mulf %79, %79 : vector<1x64xf32>
    %86 = arith.subf %84, %85 : vector<1x64xf32>
    %c0_31 = arith.constant 0 : index
    %c0_32 = arith.constant 0 : index
    %87 = vector.load %arg4[%c0_31, %c0_32] : memref<1x64xf32, #tpu.memory_space<vmem>>, vector<1x64xf32>
    %cst_33 = arith.constant 9.99999974E-6 : f32
    %88 = vector.broadcast %cst_33 : f32 to vector<1x64xf32>
    %89 = arith.addf %86, %88 : vector<1x64xf32>
    %90 = math.rsqrt %89 : vector<1x64xf32>
    %91 = arith.mulf %87, %90 : vector<1x64xf32>
    %c0_34 = arith.constant 0 : index
    %c0_35 = arith.constant 0 : index
    %92 = vector.load %arg5[%c0_34, %c0_35] : memref<1x64xf32, #tpu.memory_space<vmem>>, vector<1x64xf32>
    %93 = arith.mulf %79, %91 : vector<1x64xf32>
    %94 = arith.subf %92, %93 : vector<1x64xf32>
    %95 = vector.broadcast %91 : vector<1x64xf32> to vector<128x64xf32>
    %96 = arith.mulf %75, %95 : vector<128x64xf32>
    %97 = vector.broadcast %94 : vector<1x64xf32> to vector<128x64xf32>
    %98 = arith.addf %96, %97 : vector<128x64xf32>
    %cst_36 = arith.constant 0.000000e+00 : f32
    %99 = vector.broadcast %cst_36 : f32 to vector<128x64xf32>
    %100 = arith.cmpf ogt, %98, %99 : vector<128x64xf32>
    %cst_37 = arith.constant 2.000000e-01 : f32
    %101 = vector.broadcast %cst_37 : f32 to vector<128x64xf32>
    %102 = arith.mulf %101, %98 : vector<128x64xf32>
    %103 = arith.select %100, %98, %102 : vector<128x64xi1>, vector<128x64xf32>
    %c0_38 = arith.constant 0 : index
    %c0_39 = arith.constant 0 : index
    %104 = vector.load %arg6[%c0_38, %c0_39] : memref<512x128xf32, #tpu.memory_space<vmem>>, vector<512x128xf32>
    %cst_40 = arith.constant dense<0.000000e+00> : vector<512x64xf32>
    %105 = tpu.matmul %104, %103, %cst_40 {dimension_numbers = #tpu.dot_dimension_numbers<[1], [0], [0], [1], [0, 0, 1, 1], [], []>} : vector<512x128xf32>, vector<128x64xf32>, vector<512x64xf32> -> vector<512x64xf32>
    %c0_41 = arith.constant 0 : index
    %c0_42 = arith.constant 0 : index
    %106 = vector.load %arg7[%c0_41, %c0_42] : memref<1024x128xf32, #tpu.memory_space<vmem>>, vector<1024x128xf32>
    %cst_43 = arith.constant 0.000000e+00 : f32
    %107 = vector.broadcast %cst_43 : f32 to vector<32x128xf32>
    %108 = vector.extract_strided_slice %105 {offsets = [0, 0], sizes = [32, 64], strides = [1, 1]} : vector<512x64xf32> to vector<32x64xf32>
    %109 = vector.extract_strided_slice %106 {offsets = [0, 0], sizes = [64, 128], strides = [1, 1]} : vector<1024x128xf32> to vector<64x128xf32>
    %cst_44 = arith.constant dense<0.000000e+00> : vector<32x128xf32>
    %110 = tpu.matmul %108, %109, %cst_44 {dimension_numbers = #tpu.dot_dimension_numbers<[1], [0], [0], [1], [0, 0, 1, 1], [], []>} : vector<32x64xf32>, vector<64x128xf32>, vector<32x128xf32> -> vector<32x128xf32>
    %111 = arith.addf %107, %110 : vector<32x128xf32>
    %112 = vector.extract_strided_slice %105 {offsets = [32, 0], sizes = [32, 64], strides = [1, 1]} : vector<512x64xf32> to vector<32x64xf32>
    %113 = vector.extract_strided_slice %106 {offsets = [64, 0], sizes = [64, 128], strides = [1, 1]} : vector<1024x128xf32> to vector<64x128xf32>
    %cst_45 = arith.constant dense<0.000000e+00> : vector<32x128xf32>
    %114 = tpu.matmul %112, %113, %cst_45 {dimension_numbers = #tpu.dot_dimension_numbers<[1], [0], [0], [1], [0, 0, 1, 1], [], []>} : vector<32x64xf32>, vector<64x128xf32>, vector<32x128xf32> -> vector<32x128xf32>
    %115 = arith.addf %111, %114 : vector<32x128xf32>
    %116 = vector.extract_strided_slice %105 {offsets = [64, 0], sizes = [32, 64], strides = [1, 1]} : vector<512x64xf32> to vector<32x64xf32>
    %117 = vector.extract_strided_slice %106 {offsets = [128, 0], sizes = [64, 128], strides = [1, 1]} : vector<1024x128xf32> to vector<64x128xf32>
    %cst_46 = arith.constant dense<0.000000e+00> : vector<32x128xf32>
    %118 = tpu.matmul %116, %117, %cst_46 {dimension_numbers = #tpu.dot_dimension_numbers<[1], [0], [0], [1], [0, 0, 1, 1], [], []>} : vector<32x64xf32>, vector<64x128xf32>, vector<32x128xf32> -> vector<32x128xf32>
    %119 = arith.addf %115, %118 : vector<32x128xf32>
    %120 = vector.extract_strided_slice %105 {offsets = [96, 0], sizes = [32, 64], strides = [1, 1]} : vector<512x64xf32> to vector<32x64xf32>
    %121 = vector.extract_strided_slice %106 {offsets = [192, 0], sizes = [64, 128], strides = [1, 1]} : vector<1024x128xf32> to vector<64x128xf32>
    %cst_47 = arith.constant dense<0.000000e+00> : vector<32x128xf32>
    %122 = tpu.matmul %120, %121, %cst_47 {dimension_numbers = #tpu.dot_dimension_numbers<[1], [0], [0], [1], [0, 0, 1, 1], [], []>} : vector<32x64xf32>, vector<64x128xf32>, vector<32x128xf32> -> vector<32x128xf32>
    %123 = arith.addf %119, %122 : vector<32x128xf32>
    %124 = vector.extract_strided_slice %105 {offsets = [128, 0], sizes = [32, 64], strides = [1, 1]} : vector<512x64xf32> to vector<32x64xf32>
    %125 = vector.extract_strided_slice %106 {offsets = [256, 0], sizes = [64, 128], strides = [1, 1]} : vector<1024x128xf32> to vector<64x128xf32>
    %cst_48 = arith.constant dense<0.000000e+00> : vector<32x128xf32>
    %126 = tpu.matmul %124, %125, %cst_48 {dimension_numbers = #tpu.dot_dimension_numbers<[1], [0], [0], [1], [0, 0, 1, 1], [], []>} : vector<32x64xf32>, vector<64x128xf32>, vector<32x128xf32> -> vector<32x128xf32>
    %127 = arith.addf %123, %126 : vector<32x128xf32>
    %128 = vector.extract_strided_slice %105 {offsets = [160, 0], sizes = [32, 64], strides = [1, 1]} : vector<512x64xf32> to vector<32x64xf32>
    %129 = vector.extract_strided_slice %106 {offsets = [320, 0], sizes = [64, 128], strides = [1, 1]} : vector<1024x128xf32> to vector<64x128xf32>
    %cst_49 = arith.constant dense<0.000000e+00> : vector<32x128xf32>
    %130 = tpu.matmul %128, %129, %cst_49 {dimension_numbers = #tpu.dot_dimension_numbers<[1], [0], [0], [1], [0, 0, 1, 1], [], []>} : vector<32x64xf32>, vector<64x128xf32>, vector<32x128xf32> -> vector<32x128xf32>
    %131 = arith.addf %127, %130 : vector<32x128xf32>
    %132 = vector.extract_strided_slice %105 {offsets = [192, 0], sizes = [32, 64], strides = [1, 1]} : vector<512x64xf32> to vector<32x64xf32>
    %133 = vector.extract_strided_slice %106 {offsets = [384, 0], sizes = [64, 128], strides = [1, 1]} : vector<1024x128xf32> to vector<64x128xf32>
    %cst_50 = arith.constant dense<0.000000e+00> : vector<32x128xf32>
    %134 = tpu.matmul %132, %133, %cst_50 {dimension_numbers = #tpu.dot_dimension_numbers<[1], [0], [0], [1], [0, 0, 1, 1], [], []>} : vector<32x64xf32>, vector<64x128xf32>, vector<32x128xf32> -> vector<32x128xf32>
    %135 = arith.addf %131, %134 : vector<32x128xf32>
    %136 = vector.extract_strided_slice %105 {offsets = [224, 0], sizes = [32, 64], strides = [1, 1]} : vector<512x64xf32> to vector<32x64xf32>
    %137 = vector.extract_strided_slice %106 {offsets = [448, 0], sizes = [64, 128], strides = [1, 1]} : vector<1024x128xf32> to vector<64x128xf32>
    %cst_51 = arith.constant dense<0.000000e+00> : vector<32x128xf32>
    %138 = tpu.matmul %136, %137, %cst_51 {dimension_numbers = #tpu.dot_dimension_numbers<[1], [0], [0], [1], [0, 0, 1, 1], [], []>} : vector<32x64xf32>, vector<64x128xf32>, vector<32x128xf32> -> vector<32x128xf32>
    %139 = arith.addf %135, %138 : vector<32x128xf32>
    %140 = vector.extract_strided_slice %105 {offsets = [256, 0], sizes = [32, 64], strides = [1, 1]} : vector<512x64xf32> to vector<32x64xf32>
    %141 = vector.extract_strided_slice %106 {offsets = [512, 0], sizes = [64, 128], strides = [1, 1]} : vector<1024x128xf32> to vector<64x128xf32>
    %cst_52 = arith.constant dense<0.000000e+00> : vector<32x128xf32>
    %142 = tpu.matmul %140, %141, %cst_52 {dimension_numbers = #tpu.dot_dimension_numbers<[1], [0], [0], [1], [0, 0, 1, 1], [], []>} : vector<32x64xf32>, vector<64x128xf32>, vector<32x128xf32> -> vector<32x128xf32>
    %143 = arith.addf %139, %142 : vector<32x128xf32>
    %144 = vector.extract_strided_slice %105 {offsets = [288, 0], sizes = [32, 64], strides = [1, 1]} : vector<512x64xf32> to vector<32x64xf32>
    %145 = vector.extract_strided_slice %106 {offsets = [576, 0], sizes = [64, 128], strides = [1, 1]} : vector<1024x128xf32> to vector<64x128xf32>
    %cst_53 = arith.constant dense<0.000000e+00> : vector<32x128xf32>
    %146 = tpu.matmul %144, %145, %cst_53 {dimension_numbers = #tpu.dot_dimension_numbers<[1], [0], [0], [1], [0, 0, 1, 1], [], []>} : vector<32x64xf32>, vector<64x128xf32>, vector<32x128xf32> -> vector<32x128xf32>
    %147 = arith.addf %143, %146 : vector<32x128xf32>
    %148 = vector.extract_strided_slice %105 {offsets = [320, 0], sizes = [32, 64], strides = [1, 1]} : vector<512x64xf32> to vector<32x64xf32>
    %149 = vector.extract_strided_slice %106 {offsets = [640, 0], sizes = [64, 128], strides = [1, 1]} : vector<1024x128xf32> to vector<64x128xf32>
    %cst_54 = arith.constant dense<0.000000e+00> : vector<32x128xf32>
    %150 = tpu.matmul %148, %149, %cst_54 {dimension_numbers = #tpu.dot_dimension_numbers<[1], [0], [0], [1], [0, 0, 1, 1], [], []>} : vector<32x64xf32>, vector<64x128xf32>, vector<32x128xf32> -> vector<32x128xf32>
    %151 = arith.addf %147, %150 : vector<32x128xf32>
    %152 = vector.extract_strided_slice %105 {offsets = [352, 0], sizes = [32, 64], strides = [1, 1]} : vector<512x64xf32> to vector<32x64xf32>
    %153 = vector.extract_strided_slice %106 {offsets = [704, 0], sizes = [64, 128], strides = [1, 1]} : vector<1024x128xf32> to vector<64x128xf32>
    %cst_55 = arith.constant dense<0.000000e+00> : vector<32x128xf32>
    %154 = tpu.matmul %152, %153, %cst_55 {dimension_numbers = #tpu.dot_dimension_numbers<[1], [0], [0], [1], [0, 0, 1, 1], [], []>} : vector<32x64xf32>, vector<64x128xf32>, vector<32x128xf32> -> vector<32x128xf32>
    %155 = arith.addf %151, %154 : vector<32x128xf32>
    %156 = vector.extract_strided_slice %105 {offsets = [384, 0], sizes = [32, 64], strides = [1, 1]} : vector<512x64xf32> to vector<32x64xf32>
    %157 = vector.extract_strided_slice %106 {offsets = [768, 0], sizes = [64, 128], strides = [1, 1]} : vector<1024x128xf32> to vector<64x128xf32>
    %cst_56 = arith.constant dense<0.000000e+00> : vector<32x128xf32>
    %158 = tpu.matmul %156, %157, %cst_56 {dimension_numbers = #tpu.dot_dimension_numbers<[1], [0], [0], [1], [0, 0, 1, 1], [], []>} : vector<32x64xf32>, vector<64x128xf32>, vector<32x128xf32> -> vector<32x128xf32>
    %159 = arith.addf %155, %158 : vector<32x128xf32>
    %160 = vector.extract_strided_slice %105 {offsets = [416, 0], sizes = [32, 64], strides = [1, 1]} : vector<512x64xf32> to vector<32x64xf32>
    %161 = vector.extract_strided_slice %106 {offsets = [832, 0], sizes = [64, 128], strides = [1, 1]} : vector<1024x128xf32> to vector<64x128xf32>
    %cst_57 = arith.constant dense<0.000000e+00> : vector<32x128xf32>
    %162 = tpu.matmul %160, %161, %cst_57 {dimension_numbers = #tpu.dot_dimension_numbers<[1], [0], [0], [1], [0, 0, 1, 1], [], []>} : vector<32x64xf32>, vector<64x128xf32>, vector<32x128xf32> -> vector<32x128xf32>
    %163 = arith.addf %159, %162 : vector<32x128xf32>
    %164 = vector.extract_strided_slice %105 {offsets = [448, 0], sizes = [32, 64], strides = [1, 1]} : vector<512x64xf32> to vector<32x64xf32>
    %165 = vector.extract_strided_slice %106 {offsets = [896, 0], sizes = [64, 128], strides = [1, 1]} : vector<1024x128xf32> to vector<64x128xf32>
    %cst_58 = arith.constant dense<0.000000e+00> : vector<32x128xf32>
    %166 = tpu.matmul %164, %165, %cst_58 {dimension_numbers = #tpu.dot_dimension_numbers<[1], [0], [0], [1], [0, 0, 1, 1], [], []>} : vector<32x64xf32>, vector<64x128xf32>, vector<32x128xf32> -> vector<32x128xf32>
    %167 = arith.addf %163, %166 : vector<32x128xf32>
    %168 = vector.extract_strided_slice %105 {offsets = [480, 0], sizes = [32, 64], strides = [1, 1]} : vector<512x64xf32> to vector<32x64xf32>
    %169 = vector.extract_strided_slice %106 {offsets = [960, 0], sizes = [64, 128], strides = [1, 1]} : vector<1024x128xf32> to vector<64x128xf32>
    %cst_59 = arith.constant dense<0.000000e+00> : vector<32x128xf32>
    %170 = tpu.matmul %168, %169, %cst_59 {dimension_numbers = #tpu.dot_dimension_numbers<[1], [0], [0], [1], [0, 0, 1, 1], [], []>} : vector<32x64xf32>, vector<64x128xf32>, vector<32x128xf32> -> vector<32x128xf32>
    %171 = arith.addf %167, %170 : vector<32x128xf32>
    %cst_60 = arith.constant dense<0.000000e+00> : vector<128xf32>
    %172 = vector.multi_reduction <add>, %171, %cst_60 [0] : vector<32x128xf32> to vector<128xf32>
    %173 = vector.shape_cast %172 : vector<128xf32> to vector<1x128xf32>
    %cst_61 = arith.constant 3.125000e-02 : f32
    %174 = vector.broadcast %cst_61 : f32 to vector<1x128xf32>
    %175 = arith.mulf %173, %174 : vector<1x128xf32>
    %176 = arith.mulf %171, %171 : vector<32x128xf32>
    %cst_62 = arith.constant dense<0.000000e+00> : vector<128xf32>
    %177 = vector.multi_reduction <add>, %176, %cst_62 [0] : vector<32x128xf32> to vector<128xf32>
    %178 = vector.shape_cast %177 : vector<128xf32> to vector<1x128xf32>
    %cst_63 = arith.constant 3.125000e-02 : f32
    %179 = vector.broadcast %cst_63 : f32 to vector<1x128xf32>
    %180 = arith.mulf %178, %179 : vector<1x128xf32>
    %181 = arith.mulf %175, %175 : vector<1x128xf32>
    %182 = arith.subf %180, %181 : vector<1x128xf32>
    %c0_64 = arith.constant 0 : index
    %c0_65 = arith.constant 0 : index
    %183 = vector.load %arg8[%c0_64, %c0_65] : memref<1x128xf32, #tpu.memory_space<vmem>>, vector<1x128xf32>
    %cst_66 = arith.constant 9.99999974E-6 : f32
    %184 = vector.broadcast %cst_66 : f32 to vector<1x128xf32>
    %185 = arith.addf %182, %184 : vector<1x128xf32>
    %186 = math.rsqrt %185 : vector<1x128xf32>
    %187 = arith.mulf %183, %186 : vector<1x128xf32>
    %c0_67 = arith.constant 0 : index
    %c0_68 = arith.constant 0 : index
    %188 = vector.load %arg9[%c0_67, %c0_68] : memref<1x128xf32, #tpu.memory_space<vmem>>, vector<1x128xf32>
    %189 = arith.mulf %175, %187 : vector<1x128xf32>
    %190 = arith.subf %188, %189 : vector<1x128xf32>
    %191 = vector.broadcast %187 : vector<1x128xf32> to vector<32x128xf32>
    %192 = arith.mulf %171, %191 : vector<32x128xf32>
    %193 = vector.broadcast %190 : vector<1x128xf32> to vector<32x128xf32>
    %194 = arith.addf %192, %193 : vector<32x128xf32>
    %cst_69 = arith.constant 0.000000e+00 : f32
    %195 = vector.broadcast %cst_69 : f32 to vector<32x128xf32>
    %196 = arith.cmpf ogt, %194, %195 : vector<32x128xf32>
    %cst_70 = arith.constant 2.000000e-01 : f32
    %197 = vector.broadcast %cst_70 : f32 to vector<32x128xf32>
    %198 = arith.mulf %197, %194 : vector<32x128xf32>
    %199 = arith.select %196, %194, %198 : vector<32x128xi1>, vector<32x128xf32>
    %c0_71 = arith.constant 0 : index
    %c0_72 = arith.constant 0 : index
    %200 = vector.load %arg10[%c0_71, %c0_72] : memref<32x128xf32, #tpu.memory_space<vmem>>, vector<32x128xf32>
    %201 = arith.mulf %199, %200 : vector<32x128xf32>
    %c0_73 = arith.constant 0 : index
    %c0_74 = arith.constant 0 : index
    %202 = vector.load %arg11[%c0_73, %c0_74] : memref<2x32xf32, #tpu.memory_space<vmem>>, vector<2x32xf32>
    %cst_75 = arith.constant dense<0.000000e+00> : vector<2x128xf32>
    %203 = tpu.matmul %202, %201, %cst_75 {dimension_numbers = #tpu.dot_dimension_numbers<[1], [0], [0], [1], [0, 0, 1, 1], [], []>} : vector<2x32xf32>, vector<32x128xf32>, vector<2x128xf32> -> vector<2x128xf32>
    %cst_76 = arith.constant dense<0.000000e+00> : vector<2xf32>
    %204 = vector.multi_reduction <add>, %203, %cst_76 [1] : vector<2x128xf32> to vector<2xf32>
    %205 = vector.shape_cast %204 : vector<2xf32> to vector<2x1xf32>
    %c0_77 = arith.constant 0 : index
    %c0_78 = arith.constant 0 : index
    %206 = vector.load %arg12[%c0_77, %c0_78] : memref<1x1xf32, #tpu.memory_space<vmem>>, vector<1x1xf32>
    %207 = vector.broadcast %206 : vector<1x1xf32> to vector<2x1xf32>
    %208 = arith.addf %205, %207 : vector<2x1xf32>
    %c0_79 = arith.constant 0 : index
    %c0_80 = arith.constant 0 : index
    %209 = vector.load %arg13[%c0_79, %c0_80] : memref<2x1xf32, #tpu.memory_space<vmem>>, vector<2x1xf32>
    tpu.vector_store %arg13[%c0_79, %c0_80], %208 {strides = array<i32>} : memref<2x1xf32, #tpu.memory_space<vmem>>, vector<2x1xf32>,
    return
  }
}

</mosaic_0001>

<bundles_post_ra>
// kernel: discriminator_forward.1
= control target key start
LH: loop header
LB: loop body
LE: loop exit
PB: predicated region body
PF: predicated region fallthrough
CT: control target
= control target key end

     0   :  { %vm116_vm0 = vcmask 392192   ;;  %v19469_v53 = vmov 0.0|0.0   ;;  %s19455_s1 = inlined_call_operand.vmem [shape: f32[48,32], index: 1, kind: input, shape index: {}]   ;;  %s19456_s0 = inlined_call_operand.vmem [shape: f32[512,48], index: 0, kind: input, shape index: {}]   ;;  %s19457_s2 = inlined_call_operand.vmem [shape: f32[2048,512], index: 2, kind: input, shape index: {}]   ;;  %s19458_s3 = inlined_call_operand.vmem [shape: f32[512,64], index: 3, kind: input, shape index: {}]   ;;  %s19459_s6 = inlined_call_operand.vmem [shape: f32[512,128], index: 6, kind: input, shape index: {}]   ;;  %s19460_s4 = inlined_call_operand.vmem [shape: f32[1,64], index: 4, kind: input, shape index: {}]   ;;  %s19461_s5 = inlined_call_operand.vmem [shape: f32[1,64], index: 5, kind: input, shape index: {}]   ;;  %s19462_s7 = inlined_call_operand.vmem [shape: f32[1024,128], index: 7, kind: input, shape index: {}]   ;;  %s19463_s8 = inlined_call_operand.vmem [shape: f32[1,128], index: 8, kind: input, shape index: {}]   ;;  %s19464_s9 = inlined_call_operand.vmem [shape: f32[1,128], index: 9, kind: input, shape index: {}]   ;;  %s19465_s10 = inlined_call_operand.vmem [shape: f32[32,128], index: 10, kind: input, shape index: {}]   ;;  %s19466_s11 = inlined_call_operand.vmem [shape: f32[2,32], index: 11, kind: input, shape index: {}]   ;;  %s19467_s12 = inlined_call_operand.<no memory space> [shape: f32[1,1], index: 12, kind: input, shape index: {}]   ;;  %s19468_s13 = inlined_call_operand.vmem [shape: f32[2,1], index: 13, kind: output, shape index: {}]  }
   0x1   :  { %v110_v0 = vld [vmem:[%s19455_s1] sm:$0xff]  ;;  %v111_v1 = vld [vmem:[%s19455_s1 + $0x8] sm:$0xff]  ;;  %v112_v2 = vld [vmem:[%s19455_s1 + $0x10] sm:$0xff]  ;;  %13215 = vmatprep.subr.bf16.mxu1 %v19469_v53 }
   0x2   :  { %v12685_v3 = vpack.c.bf16 %v111_v1, %v110_v0  ;;  %v113_v4 = vld [vmem:[%s19455_s1 + $0x18] sm:$0xff]  ;;  %v114_v6 = vld [vmem:[%s19455_s1 + $0x20] sm:$0xff]  ;;  %v115_v7 = vld [vmem:[%s19455_s1 + $0x28] sm:$0xff] }
   0x3   :  { %v12689_v5 = vpack.c.bf16 %v113_v4, %v112_v2  ;;  %v46_v8 = vld [vmem:[%s19456_s0] sm:$0xff]  ;;  %v12693_v9 = vpack.c.bf16 %v115_v7, %v114_v6  ;;  %v47_v10 = vld [vmem:[%s19456_s0 + $0x8] sm:$0xff]  ;;  %v48_v11 = vld [vmem:[%s19456_s0 + $0x10] sm:$0xff] }
   0x4   :  { %12686 = vmatprep.subr.bf16.mxu0 %v12685_v3  ;;  %11586 = vmatprep.mubr.msk.f32.mxu0 %vm116_vm0, %v46_v8  ;;  %v49_v12 = vld [vmem:[%s19456_s0 + $0x18] sm:$0xff]  ;;  %v50_v13 = vld [vmem:[%s19456_s0 + $0x20] sm:$0xff]  ;;  %v51_v14 = vld [vmem:[%s19456_s0 + $0x28] sm:$0xff] }
   0x5   :  { %12688 = vmatpush3.bf16.msra.mxu0 %v12685_v3  ;;  %v52_v15 = vld [vmem:[%s19456_s0 + $0x30] sm:$0xff]  ;;  %v53_v16 = vld [vmem:[%s19456_s0 + $0x38] sm:$0xff]  ;;  %v54_v17 = vld [vmem:[%s19456_s0 + $0x40] sm:$0xff] }
   0x6   :  { %12690 = vmatprep.subr.bf16.mxu0 %v12689_v5  ;;  %v55_v18 = vld [vmem:[%s19456_s0 + $0x48] sm:$0xff]  ;;  %v56_v19 = vld [vmem:[%s19456_s0 + $0x50] sm:$0xff]  ;;  %v57_v20 = vld [vmem:[%s19456_s0 + $0x58] sm:$0xff] }
   0x7   :  { %v58_v21 = vld [vmem:[%s19456_s0 + $0x60] sm:$0xff]  ;;  %v59_v22 = vld [vmem:[%s19456_s0 + $0x68] sm:$0xff]  ;;  %v60_v23 = vld [vmem:[%s19456_s0 + $0x70] sm:$0xff] }
   0x8   :  { %v61_v24 = vld [vmem:[%s19456_s0 + $0x78] sm:$0xff]  ;;  %v62_v25 = vld [vmem:[%s19456_s0 + $0x80] sm:$0xff]  ;;  %v63_v26 = vld [vmem:[%s19456_s0 + $0x88] sm:$0xff] }
   0x9   :  { %12692 = vmatpush3.bf16.msra.mxu0 %v12689_v5  ;;  %v64_v27 = vld [vmem:[%s19456_s0 + $0x90] sm:$0xff]  ;;  %v65_v28 = vld [vmem:[%s19456_s0 + $0x98] sm:$0xff]  ;;  %v66_v29 = vld [vmem:[%s19456_s0 + $0xa0] sm:$0xff] }
   0xa   :  { %12694 = vmatprep.subr.bf16.mxu0 %v12693_v9  ;;  %v67_v30 = vld [vmem:[%s19456_s0 + $0xa8] sm:$0xff]  ;;  %v68_v31 = vld [vmem:[%s19456_s0 + $0xb0] sm:$0xff]  ;;  %v69_v32 = vld [vmem:[%s19456_s0 + $0xb8] sm:$0xff] }
   0xb   :  { %v70_v33 = vld [vmem:[%s19456_s0 + $0xc0] sm:$0xff]  ;;  %v71_v34 = vld [vmem:[%s19456_s0 + $0xc8] sm:$0xff]  ;;  %v72_v35 = vld [vmem:[%s19456_s0 + $0xd0] sm:$0xff] }
   0xc   :  { %v73_v36 = vld [vmem:[%s19456_s0 + $0xd8] sm:$0xff]  ;;  %v74_v37 = vld [vmem:[%s19456_s0 + $0xe0] sm:$0xff]  ;;  %v75_v38 = vld [vmem:[%s19456_s0 + $0xe8] sm:$0xff] }
   0xd   :  { %12696 = vmatpush3.bf16.msra.mxu0 %v12693_v9  ;;  %v76_v39 = vld [vmem:[%s19456_s0 + $0xf0] sm:$0xff]  ;;  %v77_v40 = vld [vmem:[%s19456_s0 + $0xf8] sm:$0xff]  ;;  %v78_v41 = vld [vmem:[%s19456_s0 + $0x100] sm:$0xff] }
   0xe   :  { %v79_v42 = vld [vmem:[%s19456_s0 + $0x108] sm:$0xff]  ;;  %v80_v43 = vld [vmem:[%s19456_s0 + $0x110] sm:$0xff]  ;;  %v81_v44 = vld [vmem:[%s19456_s0 + $0x118] sm:$0xff]  ;;  %12697 = vmatprep.subr.bf16.mxu0 %v19469_v53 }
   0xf   :  { %v82_v45 = vld [vmem:[%s19456_s0 + $0x120] sm:$0xff]  ;;  %v83_v46 = vld [vmem:[%s19456_s0 + $0x128] sm:$0xff]  ;;  %v84_v47 = vld [vmem:[%s19456_s0 + $0x130] sm:$0xff] }
  0x10   :  { %11587 = vmatmul.mubr.msk.f32.vlgmr.msra.gmra.mrb[0].mxu0 %vm116_vm0, %v47_v10  ;;  %v85_v48 = vld [vmem:[%s19456_s0 + $0x138] sm:$0xff]  ;;  %v86_v49 = vld [vmem:[%s19456_s0 + $0x140] sm:$0xff]  ;;  %v87_v50 = vld [vmem:[%s19456_s0 + $0x148] sm:$0xff] }
  0x11   :  { %11589 = vmatprep.mubr.msk.f32.mxu0 %vm116_vm0, %v48_v11  ;;  %v88_v51 = vld [vmem:[%s19456_s0 + $0x150] sm:$0xff]  ;;  %v89_v52 = vld [vmem:[%s19456_s0 + $0x158] sm:$0xff]  ;;  %v90_v54 = vld [vmem:[%s19456_s0 + $0x160] sm:$0xff] }
  0x12   :  { %v91_v55 = vld [vmem:[%s19456_s0 + $0x168] sm:$0xff]  ;;  %v92_v56 = vld [vmem:[%s19456_s0 + $0x170] sm:$0xff]  ;;  %v93_v57 = vld [vmem:[%s19456_s0 + $0x178] sm:$0xff] }
  0x13   :  { %v1427_v58 = vld [vmem:[%s19457_s2 + $0x10e8] sm:$0xff]  ;;  %v94_v59 = vld [vmem:[%s19456_s0 + $0x180] sm:$0xff]  ;;  %v96_v61 = vld [vmem:[%s19456_s0 + $0x190] sm:$0xff] }
  0x14   :  { %11590 = vmatmul.mubr.msk.f32.gmra.mrb[2].mxu0 %vm116_vm0, %v49_v12  ;;  %2649 = vmatprep.mubr.f32.mxu1 %v1427_v58  ;;  %v95_v60 = vld [vmem:[%s19456_s0 + $0x188] sm:$0xff]  ;;  %v97_v62 = vld [vmem:[%s19456_s0 + $0x198] sm:$0xff] }
  0x15   :  { %11592 = vmatprep.mubr.msk.f32.mxu0 %vm116_vm0, %v50_v13 }
  0x18   :  { %11593 = vmatmul.mubr.msk.f32.gmra.mrb[4].mxu0 %vm116_vm0, %v51_v14 }
  0x19   :  { %11595 = vmatprep.mubr.msk.f32.mxu0 %vm116_vm0, %v52_v15 }
  0x1c   :  { %11596 = vmatmul.mubr.msk.f32.gmra.mrb[6].mxu0 %vm116_vm0, %v53_v16 }
  0x1d   :  { %11598 = vmatprep.mubr.msk.f32.mxu0 %vm116_vm0, %v54_v17 }
  0x20   :  { %11599 = vmatmul.mubr.msk.f32.gmra.mrb[8].mxu0 %vm116_vm0, %v55_v18 }
  0x21   :  { %11601 = vmatprep.mubr.msk.f32.mxu0 %vm116_vm0, %v56_v19 }
  0x24   :  { %11602 = vmatmul.mubr.msk.f32.gmra.mrb[10].mxu0 %vm116_vm0, %v57_v20 }
  0x25   :  { %11604 = vmatprep.mubr.msk.f32.mxu0 %vm116_vm0, %v58_v21 }
  0x28   :  { %11605 = vmatmul.mubr.msk.f32.gmra.mrb[12].mxu0 %vm116_vm0, %v59_v22 }
  0x29   :  { %11607 = vmatprep.mubr.msk.f32.mxu0 %vm116_vm0, %v60_v23 }
  0x2c   :  { %11608 = vmatmul.mubr.msk.f32.gmra.mrb[14].mxu0 %vm116_vm0, %v61_v24 }
  0x2d   :  { %11610 = vmatprep.mubr.msk.f32.mxu0 %vm116_vm0, %v62_v25 }
  0x30   :  { %11611 = vmatmul.mubr.msk.f32.gmra.mrb[16].mxu0 %vm116_vm0, %v63_v26 }
  0x31   :  { %11613 = vmatprep.mubr.msk.f32.mxu0 %vm116_vm0, %v64_v27 }
  0x34   :  { %11614 = vmatmul.mubr.msk.f32.gmra.mrb[18].mxu0 %vm116_vm0, %v65_v28 }
  0x35   :  { %11616 = vmatprep.mubr.msk.f32.mxu0 %vm116_vm0, %v66_v29 }
  0x38   :  { %11617 = vmatmul.mubr.msk.f32.gmra.mrb[20].mxu0 %vm116_vm0, %v67_v30 }
  0x39   :  { %11619 = vmatprep.mubr.msk.f32.mxu0 %vm116_vm0, %v68_v31 }
  0x3c   :  { %11620 = vmatmul.mubr.msk.f32.gmra.mrb[22].mxu0 %vm116_vm0, %v69_v32 }
  0x3d   :  { %11622 = vmatprep.mubr.msk.f32.mxu0 %vm116_vm0, %v70_v33 }
  0x40   :  { %11623 = vmatmul.mubr.msk.f32.gmra.mrb[24].mxu0 %vm116_vm0, %v71_v34 }
  0x41   :  { %11625 = vmatprep.mubr.msk.f32.mxu0 %vm116_vm0, %v72_v35 }
  0x44   :  { %11626 = vmatmul.mubr.msk.f32.gmra.mrb[26].mxu0 %vm116_vm0, %v73_v36 }
  0x45   :  { %11628 = vmatprep.mubr.msk.f32.mxu0 %vm116_vm0, %v74_v37 }
  0x48   :  { %11629 = vmatmul.mubr.msk.f32.gmra.mrb[28].mxu0 %vm116_vm0, %v75_v38  ;;  %v98_v38 = vld [vmem:[%s19456_s0 + $0x1a0] sm:$0xff] }
  0x49   :  { %11631 = vmatprep.mubr.msk.f32.mxu0 %vm116_vm0, %v76_v39 }
  0x4c   :  { %11632 = vmatmul.mubr.msk.f32.gmra.mrb[30].mxu0 %vm116_vm0, %v77_v40  ;;  %v99_v40 = vld [vmem:[%s19456_s0 + $0x1a8] sm:$0xff] }
  0x4d   :  { %11634 = vmatprep.mubr.msk.f32.mxu0 %vm116_vm0, %v78_v41 }
  0x50   :  { %11635 = vmatmul.mubr.msk.f32.gmra.mrb[32].mxu0 %vm116_vm0, %v79_v42 }
  0x51   :  { %11637 = vmatprep.mubr.msk.f32.mxu0 %vm116_vm0, %v80_v43 }
  0x54   :  { %11638 = vmatmul.mubr.msk.f32.gmra.mrb[34].mxu0 %vm116_vm0, %v81_v44 }
  0x55   :  { %11640 = vmatprep.mubr.msk.f32.mxu0 %vm116_vm0, %v82_v45 }
  0x58   :  { %11641 = vmatmul.mubr.msk.f32.gmra.mrb[36].mxu0 %vm116_vm0, %v83_v46 }
  0x59   :  { %11643 = vmatprep.mubr.msk.f32.mxu0 %vm116_vm0, %v84_v47 }
  0x5c   :  { %11644 = vmatmul.mubr.msk.f32.gmra.mrb[38].mxu0 %vm116_vm0, %v85_v48 }
  0x5d   :  { %11646 = vmatprep.mubr.msk.f32.mxu0 %vm116_vm0, %v86_v49 }
  0x60   :  { %11647 = vmatmul.mubr.msk.f32.gmra.mrb[40].mxu0 %vm116_vm0, %v87_v50 }
  0x61   :  { %11649 = vmatprep.mubr.msk.f32.mxu0 %vm116_vm0, %v88_v51 }
  0x64   :  { %11650 = vmatmul.mubr.msk.f32.gmra.mrb[42].mxu0 %vm116_vm0, %v89_v52 }
  0x65   :  { %11652 = vmatprep.mubr.msk.f32.mxu0 %vm116_vm0, %v90_v54 }
  0x68   :  { %11653 = vmatmul.mubr.msk.f32.gmra.mrb[44].mxu0 %vm116_vm0, %v91_v55 }
  0x69   :  { %11655 = vmatprep.mubr.msk.f32.mxu0 %vm116_vm0, %v92_v56 }
  0x6c   :  { %11656 = vmatmul.mubr.msk.f32.gmra.mrb[46].mxu0 %vm116_vm0, %v93_v57 }
  0x6d   :  { %11658 = vmatprep.mubr.msk.f32.mxu0 %vm116_vm0, %v94_v59 }
  0x70   :  { %11659 = vmatmul.mubr.msk.f32.gmra.mrb[48].mxu0 %vm116_vm0, %v95_v60 }
  0x71   :  { %11661 = vmatprep.mubr.msk.f32.mxu0 %vm116_vm0, %v96_v61 }
  0x74   :  { %11662 = vmatmul.mubr.msk.f32.gmra.mrb[50].mxu0 %vm116_vm0, %v97_v62 }
  0x75   :  { %11664 = vmatprep.mubr.msk.f32.mxu0 %vm116_vm0, %v98_v38 }
  0x78   :  { %11665 = vmatmul.mubr.msk.f32.gmra.mrb[52].mxu0 %vm116_vm0, %v99_v40 }
  0xe3   :  { %v11588_v63 = vpop.f32.mrb[0].mxu0 }
  0xe4   :  { %vm695_vm1 = vcmp.gt.f32.partialorder %v11588_v63, 0.0  ;;  %v759_v0 = vmul.f32 0.2, %v11588_v63  ;;  %v375_v1 = vpop.f32.mrb[1].mxu0 }
  0xe5   :  { %vm694_vm2 = vcmp.gt.f32.partialorder %v375_v1, 0.0  ;;  %v758_v2 = vmul.f32 0.2, %v375_v1 }
  0xe6   :  { %v823_v3 = vsel %vm695_vm1, %v11588_v63, %v759_v0 }
  0xe7   :  { %v11591_v4 = vpop.f32.mrb[2].mxu0  ;;  %v822_v5 = vsel %vm694_vm2, %v375_v1, %v758_v2 }
  0xe8   :  { %vm697_vm3 = vcmp.gt.f32.partialorder %v11591_v4, 0.0  ;;  %v761_v6 = vmul.f32 0.2, %v11591_v4  ;;  %v385_v7 = vpop.f32.mrb[3].mxu0  ;;  %v12698_v8 = vpack.c.bf16 %v823_v3, %v822_v5 }
  0xe9   :  { %vm696_vm4 = vcmp.gt.f32.partialorder %v385_v7, 0.0  ;;  %v760_v9 = vmul.f32 0.2, %v385_v7 }
  0xea   :  { %12699 = vmatpush1.bf16.msra.mxu0 %v12698_v8  ;;  %13231 = vmatpush1.bf16.msra.mxu1 %v12698_v8  ;;  %v825_v10 = vsel %vm697_vm3, %v11591_v4, %v761_v6 }
  0xeb   :  { %v11594_v11 = vpop.f32.mrb[4].mxu0  ;;  %12700 = vmatprep.subr.bf16.mxu0 %v19469_v53  ;;  %13216 = vmatprep.subr.bf16.mxu1 %v19469_v53  ;;  %v824_v12 = vsel %vm696_vm4, %v385_v7, %v760_v9 }
  0xec   :  { %vm699_vm5 = vcmp.gt.f32.partialorder %v11594_v11, 0.0  ;;  %v763_v13 = vmul.f32 0.2, %v11594_v11  ;;  %v395_v14 = vpop.f32.mrb[5].mxu0  ;;  %v12701_v15 = vpack.c.bf16 %v825_v10, %v824_v12 }
  0xed   :  { %vm698_vm6 = vcmp.gt.f32.partialorder %v395_v14, 0.0  ;;  %v762_v16 = vmul.f32 0.2, %v395_v14 }
  0xee   :  { %12702 = vmatpush1.bf16.msra.mxu0 %v12701_v15  ;;  %13232 = vmatpush1.bf16.msra.mxu1 %v12701_v15  ;;  %v827_v17 = vsel %vm699_vm5, %v11594_v11, %v763_v13 }
  0xef   :  { %v11597_v18 = vpop.f32.mrb[6].mxu0  ;;  %12703 = vmatprep.subr.bf16.mxu0 %v19469_v53  ;;  %13217 = vmatprep.subr.bf16.mxu1 %v19469_v53  ;;  %v826_v19 = vsel %vm698_vm6, %v395_v14, %v762_v16 }
  0xf0   :  { %vm701_vm7 = vcmp.gt.f32.partialorder %v11597_v18, 0.0  ;;  %v765_v20 = vmul.f32 0.2, %v11597_v18  ;;  %v405_v21 = vpop.f32.mrb[7].mxu0  ;;  %v12704_v22 = vpack.c.bf16 %v827_v17, %v826_v19 }
  0xf1   :  { %vm700_vm8 = vcmp.gt.f32.partialorder %v405_v21, 0.0  ;;  %v764_v23 = vmul.f32 0.2, %v405_v21 }
  0xf2   :  { %12705 = vmatpush1.bf16.msra.mxu0 %v12704_v22  ;;  %13233 = vmatpush1.bf16.msra.mxu1 %v12704_v22  ;;  %v829_v24 = vsel %vm701_vm7, %v11597_v18, %v765_v20 }
  0xf3   :  { %v11600_v25 = vpop.f32.mrb[8].mxu0  ;;  %12706 = vmatprep.subr.bf16.mxu0 %v19469_v53  ;;  %13218 = vmatprep.subr.bf16.mxu1 %v19469_v53  ;;  %v828_v26 = vsel %vm700_vm8, %v405_v21, %v764_v23 }
  0xf4   :  { %vm703_vm9 = vcmp.gt.f32.partialorder %v11600_v25, 0.0  ;;  %v767_v27 = vmul.f32 0.2, %v11600_v25  ;;  %v415_v28 = vpop.f32.mrb[9].mxu0  ;;  %v12707_v29 = vpack.c.bf16 %v829_v24, %v828_v26 }
  0xf5   :  { %vm702_vm10 = vcmp.gt.f32.partialorder %v415_v28, 0.0  ;;  %v766_v30 = vmul.f32 0.2, %v415_v28 }
  0xf6   :  { %12708 = vmatpush1.bf16.msra.mxu0 %v12707_v29  ;;  %13234 = vmatpush1.bf16.msra.mxu1 %v12707_v29  ;;  %v831_v31 = vsel %vm703_vm9, %v11600_v25, %v767_v27  ;;  %v100_v27 = vld [vmem:[%s19456_s0 + $0x1b0] sm:$0xff] }
  0xf7   :  { %v11603_v32 = vpop.f32.mrb[10].mxu0  ;;  %12709 = vmatprep.subr.bf16.mxu0 %v19469_v53  ;;  %13219 = vmatprep.subr.bf16.mxu1 %v19469_v53  ;;  %v830_v33 = vsel %vm702_vm10, %v415_v28, %v766_v30 }
  0xf8   :  { %vm705_vm11 = vcmp.gt.f32.partialorder %v11603_v32, 0.0  ;;  %v769_v34 = vmul.f32 0.2, %v11603_v32  ;;  %v425_v35 = vpop.f32.mrb[11].mxu0  ;;  %v12710_v36 = vpack.c.bf16 %v831_v31, %v830_v33  ;;  %11667 = vmatprep.mubr.msk.f32.mxu0 %vm116_vm0, %v100_v27 }
  0xf9   :  { %vm704_vm12 = vcmp.gt.f32.partialorder %v425_v35, 0.0  ;;  %v768_v37 = vmul.f32 0.2, %v425_v35 }
  0xfa   :  { %12711 = vmatpush1.bf16.msra.mxu0 %v12710_v36  ;;  %13235 = vmatpush1.bf16.msra.mxu1 %v12710_v36  ;;  %v833_v39 = vsel %vm705_vm11, %v11603_v32, %v769_v34  ;;  %v101_v34 = vld [vmem:[%s19456_s0 + $0x1b8] sm:$0xff] }
  0xfb   :  { %v11606_v41 = vpop.f32.mrb[12].mxu0  ;;  %12712 = vmatprep.subr.bf16.mxu0 %v19469_v53  ;;  %13220 = vmatprep.subr.bf16.mxu1 %v19469_v53  ;;  %v832_v42 = vsel %vm704_vm12, %v425_v35, %v768_v37 }
  0xfc   :  { %vm707_vm13 = vcmp.gt.f32.partialorder %v11606_v41, 0.0  ;;  %v771_v43 = vmul.f32 0.2, %v11606_v41  ;;  %v435_v44 = vpop.f32.mrb[13].mxu0  ;;  %v12713_v45 = vpack.c.bf16 %v833_v39, %v832_v42  ;;  %11668 = vmatmul.mubr.msk.f32.gmra.mrb[54].mxu0 %vm116_vm0, %v101_v34 }
  0xfd   :  { %vm706_vm14 = vcmp.gt.f32.partialorder %v435_v44, 0.0  ;;  %v770_v46 = vmul.f32 0.2, %v435_v44 }
  0xfe   :  { %12714 = vmatpush1.bf16.msra.mxu0 %v12713_v45  ;;  %13236 = vmatpush1.bf16.msra.mxu1 %v12713_v45  ;;  %v835_v47 = vsel %vm707_vm13, %v11606_v41, %v771_v43 }
  0xff   :  { %v11609_v48 = vpop.f32.mrb[14].mxu0  ;;  %12715 = vmatprep.subr.bf16.mxu0 %v19469_v53  ;;  %13221 = vmatprep.subr.bf16.mxu1 %v19469_v53  ;;  %v834_v49 = vsel %vm706_vm14, %v435_v44, %v770_v46 }
 0x100   :  { %vm709_vm15 = vcmp.gt.f32.partialorder %v11609_v48, 0.0  ;;  %v773_v50 = vmul.f32 0.2, %v11609_v48  ;;  %v445_v51 = vpop.f32.mrb[15].mxu0  ;;  %v12716_v52 = vpack.c.bf16 %v835_v47, %v834_v49 }
 0x101   :  { %vm708_vm1 = vcmp.gt.f32.partialorder %v445_v51, 0.0  ;;  %v772_v54 = vmul.f32 0.2, %v445_v51 }
 0x102   :  { %12717 = vmatpush1.bf16.msra.mxu0 %v12716_v52  ;;  %13237 = vmatpush1.bf16.msra.mxu1 %v12716_v52  ;;  %v837_v55 = vsel %vm709_vm15, %v11609_v48, %v773_v50 }
 0x103   :  { %v11612_v56 = vpop.f32.mrb[16].mxu0  ;;  %12718 = vmatprep.subr.bf16.mxu0 %v19469_v53  ;;  %13222 = vmatprep.subr.bf16.mxu1 %v19469_v53  ;;  %v836_v57 = vsel %vm708_vm1, %v445_v51, %v772_v54 }
 0x104   :  { %vm711_vm2 = vcmp.gt.f32.partialorder %v11612_v56, 0.0  ;;  %v775_v58 = vmul.f32 0.2, %v11612_v56  ;;  %v455_v59 = vpop.f32.mrb[17].mxu0  ;;  %v12719_v60 = vpack.c.bf16 %v837_v55, %v836_v57  ;;  %v1426_v57 = vld [vmem:[%s19457_s2 + $0x10e0] sm:$0xff] }
 0x105   :  { %vm710_vm3 = vcmp.gt.f32.partialorder %v455_v59, 0.0  ;;  %v774_v61 = vmul.f32 0.2, %v455_v59 }
 0x106   :  { %12720 = vmatpush1.bf16.msra.mxu0 %v12719_v60  ;;  %13238 = vmatpush1.bf16.msra.mxu1 %v12719_v60  ;;  %v839_v62 = vsel %vm711_vm2, %v11612_v56, %v775_v58  ;;  %v1431_v60 = vld [vmem:[%s19457_s2 + $0x1108] sm:$0xff] }
 0x107   :  { %v11615_v63 = vpop.f32.mrb[18].mxu0  ;;  %12721 = vmatprep.subr.bf16.mxu0 %v19469_v53  ;;  %13223 = vmatprep.subr.bf16.mxu1 %v19469_v53  ;;  %v838_v0 = vsel %vm710_vm3, %v455_v59, %v774_v61 }
 0x108   :  { %vm713_vm4 = vcmp.gt.f32.partialorder %v11615_v63, 0.0  ;;  %v777_v1 = vmul.f32 0.2, %v11615_v63  ;;  %v465_v2 = vpop.f32.mrb[19].mxu0  ;;  %v12722_v3 = vpack.c.bf16 %v839_v62, %v838_v0 }
 0x109   :  { %vm712_vm5 = vcmp.gt.f32.partialorder %v465_v2, 0.0  ;;  %v776_v4 = vmul.f32 0.2, %v465_v2 }
 0x10a   :  { %12723 = vmatpush1.bf16.msra.mxu0 %v12722_v3  ;;  %13239 = vmatpush1.bf16.msra.mxu1 %v12722_v3  ;;  %v841_v5 = vsel %vm713_vm4, %v11615_v63, %v777_v1 }
 0x10b   :  { %v11618_v6 = vpop.f32.mrb[20].mxu0  ;;  %12724 = vmatprep.subr.bf16.mxu0 %v19469_v53  ;;  %13224 = vmatprep.subr.bf16.mxu1 %v19469_v53  ;;  %v840_v7 = vsel %vm712_vm5, %v465_v2, %v776_v4  ;;  %v1430_v2 = vld [vmem:[%s19457_s2 + $0x1100] sm:$0xff]  ;;  %v1435_v4 = vld [vmem:[%s19457_s2 + $0x1128] sm:$0xff] }
 0x10c   :  { %vm715_vm6 = vcmp.gt.f32.partialorder %v11618_v6, 0.0  ;;  %v779_v8 = vmul.f32 0.2, %v11618_v6  ;;  %v475_v9 = vpop.f32.mrb[21].mxu0  ;;  %v12725_v10 = vpack.c.bf16 %v841_v5, %v840_v7 }
 0x10d   :  { %vm714_vm7 = vcmp.gt.f32.partialorder %v475_v9, 0.0  ;;  %v778_v11 = vmul.f32 0.2, %v475_v9 }
 0x10e   :  { %12726 = vmatpush1.bf16.msra.mxu0 %v12725_v10  ;;  %13240 = vmatpush1.bf16.msra.mxu1 %v12725_v10  ;;  %v843_v12 = vsel %vm715_vm6, %v11618_v6, %v779_v8 }
 0x10f   :  { %v11621_v13 = vpop.f32.mrb[22].mxu0  ;;  %12727 = vmatprep.subr.bf16.mxu0 %v19469_v53  ;;  %13225 = vmatprep.subr.bf16.mxu1 %v19469_v53  ;;  %v842_v14 = vsel %vm714_vm7, %v475_v9, %v778_v11  ;;  %v1434_v11 = vld [vmem:[%s19457_s2 + $0x1120] sm:$0xff] }
 0x110   :  { %vm717_vm8 = vcmp.gt.f32.partialorder %v11621_v13, 0.0  ;;  %v781_v15 = vmul.f32 0.2, %v11621_v13  ;;  %v485_v16 = vpop.f32.mrb[23].mxu0  ;;  %v12728_v17 = vpack.c.bf16 %v843_v12, %v842_v14 }
 0x111   :  { %vm716_vm9 = vcmp.gt.f32.partialorder %v485_v16, 0.0  ;;  %v780_v18 = vmul.f32 0.2, %v485_v16 }
 0x112   :  { %12729 = vmatpush1.bf16.msra.mxu0 %v12728_v17  ;;  %13241 = vmatpush1.bf16.msra.mxu1 %v12728_v17  ;;  %v845_v19 = vsel %vm717_vm8, %v11621_v13, %v781_v15  ;;  %v1439_v13 = vld [vmem:[%s19457_s2 + $0x1148] sm:$0xff] }
 0x113   :  { %v11624_v20 = vpop.f32.mrb[24].mxu0  ;;  %12730 = vmatprep.subr.bf16.mxu0 %v19469_v53  ;;  %13226 = vmatprep.subr.bf16.mxu1 %v19469_v53  ;;  %v844_v21 = vsel %vm716_vm9, %v485_v16, %v780_v18 }
 0x114   :  { %vm719_vm10 = vcmp.gt.f32.partialorder %v11624_v20, 0.0  ;;  %v783_v22 = vmul.f32 0.2, %v11624_v20  ;;  %v495_v23 = vpop.f32.mrb[25].mxu0  ;;  %v12731_v24 = vpack.c.bf16 %v845_v19, %v844_v21 }
 0x115   :  { %vm718_vm11 = vcmp.gt.f32.partialorder %v495_v23, 0.0  ;;  %v782_v25 = vmul.f32 0.2, %v495_v23 }
 0x116   :  { %12732 = vmatpush1.bf16.msra.mxu0 %v12731_v24  ;;  %13242 = vmatpush1.bf16.msra.mxu1 %v12731_v24  ;;  %v847_v26 = vsel %vm719_vm10, %v11624_v20, %v783_v22  ;;  %v1438_v20 = vld [vmem:[%s19457_s2 + $0x1140] sm:$0xff]  ;;  %v1443_v22 = vld [vmem:[%s19457_s2 + $0x1168] sm:$0xff] }
 0x117   :  { %v11627_v28 = vpop.f32.mrb[26].mxu0  ;;  %12733 = vmatprep.subr.bf16.mxu0 %v19469_v53  ;;  %13227 = vmatprep.subr.bf16.mxu1 %v19469_v53  ;;  %v846_v29 = vsel %vm718_vm11, %v495_v23, %v782_v25 }
 0x118   :  { %vm721_vm12 = vcmp.gt.f32.partialorder %v11627_v28, 0.0  ;;  %v785_v30 = vmul.f32 0.2, %v11627_v28  ;;  %v505_v31 = vpop.f32.mrb[27].mxu0  ;;  %v12734_v32 = vpack.c.bf16 %v847_v26, %v846_v29  ;;  %v102_v29 = vld [vmem:[%s19456_s0 + $0x1c0] sm:$0xff] }
 0x119   :  { %vm720_vm13 = vcmp.gt.f32.partialorder %v505_v31, 0.0  ;;  %v784_v33 = vmul.f32 0.2, %v505_v31  ;;  %11670 = vmatprep.mubr.msk.f32.mxu0 %vm116_vm0, %v102_v29 }
 0x11a   :  { %12735 = vmatpush1.bf16.msra.mxu0 %v12734_v32  ;;  %13243 = vmatpush1.bf16.msra.mxu1 %v12734_v32  ;;  %v849_v35 = vsel %vm721_vm12, %v11627_v28, %v785_v30  ;;  %v103_v30 = vld [vmem:[%s19456_s0 + $0x1c8] sm:$0xff] }
 0x11b   :  { %v11630_v36 = vpop.f32.mrb[28].mxu0  ;;  %12736 = vmatprep.subr.bf16.mxu0 %v19469_v53  ;;  %13228 = vmatprep.subr.bf16.mxu1 %v19469_v53  ;;  %v848_v37 = vsel %vm720_vm13, %v505_v31, %v784_v33  ;;  %v1442_v31 = vld [vmem:[%s19457_s2 + $0x1160] sm:$0xff]  ;;  %v1447_v33 = vld [vmem:[%s19457_s2 + $0x1188] sm:$0xff] }
 0x11c   :  { %vm723_vm14 = vcmp.gt.f32.partialorder %v11630_v36, 0.0  ;;  %v787_v38 = vmul.f32 0.2, %v11630_v36  ;;  %v515_v39 = vpop.f32.mrb[29].mxu0  ;;  %v12737_v40 = vpack.c.bf16 %v849_v35, %v848_v37  ;;  %11671 = vmatmul.mubr.msk.f32.gmra.mrb[56].mxu0 %vm116_vm0, %v103_v30  ;;  %v1515_v30 = vld [vmem:[%s19457_s2 + $0x13a8] sm:$0xff] }
 0x11d   :  { %vm722_vm15 = vcmp.gt.f32.partialorder %v515_v39, 0.0  ;;  %v786_v41 = vmul.f32 0.2, %v515_v39 }
 0x11e   :  { %12738 = vmatpush1.bf16.msra.mxu0 %v12737_v40  ;;  %13244 = vmatpush1.bf16.msra.mxu1 %v12737_v40  ;;  %v851_v42 = vsel %vm723_vm14, %v11630_v36, %v787_v38  ;;  %v1446_v36 = vld [vmem:[%s19457_s2 + $0x1180] sm:$0xff]  ;;  %v1451_v38 = vld [vmem:[%s19457_s2 + $0x11a8] sm:$0xff] }
 0x11f   :  { %v11633_v43 = vpop.f32.mrb[30].mxu0  ;;  %12739 = vmatprep.subr.bf16.mxu0 %v19469_v53  ;;  %13229 = vmatprep.subr.bf16.mxu1 %v19469_v53  ;;  %v850_v44 = vsel %vm722_vm15, %v515_v39, %v786_v41 }
 0x120   :  { %vm725_vm1 = vcmp.gt.f32.partialorder %v11633_v43, 0.0  ;;  %v789_v45 = vmul.f32 0.2, %v11633_v43  ;;  %v525_v46 = vpop.f32.mrb[31].mxu0  ;;  %v12740_v47 = vpack.c.bf16 %v851_v42, %v850_v44 }
 0x121   :  { %vm724_vm2 = vcmp.gt.f32.partialorder %v525_v46, 0.0  ;;  %v788_v48 = vmul.f32 0.2, %v525_v46 }
 0x122   :  { %12741 = vmatpush1.bf16.msra.mxu0 %v12740_v47  ;;  %13245 = vmatpush1.bf16.msra.mxu1 %v12740_v47  ;;  %v853_v49 = vsel %vm725_vm1, %v11633_v43, %v789_v45  ;;  %v1450_v43 = vld [vmem:[%s19457_s2 + $0x11a0] sm:$0xff]  ;;  %v1455_v45 = vld [vmem:[%s19457_s2 + $0x11c8] sm:$0xff] }
 0x123   :  { %v11636_v50 = vpop.f32.mrb[32].mxu0  ;;  %12742 = vmatprep.subr.bf16.mxu0 %v19469_v53  ;;  %13230 = vmatprep.subr.bf16.mxu1 %v19469_v53  ;;  %v852_v51 = vsel %vm724_vm2, %v525_v46, %v788_v48  ;;  %v1454_v47 = vld [vmem:[%s19457_s2 + $0x11c0] sm:$0xff]  ;;  %v1459_v48 = vld [vmem:[%s19457_s2 + $0x11e8] sm:$0xff] }
 0x124   :  { %vm727_vm3 = vcmp.gt.f32.partialorder %v11636_v50, 0.0  ;;  %v791_v52 = vmul.f32 0.2, %v11636_v50  ;;  %v535_v54 = vpop.f32.mrb[33].mxu0  ;;  %v12743_v55 = vpack.c.bf16 %v853_v49, %v852_v51  ;;  %v1458_v49 = vld [vmem:[%s19457_s2 + $0x11e0] sm:$0xff] }
 0x125   :  { %vm726_vm4 = vcmp.gt.f32.partialorder %v535_v54, 0.0  ;;  %v790_v56 = vmul.f32 0.2, %v535_v54  ;;  %v1462_v51 = vld [vmem:[%s19457_s2 + $0x1200] sm:$0xff] }
 0x126   :  { %12744 = vmatpush1.bf16.msra.mxu0 %v12743_v55  ;;  %13246 = vmatpush1.bf16.msra.mxu1 %v12743_v55  ;;  %v855_v58 = vsel %vm727_vm3, %v11636_v50, %v791_v52  ;;  %v1463_v50 = vld [vmem:[%s19457_s2 + $0x1208] sm:$0xff] }
 0x127   :  { %12745 = vmatprep.subr.bf16.mxu1 %v19469_v53  ;;  %v854_v59 = vsel %vm726_vm4, %v535_v54, %v790_v56  ;;  %v11639_v61 = vpop.f32.mrb[34].mxu0  ;;  %v1467_v52 = vld [vmem:[%s19457_s2 + $0x1228] sm:$0xff]  ;;  %v1466_v54 = vld [vmem:[%s19457_s2 + $0x1220] sm:$0xff] }
 0x128   :  { %v12746_v62 = vpack.c.bf16 %v855_v58, %v854_v59  ;;  %vm729_vm5 = vcmp.gt.f32.partialorder %v11639_v61, 0.0  ;;  %v793_v63 = vmul.f32 0.2, %v11639_v61  ;;  %v545_v0 = vpop.f32.mrb[35].mxu0  ;;  %v1471_v55 = vld [vmem:[%s19457_s2 + $0x1248] sm:$0xff]  ;;  %v1470_v56 = vld [vmem:[%s19457_s2 + $0x1240] sm:$0xff] }
 0x129   :  { %2650 = vmatmul.mubr.f32.vlgmr.msra.gmra.mrb[0].mxu1 %v1426_v57  ;;  %vm728_vm6 = vcmp.gt.f32.partialorder %v545_v0, 0.0  ;;  %v792_v1 = vmul.f32 0.2, %v545_v0  ;;  %v1475_v57 = vld [vmem:[%s19457_s2 + $0x1268] sm:$0xff]  ;;  %v104_v58 = vld [vmem:[%s19456_s0 + $0x1d0] sm:$0xff]  ;;  %v105_v59 = vld [vmem:[%s19456_s0 + $0x1d8] sm:$0xff] }
 0x12a   :  { %12747 = vmatpush1.bf16.msra.mxu1 %v12746_v62  ;;  %2654 = vmatprep.mubr.f32.mxu1 %v1431_v60  ;;  %v857_v3 = vsel %vm729_vm5, %v11639_v61, %v793_v63  ;;  %v1474_v60 = vld [vmem:[%s19457_s2 + $0x1260] sm:$0xff]  ;;  %v1479_v61 = vld [vmem:[%s19457_s2 + $0x1288] sm:$0xff] }
 0x12b   :  { %12748 = vmatprep.subr.bf16.mxu1 %v19469_v53  ;;  %v856_v5 = vsel %vm728_vm6, %v545_v0, %v792_v1  ;;  %v11642_v6 = vpop.f32.mrb[36].mxu0  ;;  %11673 = vmatprep.mubr.msk.f32.mxu0 %vm116_vm0, %v104_v58  ;;  %v1478_v1 = vld [vmem:[%s19457_s2 + $0x1280] sm:$0xff] }
 0x12c   :  { %v12749_v7 = vpack.c.bf16 %v857_v3, %v856_v5  ;;  %vm731_vm7 = vcmp.gt.f32.partialorder %v11642_v6, 0.0  ;;  %v795_v8 = vmul.f32 0.2, %v11642_v6  ;;  %v555_v9 = vpop.f32.mrb[37].mxu0  ;;  %11674 = vmatmul.mubr.msk.f32.gmra.mrb[58].mxu0 %vm116_vm0, %v105_v59  ;;  %v1483_v3 = vld [vmem:[%s19457_s2 + $0x12a8] sm:$0xff]  ;;  %v898_v58 = vld [vmem:[%s19457_s2 + $0x60] sm:$0xff] }
 0x12d   :  { %2655 = vmatmul.mubr.f32.gmra.mrb[2].mxu1 %v1430_v2  ;;  %vm730_vm8 = vcmp.gt.f32.partialorder %v555_v9, 0.0  ;;  %v794_v10 = vmul.f32 0.2, %v555_v9  ;;  %v1538_v59 = vld [vmem:[%s19457_s2 + $0x1460] sm:$0xff] }
 0x12e   :  { %2659 = vmatprep.mubr.f32.mxu1 %v1435_v4  ;;  %12750 = vmatpush1.bf16.msra.mxu1 %v12749_v7  ;;  %v859_v12 = vsel %vm731_vm7, %v11642_v6, %v795_v8  ;;  %v1482_v6 = vld [vmem:[%s19457_s2 + $0x12a0] sm:$0xff]  ;;  %v1487_v8 = vld [vmem:[%s19457_s2 + $0x12c8] sm:$0xff] }
 0x12f   :  { %12751 = vmatprep.subr.bf16.mxu1 %v19469_v53  ;;  %v858_v14 = vsel %vm730_vm8, %v555_v9, %v794_v10  ;;  %v11645_v15 = vpop.f32.mrb[38].mxu0  ;;  %v1486_v9 = vld [vmem:[%s19457_s2 + $0x12c0] sm:$0xff]  ;;  %v1491_v10 = vld [vmem:[%s19457_s2 + $0x12e8] sm:$0xff] }
 0x130   :  { %v12752_v16 = vpack.c.bf16 %v859_v12, %v858_v14  ;;  %vm733_vm9 = vcmp.gt.f32.partialorder %v11645_v15, 0.0  ;;  %v797_v17 = vmul.f32 0.2, %v11645_v15  ;;  %v565_v18 = vpop.f32.mrb[39].mxu0  ;;  %v1495_v12 = vld [vmem:[%s19457_s2 + $0x1308] sm:$0xff] }
 0x131   :  { %2660 = vmatmul.mubr.f32.gmra.mrb[4].mxu1 %v1434_v11  ;;  %vm732_vm10 = vcmp.gt.f32.partialorder %v565_v18, 0.0  ;;  %v796_v19 = vmul.f32 0.2, %v565_v18  ;;  %v1490_v11 = vld [vmem:[%s19457_s2 + $0x12e0] sm:$0xff]  ;;  %v1499_v14 = vld [vmem:[%s19457_s2 + $0x1328] sm:$0xff] }
 0x132   :  { %2664 = vmatprep.mubr.f32.mxu1 %v1439_v13  ;;  %12753 = vmatpush1.bf16.msra.mxu1 %v12752_v16  ;;  %v861_v21 = vsel %vm733_vm9, %v11645_v15, %v797_v17  ;;  %v1494_v13 = vld [vmem:[%s19457_s2 + $0x1300] sm:$0xff]  ;;  %v1503_v16 = vld [vmem:[%s19457_s2 + $0x1348] sm:$0xff] }
 0x133   :  { %12754 = vmatprep.subr.bf16.mxu1 %v19469_v53  ;;  %v860_v23 = vsel %vm732_vm10, %v565_v18, %v796_v19  ;;  %v11648_v24 = vpop.f32.mrb[40].mxu0  ;;  %v1498_v15 = vld [vmem:[%s19457_s2 + $0x1320] sm:$0xff]  ;;  %v107_v19 = vld [vmem:[%s19456_s0 + $0x1e8] sm:$0xff] }
 0x134   :  { %v12755_v25 = vpack.c.bf16 %v861_v21, %v860_v23  ;;  %vm735_vm11 = vcmp.gt.f32.partialorder %v11648_v24, 0.0  ;;  %v799_v26 = vmul.f32 0.2, %v11648_v24  ;;  %v575_v27 = vpop.f32.mrb[41].mxu0  ;;  %v106_v17 = vld [vmem:[%s19456_s0 + $0x1e0] sm:$0xff]  ;;  %v1511_v23 = vld [vmem:[%s19457_s2 + $0x1388] sm:$0xff] }
 0x135   :  { %2665 = vmatmul.mubr.f32.gmra.mrb[6].mxu1 %v1438_v20  ;;  %vm734_vm12 = vcmp.gt.f32.partialorder %v575_v27, 0.0  ;;  %v798_v28 = vmul.f32 0.2, %v575_v27  ;;  %v1502_v18 = vld [vmem:[%s19457_s2 + $0x1340] sm:$0xff]  ;;  %11676 = vmatprep.mubr.msk.f32.mxu0 %vm116_vm0, %v106_v17  ;;  %v1507_v20 = vld [vmem:[%s19457_s2 + $0x1368] sm:$0xff] }
 0x136   :  { %2669 = vmatprep.mubr.f32.mxu1 %v1443_v22  ;;  %12756 = vmatpush1.bf16.msra.mxu1 %v12755_v25  ;;  %v863_v32 = vsel %vm735_vm11, %v11648_v24, %v799_v26  ;;  %v1506_v21 = vld [vmem:[%s19457_s2 + $0x1360] sm:$0xff] }
 0x137   :  { %12757 = vmatprep.subr.bf16.mxu1 %v19469_v53  ;;  %v862_v34 = vsel %vm734_vm12, %v575_v27, %v798_v28  ;;  %v11651_v37 = vpop.f32.mrb[42].mxu0  ;;  %11677 = vmatmul.mubr.msk.f32.gmra.mrb[60].mxu0 %vm116_vm0, %v107_v19  ;;  %v1510_v28 = vld [vmem:[%s19457_s2 + $0x1380] sm:$0xff]  ;;  %v923_v19 = vld [vmem:[%s19457_s2 + $0x128] sm:$0xff] }
 0x138   :  { %v12758_v35 = vpack.c.bf16 %v863_v32, %v862_v34  ;;  %vm737_vm13 = vcmp.gt.f32.partialorder %v11651_v37, 0.0  ;;  %v801_v39 = vmul.f32 0.2, %v11651_v37  ;;  %v585_v40 = vpop.f32.mrb[43].mxu0  ;;  %v1514_v32 = vld [vmem:[%s19457_s2 + $0x13a0] sm:$0xff] }
 0x139   :  { %2670 = vmatmul.mubr.f32.gmra.mrb[8].mxu1 %v1442_v31  ;;  %vm736_vm14 = vcmp.gt.f32.partialorder %v585_v40, 0.0  ;;  %v800_v41 = vmul.f32 0.2, %v585_v40  ;;  %v1518_v34 = vld [vmem:[%s19457_s2 + $0x13c0] sm:$0xff] }
 0x13a   :  { %2674 = vmatprep.mubr.f32.mxu1 %v1447_v33  ;;  %12759 = vmatpush1.bf16.msra.mxu1 %v12758_v35  ;;  %v865_v42 = vsel %vm737_vm13, %v11651_v37, %v801_v39  ;;  %v1519_v33 = vld [vmem:[%s19457_s2 + $0x13c8] sm:$0xff]  ;;  %v108_v35 = vld [vmem:[%s19456_s0 + $0x1f0] sm:$0xff]  ;;  %v109_v37 = vld [vmem:[%s19456_s0 + $0x1f8] sm:$0xff] }
 0x13b   :  { %12760 = vmatprep.subr.bf16.mxu1 %v19469_v53  ;;  %v864_v44 = vsel %vm736_vm14, %v585_v40, %v800_v41  ;;  %v11654_v62 = vpop.f32.mrb[44].mxu0  ;;  %11679 = vmatprep.mubr.msk.f32.mxu0 %vm116_vm0, %v108_v35  ;;  %v887_v39 = vld [vmem:[%s19457_s2 + $0x8] sm:$0xff]  ;;  %v886_v41 = vld [vmem:[%s19457_s2] sm:$0xff] }
 0x13c   :  { %v12761_v46 = vpack.c.bf16 %v865_v42, %v864_v44  ;;  %v803_v63 = vmul.f32 0.2, %v11654_v62  ;;  %v595_v0 = vpop.f32.mrb[45].mxu0  ;;  %vm739_vm15 = vcmp.gt.f32.partialorder %v11654_v62, 0.0  ;;  %11680 = vmatmul.mubr.msk.f32.gmra.mrb[62].mxu0 %vm116_vm0, %v109_v37  ;;  %v1527_v40 = vld [vmem:[%s19457_s2 + $0x1408] sm:$0xff]  ;;  %v1526_v42 = vld [vmem:[%s19457_s2 + $0x1400] sm:$0xff] }
 0x13d   :  { %2675 = vmatmul.mubr.f32.gmra.mrb[10].mxu1 %v1446_v36  ;;  %vm738_vm1 = vcmp.gt.f32.partialorder %v595_v0, 0.0  ;;  %v802_v2 = vmul.f32 0.2, %v595_v0  ;;  %v1523_v36 = vld [vmem:[%s19457_s2 + $0x13e8] sm:$0xff]  ;;  %1974 = vmatprep.mubr.f32.mxu0 %v887_v39  ;;  %v918_v17 = vld [vmem:[%s19457_s2 + $0x100] sm:$0xff] }
 0x13e   :  { %2679 = vmatprep.mubr.f32.mxu1 %v1451_v38  ;;  %12762 = vmatpush1.bf16.msra.mxu1 %v12761_v46  ;;  %v867_v5 = vsel %vm739_vm15, %v11654_v62, %v803_v63  ;;  %v1522_v38 = vld [vmem:[%s19457_s2 + $0x13e0] sm:$0xff]  ;;  %v1531_v44 = vld [vmem:[%s19457_s2 + $0x1428] sm:$0xff] }
 0x13f   :  { %12763 = vmatprep.subr.bf16.mxu1 %v19469_v53  ;;  %v866_v4 = vsel %vm738_vm1, %v595_v0, %v802_v2  ;;  %v11657_v22 = vpop.f32.mrb[46].mxu0  ;;  %v1530_v46 = vld [vmem:[%s19457_s2 + $0x1420] sm:$0xff]  ;;  %v935_v37 = vld [vmem:[%s19457_s2 + $0x188] sm:$0xff] }
 0x140   :  { %v12764_v7 = vpack.c.bf16 %v867_v5, %v866_v4  ;;  %vm741_vm2 = vcmp.gt.f32.partialorder %v11657_v22, 0.0  ;;  %v805_v24 = vmul.f32 0.2, %v11657_v22  ;;  %v605_v25 = vpop.f32.mrb[47].mxu0  ;;  %1975 = vmatmul.mubr.f32.vlgmr.msra.gmra.mrb[64].mxu0 %v886_v41  ;;  %v902_v0 = vld [vmem:[%s19457_s2 + $0x80] sm:$0xff]  ;;  %v1547_v4 = vld [vmem:[%s19457_s2 + $0x14a8] sm:$0xff] }
 0x141   :  { %2680 = vmatmul.mubr.f32.gmra.mrb[12].mxu1 %v1450_v43  ;;  %vm740_vm3 = vcmp.gt.f32.partialorder %v605_v25, 0.0  ;;  %v804_v26 = vmul.f32 0.2, %v605_v25  ;;  %v891_v43 = vld [vmem:[%s19457_s2 + $0x28] sm:$0xff]  ;;  %v906_v5 = vld [vmem:[%s19457_s2 + $0xa0] sm:$0xff] }
 0x142   :  { %2684 = vmatprep.mubr.f32.mxu1 %v1455_v45  ;;  %12765 = vmatpush1.bf16.msra.mxu1 %v12764_v7  ;;  %v869_v27 = vsel %vm741_vm2, %v11657_v22, %v805_v24  ;;  %v890_v45 = vld [vmem:[%s19457_s2 + $0x20] sm:$0xff]  ;;  %v911_v7 = vld [vmem:[%s19457_s2 + $0xc8] sm:$0xff] }
 0x143   :  { %12766 = vmatprep.subr.bf16.mxu1 %v19469_v53  ;;  %v868_v29 = vsel %vm740_vm3, %v605_v25, %v804_v26  ;;  %1979 = vmatprep.mubr.f32.mxu0 %v891_v43  ;;  %v1562_v22 = vld [vmem:[%s19457_s2 + $0x1520] sm:$0xff]  ;;  %v1567_v24 = vld [vmem:[%s19457_s2 + $0x1548] sm:$0xff] }
 0x144   :  { %v12767_v31 = vpack.c.bf16 %v869_v27, %v868_v29  ;;  %1980 = vmatmul.mubr.f32.gmra.mrb[66].mxu0 %v890_v45  ;;  %v926_v26 = vld [vmem:[%s19457_s2 + $0x140] sm:$0xff]  ;;  %v1579_v43 = vld [vmem:[%s19457_s2 + $0x15a8] sm:$0xff] }
 0x145   :  { %2685 = vmatmul.mubr.f32.gmra.mrb[14].mxu1 %v1454_v47  ;;  %v895_v47 = vld [vmem:[%s19457_s2 + $0x48] sm:$0xff]  ;;  %v1566_v27 = vld [vmem:[%s19457_s2 + $0x1540] sm:$0xff] }
 0x146   :  { %2689 = vmatprep.mubr.f32.mxu1 %v1459_v48  ;;  %12768 = vmatpush1.bf16.msra.mxu1 %v12767_v31  ;;  %v1535_v48 = vld [vmem:[%s19457_s2 + $0x1448] sm:$0xff]  ;;  %v1574_v41 = vld [vmem:[%s19457_s2 + $0x1580] sm:$0xff] }
 0x147   :  { %12769 = vmatprep.subr.bf16.mxu1 %v19469_v53  ;;  %1984 = vmatprep.mubr.f32.mxu0 %v895_v47  ;;  %v1571_v31 = vld [vmem:[%s19457_s2 + $0x1568] sm:$0xff]  ;;  %v1578_v45 = vld [vmem:[%s19457_s2 + $0x15a0] sm:$0xff] }
 0x148   :  { %v1583_v47 = vld [vmem:[%s19457_s2 + $0x15c8] sm:$0xff] }
 0x149   :  { %2690 = vmatmul.mubr.f32.gmra.mrb[16].mxu1 %v1458_v49  ;;  %v894_v49 = vld [vmem:[%s19457_s2 + $0x40] sm:$0xff] }
 0x14a   :  { %2694 = vmatprep.mubr.f32.mxu1 %v1463_v50  ;;  %v1534_v50 = vld [vmem:[%s19457_s2 + $0x1440] sm:$0xff]  ;;  %1985 = vmatmul.mubr.f32.gmra.mrb[68].mxu0 %v894_v49 }
 0x14b   :  { %v1582_v49 = vld [vmem:[%s19457_s2 + $0x15c0] sm:$0xff] }
 0x14d   :  { %2695 = vmatmul.mubr.f32.gmra.mrb[18].mxu1 %v1462_v51  ;;  %v11660_v51 = vpop.f32.mrb[48].mxu0 }
 0x14e   :  { %2699 = vmatprep.mubr.f32.mxu1 %v1467_v52  ;;  %v899_v52 = vld [vmem:[%s19457_s2 + $0x68] sm:$0xff]  ;;  %vm743_vm0 = vcmp.gt.f32.partialorder %v11660_v51, 0.0 }
 0x14f   :  { %1989 = vmatprep.mubr.f32.mxu0 %v899_v52  ;;  %v946_v52 = vld [vmem:[%s19457_s2 + $0x1e0] sm:$0xff] }
 0x150   :  { %1990 = vmatmul.mubr.f32.gmra.mrb[70].mxu0 %v898_v58  ;;  %v1590_v58 = vld [vmem:[%s19457_s2 + $0x1600] sm:$0xff] }
 0x151   :  { %2700 = vmatmul.mubr.f32.gmra.mrb[20].mxu1 %v1466_v54  ;;  %v1539_v54 = vld [vmem:[%s19457_s2 + $0x1468] sm:$0xff] }
 0x152   :  { %2704 = vmatprep.mubr.f32.mxu1 %v1471_v55  ;;  %v615_v55 = vpop.f32.mrb[49].mxu0 }
 0x153   :  { %vm742_vm4 = vcmp.gt.f32.partialorder %v615_v55, 0.0  ;;  %v11663_v25 = vpop.f32.mrb[50].mxu0 }
 0x154   :  { %v625_v29 = vpop.f32.mrb[51].mxu0  ;;  %vm745_vm5 = vcmp.gt.f32.partialorder %v11663_v25, 0.0 }
 0x155   :  { %2705 = vmatmul.mubr.f32.gmra.mrb[22].mxu1 %v1470_v56  ;;  %v807_v56 = vmul.f32 0.2, %v11660_v51  ;;  %vm744_vm6 = vcmp.gt.f32.partialorder %v625_v29, 0.0 }
 0x156   :  { %2709 = vmatprep.mubr.f32.mxu1 %v1475_v57  ;;  %v806_v57 = vmul.f32 0.2, %v615_v55 }
 0x157   :  { %v871_v63 = vsel %vm743_vm0, %v11660_v51, %v807_v56  ;;  %v1587_v51 = vld [vmem:[%s19457_s2 + $0x15e8] sm:$0xff]  ;;  %vm4664_vm0 = vcmask 261120  }
 0x158   :  { %v870_v62 = vsel %vm742_vm4, %v615_v55, %v806_v57  ;;  %v951_v55 = vld [vmem:[%s19457_s2 + $0x208] sm:$0xff]  ;;  %v950_v57 = vld [vmem:[%s19457_s2 + $0x200] sm:$0xff]  ;;  %vm7977_vm4 = vcmask 523264  }
 0x159   :  { %2710 = vmatmul.mubr.f32.gmra.mrb[24].mxu1 %v1474_v60  ;;  %v903_v60 = vld [vmem:[%s19457_s2 + $0x88] sm:$0xff]  ;;  %v12770_v2 = vpack.c.bf16 %v871_v63, %v870_v62  ;;  %v1594_v62 = vld [vmem:[%s19457_s2 + $0x1620] sm:$0xff] }
 0x15a   :  { %2714 = vmatprep.mubr.f32.mxu1 %v1479_v61  ;;  %v1543_v61 = vld [vmem:[%s19457_s2 + $0x1488] sm:$0xff]  ;;  %1994 = vmatprep.mubr.f32.mxu0 %v903_v60 }
 0x15b   :  { %1995 = vmatmul.mubr.f32.gmra.mrb[72].mxu0 %v902_v0  ;;  %12771 = vmatpush1.bf16.msra.mxu1 %v12770_v2  ;;  %v1591_v56 = vld [vmem:[%s19457_s2 + $0x1608] sm:$0xff] }
 0x15c   :  { %12772 = vmatprep.subr.bf16.mxu1 %v19469_v53  ;;  %v1595_v60 = vld [vmem:[%s19457_s2 + $0x1628] sm:$0xff] }
 0x15d   :  { %2715 = vmatmul.mubr.f32.gmra.mrb[26].mxu1 %v1478_v1  ;;  %v1542_v1 = vld [vmem:[%s19457_s2 + $0x1480] sm:$0xff]  ;;  %v959_v63 = vld [vmem:[%s19457_s2 + $0x248] sm:$0xff] }
 0x15e   :  { %2719 = vmatprep.mubr.f32.mxu1 %v1483_v3  ;;  %v907_v3 = vld [vmem:[%s19457_s2 + $0xa8] sm:$0xff] }
 0x15f   :  { %1999 = vmatprep.mubr.f32.mxu0 %v907_v3  ;;  %v1599_v0 = vld [vmem:[%s19457_s2 + $0x1648] sm:$0xff] }
 0x160   :  { %2000 = vmatmul.mubr.f32.gmra.mrb[74].mxu0 %v906_v5  ;;  %v1598_v5 = vld [vmem:[%s19457_s2 + $0x1640] sm:$0xff] }
 0x161   :  { %2720 = vmatmul.mubr.f32.gmra.mrb[28].mxu1 %v1482_v6  ;;  %v1546_v6 = vld [vmem:[%s19457_s2 + $0x14a0] sm:$0xff]  ;;  %2004 = vmatprep.mubr.f32.mxu0 %v911_v7  ;;  %v963_v7 = vld [vmem:[%s19457_s2 + $0x268] sm:$0xff] }
 0x162   :  { %2724 = vmatprep.mubr.f32.mxu1 %v1487_v8  ;;  %v1551_v8 = vld [vmem:[%s19457_s2 + $0x14c8] sm:$0xff] }
 0x165   :  { %2725 = vmatmul.mubr.f32.gmra.mrb[30].mxu1 %v1486_v9  ;;  %v910_v9 = vld [vmem:[%s19457_s2 + $0xc0] sm:$0xff] }
 0x166   :  { %2729 = vmatprep.mubr.f32.mxu1 %v1491_v10  ;;  %v1550_v10 = vld [vmem:[%s19457_s2 + $0x14c0] sm:$0xff]  ;;  %2005 = vmatmul.mubr.f32.gmra.mrb[76].mxu0 %v910_v9 }
 0x167   :  { %v962_v9 = vld [vmem:[%s19457_s2 + $0x260] sm:$0xff] }
 0x169   :  { %2730 = vmatmul.mubr.f32.gmra.mrb[32].mxu1 %v1490_v11  ;;  %v915_v11 = vld [vmem:[%s19457_s2 + $0xe8] sm:$0xff] }
 0x16a   :  { %2734 = vmatprep.mubr.f32.mxu1 %v1495_v12  ;;  %v1555_v12 = vld [vmem:[%s19457_s2 + $0x14e8] sm:$0xff]  ;;  %2009 = vmatprep.mubr.f32.mxu0 %v915_v11 }
 0x16d   :  { %2735 = vmatmul.mubr.f32.gmra.mrb[34].mxu1 %v1494_v13  ;;  %v914_v13 = vld [vmem:[%s19457_s2 + $0xe0] sm:$0xff] }
 0x16e   :  { %2739 = vmatprep.mubr.f32.mxu1 %v1499_v14  ;;  %v1554_v14 = vld [vmem:[%s19457_s2 + $0x14e0] sm:$0xff]  ;;  %2010 = vmatmul.mubr.f32.gmra.mrb[78].mxu0 %v914_v13 }
 0x171   :  { %2740 = vmatmul.mubr.f32.gmra.mrb[36].mxu1 %v1498_v15  ;;  %v919_v15 = vld [vmem:[%s19457_s2 + $0x108] sm:$0xff] }
 0x172   :  { %2744 = vmatprep.mubr.f32.mxu1 %v1503_v16  ;;  %v1559_v16 = vld [vmem:[%s19457_s2 + $0x1508] sm:$0xff]  ;;  %2014 = vmatprep.mubr.f32.mxu0 %v919_v15 }
 0x173   :  { %2015 = vmatmul.mubr.f32.gmra.mrb[80].mxu0 %v918_v17  ;;  %v1607_v15 = vld [vmem:[%s19457_s2 + $0x1688] sm:$0xff]  ;;  %v1606_v17 = vld [vmem:[%s19457_s2 + $0x1680] sm:$0xff] }
 0x174   :  { %2019 = vmatprep.mubr.f32.mxu0 %v923_v19  ;;  %v1611_v19 = vld [vmem:[%s19457_s2 + $0x16a8] sm:$0xff] }
 0x175   :  { %2745 = vmatmul.mubr.f32.gmra.mrb[38].mxu1 %v1502_v18  ;;  %v1558_v18 = vld [vmem:[%s19457_s2 + $0x1500] sm:$0xff] }
 0x176   :  { %2749 = vmatprep.mubr.f32.mxu1 %v1507_v20  ;;  %v1563_v20 = vld [vmem:[%s19457_s2 + $0x1528] sm:$0xff] }
 0x179   :  { %2750 = vmatmul.mubr.f32.gmra.mrb[40].mxu1 %v1506_v21  ;;  %v922_v21 = vld [vmem:[%s19457_s2 + $0x120] sm:$0xff] }
 0x17a   :  { %2754 = vmatprep.mubr.f32.mxu1 %v1511_v23  ;;  %2020 = vmatmul.mubr.f32.gmra.mrb[82].mxu0 %v922_v21  ;;  %v927_v23 = vld [vmem:[%s19457_s2 + $0x148] sm:$0xff]  ;;  %v1610_v21 = vld [vmem:[%s19457_s2 + $0x16a0] sm:$0xff] }
 0x17b   :  { %2024 = vmatprep.mubr.f32.mxu0 %v927_v23  ;;  %v1615_v23 = vld [vmem:[%s19457_s2 + $0x16c8] sm:$0xff] }
 0x17d   :  { %2755 = vmatmul.mubr.f32.gmra.mrb[42].mxu1 %v1510_v28  ;;  %v809_v28 = vmul.f32 0.2, %v11663_v25 }
 0x17e   :  { %2759 = vmatprep.mubr.f32.mxu1 %v1515_v30  ;;  %2025 = vmatmul.mubr.f32.gmra.mrb[84].mxu0 %v926_v26  ;;  %v931_v30 = vld [vmem:[%s19457_s2 + $0x168] sm:$0xff] }
 0x17f   :  { %2029 = vmatprep.mubr.f32.mxu0 %v931_v30  ;;  %v979_v26 = vld [vmem:[%s19457_s2 + $0x2e8] sm:$0xff] }
 0x180   :  { %v983_v30 = vld [vmem:[%s19457_s2 + $0x308] sm:$0xff] }
 0x181   :  { %2760 = vmatmul.mubr.f32.gmra.mrb[44].mxu1 %v1514_v32  ;;  %v808_v32 = vmul.f32 0.2, %v625_v29 }
 0x182   :  { %2764 = vmatprep.mubr.f32.mxu1 %v1519_v33  ;;  %v930_v33 = vld [vmem:[%s19457_s2 + $0x160] sm:$0xff] }
 0x183   :  { %2030 = vmatmul.mubr.f32.gmra.mrb[86].mxu0 %v930_v33  ;;  %v872_v35 = vsel %vm744_vm6, %v625_v29, %v808_v32  ;;  %v1618_v29 = vld [vmem:[%s19457_s2 + $0x16e0] sm:$0xff] }
 0x184   :  { %2034 = vmatprep.mubr.f32.mxu0 %v935_v37  ;;  %v982_v32 = vld [vmem:[%s19457_s2 + $0x300] sm:$0xff] }
 0x185   :  { %2765 = vmatmul.mubr.f32.gmra.mrb[46].mxu1 %v1518_v34  ;;  %v1570_v34 = vld [vmem:[%s19457_s2 + $0x1560] sm:$0xff] }
 0x186   :  { %2769 = vmatprep.mubr.f32.mxu1 %v1523_v36  ;;  %v873_v36 = vsel %vm745_vm5, %v11663_v25, %v809_v28  ;;  %v1614_v25 = vld [vmem:[%s19457_s2 + $0x16c0] sm:$0xff] }
 0x187   :  { %v12773_v39 = vpack.c.bf16 %v873_v36, %v872_v35  ;;  %v978_v28 = vld [vmem:[%s19457_s2 + $0x2e0] sm:$0xff]  ;;  %v1627_v35 = vld [vmem:[%s19457_s2 + $0x1728] sm:$0xff] }
 0x188   :  { %v1622_v33 = vld [vmem:[%s19457_s2 + $0x1700] sm:$0xff] }
 0x189   :  { %2770 = vmatmul.mubr.f32.gmra.mrb[48].mxu1 %v1522_v38  ;;  %v1575_v38 = vld [vmem:[%s19457_s2 + $0x1588] sm:$0xff]  ;;  %v986_v36 = vld [vmem:[%s19457_s2 + $0x320] sm:$0xff] }
 0x18a   :  { %2774 = vmatprep.mubr.f32.mxu1 %v1527_v40  ;;  %v934_v40 = vld [vmem:[%s19457_s2 + $0x180] sm:$0xff]  ;;  %12774 = vmatpush1.bf16.msra.mxu1 %v12773_v39  ;;  %v1631_v39 = vld [vmem:[%s19457_s2 + $0x1748] sm:$0xff] }
 0x18b   :  { %2035 = vmatmul.mubr.f32.gmra.mrb[88].mxu0 %v934_v40  ;;  %12775 = vmatprep.subr.bf16.mxu1 %v19469_v53  ;;  %v1626_v37 = vld [vmem:[%s19457_s2 + $0x1720] sm:$0xff] }
 0x18d   :  { %2775 = vmatmul.mubr.f32.gmra.mrb[50].mxu1 %v1526_v42  ;;  %v939_v42 = vld [vmem:[%s19457_s2 + $0x1a8] sm:$0xff] }
 0x18e   :  { %2779 = vmatprep.mubr.f32.mxu1 %v1531_v44  ;;  %2039 = vmatprep.mubr.f32.mxu0 %v939_v42  ;;  %v938_v44 = vld [vmem:[%s19457_s2 + $0x1a0] sm:$0xff] }
 0x18f   :  { %2040 = vmatmul.mubr.f32.gmra.mrb[90].mxu0 %v938_v44  ;;  %v990_v44 = vld [vmem:[%s19457_s2 + $0x340] sm:$0xff] }
 0x191   :  { %2780 = vmatmul.mubr.f32.gmra.mrb[52].mxu1 %v1530_v46  ;;  %v943_v46 = vld [vmem:[%s19457_s2 + $0x1c8] sm:$0xff] }
 0x192   :  { %2784 = vmatprep.mubr.f32.mxu1 %v1535_v48  ;;  %2044 = vmatprep.mubr.f32.mxu0 %v943_v46  ;;  %v942_v48 = vld [vmem:[%s19457_s2 + $0x1c0] sm:$0xff] }
 0x193   :  { %2045 = vmatmul.mubr.f32.gmra.mrb[92].mxu0 %v942_v48  ;;  %v1635_v48 = vld [vmem:[%s19457_s2 + $0x1768] sm:$0xff] }
 0x195   :  { %2785 = vmatmul.mubr.f32.gmra.mrb[54].mxu1 %v1534_v50  ;;  %v947_v50 = vld [vmem:[%s19457_s2 + $0x1e8] sm:$0xff] }
 0x196   :  { %2789 = vmatprep.mubr.f32.mxu1 %v1539_v54  ;;  %2049 = vmatprep.mubr.f32.mxu0 %v947_v50  ;;  %v1586_v54 = vld [vmem:[%s19457_s2 + $0x15e0] sm:$0xff] }
 0x197   :  { %2050 = vmatmul.mubr.f32.gmra.mrb[94].mxu0 %v946_v52  ;;  %v1634_v52 = vld [vmem:[%s19457_s2 + $0x1760] sm:$0xff] }
 0x198   :  { %2054 = vmatprep.mubr.f32.mxu0 %v951_v55  ;;  %v1639_v55 = vld [vmem:[%s19457_s2 + $0x1788] sm:$0xff] }
 0x199   :  { %2790 = vmatmul.mubr.f32.gmra.mrb[56].mxu1 %v1538_v59  ;;  %v955_v59 = vld [vmem:[%s19457_s2 + $0x228] sm:$0xff] }
 0x19a   :  { %2794 = vmatprep.mubr.f32.mxu1 %v1543_v61  ;;  %v954_v61 = vld [vmem:[%s19457_s2 + $0x220] sm:$0xff] }
 0x19b   :  { %2055 = vmatmul.mubr.f32.gmra.mrb[96].mxu0 %v950_v57  ;;  %v1638_v57 = vld [vmem:[%s19457_s2 + $0x1780] sm:$0xff] }
 0x19c   :  { %2059 = vmatprep.mubr.f32.mxu0 %v955_v59  ;;  %v1643_v59 = vld [vmem:[%s19457_s2 + $0x17a8] sm:$0xff] }
 0x19d   :  { %2795 = vmatmul.mubr.f32.gmra.mrb[58].mxu1 %v1542_v1  ;;  %v11666_v1 = vpop.f32.mrb[52].mxu0 }
 0x19e   :  { %2799 = vmatprep.mubr.f32.mxu1 %v1547_v4  ;;  %v811_v2 = vmul.f32 0.2, %v11666_v1  ;;  %v635_v3 = vpop.f32.mrb[53].mxu0  ;;  %v958_v4 = vld [vmem:[%s19457_s2 + $0x240] sm:$0xff]  ;;  %vm747_vm7 = vcmp.gt.f32.partialorder %v11666_v1, 0.0 }
 0x19f   :  { %2060 = vmatmul.mubr.f32.gmra.mrb[98].mxu0 %v954_v61  ;;  %vm746_vm8 = vcmp.gt.f32.partialorder %v635_v3, 0.0  ;;  %v1642_v61 = vld [vmem:[%s19457_s2 + $0x17a0] sm:$0xff] }
 0x1a0   :  { %2064 = vmatprep.mubr.f32.mxu0 %v959_v63  ;;  %v875_v11 = vsel %vm747_vm7, %v11666_v1, %v811_v2  ;;  %v1647_v63 = vld [vmem:[%s19457_s2 + $0x17c8] sm:$0xff]  ;;  %v1646_v1 = vld [vmem:[%s19457_s2 + $0x17c0] sm:$0xff] }
 0x1a1   :  { %2800 = vmatmul.mubr.f32.gmra.mrb[60].mxu1 %v1546_v6  ;;  %v810_v6 = vmul.f32 0.2, %v635_v3  ;;  %v1011_v2 = vld [vmem:[%s19457_s2 + $0x3e8] sm:$0xff] }
 0x1a2   :  { %2804 = vmatprep.mubr.f32.mxu1 %v1551_v8  ;;  %v1603_v8 = vld [vmem:[%s19457_s2 + $0x1668] sm:$0xff] }
 0x1a3   :  { %2065 = vmatmul.mubr.f32.gmra.mrb[100].mxu0 %v958_v4  ;;  %v1010_v4 = vld [vmem:[%s19457_s2 + $0x3e0] sm:$0xff] }
 0x1a4   :  { %2069 = vmatprep.mubr.f32.mxu0 %v963_v7  ;;  %v1655_v7 = vld [vmem:[%s19457_s2 + $0x1808] sm:$0xff] }
 0x1a5   :  { %2805 = vmatmul.mubr.f32.gmra.mrb[62].mxu1 %v1550_v10  ;;  %v874_v10 = vsel %vm746_vm8, %v635_v3, %v810_v6  ;;  %v1651_v3 = vld [vmem:[%s19457_s2 + $0x17e8] sm:$0xff] }
 0x1a6   :  { %2809 = vmatprep.mubr.f32.mxu1 %v1555_v12  ;;  %v1602_v12 = vld [vmem:[%s19457_s2 + $0x1660] sm:$0xff]  ;;  %v12776_v13 = vpack.c.bf16 %v875_v11, %v874_v10  ;;  %v1015_v6 = vld [vmem:[%s19457_s2 + $0x408] sm:$0xff] }
 0x1a7   :  { %2070 = vmatmul.mubr.f32.gmra.mrb[102].mxu0 %v962_v9  ;;  %v1654_v9 = vld [vmem:[%s19457_s2 + $0x1800] sm:$0xff]  ;;  %v1019_v10 = vld [vmem:[%s19457_s2 + $0x428] sm:$0xff] }
 0x1a8   :  { %12777 = vmatpush1.bf16.msra.mxu1 %v12776_v13  ;;  %v1659_v11 = vld [vmem:[%s19457_s2 + $0x1828] sm:$0xff] }
 0x1a9   :  { %2810 = vmatmul.mubr.f32.gmra.mrb[64].mxu1 %v1554_v14  ;;  %v967_v14 = vld [vmem:[%s19457_s2 + $0x288] sm:$0xff]  ;;  %12778 = vmatprep.subr.bf16.mxu1 %v19469_v53 }
 0x1aa   :  { %2814 = vmatprep.mubr.f32.mxu1 %v1559_v16  ;;  %2074 = vmatprep.mubr.f32.mxu0 %v967_v14  ;;  %v966_v16 = vld [vmem:[%s19457_s2 + $0x280] sm:$0xff] }
 0x1ab   :  { %2075 = vmatmul.mubr.f32.gmra.mrb[104].mxu0 %v966_v16  ;;  %v1018_v16 = vld [vmem:[%s19457_s2 + $0x420] sm:$0xff] }
 0x1ad   :  { %2815 = vmatmul.mubr.f32.gmra.mrb[66].mxu1 %v1558_v18  ;;  %v971_v18 = vld [vmem:[%s19457_s2 + $0x2a8] sm:$0xff] }
 0x1ae   :  { %2819 = vmatprep.mubr.f32.mxu1 %v1563_v20  ;;  %2079 = vmatprep.mubr.f32.mxu0 %v971_v18  ;;  %v970_v20 = vld [vmem:[%s19457_s2 + $0x2a0] sm:$0xff]  ;;  %v1023_v18 = vld [vmem:[%s19457_s2 + $0x448] sm:$0xff] }
 0x1af   :  { %2080 = vmatmul.mubr.f32.gmra.mrb[106].mxu0 %v970_v20  ;;  %v1022_v20 = vld [vmem:[%s19457_s2 + $0x440] sm:$0xff] }
 0x1b1   :  { %2820 = vmatmul.mubr.f32.gmra.mrb[68].mxu1 %v1562_v22  ;;  %v975_v22 = vld [vmem:[%s19457_s2 + $0x2c8] sm:$0xff] }
 0x1b2   :  { %2824 = vmatprep.mubr.f32.mxu1 %v1567_v24  ;;  %2084 = vmatprep.mubr.f32.mxu0 %v975_v22  ;;  %v974_v24 = vld [vmem:[%s19457_s2 + $0x2c0] sm:$0xff] }
 0x1b3   :  { %2085 = vmatmul.mubr.f32.gmra.mrb[108].mxu0 %v974_v24 }
 0x1b4   :  { %2089 = vmatprep.mubr.f32.mxu0 %v979_v26  ;;  %v1667_v26 = vld [vmem:[%s19457_s2 + $0x1868] sm:$0xff] }
 0x1b5   :  { %2825 = vmatmul.mubr.f32.gmra.mrb[70].mxu1 %v1566_v27  ;;  %v1619_v27 = vld [vmem:[%s19457_s2 + $0x16e8] sm:$0xff] }
 0x1b6   :  { %2829 = vmatprep.mubr.f32.mxu1 %v1571_v31  ;;  %v1623_v31 = vld [vmem:[%s19457_s2 + $0x1708] sm:$0xff] }
 0x1b7   :  { %2090 = vmatmul.mubr.f32.gmra.mrb[110].mxu0 %v978_v28  ;;  %v1666_v28 = vld [vmem:[%s19457_s2 + $0x1860] sm:$0xff] }
 0x1b8   :  { %2094 = vmatprep.mubr.f32.mxu0 %v983_v30  ;;  %v1671_v30 = vld [vmem:[%s19457_s2 + $0x1888] sm:$0xff] }
 0x1b9   :  { %2830 = vmatmul.mubr.f32.gmra.mrb[72].mxu1 %v1570_v34  ;;  %v987_v34 = vld [vmem:[%s19457_s2 + $0x328] sm:$0xff] }
 0x1ba   :  { %2834 = vmatprep.mubr.f32.mxu1 %v1575_v38  ;;  %v991_v38 = vld [vmem:[%s19457_s2 + $0x348] sm:$0xff] }
 0x1bb   :  { %2095 = vmatmul.mubr.f32.gmra.mrb[112].mxu0 %v982_v32  ;;  %v1670_v32 = vld [vmem:[%s19457_s2 + $0x1880] sm:$0xff] }
 0x1bc   :  { %2099 = vmatprep.mubr.f32.mxu0 %v987_v34  ;;  %v1675_v34 = vld [vmem:[%s19457_s2 + $0x18a8] sm:$0xff] }
 0x1bd   :  { %2835 = vmatmul.mubr.f32.gmra.mrb[74].mxu1 %v1574_v41 }
 0x1be   :  { %2839 = vmatprep.mubr.f32.mxu1 %v1579_v43 }
 0x1bf   :  { %2100 = vmatmul.mubr.f32.gmra.mrb[114].mxu0 %v986_v36  ;;  %v1674_v36 = vld [vmem:[%s19457_s2 + $0x18a0] sm:$0xff] }
 0x1c0   :  { %2104 = vmatprep.mubr.f32.mxu0 %v991_v38  ;;  %v1679_v38 = vld [vmem:[%s19457_s2 + $0x18c8] sm:$0xff] }
 0x1c1   :  { %2840 = vmatmul.mubr.f32.gmra.mrb[76].mxu1 %v1578_v45  ;;  %v1630_v45 = vld [vmem:[%s19457_s2 + $0x1740] sm:$0xff] }
 0x1c2   :  { %2844 = vmatprep.mubr.f32.mxu1 %v1583_v47  ;;  %v995_v47 = vld [vmem:[%s19457_s2 + $0x368] sm:$0xff] }
 0x1c3   :  { %2105 = vmatmul.mubr.f32.gmra.mrb[116].mxu0 %v990_v44  ;;  %v1682_v44 = vld [vmem:[%s19457_s2 + $0x18e0] sm:$0xff] }
 0x1c4   :  { %2109 = vmatprep.mubr.f32.mxu0 %v995_v47  ;;  %v1046_v47 = vld [vmem:[%s19457_s2 + $0x500] sm:$0xff] }
 0x1c5   :  { %2845 = vmatmul.mubr.f32.gmra.mrb[78].mxu1 %v1582_v49 }
 0x1c6   :  { %2849 = vmatprep.mubr.f32.mxu1 %v1587_v51  ;;  %v994_v51 = vld [vmem:[%s19457_s2 + $0x360] sm:$0xff] }
 0x1c7   :  { %2110 = vmatmul.mubr.f32.gmra.mrb[118].mxu0 %v994_v51  ;;  %v1691_v51 = vld [vmem:[%s19457_s2 + $0x1928] sm:$0xff] }
 0x1c9   :  { %2850 = vmatmul.mubr.f32.gmra.mrb[80].mxu1 %v1586_v54  ;;  %v999_v54 = vld [vmem:[%s19457_s2 + $0x388] sm:$0xff] }
 0x1ca   :  { %2854 = vmatprep.mubr.f32.mxu1 %v1591_v56  ;;  %2114 = vmatprep.mubr.f32.mxu0 %v999_v54  ;;  %v998_v56 = vld [vmem:[%s19457_s2 + $0x380] sm:$0xff] }
 0x1cb   :  { %2115 = vmatmul.mubr.f32.gmra.mrb[120].mxu0 %v998_v56  ;;  %v1050_v56 = vld [vmem:[%s19457_s2 + $0x520] sm:$0xff] }
 0x1cd   :  { %2855 = vmatmul.mubr.f32.gmra.mrb[82].mxu1 %v1590_v58  ;;  %v1003_v58 = vld [vmem:[%s19457_s2 + $0x3a8] sm:$0xff] }
 0x1ce   :  { %2859 = vmatprep.mubr.f32.mxu1 %v1595_v60  ;;  %2119 = vmatprep.mubr.f32.mxu0 %v1003_v58  ;;  %v1002_v60 = vld [vmem:[%s19457_s2 + $0x3a0] sm:$0xff]  ;;  %v1055_v58 = vld [vmem:[%s19457_s2 + $0x548] sm:$0xff] }
 0x1cf   :  { %v11669_v40 = vpop.f32.mrb[54].mxu0  ;;  %2120 = vmatmul.mubr.f32.gmra.mrb[122].mxu0 %v1002_v60 }
 0x1d0   :  { %vm749_vm9 = vcmp.gt.f32.partialorder %v11669_v40, 0.0  ;;  %v813_v41 = vmul.f32 0.2, %v11669_v40  ;;  %v645_v42 = vpop.f32.mrb[55].mxu0 }
 0x1d1   :  { %2860 = vmatmul.mubr.f32.gmra.mrb[84].mxu1 %v1594_v62  ;;  %vm748_vm10 = vcmp.gt.f32.partialorder %v645_v42, 0.0  ;;  %v812_v43 = vmul.f32 0.2, %v645_v42  ;;  %v1007_v62 = vld [vmem:[%s19457_s2 + $0x3c8] sm:$0xff] }
 0x1d2   :  { %2864 = vmatprep.mubr.f32.mxu1 %v1599_v0  ;;  %v877_v46 = vsel %vm749_vm9, %v11669_v40, %v813_v41  ;;  %2124 = vmatprep.mubr.f32.mxu0 %v1007_v62  ;;  %v1006_v0 = vld [vmem:[%s19457_s2 + $0x3c0] sm:$0xff]  ;;  %v1043_v41 = vld [vmem:[%s19457_s2 + $0x4e8] sm:$0xff] }
 0x1d3   :  { %v876_v49 = vsel %vm748_vm10, %v645_v42, %v812_v43  ;;  %2125 = vmatmul.mubr.f32.gmra.mrb[124].mxu0 %v1006_v0  ;;  %v1678_v40 = vld [vmem:[%s19457_s2 + $0x18c0] sm:$0xff]  ;;  %v1683_v42 = vld [vmem:[%s19457_s2 + $0x18e8] sm:$0xff] }
 0x1d4   :  { %v12779_v50 = vpack.c.bf16 %v877_v46, %v876_v49  ;;  %2129 = vmatprep.mubr.f32.mxu0 %v1011_v2  ;;  %v1042_v43 = vld [vmem:[%s19457_s2 + $0x4e0] sm:$0xff]  ;;  %v1687_v46 = vld [vmem:[%s19457_s2 + $0x1908] sm:$0xff] }
 0x1d5   :  { %2865 = vmatmul.mubr.f32.gmra.mrb[86].mxu1 %v1598_v5  ;;  %v1650_v5 = vld [vmem:[%s19457_s2 + $0x17e0] sm:$0xff]  ;;  %v1699_v2 = vld [vmem:[%s19457_s2 + $0x1968] sm:$0xff] }
 0x1d6   :  { %2869 = vmatprep.mubr.f32.mxu1 %v1603_v8  ;;  %12780 = vmatpush1.bf16.msra.mxu1 %v12779_v50  ;;  %v1014_v8 = vld [vmem:[%s19457_s2 + $0x400] sm:$0xff]  ;;  %v1051_v50 = vld [vmem:[%s19457_s2 + $0x528] sm:$0xff] }
 0x1d7   :  { %12781 = vmatprep.subr.bf16.mxu1 %v19469_v53  ;;  %2130 = vmatmul.mubr.f32.gmra.mrb[126].mxu0 %v1010_v4  ;;  %v1054_v62 = vld [vmem:[%s19457_s2 + $0x540] sm:$0xff] }
 0x1d8   :  { %2134 = vmatprep.mubr.f32.mxu0 %v1015_v6  ;;  %v1698_v4 = vld [vmem:[%s19457_s2 + $0x1960] sm:$0xff]  ;;  %v1703_v6 = vld [vmem:[%s19457_s2 + $0x1988] sm:$0xff] }
 0x1d9   :  { %2870 = vmatmul.mubr.f32.gmra.mrb[88].mxu1 %v1602_v12 }
 0x1da   :  { %2874 = vmatprep.mubr.f32.mxu1 %v1607_v15 }
 0x1db   :  { %2135 = vmatmul.mubr.f32.gmra.mrb[128].mxu0 %v1014_v8  ;;  %v1702_v8 = vld [vmem:[%s19457_s2 + $0x1980] sm:$0xff] }
 0x1dc   :  { %2139 = vmatprep.mubr.f32.mxu0 %v1019_v10  ;;  %v1707_v10 = vld [vmem:[%s19457_s2 + $0x19a8] sm:$0xff] }
 0x1dd   :  { %2875 = vmatmul.mubr.f32.gmra.mrb[90].mxu1 %v1606_v17  ;;  %v1658_v17 = vld [vmem:[%s19457_s2 + $0x1820] sm:$0xff] }
 0x1de   :  { %2879 = vmatprep.mubr.f32.mxu1 %v1611_v19  ;;  %v1663_v19 = vld [vmem:[%s19457_s2 + $0x1848] sm:$0xff] }
 0x1df   :  { %2140 = vmatmul.mubr.f32.gmra.mrb[130].mxu0 %v1018_v16  ;;  %v1710_v16 = vld [vmem:[%s19457_s2 + $0x19c0] sm:$0xff] }
 0x1e0   :  { %2144 = vmatprep.mubr.f32.mxu0 %v1023_v18  ;;  %v1715_v18 = vld [vmem:[%s19457_s2 + $0x19e8] sm:$0xff] }
 0x1e1   :  { %2880 = vmatmul.mubr.f32.gmra.mrb[92].mxu1 %v1610_v21 }
 0x1e2   :  { %2884 = vmatprep.mubr.f32.mxu1 %v1615_v23  ;;  %v1662_v23 = vld [vmem:[%s19457_s2 + $0x1840] sm:$0xff] }
 0x1e3   :  { %2145 = vmatmul.mubr.f32.gmra.mrb[132].mxu0 %v1022_v20  ;;  %v1714_v20 = vld [vmem:[%s19457_s2 + $0x19e0] sm:$0xff] }
 0x1e5   :  { %2885 = vmatmul.mubr.f32.gmra.mrb[94].mxu1 %v1614_v25  ;;  %v1027_v25 = vld [vmem:[%s19457_s2 + $0x468] sm:$0xff] }
 0x1e6   :  { %2889 = vmatprep.mubr.f32.mxu1 %v1619_v27  ;;  %2149 = vmatprep.mubr.f32.mxu0 %v1027_v25  ;;  %v1026_v27 = vld [vmem:[%s19457_s2 + $0x460] sm:$0xff] }
 0x1e7   :  { %2150 = vmatmul.mubr.f32.gmra.mrb[134].mxu0 %v1026_v27  ;;  %v1078_v27 = vld [vmem:[%s19457_s2 + $0x600] sm:$0xff] }
 0x1e9   :  { %2890 = vmatmul.mubr.f32.gmra.mrb[96].mxu1 %v1618_v29  ;;  %v1031_v29 = vld [vmem:[%s19457_s2 + $0x488] sm:$0xff] }
 0x1ea   :  { %2894 = vmatprep.mubr.f32.mxu1 %v1623_v31  ;;  %2154 = vmatprep.mubr.f32.mxu0 %v1031_v29  ;;  %v1030_v31 = vld [vmem:[%s19457_s2 + $0x480] sm:$0xff]  ;;  %v1083_v29 = vld [vmem:[%s19457_s2 + $0x628] sm:$0xff] }
 0x1eb   :  { %2155 = vmatmul.mubr.f32.gmra.mrb[136].mxu0 %v1030_v31  ;;  %v1082_v31 = vld [vmem:[%s19457_s2 + $0x620] sm:$0xff] }
 0x1ed   :  { %2895 = vmatmul.mubr.f32.gmra.mrb[98].mxu1 %v1622_v33  ;;  %v1035_v33 = vld [vmem:[%s19457_s2 + $0x4a8] sm:$0xff] }
 0x1ee   :  { %2899 = vmatprep.mubr.f32.mxu1 %v1627_v35  ;;  %2159 = vmatprep.mubr.f32.mxu0 %v1035_v33  ;;  %v1034_v35 = vld [vmem:[%s19457_s2 + $0x4a0] sm:$0xff] }
 0x1ef   :  { %v11672_v12 = vpop.f32.mrb[56].mxu0  ;;  %2160 = vmatmul.mubr.f32.gmra.mrb[138].mxu0 %v1034_v35 }
 0x1f0   :  { %v655_v13 = vpop.f32.mrb[57].mxu0  ;;  %v815_v14 = vmul.f32 0.2, %v11672_v12  ;;  %vm751_vm11 = vcmp.gt.f32.partialorder %v11672_v12, 0.0 }
 0x1f1   :  { %2900 = vmatmul.mubr.f32.gmra.mrb[100].mxu1 %v1626_v37  ;;  %v814_v15 = vmul.f32 0.2, %v655_v13  ;;  %vm750_vm12 = vcmp.gt.f32.partialorder %v655_v13, 0.0  ;;  %v1039_v37 = vld [vmem:[%s19457_s2 + $0x4c8] sm:$0xff] }
 0x1f2   :  { %2904 = vmatprep.mubr.f32.mxu1 %v1631_v39  ;;  %v879_v22 = vsel %vm751_vm11, %v11672_v12, %v815_v14  ;;  %2164 = vmatprep.mubr.f32.mxu0 %v1039_v37  ;;  %v1038_v39 = vld [vmem:[%s19457_s2 + $0x4c0] sm:$0xff]  ;;  %v1711_v14 = vld [vmem:[%s19457_s2 + $0x19c8] sm:$0xff] }
 0x1f3   :  { %v878_v21 = vsel %vm750_vm12, %v655_v13, %v814_v15  ;;  %2165 = vmatmul.mubr.f32.gmra.mrb[140].mxu0 %v1038_v39  ;;  %v1706_v12 = vld [vmem:[%s19457_s2 + $0x19a0] sm:$0xff]  ;;  %v1071_v13 = vld [vmem:[%s19457_s2 + $0x5c8] sm:$0xff] }
 0x1f4   :  { %v12782_v24 = vpack.c.bf16 %v879_v22, %v878_v21  ;;  %2169 = vmatprep.mubr.f32.mxu0 %v1043_v41  ;;  %v1070_v15 = vld [vmem:[%s19457_s2 + $0x5c0] sm:$0xff]  ;;  %v1079_v22 = vld [vmem:[%s19457_s2 + $0x608] sm:$0xff] }
 0x1f5   :  { %2905 = vmatmul.mubr.f32.gmra.mrb[102].mxu1 %v1630_v45  ;;  %v1047_v45 = vld [vmem:[%s19457_s2 + $0x508] sm:$0xff]  ;;  %v1726_v39 = vld [vmem:[%s19457_s2 + $0x1a40] sm:$0xff] }
 0x1f6   :  { %2909 = vmatprep.mubr.f32.mxu1 %v1635_v48  ;;  %12783 = vmatpush1.bf16.msra.mxu1 %v12782_v24  ;;  %v1686_v48 = vld [vmem:[%s19457_s2 + $0x1900] sm:$0xff]  ;;  %v1727_v37 = vld [vmem:[%s19457_s2 + $0x1a48] sm:$0xff] }
 0x1f7   :  { %12784 = vmatprep.subr.bf16.mxu1 %v19469_v53  ;;  %2170 = vmatmul.mubr.f32.gmra.mrb[142].mxu0 %v1042_v43  ;;  %v1731_v41 = vld [vmem:[%s19457_s2 + $0x1a68] sm:$0xff]  ;;  %v1730_v43 = vld [vmem:[%s19457_s2 + $0x1a60] sm:$0xff] }
 0x1f8   :  { %2174 = vmatprep.mubr.f32.mxu0 %v1047_v45  ;;  %v1735_v45 = vld [vmem:[%s19457_s2 + $0x1a88] sm:$0xff] }
 0x1f9   :  { %2910 = vmatmul.mubr.f32.gmra.mrb[104].mxu1 %v1634_v52 }
 0x1fa   :  { %2914 = vmatprep.mubr.f32.mxu1 %v1639_v55 }
 0x1fb   :  { %2175 = vmatmul.mubr.f32.gmra.mrb[144].mxu0 %v1046_v47  ;;  %v1734_v47 = vld [vmem:[%s19457_s2 + $0x1a80] sm:$0xff] }
 0x1fc   :  { %2179 = vmatprep.mubr.f32.mxu0 %v1051_v50  ;;  %v1098_v50 = vld [vmem:[%s19457_s2 + $0x6a0] sm:$0xff] }
 0x1fd   :  { %2915 = vmatmul.mubr.f32.gmra.mrb[106].mxu1 %v1638_v57  ;;  %v1690_v57 = vld [vmem:[%s19457_s2 + $0x1920] sm:$0xff] }
 0x1fe   :  { %2919 = vmatprep.mubr.f32.mxu1 %v1643_v59  ;;  %v1695_v59 = vld [vmem:[%s19457_s2 + $0x1948] sm:$0xff] }
 0x1ff   :  { %v11675_v49 = vpop.f32.mrb[58].mxu0  ;;  %2180 = vmatmul.mubr.f32.gmra.mrb[146].mxu0 %v1050_v56  ;;  %v1742_v56 = vld [vmem:[%s19457_s2 + $0x1ac0] sm:$0xff] }
 0x200   :  { %v665_v52 = vpop.f32.mrb[59].mxu0  ;;  %v817_v54 = vmul.f32 0.2, %v11675_v49  ;;  %vm753_vm13 = vcmp.gt.f32.partialorder %v11675_v49, 0.0  ;;  %2184 = vmatprep.mubr.f32.mxu0 %v1055_v58  ;;  %v1747_v58 = vld [vmem:[%s19457_s2 + $0x1ae8] sm:$0xff] }
 0x201   :  { %2920 = vmatmul.mubr.f32.gmra.mrb[108].mxu1 %v1642_v61  ;;  %v816_v55 = vmul.f32 0.2, %v665_v52  ;;  %vm752_vm14 = vcmp.gt.f32.partialorder %v665_v52, 0.0 }
 0x202   :  { %2924 = vmatprep.mubr.f32.mxu1 %v1647_v63  ;;  %v881_v61 = vsel %vm753_vm13, %v11675_v49, %v817_v54  ;;  %v1694_v63 = vld [vmem:[%s19457_s2 + $0x1940] sm:$0xff]  ;;  %v1739_v49 = vld [vmem:[%s19457_s2 + $0x1aa8] sm:$0xff] }
 0x203   :  { %v880_v60 = vsel %vm752_vm14, %v665_v52, %v816_v55  ;;  %2185 = vmatmul.mubr.f32.gmra.mrb[148].mxu0 %v1054_v62  ;;  %v1103_v52 = vld [vmem:[%s19457_s2 + $0x6c8] sm:$0xff]  ;;  %v1102_v55 = vld [vmem:[%s19457_s2 + $0x6c0] sm:$0xff] }
 0x204   :  { %v12785_v0 = vpack.c.bf16 %v881_v61, %v880_v60  ;;  %v1743_v54 = vld [vmem:[%s19457_s2 + $0x1ac8] sm:$0xff]  ;;  %v1106_v60 = vld [vmem:[%s19457_s2 + $0x6e0] sm:$0xff] }
 0x205   :  { %2925 = vmatmul.mubr.f32.gmra.mrb[110].mxu1 %v1646_v1  ;;  %v1059_v1 = vld [vmem:[%s19457_s2 + $0x568] sm:$0xff]  ;;  %v1746_v61 = vld [vmem:[%s19457_s2 + $0x1ae0] sm:$0xff] }
 0x206   :  { %2929 = vmatprep.mubr.f32.mxu1 %v1651_v3  ;;  %12786 = vmatpush1.bf16.msra.mxu1 %v12785_v0  ;;  %v1058_v3 = vld [vmem:[%s19457_s2 + $0x560] sm:$0xff]  ;;  %v1751_v0 = vld [vmem:[%s19457_s2 + $0x1b08] sm:$0xff] }
 0x207   :  { %2189 = vmatprep.mubr.f32.mxu0 %v1059_v1  ;;  %12787 = vmatprep.subr.bf16.mxu1 %v19469_v53 }
 0x208   :  { %2190 = vmatmul.mubr.f32.gmra.mrb[150].mxu0 %v1058_v3  ;;  %v1110_v3 = vld [vmem:[%s19457_s2 + $0x700] sm:$0xff] }
 0x209   :  { %2930 = vmatmul.mubr.f32.gmra.mrb[112].mxu1 %v1650_v5  ;;  %v1063_v5 = vld [vmem:[%s19457_s2 + $0x588] sm:$0xff] }
 0x20a   :  { %2934 = vmatprep.mubr.f32.mxu1 %v1655_v7  ;;  %2194 = vmatprep.mubr.f32.mxu0 %v1063_v5  ;;  %v1062_v7 = vld [vmem:[%s19457_s2 + $0x580] sm:$0xff]  ;;  %v11678_v21 = vpop.f32.mrb[60].mxu0  ;;  %v1115_v5 = vld [vmem:[%s19457_s2 + $0x728] sm:$0xff] }
 0x20b   :  { %v675_v24 = vpop.f32.mrb[61].mxu0  ;;  %v819_v25 = vmul.f32 0.2, %v11678_v21  ;;  %vm755_vm15 = vcmp.gt.f32.partialorder %v11678_v21, 0.0 }
 0x20c   :  { %2195 = vmatmul.mubr.f32.gmra.mrb[152].mxu0 %v1062_v7  ;;  %vm754_vm1 = vcmp.gt.f32.partialorder %v675_v24, 0.0 }
 0x20d   :  { %2935 = vmatmul.mubr.f32.gmra.mrb[114].mxu1 %v1654_v9  ;;  %v1067_v9 = vld [vmem:[%s19457_s2 + $0x5a8] sm:$0xff]  ;;  %v883_v33 = vsel %vm755_vm15, %v11678_v21, %v819_v25 }
 0x20e   :  { %2939 = vmatprep.mubr.f32.mxu1 %v1659_v11  ;;  %2199 = vmatprep.mubr.f32.mxu0 %v1067_v9  ;;  %v1066_v11 = vld [vmem:[%s19457_s2 + $0x5a0] sm:$0xff]  ;;  %v1767_v21 = vld [vmem:[%s19457_s2 + $0x1b88] sm:$0xff] }
 0x20f   :  { %v1114_v9 = vld [vmem:[%s19457_s2 + $0x720] sm:$0xff]  ;;  %v1771_v25 = vld [vmem:[%s19457_s2 + $0x1ba8] sm:$0xff] }
 0x210   :  { %2200 = vmatmul.mubr.f32.gmra.mrb[154].mxu0 %v1066_v11 }
 0x211   :  { %2940 = vmatmul.mubr.f32.gmra.mrb[116].mxu1 %v1658_v17  ;;  %2204 = vmatprep.mubr.f32.mxu0 %v1071_v13  ;;  %v1075_v17 = vld [vmem:[%s19457_s2 + $0x5e8] sm:$0xff] }
 0x212   :  { %2944 = vmatprep.mubr.f32.mxu1 %v1663_v19  ;;  %v1074_v19 = vld [vmem:[%s19457_s2 + $0x5e0] sm:$0xff]  ;;  %v1759_v13 = vld [vmem:[%s19457_s2 + $0x1b48] sm:$0xff] }
 0x214   :  { %2205 = vmatmul.mubr.f32.gmra.mrb[156].mxu0 %v1070_v15  ;;  %v1758_v15 = vld [vmem:[%s19457_s2 + $0x1b40] sm:$0xff] }
 0x215   :  { %2945 = vmatmul.mubr.f32.gmra.mrb[118].mxu1 %v1662_v23  ;;  %2209 = vmatprep.mubr.f32.mxu0 %v1075_v17  ;;  %v1719_v23 = vld [vmem:[%s19457_s2 + $0x1a08] sm:$0xff] }
 0x216   :  { %2949 = vmatprep.mubr.f32.mxu1 %v1667_v26  ;;  %v818_v26 = vmul.f32 0.2, %v675_v24  ;;  %v1763_v17 = vld [vmem:[%s19457_s2 + $0x1b68] sm:$0xff] }
 0x218   :  { %2210 = vmatmul.mubr.f32.gmra.mrb[158].mxu0 %v1074_v19  ;;  %v1762_v19 = vld [vmem:[%s19457_s2 + $0x1b60] sm:$0xff] }
 0x219   :  { %2950 = vmatmul.mubr.f32.gmra.mrb[120].mxu1 %v1666_v28  ;;  %2214 = vmatprep.mubr.f32.mxu0 %v1079_v22  ;;  %v1718_v28 = vld [vmem:[%s19457_s2 + $0x1a00] sm:$0xff] }
 0x21a   :  { %2954 = vmatprep.mubr.f32.mxu1 %v1671_v30  ;;  %v1723_v30 = vld [vmem:[%s19457_s2 + $0x1a28] sm:$0xff]  ;;  %v1126_v22 = vld [vmem:[%s19457_s2 + $0x780] sm:$0xff] }
 0x21c   :  { %2215 = vmatmul.mubr.f32.gmra.mrb[160].mxu0 %v1078_v27  ;;  %v1770_v27 = vld [vmem:[%s19457_s2 + $0x1ba0] sm:$0xff] }
 0x21d   :  { %2955 = vmatmul.mubr.f32.gmra.mrb[122].mxu1 %v1670_v32  ;;  %2219 = vmatprep.mubr.f32.mxu0 %v1083_v29  ;;  %v882_v32 = vsel %vm754_vm1, %v675_v24, %v818_v26  ;;  %v1131_v24 = vld [vmem:[%s19457_s2 + $0x7a8] sm:$0xff]  ;;  %v1130_v26 = vld [vmem:[%s19457_s2 + $0x7a0] sm:$0xff] }
 0x21e   :  { %2959 = vmatprep.mubr.f32.mxu1 %v1675_v34  ;;  %v1722_v34 = vld [vmem:[%s19457_s2 + $0x1a20] sm:$0xff]  ;;  %v12788_v35 = vpack.c.bf16 %v883_v33, %v882_v32  ;;  %v1775_v29 = vld [vmem:[%s19457_s2 + $0x1bc8] sm:$0xff] }
 0x21f   :  { %v1139_v32 = vld [vmem:[%s19457_s2 + $0x7e8] sm:$0xff] }
 0x220   :  { %2220 = vmatmul.mubr.f32.gmra.mrb[162].mxu0 %v1082_v31  ;;  %12789 = vmatpush1.bf16.msra.mxu1 %v12788_v35  ;;  %v1774_v31 = vld [vmem:[%s19457_s2 + $0x1bc0] sm:$0xff]  ;;  %v1779_v33 = vld [vmem:[%s19457_s2 + $0x1be8] sm:$0xff] }
 0x221   :  { %2960 = vmatmul.mubr.f32.gmra.mrb[124].mxu1 %v1674_v36  ;;  %v1087_v36 = vld [vmem:[%s19457_s2 + $0x648] sm:$0xff]  ;;  %12790 = vmatprep.subr.bf16.mxu1 %v19469_v53  ;;  %v1778_v35 = vld [vmem:[%s19457_s2 + $0x1be0] sm:$0xff] }
 0x222   :  { %2964 = vmatprep.mubr.f32.mxu1 %v1679_v38  ;;  %2224 = vmatprep.mubr.f32.mxu0 %v1087_v36  ;;  %v1086_v38 = vld [vmem:[%s19457_s2 + $0x640] sm:$0xff]  ;;  %v1143_v36 = vld [vmem:[%s19457_s2 + $0x808] sm:$0xff] }
 0x223   :  { %v1334_v53 = vld [vmem:[%s19457_s2 + $0xe00] sm:$0xff] }
 0x224   :  { %2225 = vmatmul.mubr.f32.gmra.mrb[164].mxu0 %v1086_v38  ;;  %v1142_v38 = vld [vmem:[%s19457_s2 + $0x800] sm:$0xff] }
 0x225   :  { %2965 = vmatmul.mubr.f32.gmra.mrb[126].mxu1 %v1678_v40  ;;  %v1091_v40 = vld [vmem:[%s19457_s2 + $0x668] sm:$0xff] }
 0x226   :  { %2969 = vmatprep.mubr.f32.mxu1 %v1683_v42  ;;  %2229 = vmatprep.mubr.f32.mxu0 %v1091_v40  ;;  %v1090_v42 = vld [vmem:[%s19457_s2 + $0x660] sm:$0xff]  ;;  %v1147_v40 = vld [vmem:[%s19457_s2 + $0x828] sm:$0xff] }
 0x228   :  { %2230 = vmatmul.mubr.f32.gmra.mrb[166].mxu0 %v1090_v42  ;;  %v1146_v42 = vld [vmem:[%s19457_s2 + $0x820] sm:$0xff] }
 0x229   :  { %2970 = vmatmul.mubr.f32.gmra.mrb[128].mxu1 %v1682_v44  ;;  %v1095_v44 = vld [vmem:[%s19457_s2 + $0x688] sm:$0xff] }
 0x22a   :  { %2974 = vmatprep.mubr.f32.mxu1 %v1687_v46  ;;  %2234 = vmatprep.mubr.f32.mxu0 %v1095_v44  ;;  %v1094_v46 = vld [vmem:[%s19457_s2 + $0x680] sm:$0xff]  ;;  %v1151_v44 = vld [vmem:[%s19457_s2 + $0x848] sm:$0xff] }
 0x22c   :  { %2235 = vmatmul.mubr.f32.gmra.mrb[168].mxu0 %v1094_v46  ;;  %v1150_v46 = vld [vmem:[%s19457_s2 + $0x840] sm:$0xff] }
 0x22d   :  { %2975 = vmatmul.mubr.f32.gmra.mrb[130].mxu1 %v1686_v48  ;;  %v1099_v48 = vld [vmem:[%s19457_s2 + $0x6a8] sm:$0xff] }
 0x22e   :  { %2979 = vmatprep.mubr.f32.mxu1 %v1691_v51  ;;  %2239 = vmatprep.mubr.f32.mxu0 %v1099_v48  ;;  %v1738_v51 = vld [vmem:[%s19457_s2 + $0x1aa0] sm:$0xff]  ;;  %v1155_v48 = vld [vmem:[%s19457_s2 + $0x868] sm:$0xff] }
 0x230   :  { %2240 = vmatmul.mubr.f32.gmra.mrb[170].mxu0 %v1098_v50  ;;  %v1154_v50 = vld [vmem:[%s19457_s2 + $0x860] sm:$0xff] }
 0x231   :  { %2980 = vmatmul.mubr.f32.gmra.mrb[132].mxu1 %v1690_v57  ;;  %2244 = vmatprep.mubr.f32.mxu0 %v1103_v52  ;;  %v1107_v57 = vld [vmem:[%s19457_s2 + $0x6e8] sm:$0xff] }
 0x232   :  { %2984 = vmatprep.mubr.f32.mxu1 %v1695_v59  ;;  %v11681_v59 = vpop.f32.mrb[62].mxu0  ;;  %v1159_v52 = vld [vmem:[%s19457_s2 + $0x888] sm:$0xff] }
 0x233   :  { %v685_v62 = vpop.f32.mrb[63].mxu0  ;;  %v821_v1 = vmul.f32 0.2, %v11681_v59  ;;  %vm757_vm2 = vcmp.gt.f32.partialorder %v11681_v59, 0.0 }
 0x234   :  { %2245 = vmatmul.mubr.f32.gmra.mrb[172].mxu0 %v1102_v55  ;;  %vm756_vm3 = vcmp.gt.f32.partialorder %v685_v62, 0.0  ;;  %v1158_v55 = vld [vmem:[%s19457_s2 + $0x880] sm:$0xff] }
 0x235   :  { %2985 = vmatmul.mubr.f32.gmra.mrb[134].mxu1 %v1694_v63  ;;  %2249 = vmatprep.mubr.f32.mxu0 %v1107_v57  ;;  %v1111_v63 = vld [vmem:[%s19457_s2 + $0x708] sm:$0xff] }
 0x236   :  { %2989 = vmatprep.mubr.f32.mxu1 %v1699_v2  ;;  %v820_v2 = vmul.f32 0.2, %v685_v62  ;;  %v1163_v57 = vld [vmem:[%s19457_s2 + $0x8a8] sm:$0xff] }
 0x238   :  { %2250 = vmatmul.mubr.f32.gmra.mrb[174].mxu0 %v1106_v60  ;;  %v884_v7 = vsel %vm756_vm3, %v685_v62, %v820_v2  ;;  %v1802_v60 = vld [vmem:[%s19457_s2 + $0x1ca0] sm:$0xff]  ;;  %v1807_v62 = vld [vmem:[%s19457_s2 + $0x1cc8] sm:$0xff] }
 0x239   :  { %2990 = vmatmul.mubr.f32.gmra.mrb[136].mxu1 %v1698_v4  ;;  %2254 = vmatprep.mubr.f32.mxu0 %v1111_v63  ;;  %v1750_v4 = vld [vmem:[%s19457_s2 + $0x1b00] sm:$0xff]  ;;  %v1811_v2 = vld [vmem:[%s19457_s2 + $0x1ce8] sm:$0xff] }
 0x23a   :  { %2994 = vmatprep.mubr.f32.mxu1 %v1703_v6  ;;  %v1755_v6 = vld [vmem:[%s19457_s2 + $0x1b28] sm:$0xff]  ;;  %v1166_v63 = vld [vmem:[%s19457_s2 + $0x8c0] sm:$0xff] }
 0x23c   :  { %2255 = vmatmul.mubr.f32.gmra.mrb[176].mxu0 %v1110_v3  ;;  %v1170_v3 = vld [vmem:[%s19457_s2 + $0x8e0] sm:$0xff] }
 0x23d   :  { %2995 = vmatmul.mubr.f32.gmra.mrb[138].mxu1 %v1702_v8  ;;  %2259 = vmatprep.mubr.f32.mxu0 %v1115_v5  ;;  %v885_v8 = vsel %vm757_vm2, %v11681_v59, %v821_v1  ;;  %v1162_v59 = vld [vmem:[%s19457_s2 + $0x8a0] sm:$0xff]  ;;  %v1171_v1 = vld [vmem:[%s19457_s2 + $0x8e8] sm:$0xff] }
 0x23e   :  { %2999 = vmatprep.mubr.f32.mxu1 %v1707_v10  ;;  %v1754_v10 = vld [vmem:[%s19457_s2 + $0x1b20] sm:$0xff]  ;;  %v12791_v11 = vpack.c.bf16 %v885_v8, %v884_v7  ;;  %v1815_v5 = vld [vmem:[%s19457_s2 + $0x1d08] sm:$0xff] }
 0x23f   :  { %v1174_v7 = vld [vmem:[%s19457_s2 + $0x900] sm:$0xff] }
 0x240   :  { %2260 = vmatmul.mubr.f32.gmra.mrb[178].mxu0 %v1114_v9  ;;  %12792 = vmatpush1.bf16.msra.mxu1 %v12791_v11  ;;  %v1814_v8 = vld [vmem:[%s19457_s2 + $0x1d00] sm:$0xff]  ;;  %v1819_v9 = vld [vmem:[%s19457_s2 + $0x1d28] sm:$0xff] }
 0x241   :  { %3000 = vmatmul.mubr.f32.gmra.mrb[140].mxu1 %v1706_v12  ;;  %v1119_v12 = vld [vmem:[%s19457_s2 + $0x748] sm:$0xff]  ;;  %v1178_v11 = vld [vmem:[%s19457_s2 + $0x920] sm:$0xff] }
 0x242   :  { %3004 = vmatprep.mubr.f32.mxu1 %v1711_v14  ;;  %2264 = vmatprep.mubr.f32.mxu0 %v1119_v12  ;;  %v1118_v14 = vld [vmem:[%s19457_s2 + $0x740] sm:$0xff] }
 0x243   :  { %v1818_v12 = vld [vmem:[%s19457_s2 + $0x1d20] sm:$0xff] }
 0x244   :  { %2265 = vmatmul.mubr.f32.gmra.mrb[180].mxu0 %v1118_v14  ;;  %v1183_v14 = vld [vmem:[%s19457_s2 + $0x948] sm:$0xff] }
 0x245   :  { %3005 = vmatmul.mubr.f32.gmra.mrb[142].mxu1 %v1710_v16  ;;  %v1123_v16 = vld [vmem:[%s19457_s2 + $0x768] sm:$0xff] }
 0x246   :  { %3009 = vmatprep.mubr.f32.mxu1 %v1715_v18  ;;  %2269 = vmatprep.mubr.f32.mxu0 %v1123_v16  ;;  %v1122_v18 = vld [vmem:[%s19457_s2 + $0x760] sm:$0xff] }
 0x247   :  { %v1822_v16 = vld [vmem:[%s19457_s2 + $0x1d40] sm:$0xff] }
 0x248   :  { %2270 = vmatmul.mubr.f32.gmra.mrb[182].mxu0 %v1122_v18  ;;  %v1187_v18 = vld [vmem:[%s19457_s2 + $0x968] sm:$0xff] }
 0x249   :  { %3010 = vmatmul.mubr.f32.gmra.mrb[144].mxu1 %v1714_v20  ;;  %v1127_v20 = vld [vmem:[%s19457_s2 + $0x788] sm:$0xff] }
 0x24a   :  { %3014 = vmatprep.mubr.f32.mxu1 %v1719_v23  ;;  %2274 = vmatprep.mubr.f32.mxu0 %v1127_v20  ;;  %v1766_v23 = vld [vmem:[%s19457_s2 + $0x1b80] sm:$0xff] }
 0x24b   :  { %v1826_v20 = vld [vmem:[%s19457_s2 + $0x1d60] sm:$0xff] }
 0x24c   :  { %2275 = vmatmul.mubr.f32.gmra.mrb[184].mxu0 %v1126_v22  ;;  %v1191_v22 = vld [vmem:[%s19457_s2 + $0x988] sm:$0xff] }
 0x24d   :  { %3015 = vmatmul.mubr.f32.gmra.mrb[146].mxu1 %v1718_v28  ;;  %2279 = vmatprep.mubr.f32.mxu0 %v1131_v24  ;;  %v1135_v28 = vld [vmem:[%s19457_s2 + $0x7c8] sm:$0xff]  ;;  %v1830_v24 = vld [vmem:[%s19457_s2 + $0x1d80] sm:$0xff] }
 0x24e   :  { %3019 = vmatprep.mubr.f32.mxu1 %v1723_v30  ;;  %v1134_v30 = vld [vmem:[%s19457_s2 + $0x7c0] sm:$0xff] }
 0x250   :  { %2280 = vmatmul.mubr.f32.gmra.mrb[186].mxu0 %v1130_v26  ;;  %v1195_v26 = vld [vmem:[%s19457_s2 + $0x9a8] sm:$0xff] }
 0x251   :  { %3020 = vmatmul.mubr.f32.gmra.mrb[148].mxu1 %v1722_v34  ;;  %2284 = vmatprep.mubr.f32.mxu0 %v1135_v28  ;;  %v1138_v34 = vld [vmem:[%s19457_s2 + $0x7e0] sm:$0xff] }
 0x252   :  { %3024 = vmatprep.mubr.f32.mxu1 %v1727_v37  ;;  %v1783_v37 = vld [vmem:[%s19457_s2 + $0x1c08] sm:$0xff]  ;;  %v1834_v28 = vld [vmem:[%s19457_s2 + $0x1da0] sm:$0xff] }
 0x254   :  { %2285 = vmatmul.mubr.f32.gmra.mrb[188].mxu0 %v1134_v30  ;;  %v1199_v30 = vld [vmem:[%s19457_s2 + $0x9c8] sm:$0xff] }
 0x255   :  { %3025 = vmatmul.mubr.f32.gmra.mrb[150].mxu1 %v1726_v39  ;;  %2289 = vmatprep.mubr.f32.mxu0 %v1139_v32  ;;  %v1782_v39 = vld [vmem:[%s19457_s2 + $0x1c00] sm:$0xff] }
 0x256   :  { %3029 = vmatprep.mubr.f32.mxu1 %v1731_v41  ;;  %v1787_v41 = vld [vmem:[%s19457_s2 + $0x1c28] sm:$0xff]  ;;  %v1838_v32 = vld [vmem:[%s19457_s2 + $0x1dc0] sm:$0xff] }
 0x258   :  { %2290 = vmatmul.mubr.f32.gmra.mrb[190].mxu0 %v1138_v34  ;;  %v1203_v34 = vld [vmem:[%s19457_s2 + $0x9e8] sm:$0xff] }
 0x259   :  { %3030 = vmatmul.mubr.f32.gmra.mrb[152].mxu1 %v1730_v43  ;;  %2294 = vmatprep.mubr.f32.mxu0 %v1143_v36  ;;  %v1786_v43 = vld [vmem:[%s19457_s2 + $0x1c20] sm:$0xff] }
 0x25a   :  { %3034 = vmatprep.mubr.f32.mxu1 %v1735_v45  ;;  %v1791_v45 = vld [vmem:[%s19457_s2 + $0x1c48] sm:$0xff]  ;;  %v1842_v36 = vld [vmem:[%s19457_s2 + $0x1de0] sm:$0xff] }
 0x25c   :  { %2295 = vmatmul.mubr.f32.gmra.mrb[192].mxu0 %v1142_v38  ;;  %v1207_v38 = vld [vmem:[%s19457_s2 + $0xa08] sm:$0xff] }
 0x25d   :  { %3035 = vmatmul.mubr.f32.gmra.mrb[154].mxu1 %v1734_v47  ;;  %2299 = vmatprep.mubr.f32.mxu0 %v1147_v40  ;;  %v1790_v47 = vld [vmem:[%s19457_s2 + $0x1c40] sm:$0xff] }
 0x25e   :  { %3039 = vmatprep.mubr.f32.mxu1 %v1739_v49  ;;  %v1795_v49 = vld [vmem:[%s19457_s2 + $0x1c68] sm:$0xff]  ;;  %v1846_v40 = vld [vmem:[%s19457_s2 + $0x1e00] sm:$0xff] }
 0x260   :  { %2300 = vmatmul.mubr.f32.gmra.mrb[194].mxu0 %v1146_v42  ;;  %v1211_v42 = vld [vmem:[%s19457_s2 + $0xa28] sm:$0xff] }
 0x261   :  { %3040 = vmatmul.mubr.f32.gmra.mrb[156].mxu1 %v1738_v51  ;;  %2304 = vmatprep.mubr.f32.mxu0 %v1151_v44  ;;  %v1794_v51 = vld [vmem:[%s19457_s2 + $0x1c60] sm:$0xff] }
 0x262   :  { %3044 = vmatprep.mubr.f32.mxu1 %v1743_v54  ;;  %v1799_v54 = vld [vmem:[%s19457_s2 + $0x1c88] sm:$0xff]  ;;  %v1850_v44 = vld [vmem:[%s19457_s2 + $0x1e20] sm:$0xff] }
 0x264   :  { %2305 = vmatmul.mubr.f32.gmra.mrb[196].mxu0 %v1150_v46  ;;  %v1215_v46 = vld [vmem:[%s19457_s2 + $0xa48] sm:$0xff] }
 0x265   :  { %3045 = vmatmul.mubr.f32.gmra.mrb[158].mxu1 %v1742_v56  ;;  %2309 = vmatprep.mubr.f32.mxu0 %v1155_v48  ;;  %v1798_v56 = vld [vmem:[%s19457_s2 + $0x1c80] sm:$0xff] }
 0x266   :  { %3049 = vmatprep.mubr.f32.mxu1 %v1747_v58  ;;  %v1803_v58 = vld [vmem:[%s19457_s2 + $0x1ca8] sm:$0xff]  ;;  %v1854_v48 = vld [vmem:[%s19457_s2 + $0x1e40] sm:$0xff] }
 0x268   :  { %2310 = vmatmul.mubr.f32.gmra.mrb[198].mxu0 %v1154_v50  ;;  %v1219_v50 = vld [vmem:[%s19457_s2 + $0xa68] sm:$0xff] }
 0x269   :  { %3050 = vmatmul.mubr.f32.gmra.mrb[160].mxu1 %v1746_v61  ;;  %2314 = vmatprep.mubr.f32.mxu0 %v1159_v52  ;;  %v1167_v61 = vld [vmem:[%s19457_s2 + $0x8c8] sm:$0xff]  ;;  %v1858_v52 = vld [vmem:[%s19457_s2 + $0x1e60] sm:$0xff] }
 0x26a   :  { %3054 = vmatprep.mubr.f32.mxu1 %v1751_v0  ;;  %v1806_v0 = vld [vmem:[%s19457_s2 + $0x1cc0] sm:$0xff] }
 0x26c   :  { %2315 = vmatmul.mubr.f32.gmra.mrb[200].mxu0 %v1158_v55  ;;  %v1223_v55 = vld [vmem:[%s19457_s2 + $0xa88] sm:$0xff] }
 0x26d   :  { %3055 = vmatmul.mubr.f32.gmra.mrb[162].mxu1 %v1750_v4  ;;  %2319 = vmatprep.mubr.f32.mxu0 %v1163_v57  ;;  %v1810_v4 = vld [vmem:[%s19457_s2 + $0x1ce0] sm:$0xff] }
 0x26e   :  { %3059 = vmatprep.mubr.f32.mxu1 %v1755_v6  ;;  %v1175_v6 = vld [vmem:[%s19457_s2 + $0x908] sm:$0xff]  ;;  %v1862_v57 = vld [vmem:[%s19457_s2 + $0x1e80] sm:$0xff] }
 0x270   :  { %2320 = vmatmul.mubr.f32.gmra.mrb[202].mxu0 %v1162_v59  ;;  %v1227_v59 = vld [vmem:[%s19457_s2 + $0xaa8] sm:$0xff] }
 0x271   :  { %3060 = vmatmul.mubr.f32.gmra.mrb[164].mxu1 %v1754_v10  ;;  %2324 = vmatprep.mubr.f32.mxu0 %v1167_v61  ;;  %v1179_v10 = vld [vmem:[%s19457_s2 + $0x928] sm:$0xff]  ;;  %v1866_v61 = vld [vmem:[%s19457_s2 + $0x1ea0] sm:$0xff] }
 0x272   :  { %3064 = vmatprep.mubr.f32.mxu1 %v1759_v13  ;;  %v1823_v13 = vld [vmem:[%s19457_s2 + $0x1d48] sm:$0xff] }
 0x274   :  { %2325 = vmatmul.mubr.f32.gmra.mrb[204].mxu0 %v1166_v63  ;;  %v1231_v63 = vld [vmem:[%s19457_s2 + $0xac8] sm:$0xff] }
 0x275   :  { %3065 = vmatmul.mubr.f32.gmra.mrb[166].mxu1 %v1758_v15  ;;  %2329 = vmatprep.mubr.f32.mxu0 %v1171_v1  ;;  %v1182_v15 = vld [vmem:[%s19457_s2 + $0x940] sm:$0xff] }
 0x276   :  { %3069 = vmatprep.mubr.f32.mxu1 %v1763_v17  ;;  %v1827_v17 = vld [vmem:[%s19457_s2 + $0x1d68] sm:$0xff]  ;;  %v1870_v1 = vld [vmem:[%s19457_s2 + $0x1ec0] sm:$0xff] }
 0x278   :  { %2330 = vmatmul.mubr.f32.gmra.mrb[206].mxu0 %v1170_v3  ;;  %v1235_v3 = vld [vmem:[%s19457_s2 + $0xae8] sm:$0xff] }
 0x279   :  { %3070 = vmatmul.mubr.f32.gmra.mrb[168].mxu1 %v1762_v19  ;;  %2334 = vmatprep.mubr.f32.mxu0 %v1175_v6  ;;  %v1186_v19 = vld [vmem:[%s19457_s2 + $0x960] sm:$0xff]  ;;  %v1879_v6 = vld [vmem:[%s19457_s2 + $0x1f08] sm:$0xff] }
 0x27a   :  { %3074 = vmatprep.mubr.f32.mxu1 %v1767_v21  ;;  %v1831_v21 = vld [vmem:[%s19457_s2 + $0x1d88] sm:$0xff] }
 0x27c   :  { %2335 = vmatmul.mubr.f32.gmra.mrb[208].mxu0 %v1174_v7  ;;  %v1239_v7 = vld [vmem:[%s19457_s2 + $0xb08] sm:$0xff] }
 0x27d   :  { %3075 = vmatmul.mubr.f32.gmra.mrb[170].mxu1 %v1766_v23  ;;  %2339 = vmatprep.mubr.f32.mxu0 %v1179_v10  ;;  %v1190_v23 = vld [vmem:[%s19457_s2 + $0x980] sm:$0xff]  ;;  %v1883_v10 = vld [vmem:[%s19457_s2 + $0x1f28] sm:$0xff] }
 0x27e   :  { %3079 = vmatprep.mubr.f32.mxu1 %v1771_v25  ;;  %v1835_v25 = vld [vmem:[%s19457_s2 + $0x1da8] sm:$0xff] }
 0x280   :  { %2340 = vmatmul.mubr.f32.gmra.mrb[210].mxu0 %v1178_v11  ;;  %v1243_v11 = vld [vmem:[%s19457_s2 + $0xb28] sm:$0xff] }
 0x281   :  { %3080 = vmatmul.mubr.f32.gmra.mrb[172].mxu1 %v1770_v27  ;;  %2344 = vmatprep.mubr.f32.mxu0 %v1183_v14  ;;  %v1194_v27 = vld [vmem:[%s19457_s2 + $0x9a0] sm:$0xff]  ;;  %v1887_v14 = vld [vmem:[%s19457_s2 + $0x1f48] sm:$0xff] }
 0x282   :  { %3084 = vmatprep.mubr.f32.mxu1 %v1775_v29  ;;  %v1839_v29 = vld [vmem:[%s19457_s2 + $0x1dc8] sm:$0xff] }
 0x284   :  { %2345 = vmatmul.mubr.f32.gmra.mrb[212].mxu0 %v1182_v15  ;;  %v1247_v15 = vld [vmem:[%s19457_s2 + $0xb48] sm:$0xff] }
 0x285   :  { %3085 = vmatmul.mubr.f32.gmra.mrb[174].mxu1 %v1774_v31  ;;  %2349 = vmatprep.mubr.f32.mxu0 %v1187_v18  ;;  %v1198_v31 = vld [vmem:[%s19457_s2 + $0x9c0] sm:$0xff] }
 0x286   :  { %3089 = vmatprep.mubr.f32.mxu1 %v1779_v33  ;;  %v1843_v33 = vld [vmem:[%s19457_s2 + $0x1de8] sm:$0xff]  ;;  %v1886_v18 = vld [vmem:[%s19457_s2 + $0x1f40] sm:$0xff] }
 0x288   :  { %2350 = vmatmul.mubr.f32.gmra.mrb[214].mxu0 %v1186_v19 }
 0x289   :  { %3090 = vmatmul.mubr.f32.gmra.mrb[176].mxu1 %v1778_v35  ;;  %2354 = vmatprep.mubr.f32.mxu0 %v1191_v22  ;;  %v1202_v35 = vld [vmem:[%s19457_s2 + $0x9e0] sm:$0xff]  ;;  %v1251_v22 = vld [vmem:[%s19457_s2 + $0xb68] sm:$0xff] }
 0x28a   :  { %3094 = vmatprep.mubr.f32.mxu1 %v1783_v37  ;;  %v1847_v37 = vld [vmem:[%s19457_s2 + $0x1e08] sm:$0xff] }
 0x28c   :  { %2355 = vmatmul.mubr.f32.gmra.mrb[216].mxu0 %v1190_v23 }
 0x28d   :  { %3095 = vmatmul.mubr.f32.gmra.mrb[178].mxu1 %v1782_v39  ;;  %2359 = vmatprep.mubr.f32.mxu0 %v1195_v26  ;;  %v1206_v39 = vld [vmem:[%s19457_s2 + $0xa00] sm:$0xff] }
 0x28e   :  { %3099 = vmatprep.mubr.f32.mxu1 %v1787_v41  ;;  %v1851_v41 = vld [vmem:[%s19457_s2 + $0x1e28] sm:$0xff] }
 0x290   :  { %2360 = vmatmul.mubr.f32.gmra.mrb[218].mxu0 %v1194_v27  ;;  %v1895_v27 = vld [vmem:[%s19457_s2 + $0x1f88] sm:$0xff] }
 0x291   :  { %3100 = vmatmul.mubr.f32.gmra.mrb[180].mxu1 %v1786_v43  ;;  %2364 = vmatprep.mubr.f32.mxu0 %v1199_v30  ;;  %v1210_v43 = vld [vmem:[%s19457_s2 + $0xa20] sm:$0xff]  ;;  %v1255_v30 = vld [vmem:[%s19457_s2 + $0xb88] sm:$0xff] }
 0x292   :  { %3104 = vmatprep.mubr.f32.mxu1 %v1791_v45  ;;  %v1855_v45 = vld [vmem:[%s19457_s2 + $0x1e48] sm:$0xff] }
 0x294   :  { %2365 = vmatmul.mubr.f32.gmra.mrb[220].mxu0 %v1198_v31 }
 0x295   :  { %3105 = vmatmul.mubr.f32.gmra.mrb[182].mxu1 %v1790_v47  ;;  %2369 = vmatprep.mubr.f32.mxu0 %v1203_v34  ;;  %v1214_v47 = vld [vmem:[%s19457_s2 + $0xa40] sm:$0xff] }
 0x296   :  { %3109 = vmatprep.mubr.f32.mxu1 %v1795_v49  ;;  %v1859_v49 = vld [vmem:[%s19457_s2 + $0x1e68] sm:$0xff] }
 0x298   :  { %2370 = vmatmul.mubr.f32.gmra.mrb[222].mxu0 %v1202_v35  ;;  %v1899_v35 = vld [vmem:[%s19457_s2 + $0x1fa8] sm:$0xff] }
 0x299   :  { %3110 = vmatmul.mubr.f32.gmra.mrb[184].mxu1 %v1794_v51  ;;  %2374 = vmatprep.mubr.f32.mxu0 %v1207_v38  ;;  %v1218_v51 = vld [vmem:[%s19457_s2 + $0xa60] sm:$0xff]  ;;  %v1259_v38 = vld [vmem:[%s19457_s2 + $0xba8] sm:$0xff] }
 0x29a   :  { %3114 = vmatprep.mubr.f32.mxu1 %v1799_v54  ;;  %v1863_v54 = vld [vmem:[%s19457_s2 + $0x1e88] sm:$0xff] }
 0x29c   :  { %2375 = vmatmul.mubr.f32.gmra.mrb[224].mxu0 %v1206_v39 }
 0x29d   :  { %3115 = vmatmul.mubr.f32.gmra.mrb[186].mxu1 %v1798_v56  ;;  %2379 = vmatprep.mubr.f32.mxu0 %v1211_v42  ;;  %v1222_v56 = vld [vmem:[%s19457_s2 + $0xa80] sm:$0xff] }
 0x29e   :  { %3119 = vmatprep.mubr.f32.mxu1 %v1803_v58  ;;  %v1867_v58 = vld [vmem:[%s19457_s2 + $0x1ea8] sm:$0xff] }
 0x2a0   :  { %2380 = vmatmul.mubr.f32.gmra.mrb[226].mxu0 %v1210_v43  ;;  %v1903_v43 = vld [vmem:[%s19457_s2 + $0x1fc8] sm:$0xff] }
 0x2a1   :  { %3120 = vmatmul.mubr.f32.gmra.mrb[188].mxu1 %v1802_v60  ;;  %2384 = vmatprep.mubr.f32.mxu0 %v1215_v46  ;;  %v1226_v60 = vld [vmem:[%s19457_s2 + $0xaa0] sm:$0xff]  ;;  %v1263_v46 = vld [vmem:[%s19457_s2 + $0xbc8] sm:$0xff] }
 0x2a2   :  { %3124 = vmatprep.mubr.f32.mxu1 %v1807_v62  ;;  %v1871_v62 = vld [vmem:[%s19457_s2 + $0x1ec8] sm:$0xff] }
 0x2a4   :  { %2385 = vmatmul.mubr.f32.gmra.mrb[228].mxu0 %v1214_v47 }
 0x2a5   :  { %3125 = vmatmul.mubr.f32.gmra.mrb[190].mxu1 %v1806_v0  ;;  %2389 = vmatprep.mubr.f32.mxu0 %v1219_v50  ;;  %v1230_v0 = vld [vmem:[%s19457_s2 + $0xac0] sm:$0xff] }
 0x2a6   :  { %3129 = vmatprep.mubr.f32.mxu1 %v1811_v2  ;;  %v1875_v2 = vld [vmem:[%s19457_s2 + $0x1ee8] sm:$0xff] }
 0x2a8   :  { %2390 = vmatmul.mubr.f32.gmra.mrb[230].mxu0 %v1218_v51  ;;  %v1907_v51 = vld [vmem:[%s19457_s2 + $0x1fe8] sm:$0xff] }
 0x2a9   :  { %3130 = vmatmul.mubr.f32.gmra.mrb[192].mxu1 %v1810_v4  ;;  %2394 = vmatprep.mubr.f32.mxu0 %v1223_v55  ;;  %v1234_v4 = vld [vmem:[%s19457_s2 + $0xae0] sm:$0xff]  ;;  %v1267_v55 = vld [vmem:[%s19457_s2 + $0xbe8] sm:$0xff] }
 0x2aa   :  { %3134 = vmatprep.mubr.f32.mxu1 %v1815_v5  ;;  %v1874_v5 = vld [vmem:[%s19457_s2 + $0x1ee0] sm:$0xff] }
 0x2ac   :  { %2395 = vmatmul.mubr.f32.gmra.mrb[232].mxu0 %v1222_v56 }
 0x2ad   :  { %3135 = vmatmul.mubr.f32.gmra.mrb[194].mxu1 %v1814_v8  ;;  %2399 = vmatprep.mubr.f32.mxu0 %v1227_v59  ;;  %v1238_v8 = vld [vmem:[%s19457_s2 + $0xb00] sm:$0xff] }
 0x2ae   :  { %3139 = vmatprep.mubr.f32.mxu1 %v1819_v9  ;;  %v1878_v9 = vld [vmem:[%s19457_s2 + $0x1f00] sm:$0xff] }
 0x2b0   :  { %2400 = vmatmul.mubr.f32.gmra.mrb[234].mxu0 %v1226_v60  ;;  %v889_v60 = vld [vmem:[%s19457_s2 + $0x18] sm:$0xff] }
 0x2b1   :  { %3140 = vmatmul.mubr.f32.gmra.mrb[196].mxu1 %v1818_v12  ;;  %2404 = vmatprep.mubr.f32.mxu0 %v1231_v63  ;;  %v1242_v12 = vld [vmem:[%s19457_s2 + $0xb20] sm:$0xff]  ;;  %v1271_v63 = vld [vmem:[%s19457_s2 + $0xc08] sm:$0xff] }
 0x2b2   :  { %3144 = vmatprep.mubr.f32.mxu1 %v1823_v13  ;;  %v1882_v13 = vld [vmem:[%s19457_s2 + $0x1f20] sm:$0xff] }
 0x2b4   :  { %2405 = vmatmul.mubr.f32.gmra.mrb[236].mxu0 %v1230_v0 }
 0x2b5   :  { %3145 = vmatmul.mubr.f32.gmra.mrb[198].mxu1 %v1822_v16  ;;  %2409 = vmatprep.mubr.f32.mxu0 %v1235_v3  ;;  %v1246_v16 = vld [vmem:[%s19457_s2 + $0xb40] sm:$0xff] }
 0x2b6   :  { %3149 = vmatprep.mubr.f32.mxu1 %v1827_v17  ;;  %v15519_v17 = vpop.f32.mrb[64].mxu0 }
 0x2b7   :  { %v1978_v19 = vpop.f32.mrb[65].mxu0 }
 0x2b8   :  { %2410 = vmatmul.mubr.f32.gmra.mrb[238].mxu0 %v1234_v4  ;;  %v893_v4 = vld [vmem:[%s19457_s2 + $0x38] sm:$0xff]  ;;  %v896_v19 = vld [vmem:[%s19457_s2 + $0x50] sm:$0xff] }
 0x2b9   :  { %3150 = vmatmul.mubr.f32.gmra.mrb[200].mxu1 %v1826_v20  ;;  %2414 = vmatprep.mubr.f32.mxu0 %v1239_v7  ;;  %v1891_v20 = vld [vmem:[%s19457_s2 + $0x1f68] sm:$0xff] }
 0x2ba   :  { %3154 = vmatprep.mubr.f32.mxu1 %v1831_v21  ;;  %v15527_v21 = vpop.f32.mrb[66].mxu0  ;;  %v1275_v7 = vld [vmem:[%s19457_s2 + $0xc28] sm:$0xff] }
 0x2bb   :  { %v1983_v23 = vpop.f32.mrb[67].mxu0 }
 0x2bc   :  { %2415 = vmatmul.mubr.f32.gmra.mrb[240].mxu0 %v1238_v8  ;;  %v15538_v26 = vpop.f32.mrb[68].mxu0 }
 0x2bd   :  { %3155 = vmatmul.mubr.f32.gmra.mrb[202].mxu1 %v1830_v24  ;;  %2419 = vmatprep.mubr.f32.mxu0 %v1243_v11  ;;  %v1250_v24 = vld [vmem:[%s19457_s2 + $0xb60] sm:$0xff] }
 0x2be   :  { %3159 = vmatprep.mubr.f32.mxu1 %v1835_v25  ;;  %v1890_v25 = vld [vmem:[%s19457_s2 + $0x1f60] sm:$0xff] }
 0x2c0   :  { %2420 = vmatmul.mubr.f32.gmra.mrb[242].mxu0 %v1242_v12  ;;  %v897_v12 = vld [vmem:[%s19457_s2 + $0x58] sm:$0xff] }
 0x2c1   :  { %3160 = vmatmul.mubr.f32.gmra.mrb[204].mxu1 %v1834_v28  ;;  %2424 = vmatprep.mubr.f32.mxu0 %v1247_v15  ;;  %v1988_v28 = vpop.f32.mrb[69].mxu0  ;;  %v1279_v15 = vld [vmem:[%s19457_s2 + $0xc48] sm:$0xff] }
 0x2c2   :  { %3164 = vmatprep.mubr.f32.mxu1 %v1839_v29  ;;  %v15543_v29 = vpop.f32.mrb[70].mxu0  ;;  %v1282_v28 = vld [vmem:[%s19457_s2 + $0xc60] sm:$0xff] }
 0x2c3   :  { %v1993_v31 = vpop.f32.mrb[71].mxu0 }
 0x2c4   :  { %2425 = vmatmul.mubr.f32.gmra.mrb[244].mxu0 %v1246_v16  ;;  %v15554_v34 = vpop.f32.mrb[72].mxu0 }
 0x2c5   :  { %3165 = vmatmul.mubr.f32.gmra.mrb[206].mxu1 %v1838_v32  ;;  %2429 = vmatprep.mubr.f32.mxu0 %v1251_v22  ;;  %v1254_v32 = vld [vmem:[%s19457_s2 + $0xb80] sm:$0xff]  ;;  %v901_v22 = vld [vmem:[%s19457_s2 + $0x78] sm:$0xff] }
 0x2c6   :  { %3169 = vmatprep.mubr.f32.mxu1 %v1843_v33  ;;  %v1894_v33 = vld [vmem:[%s19457_s2 + $0x1f80] sm:$0xff] }
 0x2c8   :  { %2430 = vmatmul.mubr.f32.gmra.mrb[246].mxu0 %v1250_v24 }
 0x2c9   :  { %3170 = vmatmul.mubr.f32.gmra.mrb[208].mxu1 %v1842_v36  ;;  %2434 = vmatprep.mubr.f32.mxu0 %v1255_v30  ;;  %v1998_v36 = vpop.f32.mrb[73].mxu0  ;;  %v900_v30 = vld [vmem:[%s19457_s2 + $0x70] sm:$0xff] }
 0x2ca   :  { %3174 = vmatprep.mubr.f32.mxu1 %v1847_v37  ;;  %v15559_v37 = vpop.f32.mrb[74].mxu0  ;;  %v1287_v36 = vld [vmem:[%s19457_s2 + $0xc88] sm:$0xff] }
 0x2cb   :  { %v2003_v39 = vpop.f32.mrb[75].mxu0 }
 0x2cc   :  { %2435 = vmatmul.mubr.f32.gmra.mrb[248].mxu0 %v1254_v32  ;;  %v15570_v42 = vpop.f32.mrb[76].mxu0  ;;  %v905_v32 = vld [vmem:[%s19457_s2 + $0x98] sm:$0xff]  ;;  %v1286_v39 = vld [vmem:[%s19457_s2 + $0xc80] sm:$0xff] }
 0x2cd   :  { %3175 = vmatmul.mubr.f32.gmra.mrb[210].mxu1 %v1846_v40  ;;  %2439 = vmatprep.mubr.f32.mxu0 %v1259_v38  ;;  %v1258_v40 = vld [vmem:[%s19457_s2 + $0xba0] sm:$0xff] }
 0x2ce   :  { %3179 = vmatprep.mubr.f32.mxu1 %v1851_v41  ;;  %v1898_v41 = vld [vmem:[%s19457_s2 + $0x1fa0] sm:$0xff] }
 0x2d0   :  { %2440 = vmatmul.mubr.f32.gmra.mrb[250].mxu0 %v1258_v40  ;;  %v904_v40 = vld [vmem:[%s19457_s2 + $0x90] sm:$0xff] }
 0x2d1   :  { %3180 = vmatmul.mubr.f32.gmra.mrb[212].mxu1 %v1850_v44  ;;  %v2008_v44 = vpop.f32.mrb[77].mxu0  ;;  %2444 = vmatprep.mubr.f32.mxu0 %v1263_v46 }
 0x2d2   :  { %3184 = vmatprep.mubr.f32.mxu1 %v1855_v45  ;;  %v15575_v45 = vpop.f32.mrb[78].mxu0 }
 0x2d3   :  { %v2013_v47 = vpop.f32.mrb[79].mxu0 }
 0x2d4   :  { %v15586_v50 = vpop.f32.mrb[80].mxu0  ;;  %v1291_v47 = vld [vmem:[%s19457_s2 + $0xca8] sm:$0xff] }
 0x2d5   :  { %3185 = vmatmul.mubr.f32.gmra.mrb[214].mxu1 %v1854_v48  ;;  %v1262_v48 = vld [vmem:[%s19457_s2 + $0xbc0] sm:$0xff] }
 0x2d6   :  { %3189 = vmatprep.mubr.f32.mxu1 %v1859_v49  ;;  %v1902_v49 = vld [vmem:[%s19457_s2 + $0x1fc0] sm:$0xff]  ;;  %2445 = vmatmul.mubr.f32.gmra.mrb[252].mxu0 %v1262_v48 }
 0x2d7   :  { %2449 = vmatprep.mubr.f32.mxu0 %v1267_v55  ;;  %v913_v55 = vld [vmem:[%s19457_s2 + $0xd8] sm:$0xff] }
 0x2d9   :  { %3190 = vmatmul.mubr.f32.gmra.mrb[216].mxu1 %v1858_v52  ;;  %v2018_v52 = vpop.f32.mrb[81].mxu0 }
 0x2da   :  { %3194 = vmatprep.mubr.f32.mxu1 %v1863_v54  ;;  %v15591_v54 = vpop.f32.mrb[82].mxu0 }
 0x2db   :  { %v2023_v56 = vpop.f32.mrb[83].mxu0 }
 0x2dc   :  { %v15602_v59 = vpop.f32.mrb[84].mxu0 }
 0x2dd   :  { %3195 = vmatmul.mubr.f32.gmra.mrb[218].mxu1 %v1862_v57  ;;  %v1266_v57 = vld [vmem:[%s19457_s2 + $0xbe0] sm:$0xff] }
 0x2de   :  { %3199 = vmatprep.mubr.f32.mxu1 %v1867_v58  ;;  %v1906_v58 = vld [vmem:[%s19457_s2 + $0x1fe0] sm:$0xff]  ;;  %2450 = vmatmul.mubr.f32.gmra.mrb[254].mxu0 %v1266_v57 }
 0x2df   :  { %2454 = vmatprep.mubr.f32.mxu0 %v1271_v63  ;;  %v912_v63 = vld [vmem:[%s19457_s2 + $0xd0] sm:$0xff] }
 0x2e1   :  { %3200 = vmatmul.mubr.f32.gmra.mrb[220].mxu1 %v1866_v61  ;;  %v2028_v61 = vpop.f32.mrb[85].mxu0 }
 0x2e2   :  { %3204 = vmatprep.mubr.f32.mxu1 %v1871_v62  ;;  %v15607_v62 = vpop.f32.mrb[86].mxu0  ;;  %v1294_v61 = vld [vmem:[%s19457_s2 + $0xcc0] sm:$0xff] }
 0x2e3   :  { %v2033_v0 = vpop.f32.mrb[87].mxu0 }
 0x2e4   :  { %v15618_v3 = vpop.f32.mrb[88].mxu0 }
 0x2e5   :  { %3205 = vmatmul.mubr.f32.gmra.mrb[222].mxu1 %v1870_v1  ;;  %v1270_v1 = vld [vmem:[%s19457_s2 + $0xc00] sm:$0xff] }
 0x2e6   :  { %3209 = vmatprep.mubr.f32.mxu1 %v1875_v2  ;;  %v888_v2 = vld [vmem:[%s19457_s2 + $0x10] sm:$0xff]  ;;  %2455 = vmatmul.mubr.f32.gmra.mrb[0].mxu0 %v1270_v1  ;;  %v917_v1 = vld [vmem:[%s19457_s2 + $0xf8] sm:$0xff] }
 0x2e7   :  { %2459 = vmatprep.mubr.f32.mxu0 %v1275_v7 }
 0x2e9   :  { %3210 = vmatmul.mubr.f32.gmra.mrb[224].mxu1 %v1874_v5  ;;  %v2038_v5 = vpop.f32.mrb[89].mxu0 }
 0x2ea   :  { %3214 = vmatprep.mubr.f32.mxu1 %v1879_v6  ;;  %v15623_v6 = vpop.f32.mrb[90].mxu0  ;;  %v1299_v5 = vld [vmem:[%s19457_s2 + $0xce8] sm:$0xff] }
 0x2eb   :  { %v2043_v8 = vpop.f32.mrb[91].mxu0 }
 0x2ec   :  { %v15634_v11 = vpop.f32.mrb[92].mxu0  ;;  %v1298_v8 = vld [vmem:[%s19457_s2 + $0xce0] sm:$0xff] }
 0x2ed   :  { %3215 = vmatmul.mubr.f32.gmra.mrb[226].mxu1 %v1878_v9  ;;  %v1274_v9 = vld [vmem:[%s19457_s2 + $0xc20] sm:$0xff] }
 0x2ee   :  { %3219 = vmatprep.mubr.f32.mxu1 %v1883_v10  ;;  %v892_v10 = vld [vmem:[%s19457_s2 + $0x30] sm:$0xff]  ;;  %2460 = vmatmul.mubr.f32.gmra.mrb[2].mxu0 %v1274_v9 }
 0x2ef   :  { %2464 = vmatprep.mubr.f32.mxu0 %v1279_v15  ;;  %v916_v9 = vld [vmem:[%s19457_s2 + $0xf0] sm:$0xff] }
 0x2f1   :  { %3220 = vmatmul.mubr.f32.gmra.mrb[228].mxu1 %v1882_v13  ;;  %v2048_v13 = vpop.f32.mrb[93].mxu0 }
 0x2f2   :  { %3224 = vmatprep.mubr.f32.mxu1 %v1887_v14  ;;  %v15639_v14 = vpop.f32.mrb[94].mxu0 }
 0x2f3   :  { %v2053_v16 = vpop.f32.mrb[95].mxu0 }
 0x2f5   :  { %3225 = vmatmul.mubr.f32.gmra.mrb[230].mxu1 %v1886_v18  ;;  %v1278_v18 = vld [vmem:[%s19457_s2 + $0xc40] sm:$0xff] }
 0x2f6   :  { %3229 = vmatprep.mubr.f32.mxu1 %v1891_v20  ;;  %v15650_v20 = vpop.f32.mrb[96].mxu0  ;;  %2465 = vmatmul.mubr.f32.gmra.mrb[4].mxu0 %v1278_v18  ;;  %v1303_v18 = vld [vmem:[%s19457_s2 + $0xd08] sm:$0xff] }
 0x2f7   :  { %v2058_v23 = vpop.f32.mrb[97].mxu0 }
 0x2f8   :  { %v15655_v24 = vpop.f32.mrb[98].mxu0  ;;  %v1302_v23 = vld [vmem:[%s19457_s2 + $0xd00] sm:$0xff] }
 0x2f9   :  { %3230 = vmatmul.mubr.f32.gmra.mrb[232].mxu1 %v1890_v25  ;;  %v1283_v25 = vld [vmem:[%s19457_s2 + $0xc68] sm:$0xff] }
 0x2fa   :  { %3234 = vmatprep.mubr.f32.mxu1 %v1895_v27  ;;  %2469 = vmatprep.mubr.f32.mxu0 %v1283_v25  ;;  %v2063_v27 = vpop.f32.mrb[99].mxu0  ;;  %v920_v25 = vld [vmem:[%s19457_s2 + $0x110] sm:$0xff] }
 0x2fb   :  { %v15666_v31 = vpop.f32.mrb[100].mxu0  ;;  %2470 = vmatmul.mubr.f32.gmra.mrb[6].mxu0 %v1282_v28  ;;  %v925_v28 = vld [vmem:[%s19457_s2 + $0x138] sm:$0xff] }
 0x2fc   :  { %2474 = vmatprep.mubr.f32.mxu0 %v1287_v36  ;;  %v1307_v36 = vld [vmem:[%s19457_s2 + $0xd28] sm:$0xff] }
 0x2fd   :  { %3235 = vmatmul.mubr.f32.gmra.mrb[234].mxu1 %v1894_v33  ;;  %v2068_v33 = vpop.f32.mrb[101].mxu0 }
 0x2fe   :  { %3239 = vmatprep.mubr.f32.mxu1 %v1899_v35  ;;  %v15671_v35 = vpop.f32.mrb[102].mxu0 }
 0x2ff   :  { %v2073_v38 = vpop.f32.mrb[103].mxu0  ;;  %2475 = vmatmul.mubr.f32.gmra.mrb[8].mxu0 %v1286_v39 }
 0x300   :  { %2479 = vmatprep.mubr.f32.mxu0 %v1291_v47  ;;  %v929_v47 = vld [vmem:[%s19457_s2 + $0x158] sm:$0xff] }
 0x301   :  { %3240 = vmatmul.mubr.f32.gmra.mrb[236].mxu1 %v1898_v41  ;;  %v15682_v41 = vpop.f32.mrb[104].mxu0 }
 0x302   :  { %3244 = vmatprep.mubr.f32.mxu1 %v1903_v43  ;;  %v909_v43 = vld [vmem:[%s19457_s2 + $0xb8] sm:$0xff]  ;;  %v2078_v44 = vpop.f32.mrb[105].mxu0 }
 0x303   :  { %v15687_v46 = vpop.f32.mrb[106].mxu0 }
 0x304   :  { %v2083_v48 = vpop.f32.mrb[107].mxu0 }
 0x305   :  { %3245 = vmatmul.mubr.f32.gmra.mrb[238].mxu1 %v1902_v49  ;;  %v1290_v49 = vld [vmem:[%s19457_s2 + $0xca0] sm:$0xff]  ;;  %v15698_v52 = vpop.f32.mrb[108].mxu0 }
 0x306   :  { %3249 = vmatprep.mubr.f32.mxu1 %v1907_v51  ;;  %v908_v51 = vld [vmem:[%s19457_s2 + $0xb0] sm:$0xff]  ;;  %2480 = vmatmul.mubr.f32.gmra.mrb[10].mxu0 %v1290_v49  ;;  %v2088_v56 = vpop.f32.mrb[109].mxu0 }
 0x307   :  { %v15703_v57 = vpop.f32.mrb[110].mxu0 }
 0x309   :  { %3250 = vmatmul.mubr.f32.gmra.mrb[240].mxu1 %v1906_v58  ;;  %v1295_v58 = vld [vmem:[%s19457_s2 + $0xcc8] sm:$0xff] }
 0x30a   :  { %3319 = vmatprep.mubr.f32.mxu1 %v889_v60  ;;  %2484 = vmatprep.mubr.f32.mxu0 %v1295_v58  ;;  %v2093_v60 = vpop.f32.mrb[111].mxu0 }
 0x30b   :  { %v15714_v0 = vpop.f32.mrb[112].mxu0  ;;  %2485 = vmatmul.mubr.f32.gmra.mrb[12].mxu0 %v1294_v61  ;;  %v1310_v60 = vld [vmem:[%s19457_s2 + $0xd40] sm:$0xff]  ;;  %v928_v61 = vld [vmem:[%s19457_s2 + $0x150] sm:$0xff] }
 0x30c   :  { %2489 = vmatprep.mubr.f32.mxu0 %v1299_v5 }
 0x30d   :  { %3320 = vmatmul.mubr.f32.vlgmr.msra.gmra.mrb[242].mxu1 %v888_v2  ;;  %v2098_v2 = vpop.f32.mrb[113].mxu0 }
 0x30e   :  { %3324 = vmatprep.mubr.f32.mxu1 %v893_v4  ;;  %v15719_v4 = vpop.f32.mrb[114].mxu0 }
 0x30f   :  { %v2103_v7 = vpop.f32.mrb[115].mxu0  ;;  %2490 = vmatmul.mubr.f32.gmra.mrb[14].mxu0 %v1298_v8  ;;  %v1315_v8 = vld [vmem:[%s19457_s2 + $0xd68] sm:$0xff] }
 0x310   :  { %2494 = vmatprep.mubr.f32.mxu0 %v1303_v18  ;;  %v932_v18 = vld [vmem:[%s19457_s2 + $0x170] sm:$0xff] }
 0x311   :  { %3325 = vmatmul.mubr.f32.gmra.mrb[244].mxu1 %v892_v10  ;;  %v15730_v10 = vpop.f32.mrb[116].mxu0 }
 0x312   :  { %3329 = vmatprep.mubr.f32.mxu1 %v897_v12  ;;  %v921_v12 = vld [vmem:[%s19457_s2 + $0x118] sm:$0xff]  ;;  %v2108_v13 = vpop.f32.mrb[117].mxu0 }
 0x313   :  { %v15737_v16 = vpop.f32.mrb[118].mxu0  ;;  %2495 = vmatmul.mubr.f32.gmra.mrb[16].mxu0 %v1302_v23  ;;  %v1314_v13 = vld [vmem:[%s19457_s2 + $0xd60] sm:$0xff] }
 0x314   :  { %2499 = vmatprep.mubr.f32.mxu0 %v1307_v36 }
 0x315   :  { %3330 = vmatmul.mubr.f32.gmra.mrb[246].mxu1 %v896_v19 }
 0x316   :  { %3334 = vmatprep.mubr.f32.mxu1 %v901_v22  ;;  %v2113_v22 = vpop.f32.mrb[119].mxu0 }
 0x317   :  { %v15748_v27 = vpop.f32.mrb[120].mxu0  ;;  %v937_v22 = vld [vmem:[%s19457_s2 + $0x198] sm:$0xff] }
 0x319   :  { %3335 = vmatmul.mubr.f32.gmra.mrb[248].mxu1 %v900_v30  ;;  %v2118_v30 = vpop.f32.mrb[121].mxu0 }
 0x31a   :  { %3339 = vmatprep.mubr.f32.mxu1 %v905_v32  ;;  %v15755_v33 = vpop.f32.mrb[122].mxu0  ;;  %v1319_v30 = vld [vmem:[%s19457_s2 + $0xd88] sm:$0xff] }
 0x31b   :  { %v2123_v39 = vpop.f32.mrb[123].mxu0 }
 0x31c   :  { %v15766_v44 = vpop.f32.mrb[124].mxu0  ;;  %v1318_v39 = vld [vmem:[%s19457_s2 + $0xd80] sm:$0xff] }
 0x31d   :  { %3340 = vmatmul.mubr.f32.gmra.mrb[250].mxu1 %v904_v40  ;;  %v1306_v40 = vld [vmem:[%s19457_s2 + $0xd20] sm:$0xff]  ;;  %v2128_v48 = vpop.f32.mrb[125].mxu0 }
 0x31e   :  { %3344 = vmatprep.mubr.f32.mxu1 %v909_v43  ;;  %v924_v43 = vld [vmem:[%s19457_s2 + $0x130] sm:$0xff]  ;;  %2500 = vmatmul.mubr.f32.gmra.mrb[18].mxu0 %v1306_v40 }
 0x31f   :  { %v936_v40 = vld [vmem:[%s19457_s2 + $0x190] sm:$0xff] }
 0x321   :  { %3345 = vmatmul.mubr.f32.gmra.mrb[252].mxu1 %v908_v51  ;;  %v15773_v51 = vpop.f32.mrb[126].mxu0 }
 0x322   :  { %3349 = vmatprep.mubr.f32.mxu1 %v913_v55  ;;  %v1311_v55 = vld [vmem:[%s19457_s2 + $0xd48] sm:$0xff]  ;;  %v2133_v58 = vpop.f32.mrb[127].mxu0 }
 0x323   :  { %2504 = vmatprep.mubr.f32.mxu0 %v1311_v55  ;;  %v1323_v58 = vld [vmem:[%s19457_s2 + $0xda8] sm:$0xff] }
 0x324   :  { %2505 = vmatmul.mubr.f32.gmra.mrb[20].mxu0 %v1310_v60 }
 0x325   :  { %3350 = vmatmul.mubr.f32.gmra.mrb[254].mxu1 %v912_v63  ;;  %v15784_v63 = vpop.f32.mrb[128].mxu0  ;;  %2509 = vmatprep.mubr.f32.mxu0 %v1315_v8 }
 0x326   :  { %3354 = vmatprep.mubr.f32.mxu1 %v917_v1  ;;  %v933_v1 = vld [vmem:[%s19457_s2 + $0x178] sm:$0xff]  ;;  %v2138_v2 = vpop.f32.mrb[129].mxu0 }
 0x327   :  { %v15791_v7 = vpop.f32.mrb[130].mxu0  ;;  %v940_v2 = vld [vmem:[%s19457_s2 + $0x1b0] sm:$0xff] }
 0x328   :  { %v15735_v15 = vpop.f32.mrb[150].mxu1  ;;  %2510 = vmatmul.mubr.f32.gmra.mrb[22].mxu0 %v1314_v13 }
 0x329   :  { %19471 = vst [vmem:[#allocation3_spill] sm:$0xff] %v15735_v15  ;;  %v3028_v19 = vpop.f32.mrb[151].mxu1  ;;  %3355 = vmatmul.mubr.f32.gmra.mrb[150].mxu1 %v916_v9  ;;  %2514 = vmatprep.mubr.f32.mxu0 %v1319_v30 }
 0x32a   :  { %3359 = vmatprep.mubr.f32.mxu1 %v921_v12  ;;  %v2143_v12 = vpop.f32.mrb[131].mxu0 }
 0x32b   :  { %v15802_v19 = vpop.f32.mrb[132].mxu0 }
 0x32c   :  { %v15753_v32 = vpop.f32.mrb[152].mxu1  ;;  %v2148_v23 = vpop.f32.mrb[133].mxu0  ;;  %2515 = vmatmul.mubr.f32.gmra.mrb[24].mxu0 %v1318_v39 }
 0x32d   :  { %19472 = vst [vmem:[#allocation4_spill] sm:$0xff] %v15753_v32  ;;  %v3033_v38 = vpop.f32.mrb[153].mxu1  ;;  %3360 = vmatmul.mubr.f32.gmra.mrb[152].mxu1 %v920_v25  ;;  %2519 = vmatprep.mubr.f32.mxu0 %v1323_v58  ;;  %v1354_v32 = vld [vmem:[%s19457_s2 + $0xea0] sm:$0xff] }
 0x32e   :  { %3364 = vmatprep.mubr.f32.mxu1 %v925_v28  ;;  %v15809_v28 = vpop.f32.mrb[134].mxu0 }
 0x32f   :  { %v2153_v38 = vpop.f32.mrb[135].mxu0 }
 0x330   :  { %v15771_v49 = vpop.f32.mrb[154].mxu1  ;;  %v944_v38 = vld [vmem:[%s19457_s2 + $0x1d0] sm:$0xff] }
 0x331   :  { %19473 = vst [vmem:[#allocation5_spill] sm:$0xff] %v15771_v49  ;;  %v3038_v56 = vpop.f32.mrb[155].mxu1  ;;  %3365 = vmatmul.mubr.f32.gmra.mrb[154].mxu1 %v924_v43  ;;  %v15820_v43 = vpop.f32.mrb[136].mxu0 }
 0x332   :  { %3369 = vmatprep.mubr.f32.mxu1 %v929_v47  ;;  %v941_v47 = vld [vmem:[%s19457_s2 + $0x1b8] sm:$0xff]  ;;  %v2158_v48 = vpop.f32.mrb[137].mxu0 }
 0x333   :  { %v15827_v56 = vpop.f32.mrb[138].mxu0 }
 0x334   :  { %v15789_v5 = vpop.f32.mrb[156].mxu1 }
 0x335   :  { %19474 = vst [vmem:[#allocation6_spill] sm:$0xff] %v15789_v5  ;;  %v3043_v9 = vpop.f32.mrb[157].mxu1  ;;  %3370 = vmatmul.mubr.f32.gmra.mrb[156].mxu1 %v928_v61  ;;  %v2163_v61 = vpop.f32.mrb[139].mxu0  ;;  %v1350_v5 = vld [vmem:[%s19457_s2 + $0xe80] sm:$0xff] }
 0x336   :  { %3374 = vmatprep.mubr.f32.mxu1 %v933_v1  ;;  %v1322_v1 = vld [vmem:[%s19457_s2 + $0xda0] sm:$0xff]  ;;  %v15838_v8 = vpop.f32.mrb[140].mxu0  ;;  %v945_v9 = vld [vmem:[%s19457_s2 + $0x1d8] sm:$0xff] }
 0x337   :  { %2520 = vmatmul.mubr.f32.gmra.mrb[26].mxu0 %v1322_v1  ;;  %v2168_v12 = vpop.f32.mrb[141].mxu0 }
 0x338   :  { %v15807_v25 = vpop.f32.mrb[158].mxu1 }
 0x339   :  { %19475 = vst [vmem:[#allocation7_spill] sm:$0xff] %v15807_v25  ;;  %v3048_v36 = vpop.f32.mrb[159].mxu1  ;;  %3375 = vmatmul.mubr.f32.gmra.mrb[158].mxu1 %v932_v18  ;;  %v15845_v18 = vpop.f32.mrb[142].mxu0 }
 0x33a   :  { %3379 = vmatprep.mubr.f32.mxu1 %v937_v22  ;;  %v1327_v22 = vld [vmem:[%s19457_s2 + $0xdc8] sm:$0xff]  ;;  %v2173_v30 = vpop.f32.mrb[143].mxu0  ;;  %v1326_v36 = vld [vmem:[%s19457_s2 + $0xdc0] sm:$0xff] }
 0x33b   :  { %2524 = vmatprep.mubr.f32.mxu0 %v1327_v22  ;;  %v15856_v39 = vpop.f32.mrb[144].mxu0  ;;  %v4604_v22 = vld [vmem:[%s19458_s3 + $0x20] sm:$0xff]  ;;  %v953_v30 = vld [vmem:[%s19457_s2 + $0x218] sm:$0xff] }
 0x33c   :  { %v15825_v55 = vpop.f32.mrb[160].mxu1  ;;  %2525 = vmatmul.mubr.f32.gmra.mrb[28].mxu0 %v1326_v36 }
 0x33d   :  { %19476 = vst [vmem:[#allocation8_spill] sm:$0xff] %v15825_v55  ;;  %v3053_v60 = vpop.f32.mrb[161].mxu1  ;;  %3380 = vmatmul.mubr.f32.gmra.mrb[160].mxu1 %v936_v40  ;;  %v949_v40 = vld [vmem:[%s19457_s2 + $0x1f8] sm:$0xff]  ;;  %v1346_v55 = vld [vmem:[%s19457_s2 + $0xe60] sm:$0xff] }
 0x33e   :  { %3384 = vmatprep.mubr.f32.mxu1 %v941_v47  ;;  %v2178_v47 = vpop.f32.mrb[145].mxu0  ;;  %v1331_v60 = vld [vmem:[%s19457_s2 + $0xde8] sm:$0xff] }
 0x33f   :  { %v15863_v58 = vpop.f32.mrb[146].mxu0  ;;  %2529 = vmatprep.mubr.f32.mxu0 %v1331_v60  ;;  %v1335_v60 = vld [vmem:[%s19457_s2 + $0xe08] sm:$0xff] }
 0x340   :  { %v15843_v13 = vpop.f32.mrb[162].mxu1  ;;  %v2183_v1 = vpop.f32.mrb[147].mxu0 }
 0x341   :  { %19477 = vst [vmem:[#allocation9_spill] sm:$0xff] %v15843_v13  ;;  %v3058_v23 = vpop.f32.mrb[163].mxu1  ;;  %3385 = vmatmul.mubr.f32.gmra.mrb[162].mxu1 %v940_v2  ;;  %v1330_v2 = vld [vmem:[%s19457_s2 + $0xde0] sm:$0xff]  ;;  %v15874_v12 = vpop.f32.mrb[148].mxu0 }
 0x342   :  { %3389 = vmatprep.mubr.f32.mxu1 %v945_v9  ;;  %v948_v9 = vld [vmem:[%s19457_s2 + $0x1f0] sm:$0xff]  ;;  %v4605_v23 = vld [vmem:[%s19458_s3 + $0x28] sm:$0xff]  ;;  %2530 = vmatmul.mubr.f32.gmra.mrb[30].mxu0 %v1330_v2 }
 0x343   :  { %v12793_v36 = vpack.c.bf16 %v4605_v23, %v4604_v22  ;;  %v952_v2 = vld [vmem:[%s19457_s2 + $0x210] sm:$0xff]  ;;  %v957_v23 = vld [vmem:[%s19457_s2 + $0x238] sm:$0xff]  ;;  %2534 = vmatprep.mubr.f32.mxu0 %v1335_v60 }
 0x344   :  { %v15861_v48 = vpop.f32.mrb[164].mxu1  ;;  %v956_v60 = vld [vmem:[%s19457_s2 + $0x230] sm:$0xff] }
 0x345   :  { %19478 = vst [vmem:[#allocation10_spill] sm:$0xff] %v15861_v48  ;;  %v3063_v61 = vpop.f32.mrb[165].mxu1  ;;  %3390 = vmatmul.mubr.f32.gmra.mrb[164].mxu1 %v944_v38  ;;  %v2188_v38 = vpop.f32.mrb[149].mxu0  ;;  %12794 = vmatprep.subr.bf16.mxu0 %v12793_v36  ;;  %v1342_v48 = vld [vmem:[%s19457_s2 + $0xe40] sm:$0xff] }
 0x346   :  { %3394 = vmatprep.mubr.f32.mxu1 %v949_v40  ;;  %v15887_v47 = vpop.f32.mrb[150].mxu0  ;;  %12796 = vmatpush3.bf16.msra.mxu0 %v12793_v36 }
 0x347   :  { %v2193_v1 = vpop.f32.mrb[151].mxu0  ;;  %2535 = vmatmul.mubr.f32.gmra.mrb[32].mxu0 %v1334_v53 }
 0x348   :  { %v15885_v40 = vpop.f32.mrb[166].mxu1  ;;  %v15898_v22 = vpop.f32.mrb[152].mxu0 }
 0x349   :  { %19479 = vst [vmem:[#allocation11_spill] sm:$0xff] %v15885_v40  ;;  %v3068_v61 = vpop.f32.mrb[167].mxu1  ;;  %3395 = vmatmul.mubr.f32.gmra.mrb[166].mxu1 %v948_v9  ;;  %v2198_v9 = vpop.f32.mrb[153].mxu0  ;;  %v1338_v40 = vld [vmem:[%s19457_s2 + $0xe20] sm:$0xff] }
 0x34a   :  { %3399 = vmatprep.mubr.f32.mxu1 %v953_v30  ;;  %v15905_v61 = vpop.f32.mrb[154].mxu0  ;;  %v1339_v30 = vld [vmem:[%s19457_s2 + $0xe28] sm:$0xff]  ;;  %v961_v9 = vld [vmem:[%s19457_s2 + $0x258] sm:$0xff] }
 0x34b   :  { %2539 = vmatprep.mubr.f32.mxu0 %v1339_v30  ;;  %v2203_v36 = vpop.f32.mrb[155].mxu0 }
 0x34c   :  { %v15903_v38 = vpop.f32.mrb[168].mxu1  ;;  %v15916_v53 = vpop.f32.mrb[156].mxu0  ;;  %2540 = vmatmul.mubr.f32.gmra.mrb[34].mxu0 %v1338_v40 }
 0x34d   :  { %19480 = vst [vmem:[#allocation12_spill] sm:$0xff] %v15903_v38  ;;  %v3073_v1 = vpop.f32.mrb[169].mxu1  ;;  %3400 = vmatmul.mubr.f32.gmra.mrb[168].mxu1 %v952_v2  ;;  %v2208_v38 = vpop.f32.mrb[157].mxu0 }
 0x34e   :  { %3404 = vmatprep.mubr.f32.mxu1 %v957_v23  ;;  %v15923_v2 = vpop.f32.mrb[158].mxu0  ;;  %v1343_v23 = vld [vmem:[%s19457_s2 + $0xe48] sm:$0xff]  ;;  %v960_v38 = vld [vmem:[%s19457_s2 + $0x250] sm:$0xff] }
 0x34f   :  { %2544 = vmatprep.mubr.f32.mxu0 %v1343_v23  ;;  %v2213_v36 = vpop.f32.mrb[159].mxu0 }
 0x350   :  { %v15921_v1 = vpop.f32.mrb[170].mxu1  ;;  %v15934_v40 = vpop.f32.mrb[160].mxu0  ;;  %2545 = vmatmul.mubr.f32.gmra.mrb[36].mxu0 %v1342_v48 }
 0x351   :  { %19481 = vst [vmem:[#allocation13_spill] sm:$0xff] %v15921_v1  ;;  %v3078_v30 = vpop.f32.mrb[171].mxu1  ;;  %3405 = vmatmul.mubr.f32.gmra.mrb[170].mxu1 %v956_v60  ;;  %v965_v1 = vld [vmem:[%s19457_s2 + $0x278] sm:$0xff]  ;;  %v2218_v13 = vpop.f32.mrb[161].mxu0 }
 0x352   :  { %3409 = vmatprep.mubr.f32.mxu1 %v961_v9  ;;  %v15941_v60 = vpop.f32.mrb[162].mxu0  ;;  %v1347_v9 = vld [vmem:[%s19457_s2 + $0xe68] sm:$0xff]  ;;  %v964_v13 = vld [vmem:[%s19457_s2 + $0x270] sm:$0xff] }
 0x353   :  { %2549 = vmatprep.mubr.f32.mxu0 %v1347_v9  ;;  %v2223_v36 = vpop.f32.mrb[163].mxu0 }
 0x354   :  { %v15939_v30 = vpop.f32.mrb[172].mxu1  ;;  %v15952_v48 = vpop.f32.mrb[164].mxu0  ;;  %2550 = vmatmul.mubr.f32.gmra.mrb[38].mxu0 %v1346_v55 }
 0x355   :  { %19482 = vst [vmem:[#allocation14_spill] sm:$0xff] %v15939_v30  ;;  %v3083_v23 = vpop.f32.mrb[173].mxu1  ;;  %3410 = vmatmul.mubr.f32.gmra.mrb[172].mxu1 %v960_v38  ;;  %v969_v30 = vld [vmem:[%s19457_s2 + $0x298] sm:$0xff]  ;;  %v2228_v25 = vpop.f32.mrb[165].mxu0 }
 0x356   :  { %3414 = vmatprep.mubr.f32.mxu1 %v965_v1  ;;  %v15959_v38 = vpop.f32.mrb[166].mxu0  ;;  %v1351_v1 = vld [vmem:[%s19457_s2 + $0xe88] sm:$0xff]  ;;  %v968_v25 = vld [vmem:[%s19457_s2 + $0x290] sm:$0xff] }
 0x357   :  { %2554 = vmatprep.mubr.f32.mxu0 %v1351_v1  ;;  %v2233_v36 = vpop.f32.mrb[167].mxu0 }
 0x358   :  { %v15957_v23 = vpop.f32.mrb[174].mxu1  ;;  %v15970_v55 = vpop.f32.mrb[168].mxu0  ;;  %2555 = vmatmul.mubr.f32.gmra.mrb[40].mxu0 %v1350_v5 }
 0x359   :  { %19483 = vst [vmem:[#allocation15_spill] sm:$0xff] %v15957_v23  ;;  %v3088_v9 = vpop.f32.mrb[175].mxu1  ;;  %3415 = vmatmul.mubr.f32.gmra.mrb[174].mxu1 %v964_v13  ;;  %v973_v23 = vld [vmem:[%s19457_s2 + $0x2b8] sm:$0xff]  ;;  %v2238_v49 = vpop.f32.mrb[169].mxu0 }
 0x35a   :  { %3419 = vmatprep.mubr.f32.mxu1 %v969_v30  ;;  %v15977_v13 = vpop.f32.mrb[170].mxu0  ;;  %v1355_v30 = vld [vmem:[%s19457_s2 + $0xea8] sm:$0xff]  ;;  %v972_v49 = vld [vmem:[%s19457_s2 + $0x2b0] sm:$0xff] }
 0x35b   :  { %19485 = vst [vmem:[#allocation17_spill] sm:$0xff] %v15977_v13  ;;  %2559 = vmatprep.mubr.f32.mxu0 %v1355_v30  ;;  %v2243_v36 = vpop.f32.mrb[171].mxu0 }
 0x35c   :  { %v15975_v9 = vpop.f32.mrb[176].mxu1  ;;  %v15988_v5 = vpop.f32.mrb[172].mxu0  ;;  %2560 = vmatmul.mubr.f32.gmra.mrb[42].mxu0 %v1354_v32  ;;  %v1358_v36 = vld [vmem:[%s19457_s2 + $0xec0] sm:$0xff]  ;;  %v981_v32 = vld [vmem:[%s19457_s2 + $0x2f8] sm:$0xff] }
 0x35d   :  { %19484 = vst [vmem:[#allocation16_spill] sm:$0xff] %v15975_v9  ;;  %v3093_v1 = vpop.f32.mrb[177].mxu1  ;;  %3420 = vmatmul.mubr.f32.gmra.mrb[176].mxu1 %v968_v25  ;;  %19486 = vst [vmem:[#allocation18_spill] sm:$0xff] %v15988_v5  ;;  %v977_v9 = vld [vmem:[%s19457_s2 + $0x2d8] sm:$0xff]  ;;  %v2248_v15 = vpop.f32.mrb[173].mxu0  ;;  %v1359_v25 = vld [vmem:[%s19457_s2 + $0xec8] sm:$0xff] }
 0x35e   :  { %3424 = vmatprep.mubr.f32.mxu1 %v973_v23  ;;  %v15998_v23 = vpop.f32.mrb[174].mxu0  ;;  %2564 = vmatprep.mubr.f32.mxu0 %v1359_v25  ;;  %v976_v15 = vld [vmem:[%s19457_s2 + $0x2d0] sm:$0xff] }
 0x35f   :  { %19488 = vst [vmem:[#allocation20_spill] sm:$0xff] %v15998_v23 }
 0x360   :  { %v15993_v1 = vpop.f32.mrb[178].mxu1  ;;  %2565 = vmatmul.mubr.f32.gmra.mrb[44].mxu0 %v1358_v36 }
 0x361   :  { %19487 = vst [vmem:[#allocation19_spill] sm:$0xff] %v15993_v1  ;;  %v3098_v30 = vpop.f32.mrb[179].mxu1  ;;  %3425 = vmatmul.mubr.f32.gmra.mrb[178].mxu1 %v972_v49  ;;  %v2253_v1 = vpop.f32.mrb[175].mxu0 }
 0x362   :  { %3429 = vmatprep.mubr.f32.mxu1 %v977_v9  ;;  %v16009_v5 = vpop.f32.mrb[176].mxu0  ;;  %v1363_v30 = vld [vmem:[%s19457_s2 + $0xee8] sm:$0xff]  ;;  %v1362_v1 = vld [vmem:[%s19457_s2 + $0xee0] sm:$0xff] }
 0x363   :  { %19489 = vst [vmem:[#allocation21_spill] sm:$0xff] %v16009_v5  ;;  %v2258_v25 = vpop.f32.mrb[177].mxu0  ;;  %2569 = vmatprep.mubr.f32.mxu0 %v1363_v30 }
 0x364   :  { %v16011_v49 = vpop.f32.mrb[180].mxu1  ;;  %v16016_v23 = vpop.f32.mrb[178].mxu0  ;;  %v985_v25 = vld [vmem:[%s19457_s2 + $0x318] sm:$0xff]  ;;  %2570 = vmatmul.mubr.f32.gmra.mrb[46].mxu0 %v1362_v1 }
 0x365   :  { %19490 = vst [vmem:[#allocation22_spill] sm:$0xff] %v16011_v49  ;;  %v3103_v9 = vpop.f32.mrb[181].mxu1  ;;  %3430 = vmatmul.mubr.f32.gmra.mrb[180].mxu1 %v976_v15  ;;  %19491 = vst [vmem:[#allocation23_spill] sm:$0xff] %v16016_v23  ;;  %v980_v49 = vld [vmem:[%s19457_s2 + $0x2f0] sm:$0xff]  ;;  %v2263_v36 = vpop.f32.mrb[179].mxu0 }
 0x366   :  { %3434 = vmatprep.mubr.f32.mxu1 %v981_v32  ;;  %v16027_v5 = vpop.f32.mrb[180].mxu0  ;;  %v1367_v9 = vld [vmem:[%s19457_s2 + $0xf08] sm:$0xff]  ;;  %v1366_v36 = vld [vmem:[%s19457_s2 + $0xf00] sm:$0xff] }
 0x367   :  { %19492 = vst [vmem:[#allocation24_spill] sm:$0xff] %v16027_v5  ;;  %v2268_v30 = vpop.f32.mrb[181].mxu0  ;;  %2574 = vmatprep.mubr.f32.mxu0 %v1367_v9 }
 0x368   :  { %v16029_v15 = vpop.f32.mrb[182].mxu1  ;;  %v16034_v23 = vpop.f32.mrb[182].mxu0  ;;  %v989_v30 = vld [vmem:[%s19457_s2 + $0x338] sm:$0xff]  ;;  %2575 = vmatmul.mubr.f32.gmra.mrb[48].mxu0 %v1366_v36 }
 0x369   :  { %19493 = vst [vmem:[#allocation25_spill] sm:$0xff] %v16029_v15  ;;  %v3108_v32 = vpop.f32.mrb[183].mxu1  ;;  %3435 = vmatmul.mubr.f32.gmra.mrb[182].mxu1 %v980_v49  ;;  %19494 = vst [vmem:[#allocation26_spill] sm:$0xff] %v16034_v23  ;;  %v984_v15 = vld [vmem:[%s19457_s2 + $0x310] sm:$0xff]  ;;  %v2273_v1 = vpop.f32.mrb[183].mxu0 }
 0x36a   :  { %3439 = vmatprep.mubr.f32.mxu1 %v985_v25  ;;  %v16045_v5 = vpop.f32.mrb[184].mxu0  ;;  %v1371_v32 = vld [vmem:[%s19457_s2 + $0xf28] sm:$0xff]  ;;  %v1370_v1 = vld [vmem:[%s19457_s2 + $0xf20] sm:$0xff] }
 0x36b   :  { %19495 = vst [vmem:[#allocation27_spill] sm:$0xff] %v16045_v5  ;;  %v2278_v9 = vpop.f32.mrb[185].mxu0  ;;  %2579 = vmatprep.mubr.f32.mxu0 %v1371_v32 }
 0x36c   :  { %v16047_v49 = vpop.f32.mrb[184].mxu1  ;;  %v16052_v23 = vpop.f32.mrb[186].mxu0  ;;  %v993_v9 = vld [vmem:[%s19457_s2 + $0x358] sm:$0xff]  ;;  %2580 = vmatmul.mubr.f32.gmra.mrb[50].mxu0 %v1370_v1 }
 0x36d   :  { %19496 = vst [vmem:[#allocation28_spill] sm:$0xff] %v16047_v49  ;;  %v3113_v25 = vpop.f32.mrb[185].mxu1  ;;  %3440 = vmatmul.mubr.f32.gmra.mrb[184].mxu1 %v984_v15  ;;  %19497 = vst [vmem:[#allocation29_spill] sm:$0xff] %v16052_v23  ;;  %v988_v49 = vld [vmem:[%s19457_s2 + $0x330] sm:$0xff]  ;;  %v2283_v36 = vpop.f32.mrb[187].mxu0 }
 0x36e   :  { %3444 = vmatprep.mubr.f32.mxu1 %v989_v30  ;;  %v16063_v5 = vpop.f32.mrb[188].mxu0  ;;  %v1375_v25 = vld [vmem:[%s19457_s2 + $0xf48] sm:$0xff]  ;;  %v1374_v36 = vld [vmem:[%s19457_s2 + $0xf40] sm:$0xff] }
 0x36f   :  { %19498 = vst [vmem:[#allocation30_spill] sm:$0xff] %v16063_v5  ;;  %v2288_v32 = vpop.f32.mrb[189].mxu0  ;;  %2584 = vmatprep.mubr.f32.mxu0 %v1375_v25 }
 0x370   :  { %v16065_v15 = vpop.f32.mrb[186].mxu1  ;;  %v16070_v23 = vpop.f32.mrb[190].mxu0  ;;  %v997_v32 = vld [vmem:[%s19457_s2 + $0x378] sm:$0xff]  ;;  %2585 = vmatmul.mubr.f32.gmra.mrb[52].mxu0 %v1374_v36 }
 0x371   :  { %19499 = vst [vmem:[#allocation31_spill] sm:$0xff] %v16065_v15  ;;  %v3118_v30 = vpop.f32.mrb[187].mxu1  ;;  %3445 = vmatmul.mubr.f32.gmra.mrb[186].mxu1 %v988_v49  ;;  %19500 = vst [vmem:[#allocation32_spill] sm:$0xff] %v16070_v23  ;;  %v992_v15 = vld [vmem:[%s19457_s2 + $0x350] sm:$0xff]  ;;  %v2293_v1 = vpop.f32.mrb[191].mxu0 }
 0x372   :  { %3449 = vmatprep.mubr.f32.mxu1 %v993_v9  ;;  %v16081_v5 = vpop.f32.mrb[192].mxu0  ;;  %v1379_v30 = vld [vmem:[%s19457_s2 + $0xf68] sm:$0xff]  ;;  %v1378_v1 = vld [vmem:[%s19457_s2 + $0xf60] sm:$0xff] }
 0x373   :  { %19501 = vst [vmem:[#allocation33_spill] sm:$0xff] %v16081_v5  ;;  %v2298_v25 = vpop.f32.mrb[193].mxu0  ;;  %2589 = vmatprep.mubr.f32.mxu0 %v1379_v30 }
 0x374   :  { %v16083_v49 = vpop.f32.mrb[188].mxu1  ;;  %v16088_v23 = vpop.f32.mrb[194].mxu0  ;;  %v1001_v25 = vld [vmem:[%s19457_s2 + $0x398] sm:$0xff]  ;;  %2590 = vmatmul.mubr.f32.gmra.mrb[54].mxu0 %v1378_v1 }
 0x375   :  { %19502 = vst [vmem:[#allocation34_spill] sm:$0xff] %v16083_v49  ;;  %v3123_v9 = vpop.f32.mrb[189].mxu1  ;;  %3450 = vmatmul.mubr.f32.gmra.mrb[188].mxu1 %v992_v15  ;;  %19503 = vst [vmem:[#allocation35_spill] sm:$0xff] %v16088_v23  ;;  %v996_v49 = vld [vmem:[%s19457_s2 + $0x370] sm:$0xff]  ;;  %v2303_v36 = vpop.f32.mrb[195].mxu0 }
 0x376   :  { %3454 = vmatprep.mubr.f32.mxu1 %v997_v32  ;;  %v16099_v5 = vpop.f32.mrb[196].mxu0  ;;  %v1383_v9 = vld [vmem:[%s19457_s2 + $0xf88] sm:$0xff]  ;;  %v1382_v36 = vld [vmem:[%s19457_s2 + $0xf80] sm:$0xff] }
 0x377   :  { %19504 = vst [vmem:[#allocation36_spill] sm:$0xff] %v16099_v5  ;;  %v2308_v30 = vpop.f32.mrb[197].mxu0  ;;  %2594 = vmatprep.mubr.f32.mxu0 %v1383_v9 }
 0x378   :  { %v16101_v15 = vpop.f32.mrb[190].mxu1  ;;  %v16106_v23 = vpop.f32.mrb[198].mxu0  ;;  %v1005_v30 = vld [vmem:[%s19457_s2 + $0x3b8] sm:$0xff]  ;;  %2595 = vmatmul.mubr.f32.gmra.mrb[56].mxu0 %v1382_v36 }
 0x379   :  { %19505 = vst [vmem:[#allocation37_spill] sm:$0xff] %v16101_v15  ;;  %v3128_v32 = vpop.f32.mrb[191].mxu1  ;;  %3455 = vmatmul.mubr.f32.gmra.mrb[190].mxu1 %v996_v49  ;;  %19506 = vst [vmem:[#allocation38_spill] sm:$0xff] %v16106_v23  ;;  %v1000_v15 = vld [vmem:[%s19457_s2 + $0x390] sm:$0xff]  ;;  %v2313_v1 = vpop.f32.mrb[199].mxu0 }
 0x37a   :  { %3459 = vmatprep.mubr.f32.mxu1 %v1001_v25  ;;  %v16117_v5 = vpop.f32.mrb[200].mxu0  ;;  %v1387_v32 = vld [vmem:[%s19457_s2 + $0xfa8] sm:$0xff]  ;;  %v1386_v1 = vld [vmem:[%s19457_s2 + $0xfa0] sm:$0xff] }
 0x37b   :  { %19507 = vst [vmem:[#allocation39_spill] sm:$0xff] %v16117_v5  ;;  %v2318_v9 = vpop.f32.mrb[201].mxu0  ;;  %2599 = vmatprep.mubr.f32.mxu0 %v1387_v32 }
 0x37c   :  { %v16119_v49 = vpop.f32.mrb[192].mxu1  ;;  %v16124_v23 = vpop.f32.mrb[202].mxu0  ;;  %v1009_v9 = vld [vmem:[%s19457_s2 + $0x3d8] sm:$0xff]  ;;  %2600 = vmatmul.mubr.f32.gmra.mrb[58].mxu0 %v1386_v1 }
 0x37d   :  { %19508 = vst [vmem:[#allocation40_spill] sm:$0xff] %v16119_v49  ;;  %v3133_v25 = vpop.f32.mrb[193].mxu1  ;;  %3460 = vmatmul.mubr.f32.gmra.mrb[192].mxu1 %v1000_v15  ;;  %19509 = vst [vmem:[#allocation41_spill] sm:$0xff] %v16124_v23  ;;  %v1004_v49 = vld [vmem:[%s19457_s2 + $0x3b0] sm:$0xff]  ;;  %v2323_v36 = vpop.f32.mrb[203].mxu0 }
 0x37e   :  { %3464 = vmatprep.mubr.f32.mxu1 %v1005_v30  ;;  %v16135_v5 = vpop.f32.mrb[204].mxu0  ;;  %v1391_v25 = vld [vmem:[%s19457_s2 + $0xfc8] sm:$0xff]  ;;  %v1390_v36 = vld [vmem:[%s19457_s2 + $0xfc0] sm:$0xff] }
 0x37f   :  { %19510 = vst [vmem:[#allocation42_spill] sm:$0xff] %v16135_v5  ;;  %v2328_v32 = vpop.f32.mrb[205].mxu0  ;;  %2604 = vmatprep.mubr.f32.mxu0 %v1391_v25 }
 0x380   :  { %v16137_v15 = vpop.f32.mrb[194].mxu1  ;;  %v16142_v23 = vpop.f32.mrb[206].mxu0  ;;  %v1013_v32 = vld [vmem:[%s19457_s2 + $0x3f8] sm:$0xff]  ;;  %2605 = vmatmul.mubr.f32.gmra.mrb[60].mxu0 %v1390_v36 }
 0x381   :  { %19511 = vst [vmem:[#allocation43_spill] sm:$0xff] %v16137_v15  ;;  %v3138_v30 = vpop.f32.mrb[195].mxu1  ;;  %3465 = vmatmul.mubr.f32.gmra.mrb[194].mxu1 %v1004_v49  ;;  %19512 = vst [vmem:[#allocation44_spill] sm:$0xff] %v16142_v23  ;;  %v1008_v15 = vld [vmem:[%s19457_s2 + $0x3d0] sm:$0xff]  ;;  %v2333_v1 = vpop.f32.mrb[207].mxu0 }
 0x382   :  { %3469 = vmatprep.mubr.f32.mxu1 %v1009_v9  ;;  %v16153_v5 = vpop.f32.mrb[208].mxu0  ;;  %v1395_v30 = vld [vmem:[%s19457_s2 + $0xfe8] sm:$0xff]  ;;  %v1394_v1 = vld [vmem:[%s19457_s2 + $0xfe0] sm:$0xff] }
 0x383   :  { %19513 = vst [vmem:[#allocation45_spill] sm:$0xff] %v16153_v5  ;;  %v2338_v25 = vpop.f32.mrb[209].mxu0  ;;  %2609 = vmatprep.mubr.f32.mxu0 %v1395_v30 }
 0x384   :  { %v16155_v49 = vpop.f32.mrb[196].mxu1  ;;  %v16160_v23 = vpop.f32.mrb[210].mxu0  ;;  %v1017_v25 = vld [vmem:[%s19457_s2 + $0x418] sm:$0xff]  ;;  %2610 = vmatmul.mubr.f32.gmra.mrb[62].mxu0 %v1394_v1 }
 0x385   :  { %19514 = vst [vmem:[#allocation46_spill] sm:$0xff] %v16155_v49  ;;  %v3143_v9 = vpop.f32.mrb[197].mxu1  ;;  %3470 = vmatmul.mubr.f32.gmra.mrb[196].mxu1 %v1008_v15  ;;  %19515 = vst [vmem:[#allocation47_spill] sm:$0xff] %v16160_v23  ;;  %v1012_v49 = vld [vmem:[%s19457_s2 + $0x3f0] sm:$0xff]  ;;  %v2343_v36 = vpop.f32.mrb[211].mxu0  ;;  %v1021_v1 = vld [vmem:[%s19457_s2 + $0x438] sm:$0xff] }
 0x386   :  { %3474 = vmatprep.mubr.f32.mxu1 %v1013_v32  ;;  %v16171_v5 = vpop.f32.mrb[212].mxu0  ;;  %v1399_v9 = vld [vmem:[%s19457_s2 + $0x1008] sm:$0xff]  ;;  %v1398_v36 = vld [vmem:[%s19457_s2 + $0x1000] sm:$0xff] }
 0x387   :  { %19516 = vst [vmem:[#allocation48_spill] sm:$0xff] %v16171_v5  ;;  %v2348_v30 = vpop.f32.mrb[213].mxu0  ;;  %2614 = vmatprep.mubr.f32.mxu0 %v1399_v9  ;;  %v1016_v5 = vld [vmem:[%s19457_s2 + $0x410] sm:$0xff] }
 0x388   :  { %v16173_v15 = vpop.f32.mrb[198].mxu1  ;;  %v16184_v23 = vpop.f32.mrb[214].mxu0 }
 0x389   :  { %19517 = vst [vmem:[#allocation49_spill] sm:$0xff] %v16173_v15  ;;  %v3148_v32 = vpop.f32.mrb[199].mxu1  ;;  %3475 = vmatmul.mubr.f32.gmra.mrb[198].mxu1 %v1012_v49  ;;  %19518 = vst [vmem:[#allocation50_spill] sm:$0xff] %v16184_v23  ;;  %v2353_v30 = vpop.f32.mrb[215].mxu0  ;;  %2615 = vmatmul.mubr.f32.gmra.mrb[214].mxu0 %v1398_v36  ;;  %v1403_v49 = vld [vmem:[%s19457_s2 + $0x1028] sm:$0xff]  ;;  %v1025_v36 = vld [vmem:[%s19457_s2 + $0x458] sm:$0xff] }
 0x38a   :  { %3479 = vmatprep.mubr.f32.mxu1 %v1017_v25  ;;  %2619 = vmatprep.mubr.f32.mxu0 %v1403_v49  ;;  %v1402_v25 = vld [vmem:[%s19457_s2 + $0x1020] sm:$0xff]  ;;  %v1020_v32 = vld [vmem:[%s19457_s2 + $0x430] sm:$0xff]  ;;  %v16200_v30 = vpop.f32.mrb[216].mxu0 }
 0x38b   :  { %19520 = vst [vmem:[#allocation52_spill] sm:$0xff] %v16200_v30 }
 0x38c   :  { %v16189_v15 = vpop.f32.mrb[200].mxu1 }
 0x38d   :  { %19519 = vst [vmem:[#allocation51_spill] sm:$0xff] %v16189_v15  ;;  %v3153_v9 = vpop.f32.mrb[201].mxu1  ;;  %3480 = vmatmul.mubr.f32.gmra.mrb[200].mxu1 %v1016_v5  ;;  %v2358_v15 = vpop.f32.mrb[217].mxu0  ;;  %2620 = vmatmul.mubr.f32.gmra.mrb[216].mxu0 %v1402_v25  ;;  %v1407_v5 = vld [vmem:[%s19457_s2 + $0x1048] sm:$0xff]  ;;  %v1029_v25 = vld [vmem:[%s19457_s2 + $0x478] sm:$0xff] }
 0x38e   :  { %3484 = vmatprep.mubr.f32.mxu1 %v1021_v1  ;;  %2624 = vmatprep.mubr.f32.mxu0 %v1407_v5  ;;  %v1406_v1 = vld [vmem:[%s19457_s2 + $0x1040] sm:$0xff]  ;;  %v1024_v9 = vld [vmem:[%s19457_s2 + $0x450] sm:$0xff]  ;;  %v16216_v15 = vpop.f32.mrb[218].mxu0 }
 0x38f   :  { %19522 = vst [vmem:[#allocation54_spill] sm:$0xff] %v16216_v15 }
 0x390   :  { %v16205_v23 = vpop.f32.mrb[202].mxu1 }
 0x391   :  { %19521 = vst [vmem:[#allocation53_spill] sm:$0xff] %v16205_v23  ;;  %v3158_v49 = vpop.f32.mrb[203].mxu1  ;;  %3485 = vmatmul.mubr.f32.gmra.mrb[202].mxu1 %v1020_v32  ;;  %v2363_v23 = vpop.f32.mrb[219].mxu0  ;;  %2625 = vmatmul.mubr.f32.gmra.mrb[218].mxu0 %v1406_v1  ;;  %v1411_v32 = vld [vmem:[%s19457_s2 + $0x1068] sm:$0xff]  ;;  %v1033_v1 = vld [vmem:[%s19457_s2 + $0x498] sm:$0xff] }
 0x392   :  { %3489 = vmatprep.mubr.f32.mxu1 %v1025_v36  ;;  %2629 = vmatprep.mubr.f32.mxu0 %v1411_v32  ;;  %v1410_v36 = vld [vmem:[%s19457_s2 + $0x1060] sm:$0xff]  ;;  %v1028_v49 = vld [vmem:[%s19457_s2 + $0x470] sm:$0xff]  ;;  %v16232_v23 = vpop.f32.mrb[220].mxu0 }
 0x393   :  { %19524 = vst [vmem:[#allocation56_spill] sm:$0xff] %v16232_v23 }
 0x394   :  { %v16221_v30 = vpop.f32.mrb[204].mxu1 }
 0x395   :  { %19523 = vst [vmem:[#allocation55_spill] sm:$0xff] %v16221_v30  ;;  %v3163_v5 = vpop.f32.mrb[205].mxu1  ;;  %3490 = vmatmul.mubr.f32.gmra.mrb[204].mxu1 %v1024_v9  ;;  %v2368_v30 = vpop.f32.mrb[221].mxu0  ;;  %2630 = vmatmul.mubr.f32.gmra.mrb[220].mxu0 %v1410_v36  ;;  %v1415_v9 = vld [vmem:[%s19457_s2 + $0x1088] sm:$0xff]  ;;  %v1037_v36 = vld [vmem:[%s19457_s2 + $0x4b8] sm:$0xff] }
 0x396   :  { %3494 = vmatprep.mubr.f32.mxu1 %v1029_v25  ;;  %2634 = vmatprep.mubr.f32.mxu0 %v1415_v9  ;;  %v1414_v25 = vld [vmem:[%s19457_s2 + $0x1080] sm:$0xff]  ;;  %v1032_v5 = vld [vmem:[%s19457_s2 + $0x490] sm:$0xff]  ;;  %v16248_v30 = vpop.f32.mrb[222].mxu0 }
 0x397   :  { %19526 = vst [vmem:[#allocation58_spill] sm:$0xff] %v16248_v30 }
 0x398   :  { %v16237_v15 = vpop.f32.mrb[206].mxu1 }
 0x399   :  { %19525 = vst [vmem:[#allocation57_spill] sm:$0xff] %v16237_v15  ;;  %v3168_v32 = vpop.f32.mrb[207].mxu1  ;;  %3495 = vmatmul.mubr.f32.gmra.mrb[206].mxu1 %v1028_v49  ;;  %v2373_v15 = vpop.f32.mrb[223].mxu0  ;;  %2635 = vmatmul.mubr.f32.gmra.mrb[222].mxu0 %v1414_v25  ;;  %v1419_v49 = vld [vmem:[%s19457_s2 + $0x10a8] sm:$0xff]  ;;  %v1041_v25 = vld [vmem:[%s19457_s2 + $0x4d8] sm:$0xff] }
 0x39a   :  { %3499 = vmatprep.mubr.f32.mxu1 %v1033_v1  ;;  %2639 = vmatprep.mubr.f32.mxu0 %v1419_v49  ;;  %v1418_v1 = vld [vmem:[%s19457_s2 + $0x10a0] sm:$0xff]  ;;  %v1036_v32 = vld [vmem:[%s19457_s2 + $0x4b0] sm:$0xff]  ;;  %v16264_v15 = vpop.f32.mrb[224].mxu0 }
 0x39b   :  { %19528 = vst [vmem:[#allocation60_spill] sm:$0xff] %v16264_v15 }
 0x39c   :  { %v16253_v23 = vpop.f32.mrb[208].mxu1 }
 0x39d   :  { %19527 = vst [vmem:[#allocation59_spill] sm:$0xff] %v16253_v23  ;;  %v3173_v9 = vpop.f32.mrb[209].mxu1  ;;  %3500 = vmatmul.mubr.f32.gmra.mrb[208].mxu1 %v1032_v5  ;;  %v2378_v23 = vpop.f32.mrb[225].mxu0  ;;  %2640 = vmatmul.mubr.f32.gmra.mrb[224].mxu0 %v1418_v1  ;;  %v1423_v5 = vld [vmem:[%s19457_s2 + $0x10c8] sm:$0xff]  ;;  %v1040_v1 = vld [vmem:[%s19457_s2 + $0x4d0] sm:$0xff] }
 0x39e   :  { %3504 = vmatprep.mubr.f32.mxu1 %v1037_v36  ;;  %v4606_v36 = vld [vmem:[%s19458_s3 + $0x30] sm:$0xff]  ;;  %2644 = vmatprep.mubr.f32.mxu0 %v1423_v5  ;;  %v1422_v9 = vld [vmem:[%s19457_s2 + $0x10c0] sm:$0xff]  ;;  %v4607_v23 = vld [vmem:[%s19458_s3 + $0x38] sm:$0xff] }
 0x39f   :  { %v12797_v15 = vpack.c.bf16 %v4607_v23, %v4606_v36  ;;  %v1049_v36 = vld [vmem:[%s19457_s2 + $0x518] sm:$0xff] }
 0x3a0   :  { %v16269_v30 = vpop.f32.mrb[210].mxu1 }
 0x3a1   :  { %19529 = vst [vmem:[#allocation61_spill] sm:$0xff] %v16269_v30  ;;  %v3178_v49 = vpop.f32.mrb[211].mxu1  ;;  %3505 = vmatmul.mubr.f32.gmra.mrb[210].mxu1 %v1036_v32  ;;  %v16286_v30 = vpop.f32.mrb[226].mxu0  ;;  %v1045_v32 = vld [vmem:[%s19457_s2 + $0x4f8] sm:$0xff]  ;;  %12798 = vmatprep.subr.bf16.mxu0 %v12797_v15 }
 0x3a2   :  { %3509 = vmatprep.mubr.f32.mxu1 %v1041_v25  ;;  %19530 = vst [vmem:[#allocation62_spill] sm:$0xff] %v16286_v30  ;;  %v2383_v5 = vpop.f32.mrb[227].mxu0  ;;  %2645 = vmatmul.mubr.f32.gmra.mrb[226].mxu0 %v1422_v9  ;;  %v1044_v25 = vld [vmem:[%s19457_s2 + $0x4f0] sm:$0xff] }
 0x3a3   :  { %12800 = vmatpush3.bf16.msra.mxu0 %v12797_v15  ;;  %v1053_v15 = vld [vmem:[%s19457_s2 + $0x538] sm:$0xff] }
 0x3a4   :  { %v16291_v49 = vpop.f32.mrb[212].mxu1 }
 0x3a5   :  { %19531 = vst [vmem:[#allocation63_spill] sm:$0xff] %v16291_v49  ;;  %v3183_v13 = vpop.f32.mrb[213].mxu1  ;;  %3510 = vmatmul.mubr.f32.gmra.mrb[212].mxu1 %v1040_v1 }
 0x3a6   :  { %3514 = vmatprep.mubr.f32.mxu1 %v1045_v32  ;;  %v1048_v13 = vld [vmem:[%s19457_s2 + $0x510] sm:$0xff] }
 0x3a7   :  { %v1052_v32 = vld [vmem:[%s19457_s2 + $0x530] sm:$0xff] }
 0x3a8   :  { %v16299_v23 = vpop.f32.mrb[214].mxu1 }
 0x3a9   :  { %19532 = vst [vmem:[#allocation64_spill] sm:$0xff] %v16299_v23  ;;  %v3188_v30 = vpop.f32.mrb[215].mxu1  ;;  %3515 = vmatmul.mubr.f32.gmra.mrb[214].mxu1 %v1044_v25 }
 0x3aa   :  { %3519 = vmatprep.mubr.f32.mxu1 %v1049_v36  ;;  %v1057_v30 = vld [vmem:[%s19457_s2 + $0x558] sm:$0xff]  ;;  %v1056_v36 = vld [vmem:[%s19457_s2 + $0x550] sm:$0xff] }
 0x3ac   :  { %v16307_v9 = vpop.f32.mrb[216].mxu1 }
 0x3ad   :  { %19533 = vst [vmem:[#allocation65_spill] sm:$0xff] %v16307_v9  ;;  %v3193_v1 = vpop.f32.mrb[217].mxu1  ;;  %3520 = vmatmul.mubr.f32.gmra.mrb[216].mxu1 %v1048_v13  ;;  %v1061_v13 = vld [vmem:[%s19457_s2 + $0x578] sm:$0xff] }
 0x3ae   :  { %3524 = vmatprep.mubr.f32.mxu1 %v1053_v15 }
 0x3b0   :  { %v16315_v5 = vpop.f32.mrb[218].mxu1 }
 0x3b1   :  { %19534 = vst [vmem:[#allocation66_spill] sm:$0xff] %v16315_v5  ;;  %v3198_v25 = vpop.f32.mrb[219].mxu1  ;;  %3525 = vmatmul.mubr.f32.gmra.mrb[218].mxu1 %v1052_v32  ;;  %v1060_v5 = vld [vmem:[%s19457_s2 + $0x570] sm:$0xff]  ;;  %v1065_v32 = vld [vmem:[%s19457_s2 + $0x598] sm:$0xff] }
 0x3b2   :  { %3529 = vmatprep.mubr.f32.mxu1 %v1057_v30 }
 0x3b4   :  { %v16323_v15 = vpop.f32.mrb[220].mxu1 }
 0x3b5   :  { %19535 = vst [vmem:[#allocation67_spill] sm:$0xff] %v16323_v15  ;;  %v3203_v1 = vpop.f32.mrb[221].mxu1  ;;  %3530 = vmatmul.mubr.f32.gmra.mrb[220].mxu1 %v1056_v36  ;;  %v1064_v15 = vld [vmem:[%s19457_s2 + $0x590] sm:$0xff]  ;;  %v1069_v36 = vld [vmem:[%s19457_s2 + $0x5b8] sm:$0xff] }
 0x3b6   :  { %3534 = vmatprep.mubr.f32.mxu1 %v1061_v13 }
 0x3b8   :  { %v16331_v30 = vpop.f32.mrb[222].mxu1 }
 0x3b9   :  { %19536 = vst [vmem:[#allocation68_spill] sm:$0xff] %v16331_v30  ;;  %v3208_v25 = vpop.f32.mrb[223].mxu1  ;;  %3535 = vmatmul.mubr.f32.gmra.mrb[222].mxu1 %v1060_v5  ;;  %v1068_v30 = vld [vmem:[%s19457_s2 + $0x5b0] sm:$0xff]  ;;  %v1073_v5 = vld [vmem:[%s19457_s2 + $0x5d8] sm:$0xff] }
 0x3ba   :  { %3539 = vmatprep.mubr.f32.mxu1 %v1065_v32 }
 0x3bc   :  { %v16339_v13 = vpop.f32.mrb[224].mxu1 }
 0x3bd   :  { %19537 = vst [vmem:[#allocation69_spill] sm:$0xff] %v16339_v13  ;;  %v3213_v1 = vpop.f32.mrb[225].mxu1  ;;  %3540 = vmatmul.mubr.f32.gmra.mrb[224].mxu1 %v1064_v15  ;;  %v1072_v13 = vld [vmem:[%s19457_s2 + $0x5d0] sm:$0xff]  ;;  %v1077_v15 = vld [vmem:[%s19457_s2 + $0x5f8] sm:$0xff] }
 0x3be   :  { %3544 = vmatprep.mubr.f32.mxu1 %v1069_v36 }
 0x3c0   :  { %v16347_v32 = vpop.f32.mrb[226].mxu1 }
 0x3c1   :  { %19538 = vst [vmem:[#allocation70_spill] sm:$0xff] %v16347_v32  ;;  %v3218_v25 = vpop.f32.mrb[227].mxu1  ;;  %3545 = vmatmul.mubr.f32.gmra.mrb[226].mxu1 %v1068_v30  ;;  %v1076_v32 = vld [vmem:[%s19457_s2 + $0x5f0] sm:$0xff]  ;;  %v1081_v30 = vld [vmem:[%s19457_s2 + $0x618] sm:$0xff] }
 0x3c2   :  { %3549 = vmatprep.mubr.f32.mxu1 %v1073_v5 }
 0x3c4   :  { %v16355_v36 = vpop.f32.mrb[228].mxu1 }
 0x3c5   :  { %19539 = vst [vmem:[#allocation71_spill] sm:$0xff] %v16355_v36  ;;  %v3223_v1 = vpop.f32.mrb[229].mxu1  ;;  %3550 = vmatmul.mubr.f32.gmra.mrb[228].mxu1 %v1072_v13  ;;  %v1080_v36 = vld [vmem:[%s19457_s2 + $0x610] sm:$0xff]  ;;  %v1085_v13 = vld [vmem:[%s19457_s2 + $0x638] sm:$0xff] }
 0x3c6   :  { %3554 = vmatprep.mubr.f32.mxu1 %v1077_v15 }
 0x3c8   :  { %v16363_v5 = vpop.f32.mrb[230].mxu1 }
 0x3c9   :  { %19540 = vst [vmem:[#allocation72_spill] sm:$0xff] %v16363_v5  ;;  %v3228_v25 = vpop.f32.mrb[231].mxu1  ;;  %3555 = vmatmul.mubr.f32.gmra.mrb[230].mxu1 %v1076_v32  ;;  %v1084_v5 = vld [vmem:[%s19457_s2 + $0x630] sm:$0xff]  ;;  %v1089_v32 = vld [vmem:[%s19457_s2 + $0x658] sm:$0xff] }
 0x3ca   :  { %3559 = vmatprep.mubr.f32.mxu1 %v1081_v30 }
 0x3cc   :  { %v16371_v15 = vpop.f32.mrb[232].mxu1 }
 0x3cd   :  { %19541 = vst [vmem:[#allocation73_spill] sm:$0xff] %v16371_v15  ;;  %v3233_v1 = vpop.f32.mrb[233].mxu1  ;;  %3560 = vmatmul.mubr.f32.gmra.mrb[232].mxu1 %v1080_v36  ;;  %v1088_v15 = vld [vmem:[%s19457_s2 + $0x650] sm:$0xff]  ;;  %v1093_v36 = vld [vmem:[%s19457_s2 + $0x678] sm:$0xff] }
 0x3ce   :  { %3564 = vmatprep.mubr.f32.mxu1 %v1085_v13 }
 0x3d0   :  { %v16379_v30 = vpop.f32.mrb[234].mxu1 }
 0x3d1   :  { %19542 = vst [vmem:[#allocation74_spill] sm:$0xff] %v16379_v30  ;;  %v3238_v25 = vpop.f32.mrb[235].mxu1  ;;  %3565 = vmatmul.mubr.f32.gmra.mrb[234].mxu1 %v1084_v5  ;;  %v1092_v30 = vld [vmem:[%s19457_s2 + $0x670] sm:$0xff]  ;;  %v1097_v5 = vld [vmem:[%s19457_s2 + $0x698] sm:$0xff] }
 0x3d2   :  { %3569 = vmatprep.mubr.f32.mxu1 %v1089_v32  ;;  %v4600_v25 = vld [vmem:[%s19458_s3] sm:$0xff] }
 0x3d4   :  { %v16387_v13 = vpop.f32.mrb[236].mxu1 }
 0x3d5   :  { %19543 = vst [vmem:[#allocation75_spill] sm:$0xff] %v16387_v13  ;;  %v3243_v1 = vpop.f32.mrb[237].mxu1  ;;  %3570 = vmatmul.mubr.f32.gmra.mrb[236].mxu1 %v1088_v15  ;;  %v1096_v13 = vld [vmem:[%s19457_s2 + $0x690] sm:$0xff] }
 0x3d6   :  { %3574 = vmatprep.mubr.f32.mxu1 %v1093_v36  ;;  %v4601_v1 = vld [vmem:[%s19458_s3 + $0x8] sm:$0xff] }
 0x3d7   :  { %v16403_v36 = vpack.c.bf16 %v4601_v1, %v4600_v25 }
 0x3d8   :  { %v16395_v32 = vpop.f32.mrb[238].mxu1 }
 0x3d9   :  { %19544 = vst [vmem:[#allocation76_spill] sm:$0xff] %v16395_v32  ;;  %v3248_v15 = vpop.f32.mrb[239].mxu1  ;;  %3575 = vmatmul.mubr.f32.gmra.mrb[238].mxu1 %v1092_v30  ;;  %v1101_v32 = vld [vmem:[%s19457_s2 + $0x6b8] sm:$0xff]  ;;  %12802 = vmatprep.subr.bf16.mxu0 %v16403_v36  ;;  %v1100_v30 = vld [vmem:[%s19457_s2 + $0x6b0] sm:$0xff] }
 0x3da   :  { %3579 = vmatprep.mubr.f32.mxu1 %v1097_v5  ;;  %v1105_v5 = vld [vmem:[%s19457_s2 + $0x6d8] sm:$0xff] }
 0x3dc   :  { %v16412_v9 = vpop.f32.mrb[240].mxu1 }
 0x3dd   :  { %19545 = vst [vmem:[#allocation77_spill] sm:$0xff] %v16412_v9  ;;  %v3253_v23 = vpop.f32.mrb[241].mxu1  ;;  %3580 = vmatmul.mubr.f32.gmra.mrb[240].mxu1 %v1096_v13  ;;  %v1109_v13 = vld [vmem:[%s19457_s2 + $0x6f8] sm:$0xff] }
 0x3de   :  { %3584 = vmatprep.mubr.f32.mxu1 %v1101_v32  ;;  %v1104_v23 = vld [vmem:[%s19457_s2 + $0x6d0] sm:$0xff] }
 0x3e0   :  { %v3321_v25 = vpop.f32.mrb[242].mxu1 }
 0x3e1   :  { %v16421_v1 = vadd.f32 %v3321_v25, %v15519_v17  ;;  %v3323_v15 = vpop.f32.mrb[243].mxu1  ;;  %3585 = vmatmul.mubr.f32.gmra.mrb[242].mxu1 %v1100_v30  ;;  %v1108_v17 = vld [vmem:[%s19457_s2 + $0x6f0] sm:$0xff]  ;;  %v1113_v30 = vld [vmem:[%s19457_s2 + $0x718] sm:$0xff] }
 0x3e2   :  { %3589 = vmatprep.mubr.f32.mxu1 %v1105_v5 }
 0x3e4   :  { %v3326_v32 = vpop.f32.mrb[244].mxu1 }
 0x3e5   :  { %v16430_v9 = vadd.f32 %v3326_v32, %v15527_v21  ;;  %v3328_v49 = vpop.f32.mrb[245].mxu1  ;;  %3590 = vmatmul.mubr.f32.gmra.mrb[244].mxu1 %v1104_v23  ;;  %v1112_v21 = vld [vmem:[%s19457_s2 + $0x710] sm:$0xff] }
 0x3e6   :  { %3594 = vmatprep.mubr.f32.mxu1 %v1109_v13  ;;  %v1117_v49 = vld [vmem:[%s19457_s2 + $0x738] sm:$0xff] }
 0x3e8   :  { %v3331_v5 = vpop.f32.mrb[246].mxu1 }
 0x3e9   :  { %v16439_v25 = vadd.f32 %v3331_v5, %v15538_v26  ;;  %v3333_v15 = vpop.f32.mrb[247].mxu1  ;;  %3595 = vmatmul.mubr.f32.gmra.mrb[246].mxu1 %v1108_v17  ;;  %v1116_v26 = vld [vmem:[%s19457_s2 + $0x730] sm:$0xff]  ;;  %v1121_v17 = vld [vmem:[%s19457_s2 + $0x758] sm:$0xff] }
 0x3ea   :  { %3599 = vmatprep.mubr.f32.mxu1 %v1113_v30 }
 0x3ec   :  { %v3336_v23 = vpop.f32.mrb[248].mxu1 }
 0x3ed   :  { %v16448_v13 = vadd.f32 %v3336_v23, %v15543_v29  ;;  %v3338_v32 = vpop.f32.mrb[249].mxu1  ;;  %3600 = vmatmul.mubr.f32.gmra.mrb[248].mxu1 %v1112_v21  ;;  %v1120_v29 = vld [vmem:[%s19457_s2 + $0x750] sm:$0xff]  ;;  %v1125_v21 = vld [vmem:[%s19457_s2 + $0x778] sm:$0xff] }
 0x3ee   :  { %3604 = vmatprep.mubr.f32.mxu1 %v1117_v49 }
 0x3f0   :  { %v3341_v30 = vpop.f32.mrb[250].mxu1 }
 0x3f1   :  { %v16457_v5 = vadd.f32 %v3341_v30, %v15554_v34  ;;  %v3343_v15 = vpop.f32.mrb[251].mxu1  ;;  %3605 = vmatmul.mubr.f32.gmra.mrb[250].mxu1 %v1116_v26  ;;  %v1124_v34 = vld [vmem:[%s19457_s2 + $0x770] sm:$0xff]  ;;  %v1129_v26 = vld [vmem:[%s19457_s2 + $0x798] sm:$0xff] }
 0x3f2   :  { %3609 = vmatprep.mubr.f32.mxu1 %v1121_v17 }
 0x3f4   :  { %v3346_v49 = vpop.f32.mrb[252].mxu1 }
 0x3f5   :  { %v16466_v23 = vadd.f32 %v3346_v49, %v15559_v37  ;;  %v3348_v32 = vpop.f32.mrb[253].mxu1  ;;  %3610 = vmatmul.mubr.f32.gmra.mrb[252].mxu1 %v1120_v29  ;;  %v1128_v37 = vld [vmem:[%s19457_s2 + $0x790] sm:$0xff]  ;;  %v1133_v29 = vld [vmem:[%s19457_s2 + $0x7b8] sm:$0xff] }
 0x3f6   :  { %3614 = vmatprep.mubr.f32.mxu1 %v1125_v21 }
 0x3f8   :  { %v3351_v17 = vpop.f32.mrb[254].mxu1 }
 0x3f9   :  { %v16475_v30 = vadd.f32 %v3351_v17, %v15570_v42  ;;  %v3353_v15 = vpop.f32.mrb[255].mxu1  ;;  %3615 = vmatmul.mubr.f32.gmra.mrb[254].mxu1 %v1124_v34  ;;  %v1132_v42 = vld [vmem:[%s19457_s2 + $0x7b0] sm:$0xff]  ;;  %v1137_v34 = vld [vmem:[%s19457_s2 + $0x7d8] sm:$0xff] }
 0x3fa   :  { %3619 = vmatprep.mubr.f32.mxu1 %v1129_v26 }
 0x3fc   :  { %v3356_v21 = vpop.f32.mrb[150].mxu1 }
 0x3fd   :  { %v16484_v49 = vadd.f32 %v3356_v21, %v15575_v45  ;;  %v3358_v32 = vpop.f32.mrb[151].mxu1  ;;  %3620 = vmatmul.mubr.f32.gmra.mrb[150].mxu1 %v1128_v37  ;;  %v1136_v45 = vld [vmem:[%s19457_s2 + $0x7d0] sm:$0xff]  ;;  %v1141_v37 = vld [vmem:[%s19457_s2 + $0x7f8] sm:$0xff] }
 0x3fe   :  { %3624 = vmatprep.mubr.f32.mxu1 %v1133_v29 }
 0x400   :  { %v3361_v26 = vpop.f32.mrb[152].mxu1 }
 0x401   :  { %v16493_v17 = vadd.f32 %v3361_v26, %v15586_v50  ;;  %v3363_v15 = vpop.f32.mrb[153].mxu1  ;;  %3625 = vmatmul.mubr.f32.gmra.mrb[152].mxu1 %v1132_v42  ;;  %v1140_v50 = vld [vmem:[%s19457_s2 + $0x7f0] sm:$0xff]  ;;  %v1145_v42 = vld [vmem:[%s19457_s2 + $0x818] sm:$0xff] }
 0x402   :  { %3629 = vmatprep.mubr.f32.mxu1 %v1137_v34 }
 0x404   :  { %v3366_v29 = vpop.f32.mrb[154].mxu1 }
 0x405   :  { %v16502_v21 = vadd.f32 %v3366_v29, %v15591_v54  ;;  %v3368_v32 = vpop.f32.mrb[155].mxu1  ;;  %3630 = vmatmul.mubr.f32.gmra.mrb[154].mxu1 %v1136_v45  ;;  %v1144_v54 = vld [vmem:[%s19457_s2 + $0x810] sm:$0xff]  ;;  %v1149_v45 = vld [vmem:[%s19457_s2 + $0x838] sm:$0xff] }
 0x406   :  { %3634 = vmatprep.mubr.f32.mxu1 %v1141_v37 }
 0x408   :  { %v3371_v34 = vpop.f32.mrb[156].mxu1 }
 0x409   :  { %v16511_v26 = vadd.f32 %v3371_v34, %v15602_v59  ;;  %v3373_v15 = vpop.f32.mrb[157].mxu1  ;;  %3635 = vmatmul.mubr.f32.gmra.mrb[156].mxu1 %v1140_v50  ;;  %v1148_v59 = vld [vmem:[%s19457_s2 + $0x830] sm:$0xff]  ;;  %v1153_v50 = vld [vmem:[%s19457_s2 + $0x858] sm:$0xff] }
 0x40a   :  { %3639 = vmatprep.mubr.f32.mxu1 %v1145_v42 }
 0x40c   :  { %v3376_v37 = vpop.f32.mrb[158].mxu1 }
 0x40d   :  { %v16520_v29 = vadd.f32 %v3376_v37, %v15607_v62  ;;  %v3378_v32 = vpop.f32.mrb[159].mxu1  ;;  %3640 = vmatmul.mubr.f32.gmra.mrb[158].mxu1 %v1144_v54  ;;  %v1152_v62 = vld [vmem:[%s19457_s2 + $0x850] sm:$0xff]  ;;  %v1157_v54 = vld [vmem:[%s19457_s2 + $0x878] sm:$0xff] }
 0x40e   :  { %3644 = vmatprep.mubr.f32.mxu1 %v1149_v45 }
 0x410   :  { %v3381_v42 = vpop.f32.mrb[160].mxu1 }
 0x411   :  { %v16529_v34 = vadd.f32 %v3381_v42, %v15618_v3  ;;  %v3383_v15 = vpop.f32.mrb[161].mxu1  ;;  %3645 = vmatmul.mubr.f32.gmra.mrb[160].mxu1 %v1148_v59  ;;  %v1156_v3 = vld [vmem:[%s19457_s2 + $0x870] sm:$0xff]  ;;  %v1161_v59 = vld [vmem:[%s19457_s2 + $0x898] sm:$0xff] }
 0x412   :  { %3649 = vmatprep.mubr.f32.mxu1 %v1153_v50 }
 0x414   :  { %v3386_v45 = vpop.f32.mrb[162].mxu1 }
 0x415   :  { %v16538_v37 = vadd.f32 %v3386_v45, %v15623_v6  ;;  %v3388_v32 = vpop.f32.mrb[163].mxu1  ;;  %3650 = vmatmul.mubr.f32.gmra.mrb[162].mxu1 %v1152_v62  ;;  %v1160_v6 = vld [vmem:[%s19457_s2 + $0x890] sm:$0xff]  ;;  %v1165_v62 = vld [vmem:[%s19457_s2 + $0x8b8] sm:$0xff] }
 0x416   :  { %3654 = vmatprep.mubr.f32.mxu1 %v1157_v54 }
 0x418   :  { %v3391_v50 = vpop.f32.mrb[164].mxu1 }
 0x419   :  { %v16547_v42 = vadd.f32 %v3391_v50, %v15634_v11  ;;  %v3393_v15 = vpop.f32.mrb[165].mxu1  ;;  %3655 = vmatmul.mubr.f32.gmra.mrb[164].mxu1 %v1156_v3  ;;  %v1164_v11 = vld [vmem:[%s19457_s2 + $0x8b0] sm:$0xff]  ;;  %v1169_v3 = vld [vmem:[%s19457_s2 + $0x8d8] sm:$0xff] }
 0x41a   :  { %3659 = vmatprep.mubr.f32.mxu1 %v1161_v59 }
 0x41c   :  { %v3396_v54 = vpop.f32.mrb[166].mxu1 }
 0x41d   :  { %v16556_v45 = vadd.f32 %v3396_v54, %v15639_v14  ;;  %v3398_v32 = vpop.f32.mrb[167].mxu1  ;;  %3660 = vmatmul.mubr.f32.gmra.mrb[166].mxu1 %v1160_v6  ;;  %v1168_v14 = vld [vmem:[%s19457_s2 + $0x8d0] sm:$0xff] }
 0x41e   :  { %3664 = vmatprep.mubr.f32.mxu1 %v1165_v62  ;;  %v4602_v6 = vld [vmem:[%s19458_s3 + $0x10] sm:$0xff]  ;;  %v4603_v62 = vld [vmem:[%s19458_s3 + $0x18] sm:$0xff] }
 0x420   :  { %v3401_v59 = vpop.f32.mrb[168].mxu1 }
 0x421   :  { %v3402_v50 = vadd.f32 %v3401_v59, %v15650_v20  ;;  %v3403_v15 = vpop.f32.mrb[169].mxu1  ;;  %3665 = vmatmul.mubr.f32.gmra.mrb[168].mxu1 %v1164_v11  ;;  %v1173_v20 = vld [vmem:[%s19457_s2 + $0x8f8] sm:$0xff]  ;;  %v1172_v59 = vld [vmem:[%s19457_s2 + $0x8f0] sm:$0xff] }
 0x422   :  { %3669 = vmatprep.mubr.f32.mxu1 %v1169_v3  ;;  %v12805_v3 = vpack.c.bf16 %v4603_v62, %v4602_v6  ;;  %v4608_v15 = vld [vmem:[%s19458_s3 + $0x40] sm:$0xff] }
 0x423   :  { %11690 = vmatprep.mubr.msk.f32.mxu0 %vm4664_vm0, %v3402_v50  ;;  %v4609_v50 = vld [vmem:[%s19458_s3 + $0x48] sm:$0xff] }
 0x424   :  { %v3406_v54 = vpop.f32.mrb[170].mxu1 }
 0x425   :  { %v3407_v32 = vadd.f32 %v3406_v54, %v15655_v24  ;;  %v3408_v11 = vpop.f32.mrb[171].mxu1  ;;  %3670 = vmatmul.mubr.f32.gmra.mrb[170].mxu1 %v1168_v14  ;;  %v1177_v24 = vld [vmem:[%s19457_s2 + $0x918] sm:$0xff]  ;;  %v1176_v54 = vld [vmem:[%s19457_s2 + $0x910] sm:$0xff] }
 0x426   :  { %3674 = vmatprep.mubr.f32.mxu1 %v1173_v20  ;;  %v16594_v20 = vpack.c.bf16 %v4609_v50, %v4608_v15  ;;  %v1185_v15 = vld [vmem:[%s19457_s2 + $0x958] sm:$0xff] }
 0x427   :  { %11691 = vmatmul.mubr.msk.f32.vlgmr.msra.gmra.mrb[64].mxu0 %vm4664_vm0, %v3407_v32  ;;  %v1181_v32 = vld [vmem:[%s19457_s2 + $0x938] sm:$0xff] }
 0x428   :  { %v3411_v14 = vpop.f32.mrb[172].mxu1  ;;  %12804 = vmatpush3.bf16.msra.mxu0 %v16403_v36 }
 0x429   :  { %v3412_v6 = vadd.f32 %v3411_v14, %v15666_v31  ;;  %v3413_v62 = vpop.f32.mrb[173].mxu1  ;;  %3675 = vmatmul.mubr.f32.gmra.mrb[172].mxu1 %v1172_v59  ;;  %12806 = vmatprep.subr.bf16.mxu0 %v12805_v3  ;;  %v1180_v59 = vld [vmem:[%s19457_s2 + $0x930] sm:$0xff]  ;;  %v1189_v14 = vld [vmem:[%s19457_s2 + $0x978] sm:$0xff] }
 0x42a   :  { %3679 = vmatprep.mubr.f32.mxu1 %v1177_v24 }
 0x42b   :  { %11693 = vmatprep.mubr.msk.f32.mxu0 %vm4664_vm0, %v3412_v6 }
 0x42c   :  { %v3416_v11 = vpop.f32.mrb[174].mxu1  ;;  %12808 = vmatpush3.bf16.msra.mxu0 %v12805_v3 }
 0x42d   :  { %v3417_v31 = vadd.f32 %v3416_v11, %v15671_v35  ;;  %v3418_v36 = vpop.f32.mrb[175].mxu1  ;;  %3680 = vmatmul.mubr.f32.gmra.mrb[174].mxu1 %v1176_v54  ;;  %12810 = vmatprep.subr.bf16.mxu0 %v16594_v20  ;;  %v1184_v35 = vld [vmem:[%s19457_s2 + $0x950] sm:$0xff] }
 0x42e   :  { %3684 = vmatprep.mubr.f32.mxu1 %v1181_v32  ;;  %v1193_v32 = vld [vmem:[%s19457_s2 + $0x998] sm:$0xff] }
 0x42f   :  { %11694 = vmatmul.mubr.msk.f32.gmra.mrb[66].mxu0 %vm4664_vm0, %v3417_v31 }
 0x430   :  { %v3421_v50 = vpop.f32.mrb[176].mxu1 }
 0x431   :  { %v3422_v3 = vadd.f32 %v3421_v50, %v15682_v41  ;;  %v3423_v24 = vpop.f32.mrb[177].mxu1  ;;  %3685 = vmatmul.mubr.f32.gmra.mrb[176].mxu1 %v1180_v59  ;;  %v1188_v41 = vld [vmem:[%s19457_s2 + $0x970] sm:$0xff]  ;;  %v1197_v59 = vld [vmem:[%s19457_s2 + $0x9b8] sm:$0xff] }
 0x432   :  { %3689 = vmatprep.mubr.f32.mxu1 %v1185_v15  ;;  %v1201_v24 = vld [vmem:[%s19457_s2 + $0x9d8] sm:$0xff] }
 0x433   :  { %11696 = vmatprep.mubr.msk.f32.mxu0 %vm4664_vm0, %v3422_v3 }
 0x434   :  { %v3426_v6 = vpop.f32.mrb[178].mxu1 }
 0x435   :  { %v3427_v62 = vadd.f32 %v3426_v6, %v15687_v46  ;;  %v3428_v54 = vpop.f32.mrb[179].mxu1  ;;  %3690 = vmatmul.mubr.f32.gmra.mrb[178].mxu1 %v1184_v35  ;;  %v1192_v46 = vld [vmem:[%s19457_s2 + $0x990] sm:$0xff] }
 0x436   :  { %3694 = vmatprep.mubr.f32.mxu1 %v1189_v14 }
 0x437   :  { %11697 = vmatmul.mubr.msk.f32.gmra.mrb[68].mxu0 %vm4664_vm0, %v3427_v62  ;;  %v1205_v62 = vld [vmem:[%s19457_s2 + $0x9f8] sm:$0xff] }
 0x438   :  { %v3431_v11 = vpop.f32.mrb[180].mxu1 }
 0x439   :  { %v3432_v31 = vadd.f32 %v3431_v11, %v15698_v52  ;;  %v3433_v36 = vpop.f32.mrb[181].mxu1  ;;  %3695 = vmatmul.mubr.f32.gmra.mrb[180].mxu1 %v1188_v41  ;;  %v1196_v52 = vld [vmem:[%s19457_s2 + $0x9b0] sm:$0xff]  ;;  %v1209_v11 = vld [vmem:[%s19457_s2 + $0xa18] sm:$0xff] }
 0x43a   :  { %3699 = vmatprep.mubr.f32.mxu1 %v1193_v32 }
 0x43b   :  { %11699 = vmatprep.mubr.msk.f32.mxu0 %vm4664_vm0, %v3432_v31 }
 0x43c   :  { %v3436_v15 = vpop.f32.mrb[182].mxu1 }
 0x43d   :  { %v3437_v50 = vadd.f32 %v3436_v15, %v15703_v57  ;;  %v3438_v3 = vpop.f32.mrb[183].mxu1  ;;  %3700 = vmatmul.mubr.f32.gmra.mrb[182].mxu1 %v1192_v46  ;;  %v1200_v57 = vld [vmem:[%s19457_s2 + $0x9d0] sm:$0xff] }
 0x43e   :  { %3704 = vmatprep.mubr.f32.mxu1 %v1197_v59  ;;  %v1213_v59 = vld [vmem:[%s19457_s2 + $0xa38] sm:$0xff] }
 0x43f   :  { %11700 = vmatmul.mubr.msk.f32.gmra.mrb[70].mxu0 %vm4664_vm0, %v3437_v50 }
 0x440   :  { %v3441_v35 = vpop.f32.mrb[184].mxu1 }
 0x441   :  { %v3442_v14 = vadd.f32 %v3441_v35, %v15714_v0  ;;  %v3443_v6 = vpop.f32.mrb[185].mxu1  ;;  %3705 = vmatmul.mubr.f32.gmra.mrb[184].mxu1 %v1196_v52  ;;  %v1204_v0 = vld [vmem:[%s19457_s2 + $0x9f0] sm:$0xff]  ;;  %v1217_v52 = vld [vmem:[%s19457_s2 + $0xa58] sm:$0xff] }
 0x442   :  { %3709 = vmatprep.mubr.f32.mxu1 %v1201_v24  ;;  %v1221_v6 = vld [vmem:[%s19457_s2 + $0xa78] sm:$0xff] }
 0x443   :  { %11702 = vmatprep.mubr.msk.f32.mxu0 %vm4664_vm0, %v3442_v14 }
 0x444   :  { %v3446_v54 = vpop.f32.mrb[186].mxu1 }
 0x445   :  { %v3447_v41 = vadd.f32 %v3446_v54, %v15719_v4  ;;  %v3448_v32 = vpop.f32.mrb[187].mxu1  ;;  %3710 = vmatmul.mubr.f32.gmra.mrb[186].mxu1 %v1200_v57  ;;  %v1208_v4 = vld [vmem:[%s19457_s2 + $0xa10] sm:$0xff] }
 0x446   :  { %3714 = vmatprep.mubr.f32.mxu1 %v1205_v62 }
 0x447   :  { %11703 = vmatmul.mubr.msk.f32.gmra.mrb[72].mxu0 %vm4664_vm0, %v3447_v41  ;;  %v1225_v41 = vld [vmem:[%s19457_s2 + $0xa98] sm:$0xff] }
 0x448   :  { %v3451_v31 = vpop.f32.mrb[188].mxu1 }
 0x449   :  { %v3452_v36 = vadd.f32 %v3451_v31, %v15730_v10  ;;  %v3453_v46 = vpop.f32.mrb[189].mxu1  ;;  %3715 = vmatmul.mubr.f32.gmra.mrb[188].mxu1 %v1204_v0  ;;  %v1212_v10 = vld [vmem:[%s19457_s2 + $0xa30] sm:$0xff]  ;;  %v1229_v31 = vld [vmem:[%s19457_s2 + $0xab8] sm:$0xff] }
 0x44a   :  { %3719 = vmatprep.mubr.f32.mxu1 %v1209_v11 }
 0x44b   :  { %11705 = vmatprep.mubr.msk.f32.mxu0 %vm4664_vm0, %v3452_v36 }
 0x44c   :  { %v3456_v15 = vpop.f32.mrb[190].mxu1 }
 0x44d   :  { %v3457_v50 = vadd.f32 %v3456_v15, %v15737_v16  ;;  %v3458_v3 = vpop.f32.mrb[191].mxu1  ;;  %3720 = vmatmul.mubr.f32.gmra.mrb[190].mxu1 %v1208_v4  ;;  %v1216_v16 = vld [vmem:[%s19457_s2 + $0xa50] sm:$0xff]  ;;  %v4611_v15 = vld [vmem:[%s19458_s3 + $0x58] sm:$0xff] }
 0x44e   :  { %3724 = vmatprep.mubr.f32.mxu1 %v1213_v59  ;;  %v4610_v59 = vld [vmem:[%s19458_s3 + $0x50] sm:$0xff] }
 0x44f   :  { %11706 = vmatmul.mubr.msk.f32.gmra.mrb[74].mxu0 %vm4664_vm0, %v3457_v50 }
 0x450   :  { %v3461_v24 = vpop.f32.mrb[192].mxu1 }
 0x451   :  { %v3462_v35 = vadd.f32 %v3461_v24, %v15748_v27  ;;  %v3463_v14 = vpop.f32.mrb[193].mxu1  ;;  %3725 = vmatmul.mubr.f32.gmra.mrb[192].mxu1 %v1212_v10  ;;  %v1220_v27 = vld [vmem:[%s19457_s2 + $0xa70] sm:$0xff] }
 0x452   :  { %3729 = vmatprep.mubr.f32.mxu1 %v1217_v52  ;;  %v12813_v52 = vpack.c.bf16 %v4611_v15, %v4610_v59  ;;  %v1232_v24 = vld [vmem:[%s19457_s2 + $0xad0] sm:$0xff]  ;;  %v4613_v14 = vld [vmem:[%s19458_s3 + $0x68] sm:$0xff] }
 0x453   :  { %11708 = vmatprep.mubr.msk.f32.mxu0 %vm4664_vm0, %v3462_v35  ;;  %v4612_v35 = vld [vmem:[%s19458_s3 + $0x60] sm:$0xff] }
 0x454   :  { %v3466_v57 = vpop.f32.mrb[194].mxu1 }
 0x455   :  { %v3467_v62 = vadd.f32 %v3466_v57, %v15755_v33  ;;  %v3468_v54 = vpop.f32.mrb[195].mxu1  ;;  %3730 = vmatmul.mubr.f32.gmra.mrb[194].mxu1 %v1216_v16  ;;  %v1224_v33 = vld [vmem:[%s19457_s2 + $0xa90] sm:$0xff]  ;;  %v16739_v57 = vpack.c.bf16 %v4613_v14, %v4612_v35 }
 0x456   :  { %3734 = vmatprep.mubr.f32.mxu1 %v1221_v6  ;;  %v1268_v14 = vld [vmem:[%s19457_s2 + $0xbf0] sm:$0xff] }
 0x457   :  { %11709 = vmatmul.mubr.msk.f32.gmra.mrb[76].mxu0 %vm4664_vm0, %v3467_v62 }
 0x458   :  { %v3471_v32 = vpop.f32.mrb[196].mxu1 }
 0x459   :  { %v3472_v0 = vadd.f32 %v3471_v32, %v15766_v44  ;;  %v3473_v11 = vpop.f32.mrb[197].mxu1  ;;  %3735 = vmatmul.mubr.f32.gmra.mrb[196].mxu1 %v1220_v27  ;;  %v1228_v44 = vld [vmem:[%s19457_s2 + $0xab0] sm:$0xff] }
 0x45a   :  { %3739 = vmatprep.mubr.f32.mxu1 %v1225_v41  ;;  %v1244_v41 = vld [vmem:[%s19457_s2 + $0xb30] sm:$0xff] }
 0x45b   :  { %11711 = vmatprep.mubr.msk.f32.mxu0 %vm4664_vm0, %v3472_v0  ;;  %v1248_v0 = vld [vmem:[%s19457_s2 + $0xb50] sm:$0xff] }
 0x45c   :  { %v3476_v36 = vpop.f32.mrb[198].mxu1 }
 0x45d   :  { %v3477_v46 = vadd.f32 %v3476_v36, %v15773_v51  ;;  %v3478_v4 = vpop.f32.mrb[199].mxu1  ;;  %3740 = vmatmul.mubr.f32.gmra.mrb[198].mxu1 %v1224_v33  ;;  %v1233_v51 = vld [vmem:[%s19457_s2 + $0xad8] sm:$0xff]  ;;  %v1252_v33 = vld [vmem:[%s19457_s2 + $0xb70] sm:$0xff] }
 0x45e   :  { %3744 = vmatprep.mubr.f32.mxu1 %v1229_v31  ;;  %v1256_v36 = vld [vmem:[%s19457_s2 + $0xb90] sm:$0xff] }
 0x45f   :  { %11712 = vmatmul.mubr.msk.f32.gmra.mrb[78].mxu0 %vm4664_vm0, %v3477_v46  ;;  %v1260_v4 = vld [vmem:[%s19457_s2 + $0xbb0] sm:$0xff] }
 0x460   :  { %v3481_v50 = vpop.f32.mrb[200].mxu1  ;;  %11722 = vmatprep.mubr.msk.f32.mxu0 %vm4664_vm0, %v16421_v1 }
 0x461   :  { %v16717_v3 = vadd.f32 %v3481_v50, %v15784_v63  ;;  %v3483_v10 = vpop.f32.mrb[201].mxu1  ;;  %3745 = vmatmul.mubr.f32.gmra.mrb[200].mxu1 %v1228_v44  ;;  %v1237_v63 = vld [vmem:[%s19457_s2 + $0xaf8] sm:$0xff]  ;;  %v1264_v50 = vld [vmem:[%s19457_s2 + $0xbd0] sm:$0xff] }
 0x462   :  { %3749 = vmatprep.mubr.f32.mxu1 %v1233_v51  ;;  %v4615_v44 = vld [vmem:[%s19458_s3 + $0x78] sm:$0xff]  ;;  %v4617_v10 = vld [vmem:[%s19458_s3 + $0x88] sm:$0xff] }
 0x463   :  { %11723 = vmatmul.mubr.msk.f32.vlgmr.msra.gmra.mrb[64].mxu0 %vm4664_vm0, %v16430_v9  ;;  %v1236_v9 = vld [vmem:[%s19457_s2 + $0xaf0] sm:$0xff] }
 0x464   :  { %v3486_v1 = vpop.f32.mrb[202].mxu1  ;;  %11725 = vmatprep.mubr.msk.f32.mxu0 %vm4664_vm0, %v16439_v25  ;;  %12812 = vmatpush3.bf16.msra.mxu0 %v16594_v20  ;;  %v1241_v25 = vld [vmem:[%s19457_s2 + $0xb18] sm:$0xff] }
 0x465   :  { %v16737_v16 = vadd.f32 %v3486_v1, %v15791_v7  ;;  %v3488_v6 = vpop.f32.mrb[203].mxu1  ;;  %3750 = vmatmul.mubr.f32.gmra.mrb[202].mxu1 %v1232_v24  ;;  %12814 = vmatprep.subr.bf16.mxu0 %v12813_v52 }
 0x466   :  { %3754 = vmatprep.mubr.f32.mxu1 %v1237_v63  ;;  %v1273_v63 = vld [vmem:[%s19457_s2 + $0xc18] sm:$0xff]  ;;  %v1272_v6 = vld [vmem:[%s19457_s2 + $0xc10] sm:$0xff] }
 0x467   :  { %11726 = vmatmul.mubr.msk.f32.gmra.mrb[66].mxu0 %vm4664_vm0, %v16448_v13  ;;  %v1240_v13 = vld [vmem:[%s19457_s2 + $0xb10] sm:$0xff] }
 0x468   :  { %v3491_v20 = vpop.f32.mrb[204].mxu1  ;;  %11728 = vmatprep.mubr.msk.f32.mxu0 %vm4664_vm0, %v16457_v5  ;;  %12816 = vmatpush3.bf16.msra.mxu0 %v12813_v52  ;;  %v1245_v5 = vld [vmem:[%s19457_s2 + $0xb38] sm:$0xff] }
 0x469   :  { %v16752_v7 = vadd.f32 %v3491_v20, %v15802_v19  ;;  %v3493_v62 = vpop.f32.mrb[205].mxu1  ;;  %3755 = vmatmul.mubr.f32.gmra.mrb[204].mxu1 %v1236_v9  ;;  %12818 = vmatprep.subr.bf16.mxu0 %v16739_v57  ;;  %v1276_v20 = vld [vmem:[%s19457_s2 + $0xc30] sm:$0xff] }
 0x46a   :  { %3759 = vmatprep.mubr.f32.mxu1 %v1241_v25 }
 0x46b   :  { %11729 = vmatmul.mubr.msk.f32.gmra.mrb[68].mxu0 %vm4664_vm0, %v16466_v23  ;;  %v1249_v23 = vld [vmem:[%s19457_s2 + $0xb58] sm:$0xff] }
 0x46c   :  { %v3496_v54 = vpop.f32.mrb[206].mxu1  ;;  %11731 = vmatprep.mubr.msk.f32.mxu0 %vm4664_vm0, %v16475_v30 }
 0x46d   :  { %v16766_v19 = vadd.f32 %v3496_v54, %v15809_v28  ;;  %v3498_v27 = vpop.f32.mrb[207].mxu1  ;;  %3760 = vmatmul.mubr.f32.gmra.mrb[206].mxu1 %v1240_v13  ;;  %v1285_v54 = vld [vmem:[%s19457_s2 + $0xc78] sm:$0xff] }
 0x46e   :  { %3764 = vmatprep.mubr.f32.mxu1 %v1245_v5 }
 0x46f   :  { %11732 = vmatmul.mubr.msk.f32.gmra.mrb[70].mxu0 %vm4664_vm0, %v16484_v49  ;;  %v1253_v49 = vld [vmem:[%s19457_s2 + $0xb78] sm:$0xff] }
 0x470   :  { %v3501_v32 = vpop.f32.mrb[208].mxu1  ;;  %11734 = vmatprep.mubr.msk.f32.mxu0 %vm4664_vm0, %v16493_v17 }
 0x471   :  { %v3502_v28 = vadd.f32 %v3501_v32, %v15820_v43  ;;  %v3503_v30 = vpop.f32.mrb[209].mxu1  ;;  %3765 = vmatmul.mubr.f32.gmra.mrb[208].mxu1 %v1244_v41 }
 0x472   :  { %3769 = vmatprep.mubr.f32.mxu1 %v1249_v23  ;;  %v1289_v23 = vld [vmem:[%s19457_s2 + $0xc98] sm:$0xff] }
 0x473   :  { %11735 = vmatmul.mubr.msk.f32.gmra.mrb[72].mxu0 %vm4664_vm0, %v16502_v21  ;;  %v1257_v21 = vld [vmem:[%s19457_s2 + $0xb98] sm:$0xff] }
 0x474   :  { %v3506_v11 = vpop.f32.mrb[210].mxu1  ;;  %11737 = vmatprep.mubr.msk.f32.mxu0 %vm4664_vm0, %v16511_v26 }
 0x475   :  { %v3507_v43 = vadd.f32 %v3506_v11, %v15827_v56  ;;  %v3508_v17 = vpop.f32.mrb[211].mxu1  ;;  %3770 = vmatmul.mubr.f32.gmra.mrb[210].mxu1 %v1248_v0  ;;  %v1293_v0 = vld [vmem:[%s19457_s2 + $0xcb8] sm:$0xff] }
 0x476   :  { %3774 = vmatprep.mubr.f32.mxu1 %v1253_v49  ;;  %v1297_v17 = vld [vmem:[%s19457_s2 + $0xcd8] sm:$0xff] }
 0x477   :  { %11738 = vmatmul.mubr.msk.f32.gmra.mrb[74].mxu0 %vm4664_vm0, %v16520_v29  ;;  %v1261_v29 = vld [vmem:[%s19457_s2 + $0xbb8] sm:$0xff] }
 0x478   :  { %v3511_v31 = vpop.f32.mrb[212].mxu1  ;;  %11740 = vmatprep.mubr.msk.f32.mxu0 %vm4664_vm0, %v16529_v34 }
 0x479   :  { %v3512_v56 = vadd.f32 %v3511_v31, %v15838_v8  ;;  %v3513_v26 = vpop.f32.mrb[213].mxu1  ;;  %3775 = vmatmul.mubr.f32.gmra.mrb[212].mxu1 %v1252_v33 }
 0x47a   :  { %3779 = vmatprep.mubr.f32.mxu1 %v1257_v21  ;;  %v4619_v26 = vld [vmem:[%s19458_s3 + $0x98] sm:$0xff] }
 0x47b   :  { %11741 = vmatmul.mubr.msk.f32.gmra.mrb[76].mxu0 %vm4664_vm0, %v16538_v37  ;;  %v4614_v37 = vld [vmem:[%s19458_s3 + $0x70] sm:$0xff] }
 0x47c   :  { %v3516_v46 = vpop.f32.mrb[214].mxu1  ;;  %11743 = vmatprep.mubr.msk.f32.mxu0 %vm4664_vm0, %v16547_v42  ;;  %v12821_v51 = vpack.c.bf16 %v4615_v44, %v4614_v37  ;;  %v4621_v37 = vld [vmem:[%s19458_s3 + $0xa8] sm:$0xff]  ;;  %v16940_v44 = vpop.f32.mrb[228].mxu0 }
 0x47d   :  { %v3517_v8 = vadd.f32 %v3516_v46, %v15845_v18  ;;  %v3518_v34 = vpop.f32.mrb[215].mxu1  ;;  %3780 = vmatmul.mubr.f32.gmra.mrb[214].mxu1 %v1256_v36  ;;  %v1265_v18 = vld [vmem:[%s19457_s2 + $0xbd8] sm:$0xff] }
 0x47e   :  { %3784 = vmatprep.mubr.f32.mxu1 %v1261_v29  ;;  %v1300_v34 = vld [vmem:[%s19457_s2 + $0xcf0] sm:$0xff] }
 0x47f   :  { %11744 = vmatmul.mubr.msk.f32.gmra.mrb[78].mxu0 %vm4664_vm0, %v16556_v45  ;;  %v4616_v45 = vld [vmem:[%s19458_s3 + $0x80] sm:$0xff] }
 0x480   :  { %v3521_v42 = vpop.f32.mrb[216].mxu1  ;;  %11754 = vmatprep.mubr.msk.f32.mxu0 %vm4664_vm0, %v16717_v3  ;;  %v16847_v35 = vpack.c.bf16 %v4617_v10, %v4616_v45  ;;  %v1309_v45 = vld [vmem:[%s19457_s2 + $0xd38] sm:$0xff] }
 0x481   :  { %v3522_v59 = vadd.f32 %v3521_v42, %v15856_v39  ;;  %v3523_v15 = vpop.f32.mrb[217].mxu1  ;;  %3785 = vmatmul.mubr.f32.gmra.mrb[216].mxu1 %v1260_v4  ;;  %v1269_v39 = vld [vmem:[%s19457_s2 + $0xbf8] sm:$0xff]  ;;  %v4620_v4 = vld [vmem:[%s19458_s3 + $0xa0] sm:$0xff]  ;;  %v2388_v42 = vpop.f32.mrb[229].mxu0 }
 0x482   :  { %3789 = vmatprep.mubr.f32.mxu1 %v1265_v18  ;;  %v16953_v10 = vpop.f32.mrb[230].mxu0  ;;  %v19551_v42 = vld [vmem:[#allocation24_spill] sm:$0xff] }
 0x483   :  { %11755 = vmatmul.mubr.msk.f32.vlgmr.msra.gmra.mrb[64].mxu0 %vm4664_vm0, %v16737_v16 }
 0x484   :  { %v3526_v3 = vpop.f32.mrb[218].mxu1  ;;  %11757 = vmatprep.mubr.msk.f32.mxu0 %vm4664_vm0, %v16752_v7  ;;  %12820 = vmatpush3.bf16.msra.mxu0 %v16739_v57  ;;  %v1277_v57 = vld [vmem:[%s19457_s2 + $0xc38] sm:$0xff] }
 0x485   :  { %v3527_v52 = vadd.f32 %v3526_v3, %v15863_v58  ;;  %v3528_v24 = vpop.f32.mrb[219].mxu1  ;;  %3790 = vmatmul.mubr.f32.gmra.mrb[218].mxu1 %v1264_v50  ;;  %12822 = vmatprep.subr.bf16.mxu0 %v12821_v51  ;;  %v1281_v7 = vld [vmem:[%s19457_s2 + $0xc58] sm:$0xff]  ;;  %v1304_v50 = vld [vmem:[%s19457_s2 + $0xd10] sm:$0xff] }
 0x486   :  { %3794 = vmatprep.mubr.f32.mxu1 %v1269_v39  ;;  %v1308_v24 = vld [vmem:[%s19457_s2 + $0xd30] sm:$0xff] }
 0x487   :  { %11758 = vmatmul.mubr.msk.f32.gmra.mrb[66].mxu0 %vm4664_vm0, %v16766_v19 }
 0x488   :  { %v3531_v1 = vpop.f32.mrb[220].mxu1  ;;  %11760 = vmatprep.mubr.msk.f32.mxu0 %vm4664_vm0, %v3502_v28  ;;  %12824 = vmatpush3.bf16.msra.mxu0 %v12821_v51  ;;  %v16944_v51 = vpack.c.bf16 %v4621_v37, %v4620_v4  ;;  %v1337_v4 = vld [vmem:[%s19457_s2 + $0xe18] sm:$0xff] }
 0x489   :  { %v3532_v58 = vadd.f32 %v3531_v1, %v15874_v12  ;;  %v3533_v16 = vpop.f32.mrb[221].mxu1  ;;  %3795 = vmatmul.mubr.f32.gmra.mrb[220].mxu1 %v1268_v14  ;;  %12826 = vmatprep.subr.bf16.mxu0 %v16847_v35 }
 0x48a   :  { %3799 = vmatprep.mubr.f32.mxu1 %v1273_v63  ;;  %v1312_v16 = vld [vmem:[%s19457_s2 + $0xd50] sm:$0xff] }
 0x48b   :  { %11761 = vmatmul.mubr.msk.f32.gmra.mrb[68].mxu0 %vm4664_vm0, %v3507_v43 }
 0x48c   :  { %v3536_v9 = vpop.f32.mrb[222].mxu1  ;;  %11763 = vmatprep.mubr.msk.f32.mxu0 %vm4664_vm0, %v3512_v56  ;;  %v4618_v56 = vld [vmem:[%s19458_s3 + $0x90] sm:$0xff] }
 0x48d   :  { %v3537_v12 = vadd.f32 %v3536_v9, %v15887_v47  ;;  %v3538_v25 = vpop.f32.mrb[223].mxu1  ;;  %3800 = vmatmul.mubr.f32.gmra.mrb[222].mxu1 %v1272_v6  ;;  %v1280_v47 = vld [vmem:[%s19457_s2 + $0xc50] sm:$0xff]  ;;  %v1317_v6 = vld [vmem:[%s19457_s2 + $0xd78] sm:$0xff] }
 0x48e   :  { %3804 = vmatprep.mubr.f32.mxu1 %v1277_v57  ;;  %v19546_v25 = vld [vmem:[#allocation17_spill] sm:$0xff] }
 0x48f   :  { %11764 = vmatmul.mubr.msk.f32.gmra.mrb[70].mxu0 %vm4664_vm0, %v3517_v8  ;;  %v12829_v8 = vpack.c.bf16 %v4619_v26, %v4618_v56  ;;  %v1333_v56 = vld [vmem:[%s19457_s2 + $0xdf8] sm:$0xff] }
 0x490   :  { %v3541_v62 = vpop.f32.mrb[224].mxu1  ;;  %11766 = vmatprep.mubr.msk.f32.mxu0 %vm4664_vm0, %v3522_v59 }
 0x491   :  { %v3542_v13 = vadd.f32 %v3541_v62, %v15898_v22  ;;  %v3543_v5 = vpop.f32.mrb[225].mxu1  ;;  %3805 = vmatmul.mubr.f32.gmra.mrb[224].mxu1 %v1276_v20  ;;  %v1284_v22 = vld [vmem:[%s19457_s2 + $0xc70] sm:$0xff]  ;;  %v1321_v62 = vld [vmem:[%s19457_s2 + $0xd98] sm:$0xff] }
 0x492   :  { %3809 = vmatprep.mubr.f32.mxu1 %v1281_v7  ;;  %v1316_v7 = vld [vmem:[%s19457_s2 + $0xd70] sm:$0xff] }
 0x493   :  { %11767 = vmatmul.mubr.msk.f32.gmra.mrb[72].mxu0 %vm4664_vm0, %v3527_v52 }
 0x494   :  { %v3546_v19 = vpop.f32.mrb[226].mxu1  ;;  %11769 = vmatprep.mubr.msk.f32.mxu0 %vm4664_vm0, %v3532_v58 }
 0x495   :  { %v3547_v27 = vadd.f32 %v3546_v19, %v15905_v61  ;;  %v3548_v41 = vpop.f32.mrb[227].mxu1  ;;  %3810 = vmatmul.mubr.f32.gmra.mrb[226].mxu1 %v1280_v47  ;;  %v1288_v61 = vld [vmem:[%s19457_s2 + $0xc90] sm:$0xff] }
 0x496   :  { %3814 = vmatprep.mubr.f32.mxu1 %v1285_v54  ;;  %v19547_v54 = vld [vmem:[#allocation18_spill] sm:$0xff]  ;;  %v1320_v41 = vld [vmem:[%s19457_s2 + $0xd90] sm:$0xff] }
 0x497   :  { %11770 = vmatmul.mubr.msk.f32.gmra.mrb[74].mxu0 %vm4664_vm0, %v3537_v12 }
 0x498   :  { %v3551_v32 = vpop.f32.mrb[228].mxu1  ;;  %11772 = vmatprep.mubr.msk.f32.mxu0 %vm4664_vm0, %v3542_v13 }
 0x499   :  { %v3552_v28 = vadd.f32 %v3551_v32, %v15916_v53  ;;  %v3553_v30 = vpop.f32.mrb[229].mxu1  ;;  %3815 = vmatmul.mubr.f32.gmra.mrb[228].mxu1 %v1284_v22  ;;  %v1292_v53 = vld [vmem:[%s19457_s2 + $0xcb0] sm:$0xff]  ;;  %v1325_v22 = vld [vmem:[%s19457_s2 + $0xdb8] sm:$0xff] }
 0x49a   :  { %3819 = vmatprep.mubr.f32.mxu1 %v1289_v23  ;;  %v19548_v30 = vld [vmem:[#allocation20_spill] sm:$0xff] }
 0x49b   :  { %11773 = vmatmul.mubr.msk.f32.gmra.mrb[76].mxu0 %vm4664_vm0, %v3547_v27 }
 0x49c   :  { %v3556_v49 = vpop.f32.mrb[230].mxu1  ;;  %11775 = vmatprep.mubr.msk.f32.mxu0 %vm4664_vm0, %v3552_v28 }
 0x49d   :  { %v3557_v11 = vadd.f32 %v3556_v49, %v15923_v2  ;;  %v3558_v43 = vpop.f32.mrb[231].mxu1  ;;  %3820 = vmatmul.mubr.f32.gmra.mrb[230].mxu1 %v1288_v61  ;;  %v1296_v2 = vld [vmem:[%s19457_s2 + $0xcd0] sm:$0xff] }
 0x49e   :  { %3824 = vmatprep.mubr.f32.mxu1 %v1293_v0  ;;  %v1324_v49 = vld [vmem:[%s19457_s2 + $0xdb0] sm:$0xff] }
 0x49f   :  { %11776 = vmatmul.mubr.msk.f32.gmra.mrb[78].mxu0 %vm4664_vm0, %v3557_v11  ;;  %v1329_v11 = vld [vmem:[%s19457_s2 + $0xdd8] sm:$0xff] }
 0x4a0   :  { %v3561_v33 = vpop.f32.mrb[232].mxu1 }
 0x4a1   :  { %v3562_v21 = vadd.f32 %v3561_v33, %v15934_v40  ;;  %v3563_v31 = vpop.f32.mrb[233].mxu1  ;;  %3825 = vmatmul.mubr.f32.gmra.mrb[232].mxu1 %v1292_v53  ;;  %v1301_v40 = vld [vmem:[%s19457_s2 + $0xcf8] sm:$0xff] }
 0x4a2   :  { %3829 = vmatprep.mubr.f32.mxu1 %v1297_v17  ;;  %v19549_v33 = vld [vmem:[#allocation21_spill] sm:$0xff] }
 0x4a3   :  { %11786 = vmatprep.mubr.msk.f32.mxu0 %vm4664_vm0, %v3562_v21 }
 0x4a4   :  { %v3566_v36 = vpop.f32.mrb[234].mxu1 }
 0x4a5   :  { %v3567_v29 = vadd.f32 %v3566_v36, %v15941_v60  ;;  %v3568_v46 = vpop.f32.mrb[235].mxu1  ;;  %3830 = vmatmul.mubr.f32.gmra.mrb[234].mxu1 %v1296_v2  ;;  %v1305_v60 = vld [vmem:[%s19457_s2 + $0xd18] sm:$0xff]  ;;  %v1328_v2 = vld [vmem:[%s19457_s2 + $0xdd0] sm:$0xff] }
 0x4a6   :  { %3834 = vmatprep.mubr.f32.mxu1 %v1301_v40 }
 0x4a7   :  { %11787 = vmatmul.mubr.msk.f32.vlgmr.msra.gmra.mrb[64].mxu0 %vm4664_vm0, %v3567_v29  ;;  %v19550_v29 = vld [vmem:[#allocation23_spill] sm:$0xff] }
 0x4a8   :  { %v3571_v18 = vpop.f32.mrb[236].mxu1  ;;  %12828 = vmatpush3.bf16.msra.mxu0 %v16847_v35  ;;  %v1313_v35 = vld [vmem:[%s19457_s2 + $0xd58] sm:$0xff] }
 0x4a9   :  { %v3572_v59 = vadd.f32 %v3571_v18, %v15952_v48  ;;  %v3573_v15 = vpop.f32.mrb[237].mxu1  ;;  %3835 = vmatmul.mubr.f32.gmra.mrb[236].mxu1 %v1300_v34  ;;  %12830 = vmatprep.subr.bf16.mxu0 %v12829_v8  ;;  %v2393_v48 = vpop.f32.mrb[231].mxu0  ;;  %v1332_v34 = vld [vmem:[%s19457_s2 + $0xdf0] sm:$0xff] }
 0x4aa   :  { %3839 = vmatprep.mubr.f32.mxu1 %v1305_v60  ;;  %v16964_v14 = vpop.f32.mrb[232].mxu0 }
 0x4ab   :  { %11789 = vmatprep.mubr.msk.f32.mxu0 %vm4664_vm0, %v3572_v59  ;;  %v2398_v1 = vpop.f32.mrb[233].mxu0 }
 0x4ac   :  { %v3576_v39 = vpop.f32.mrb[238].mxu1  ;;  %12832 = vmatpush3.bf16.msra.mxu0 %v12829_v8  ;;  %v16974_v57 = vpop.f32.mrb[234].mxu0  ;;  %v1345_v1 = vld [vmem:[%s19457_s2 + $0xe58] sm:$0xff] }
 0x4ad   :  { %v3577_v3 = vadd.f32 %v3576_v39, %v15959_v38  ;;  %v3578_v52 = vpop.f32.mrb[239].mxu1  ;;  %3840 = vmatmul.mubr.f32.gmra.mrb[238].mxu1 %v1304_v50  ;;  %12834 = vmatprep.subr.bf16.mxu0 %v16944_v51  ;;  %v2403_v12 = vpop.f32.mrb[235].mxu0  ;;  %v1336_v50 = vld [vmem:[%s19457_s2 + $0xe10] sm:$0xff] }
 0x4ae   :  { %3844 = vmatprep.mubr.f32.mxu1 %v1309_v45  ;;  %v16984_v13 = vpop.f32.mrb[236].mxu0  ;;  %v1341_v45 = vld [vmem:[%s19457_s2 + $0xe38] sm:$0xff] }
 0x4af   :  { %11790 = vmatmul.mubr.msk.f32.gmra.mrb[66].mxu0 %vm4664_vm0, %v3577_v3  ;;  %v2408_v47 = vpop.f32.mrb[237].mxu0  ;;  %v19552_v52 = vld [vmem:[#allocation26_spill] sm:$0xff] }
 0x4b0   :  { %v3581_v63 = vpop.f32.mrb[240].mxu1  ;;  %v16994_v23 = vpop.f32.mrb[238].mxu0 }
 0x4b1   :  { %v3582_v38 = vadd.f32 %v3581_v63, %v15970_v55  ;;  %v3583_v58 = vpop.f32.mrb[241].mxu1  ;;  %3845 = vmatmul.mubr.f32.gmra.mrb[240].mxu1 %v1308_v24  ;;  %v2413_v28 = vpop.f32.mrb[239].mxu0  ;;  %v1340_v63 = vld [vmem:[%s19457_s2 + $0xe30] sm:$0xff] }
 0x4b2   :  { %3849 = vmatprep.mubr.f32.mxu1 %v1313_v35  ;;  %v17004_v43 = vpop.f32.mrb[240].mxu0  ;;  %v19555_v28 = vld [vmem:[#allocation30_spill] sm:$0xff] }
 0x4b3   :  { %11792 = vmatprep.mubr.msk.f32.mxu0 %vm4664_vm0, %v3582_v38  ;;  %v2418_v17 = vpop.f32.mrb[241].mxu0 }
 0x4b4   :  { %v3586_v9 = vpop.f32.mrb[242].mxu1  ;;  %v17014_v26 = vpop.f32.mrb[242].mxu0 }
 0x4b5   :  { %v3587_v20 = vadd.f32 %v3586_v9, %v19546_v25  ;;  %v3588_v55 = vpop.f32.mrb[243].mxu1  ;;  %3850 = vmatmul.mubr.f32.gmra.mrb[242].mxu1 %v1312_v16  ;;  %v2423_v36 = vpop.f32.mrb[243].mxu0  ;;  %v1344_v25 = vld [vmem:[%s19457_s2 + $0xe50] sm:$0xff] }
 0x4b6   :  { %3854 = vmatprep.mubr.f32.mxu1 %v1317_v6  ;;  %v17024_v37 = vpop.f32.mrb[244].mxu0  ;;  %v19553_v6 = vld [vmem:[#allocation27_spill] sm:$0xff] }
 0x4b7   :  { %11793 = vmatmul.mubr.msk.f32.gmra.mrb[68].mxu0 %vm4664_vm0, %v3587_v20  ;;  %v2428_v18 = vpop.f32.mrb[245].mxu0  ;;  %v1349_v20 = vld [vmem:[%s19457_s2 + $0xe78] sm:$0xff] }
 0x4b8   :  { %v3591_v5 = vpop.f32.mrb[244].mxu1  ;;  %v17034_v39 = vpop.f32.mrb[246].mxu0  ;;  %v4623_v18 = vld [vmem:[%s19458_s3 + $0xb8] sm:$0xff] }
 0x4b9   :  { %v3592_v19 = vadd.f32 %v3591_v5, %v19547_v54  ;;  %v3593_v27 = vpop.f32.mrb[245].mxu1  ;;  %3855 = vmatmul.mubr.f32.gmra.mrb[244].mxu1 %v1316_v7  ;;  %v2433_v3 = vpop.f32.mrb[247].mxu0  ;;  %v19554_v5 = vld [vmem:[#allocation29_spill] sm:$0xff] }
 0x4ba   :  { %3859 = vmatprep.mubr.f32.mxu1 %v1321_v62  ;;  %v17044_v38 = vpop.f32.mrb[248].mxu0  ;;  %v1353_v27 = vld [vmem:[%s19457_s2 + $0xe98] sm:$0xff] }
 0x4bb   :  { %11795 = vmatprep.mubr.msk.f32.mxu0 %vm4664_vm0, %v3592_v19  ;;  %v2438_v16 = vpop.f32.mrb[249].mxu0  ;;  %v1348_v19 = vld [vmem:[%s19457_s2 + $0xe70] sm:$0xff] }
 0x4bc   :  { %v3596_v32 = vpop.f32.mrb[246].mxu1  ;;  %v17054_v55 = vpop.f32.mrb[250].mxu0 }
 0x4bd   :  { %v3597_v61 = vadd.f32 %v3596_v32, %v19548_v30  ;;  %v3598_v0 = vpop.f32.mrb[247].mxu1  ;;  %3860 = vmatmul.mubr.f32.gmra.mrb[246].mxu1 %v1320_v41  ;;  %v2443_v62 = vpop.f32.mrb[251].mxu0 }
 0x4be   :  { %3864 = vmatprep.mubr.f32.mxu1 %v1325_v22  ;;  %v17064_v41 = vpop.f32.mrb[252].mxu0  ;;  %v1352_v0 = vld [vmem:[%s19457_s2 + $0xe90] sm:$0xff]  ;;  %v1373_v62 = vld [vmem:[%s19457_s2 + $0xf38] sm:$0xff] }
 0x4bf   :  { %11796 = vmatmul.mubr.msk.f32.gmra.mrb[70].mxu0 %vm4664_vm0, %v3597_v61  ;;  %v2448_v32 = vpop.f32.mrb[253].mxu0 }
 0x4c0   :  { %v3601_v53 = vpop.f32.mrb[248].mxu1  ;;  %v1377_v32 = vld [vmem:[%s19457_s2 + $0xf58] sm:$0xff] }
 0x4c1   :  { %v3602_v21 = vadd.f32 %v3601_v53, %v19549_v33  ;;  %v3603_v31 = vpop.f32.mrb[249].mxu1  ;;  %3865 = vmatmul.mubr.f32.gmra.mrb[248].mxu1 %v1324_v49  ;;  %v1357_v49 = vld [vmem:[%s19457_s2 + $0xeb8] sm:$0xff]  ;;  %v19556_v33 = vld [vmem:[#allocation32_spill] sm:$0xff] }
 0x4c2   :  { %3869 = vmatprep.mubr.f32.mxu1 %v1329_v11  ;;  %v17074_v11 = vpop.f32.mrb[254].mxu0 }
 0x4c3   :  { %11798 = vmatprep.mubr.msk.f32.mxu0 %vm4664_vm0, %v3602_v21  ;;  %v2453_v17 = vpop.f32.mrb[255].mxu0 }
 0x4c4   :  { %v3606_v40 = vpop.f32.mrb[250].mxu1  ;;  %v1376_v17 = vld [vmem:[%s19457_s2 + $0xf50] sm:$0xff] }
 0x4c5   :  { %v3607_v46 = vadd.f32 %v3606_v40, %v19550_v29  ;;  %v3608_v8 = vpop.f32.mrb[251].mxu1  ;;  %3870 = vmatmul.mubr.f32.gmra.mrb[250].mxu1 %v1328_v2  ;;  %v1356_v2 = vld [vmem:[%s19457_s2 + $0xeb0] sm:$0xff]  ;;  %v17084_v40 = vpop.f32.mrb[0].mxu0 }
 0x4c6   :  { %3874 = vmatprep.mubr.f32.mxu1 %v1333_v56  ;;  %v1361_v56 = vld [vmem:[%s19457_s2 + $0xed8] sm:$0xff]  ;;  %v2458_v29 = vpop.f32.mrb[1].mxu0 }
 0x4c7   :  { %11799 = vmatmul.mubr.msk.f32.gmra.mrb[72].mxu0 %vm4664_vm0, %v3607_v46  ;;  %v19557_v46 = vld [vmem:[#allocation33_spill] sm:$0xff] }
 0x4c8   :  { %v3611_v60 = vpop.f32.mrb[252].mxu1 }
 0x4c9   :  { %v3612_v59 = vadd.f32 %v3611_v60, %v19551_v42  ;;  %v3613_v15 = vpop.f32.mrb[253].mxu1  ;;  %3875 = vmatmul.mubr.f32.gmra.mrb[252].mxu1 %v1332_v34  ;;  %v4622_v60 = vld [vmem:[%s19458_s3 + $0xb0] sm:$0xff]  ;;  %v1365_v42 = vld [vmem:[%s19457_s2 + $0xef8] sm:$0xff] }
 0x4ca   :  { %3879 = vmatprep.mubr.f32.mxu1 %v1337_v4  ;;  %v1360_v4 = vld [vmem:[%s19457_s2 + $0xed0] sm:$0xff] }
 0x4cb   :  { %11801 = vmatprep.mubr.msk.f32.mxu0 %vm4664_vm0, %v3612_v59  ;;  %v17100_v59 = vpop.f32.mrb[2].mxu0 }
 0x4cc   :  { %v3616_v48 = vpop.f32.mrb[254].mxu1 }
 0x4cd   :  { %v3617_v24 = vadd.f32 %v3616_v48, %v19552_v52  ;;  %v3618_v35 = vpop.f32.mrb[255].mxu1  ;;  %3880 = vmatmul.mubr.f32.gmra.mrb[254].mxu1 %v1336_v50  ;;  %v2463_v50 = vpop.f32.mrb[3].mxu0  ;;  %v12837_v52 = vpack.c.bf16 %v4623_v18, %v4622_v60  ;;  %v19563_v18 = vld [vmem:[#allocation42_spill] sm:$0xff] }
 0x4ce   :  { %3884 = vmatprep.mubr.f32.mxu1 %v1341_v45  ;;  %v19558_v45 = vld [vmem:[#allocation35_spill] sm:$0xff]  ;;  %v1384_v50 = vld [vmem:[%s19457_s2 + $0xf90] sm:$0xff] }
 0x4cf   :  { %11802 = vmatmul.mubr.msk.f32.gmra.mrb[74].mxu0 %vm4664_vm0, %v3617_v24  ;;  %v1364_v24 = vld [vmem:[%s19457_s2 + $0xef0] sm:$0xff]  ;;  %v4624_v35 = vld [vmem:[%s19458_s3 + $0xc0] sm:$0xff] }
 0x4d0   :  { %v3621_v58 = vpop.f32.mrb[150].mxu1 }
 0x4d1   :  { %v3622_v9 = vadd.f32 %v3621_v58, %v19553_v6  ;;  %v3623_v12 = vpop.f32.mrb[151].mxu1  ;;  %3885 = vmatmul.mubr.f32.gmra.mrb[150].mxu1 %v1340_v63  ;;  %v4625_v63 = vld [vmem:[%s19458_s3 + $0xc8] sm:$0xff]  ;;  %v17116_v58 = vpop.f32.mrb[4].mxu0 }
 0x4d2   :  { %3889 = vmatprep.mubr.f32.mxu1 %v1345_v1  ;;  %v1369_v1 = vld [vmem:[%s19457_s2 + $0xf18] sm:$0xff]  ;;  %v2468_v6 = vpop.f32.mrb[5].mxu0 }
 0x4d3   :  { %11804 = vmatprep.mubr.msk.f32.mxu0 %vm4664_vm0, %v3622_v9  ;;  %v19559_v9 = vld [vmem:[#allocation36_spill] sm:$0xff] }
 0x4d4   :  { %v3626_v7 = vpop.f32.mrb[152].mxu1 }
 0x4d5   :  { %v3627_v47 = vadd.f32 %v3626_v7, %v19554_v5  ;;  %v3628_v54 = vpop.f32.mrb[153].mxu1  ;;  %3890 = vmatmul.mubr.f32.gmra.mrb[152].mxu1 %v1344_v25  ;;  %v1368_v7 = vld [vmem:[%s19457_s2 + $0xf10] sm:$0xff] }
 0x4d6   :  { %3894 = vmatprep.mubr.f32.mxu1 %v1349_v20  ;;  %v17120_v20 = vpack.c.bf16 %v4625_v63, %v4624_v35  ;;  %v19560_v54 = vld [vmem:[#allocation38_spill] sm:$0xff] }
 0x4d7   :  { %11805 = vmatmul.mubr.msk.f32.gmra.mrb[76].mxu0 %vm4664_vm0, %v3627_v47 }
 0x4d8   :  { %v3631_v22 = vpop.f32.mrb[154].mxu1 }
 0x4d9   :  { %v3632_v30 = vadd.f32 %v3631_v22, %v19555_v28  ;;  %v3633_v61 = vpop.f32.mrb[155].mxu1  ;;  %3895 = vmatmul.mubr.f32.gmra.mrb[154].mxu1 %v1348_v19  ;;  %v1372_v22 = vld [vmem:[%s19457_s2 + $0xf30] sm:$0xff] }
 0x4da   :  { %3899 = vmatprep.mubr.f32.mxu1 %v1353_v27 }
 0x4db   :  { %11807 = vmatprep.mubr.msk.f32.mxu0 %vm4664_vm0, %v3632_v30 }
 0x4dc   :  { %v3636_v53 = vpop.f32.mrb[156].mxu1 }
 0x4dd   :  { %v3637_v21 = vadd.f32 %v3636_v53, %v19556_v33  ;;  %v3638_v31 = vpop.f32.mrb[157].mxu1  ;;  %3900 = vmatmul.mubr.f32.gmra.mrb[156].mxu1 %v1352_v0  ;;  %v19561_v0 = vld [vmem:[#allocation39_spill] sm:$0xff]  ;;  %v1381_v33 = vld [vmem:[%s19457_s2 + $0xf78] sm:$0xff] }
 0x4de   :  { %3904 = vmatprep.mubr.f32.mxu1 %v1357_v49 }
 0x4df   :  { %11808 = vmatmul.mubr.msk.f32.gmra.mrb[78].mxu0 %vm4664_vm0, %v3637_v21 }
 0x4e0   :  { %v3641_v36 = vpop.f32.mrb[158].mxu1 }
 0x4e1   :  { %v3642_v8 = vadd.f32 %v3641_v36, %v19557_v46  ;;  %v3643_v34 = vpop.f32.mrb[159].mxu1  ;;  %3905 = vmatmul.mubr.f32.gmra.mrb[158].mxu1 %v1356_v2  ;;  %v1380_v46 = vld [vmem:[%s19457_s2 + $0xf70] sm:$0xff] }
 0x4e2   :  { %3909 = vmatprep.mubr.f32.mxu1 %v1361_v56  ;;  %v19562_v56 = vld [vmem:[#allocation41_spill] sm:$0xff] }
 0x4e3   :  { %11818 = vmatprep.mubr.msk.f32.mxu0 %vm4664_vm0, %v3642_v8  ;;  %v1385_v8 = vld [vmem:[%s19457_s2 + $0xf98] sm:$0xff] }
 0x4e4   :  { %v3646_v15 = vpop.f32.mrb[160].mxu1 }
 0x4e5   :  { %v3647_v48 = vadd.f32 %v3646_v15, %v19558_v45  ;;  %v3648_v3 = vpop.f32.mrb[161].mxu1  ;;  %3910 = vmatmul.mubr.f32.gmra.mrb[160].mxu1 %v1360_v4  ;;  %v1389_v45 = vld [vmem:[%s19457_s2 + $0xfb8] sm:$0xff] }
 0x4e6   :  { %3914 = vmatprep.mubr.f32.mxu1 %v1365_v42 }
 0x4e7   :  { %11819 = vmatmul.mubr.msk.f32.vlgmr.msra.gmra.mrb[64].mxu0 %vm4664_vm0, %v3647_v48 }
 0x4e8   :  { %v3651_v16 = vpop.f32.mrb[162].mxu1  ;;  %12836 = vmatpush3.bf16.msra.mxu0 %v16944_v51  ;;  %v17129_v51 = vpop.f32.mrb[6].mxu0 }
 0x4e9   :  { %v3652_v12 = vadd.f32 %v3651_v16, %v19559_v9  ;;  %v3653_v25 = vpop.f32.mrb[163].mxu1  ;;  %3915 = vmatmul.mubr.f32.gmra.mrb[162].mxu1 %v1364_v24  ;;  %12838 = vmatprep.subr.bf16.mxu0 %v12837_v52  ;;  %v2473_v47 = vpop.f32.mrb[7].mxu0  ;;  %v19564_v24 = vld [vmem:[#allocation44_spill] sm:$0xff]  ;;  %v1393_v16 = vld [vmem:[%s19457_s2 + $0xfd8] sm:$0xff] }
 0x4ea   :  { %3919 = vmatprep.mubr.f32.mxu1 %v1369_v1  ;;  %v17140_v28 = vpop.f32.mrb[8].mxu0  ;;  %v1388_v1 = vld [vmem:[%s19457_s2 + $0xfb0] sm:$0xff]  ;;  %v1397_v47 = vld [vmem:[%s19457_s2 + $0xff8] sm:$0xff] }
 0x4eb   :  { %11821 = vmatprep.mubr.msk.f32.mxu0 %vm4664_vm0, %v3652_v12  ;;  %v2478_v61 = vpop.f32.mrb[9].mxu0  ;;  %v19565_v25 = vld [vmem:[#allocation45_spill] sm:$0xff] }
 0x4ec   :  { %v3656_v5 = vpop.f32.mrb[164].mxu1  ;;  %12840 = vmatpush3.bf16.msra.mxu0 %v12837_v52  ;;  %v17150_v21 = vpop.f32.mrb[10].mxu0  ;;  %v1396_v61 = vld [vmem:[%s19457_s2 + $0xff0] sm:$0xff] }
 0x4ed   :  { %v3657_v19 = vadd.f32 %v3656_v5, %v19560_v54  ;;  %v3658_v27 = vpop.f32.mrb[165].mxu1  ;;  %3920 = vmatmul.mubr.f32.gmra.mrb[164].mxu1 %v1368_v7  ;;  %12842 = vmatprep.subr.bf16.mxu0 %v17120_v20  ;;  %v2483_v2 = vpop.f32.mrb[11].mxu0  ;;  %v1392_v5 = vld [vmem:[%s19457_s2 + $0xfd0] sm:$0xff] }
 0x4ee   :  { %3924 = vmatprep.mubr.f32.mxu1 %v1373_v62  ;;  %v17160_v34 = vpop.f32.mrb[12].mxu0 }
 0x4ef   :  { %11822 = vmatmul.mubr.msk.f32.gmra.mrb[66].mxu0 %vm4664_vm0, %v3657_v19  ;;  %v2488_v60 = vpop.f32.mrb[13].mxu0 }
 0x4f0   :  { %v3661_v30 = vpop.f32.mrb[166].mxu1  ;;  %v17170_v48 = vpop.f32.mrb[14].mxu0 }
 0x4f1   :  { %v3662_v49 = vadd.f32 %v3661_v30, %v19561_v0  ;;  %v3663_v53 = vpop.f32.mrb[167].mxu1  ;;  %3925 = vmatmul.mubr.f32.gmra.mrb[166].mxu1 %v1372_v22  ;;  %v2493_v52 = vpop.f32.mrb[15].mxu0  ;;  %v19566_v22 = vld [vmem:[#allocation47_spill] sm:$0xff]  ;;  %v1401_v0 = vld [vmem:[%s19457_s2 + $0x1018] sm:$0xff] }
 0x4f2   :  { %3929 = vmatprep.mubr.f32.mxu1 %v1377_v32  ;;  %v17180_v6 = vpop.f32.mrb[16].mxu0  ;;  %v19569_v52 = vld [vmem:[#allocation52_spill] sm:$0xff] }
 0x4f3   :  { %11824 = vmatprep.mubr.msk.f32.mxu0 %vm4664_vm0, %v3662_v49  ;;  %v2498_v12 = vpop.f32.mrb[17].mxu0 }
 0x4f4   :  { %v3666_v31 = vpop.f32.mrb[168].mxu1  ;;  %v17190_v54 = vpop.f32.mrb[18].mxu0 }
 0x4f5   :  { %v3667_v36 = vadd.f32 %v3666_v31, %v19562_v56  ;;  %v3668_v29 = vpop.f32.mrb[169].mxu1  ;;  %3930 = vmatmul.mubr.f32.gmra.mrb[168].mxu1 %v1376_v17  ;;  %v2503_v27 = vpop.f32.mrb[19].mxu0  ;;  %v1400_v56 = vld [vmem:[%s19457_s2 + $0x1010] sm:$0xff] }
 0x4f6   :  { %3934 = vmatprep.mubr.f32.mxu1 %v1381_v33  ;;  %v17200_v49 = vpop.f32.mrb[20].mxu0  ;;  %v19567_v33 = vld [vmem:[#allocation48_spill] sm:$0xff] }
 0x4f7   :  { %11825 = vmatmul.mubr.msk.f32.gmra.mrb[68].mxu0 %vm4664_vm0, %v3667_v36  ;;  %v2508_v17 = vpop.f32.mrb[21].mxu0  ;;  %v1405_v36 = vld [vmem:[%s19457_s2 + $0x1038] sm:$0xff] }
 0x4f8   :  { %v3671_v4 = vpop.f32.mrb[170].mxu1  ;;  %v17210_v29 = vpop.f32.mrb[22].mxu0 }
 0x4f9   :  { %v3672_v42 = vadd.f32 %v3671_v4, %v19563_v18  ;;  %v3673_v15 = vpop.f32.mrb[171].mxu1  ;;  %3935 = vmatmul.mubr.f32.gmra.mrb[170].mxu1 %v1380_v46  ;;  %v19568_v4 = vld [vmem:[#allocation50_spill] sm:$0xff] }
 0x4fa   :  { %3939 = vmatprep.mubr.f32.mxu1 %v1385_v8  ;;  %v2513_v8 = vpop.f32.mrb[23].mxu0  ;;  %v1409_v15 = vld [vmem:[%s19457_s2 + $0x1058] sm:$0xff] }
 0x4fb   :  { %11827 = vmatprep.mubr.msk.f32.mxu0 %vm4664_vm0, %v3672_v42  ;;  %v1404_v42 = vld [vmem:[%s19457_s2 + $0x1030] sm:$0xff]  ;;  %v1425_v8 = vld [vmem:[%s19457_s2 + $0x10d8] sm:$0xff] }
 0x4fc   :  { %v3676_v3 = vpop.f32.mrb[172].mxu1 }
 0x4fd   :  { %v3677_v35 = vadd.f32 %v3676_v3, %v19564_v24  ;;  %v3678_v63 = vpop.f32.mrb[173].mxu1  ;;  %3940 = vmatmul.mubr.f32.gmra.mrb[172].mxu1 %v1384_v50  ;;  %v17220_v50 = vpop.f32.mrb[24].mxu0 }
 0x4fe   :  { %3944 = vmatprep.mubr.f32.mxu1 %v1389_v45  ;;  %v2518_v3 = vpop.f32.mrb[25].mxu0  ;;  %v1408_v63 = vld [vmem:[%s19457_s2 + $0x1050] sm:$0xff] }
 0x4ff   :  { %11828 = vmatmul.mubr.msk.f32.gmra.mrb[70].mxu0 %vm4664_vm0, %v3677_v35  ;;  %v1424_v3 = vld [vmem:[%s19457_s2 + $0x10d0] sm:$0xff] }
 0x500   :  { %v3681_v9 = vpop.f32.mrb[174].mxu1 }
 0x501   :  { %v3682_v7 = vadd.f32 %v3681_v9, %v19565_v25  ;;  %v3683_v62 = vpop.f32.mrb[175].mxu1  ;;  %3945 = vmatmul.mubr.f32.gmra.mrb[174].mxu1 %v1388_v1  ;;  %v1413_v1 = vld [vmem:[%s19457_s2 + $0x1078] sm:$0xff] }
 0x502   :  { %3949 = vmatprep.mubr.f32.mxu1 %v1393_v16  ;;  %v17230_v16 = vpop.f32.mrb[26].mxu0  ;;  %v19570_v25 = vld [vmem:[#allocation54_spill] sm:$0xff] }
 0x503   :  { %11830 = vmatprep.mubr.msk.f32.mxu0 %vm4664_vm0, %v3682_v7  ;;  %v2523_v12 = vpop.f32.mrb[27].mxu0 }
 0x504   :  { %v3686_v19 = vpop.f32.mrb[176].mxu1  ;;  %v19574_v12 = vld [vmem:[#allocation62_spill] sm:$0xff] }
 0x505   :  { %v3687_v32 = vadd.f32 %v3686_v19, %v19566_v22  ;;  %v3688_v30 = vpop.f32.mrb[177].mxu1  ;;  %3950 = vmatmul.mubr.f32.gmra.mrb[176].mxu1 %v1392_v5  ;;  %v1412_v5 = vld [vmem:[%s19457_s2 + $0x1070] sm:$0xff]  ;;  %v17240_v19 = vpop.f32.mrb[28].mxu0 }
 0x506   :  { %3954 = vmatprep.mubr.f32.mxu1 %v1397_v47  ;;  %v1417_v47 = vld [vmem:[%s19457_s2 + $0x1098] sm:$0xff]  ;;  %v2528_v22 = vpop.f32.mrb[29].mxu0 }
 0x507   :  { %11831 = vmatmul.mubr.msk.f32.gmra.mrb[72].mxu0 %vm4664_vm0, %v3687_v32  ;;  %v19571_v32 = vld [vmem:[#allocation56_spill] sm:$0xff]  ;;  %v17250_v17 = vpop.f32.mrb[30].mxu0  ;;  %v1433_v22 = vld [vmem:[%s19457_s2 + $0x1118] sm:$0xff] }
 0x508   :  { %v3691_v53 = vpop.f32.mrb[178].mxu1 }
 0x509   :  { %v3692_v31 = vadd.f32 %v3691_v53, %v19567_v33  ;;  %v3693_v2 = vpop.f32.mrb[179].mxu1  ;;  %3955 = vmatmul.mubr.f32.gmra.mrb[178].mxu1 %v1396_v61  ;;  %v1421_v53 = vld [vmem:[%s19457_s2 + $0x10b8] sm:$0xff] }
 0x50a   :  { %3959 = vmatprep.mubr.f32.mxu1 %v1401_v0  ;;  %v1416_v0 = vld [vmem:[%s19457_s2 + $0x1090] sm:$0xff]  ;;  %v19572_v2 = vld [vmem:[#allocation58_spill] sm:$0xff] }
 0x50b   :  { %11833 = vmatprep.mubr.msk.f32.mxu0 %vm4664_vm0, %v3692_v31  ;;  %v2533_v31 = vpop.f32.mrb[31].mxu0 }
 0x50c   :  { %v3696_v46 = vpop.f32.mrb[180].mxu1  ;;  %v1432_v31 = vld [vmem:[%s19457_s2 + $0x1110] sm:$0xff] }
 0x50d   :  { %v3697_v60 = vadd.f32 %v3696_v46, %v19568_v4  ;;  %v3698_v18 = vpop.f32.mrb[181].mxu1  ;;  %3960 = vmatmul.mubr.f32.gmra.mrb[180].mxu1 %v1400_v56  ;;  %v1420_v46 = vld [vmem:[%s19457_s2 + $0x10b0] sm:$0xff]  ;;  %v17260_v4 = vpop.f32.mrb[32].mxu0 }
 0x50e   :  { %3964 = vmatprep.mubr.f32.mxu1 %v1405_v36  ;;  %v2538_v18 = vpop.f32.mrb[33].mxu0 }
 0x50f   :  { %11834 = vmatmul.mubr.msk.f32.gmra.mrb[74].mxu0 %vm4664_vm0, %v3697_v60 }
 0x510   :  { %v3701_v45 = vpop.f32.mrb[182].mxu1 }
 0x511   :  { %v3702_v24 = vadd.f32 %v3701_v45, %v19569_v52  ;;  %v3703_v35 = vpop.f32.mrb[183].mxu1  ;;  %3965 = vmatmul.mubr.f32.gmra.mrb[182].mxu1 %v1404_v42  ;;  %v19573_v42 = vld [vmem:[#allocation60_spill] sm:$0xff] }
 0x512   :  { %3969 = vmatprep.mubr.f32.mxu1 %v1409_v15  ;;  %v4626_v52 = vld [vmem:[%s19458_s3 + $0xd0] sm:$0xff]  ;;  %v1429_v35 = vld [vmem:[%s19457_s2 + $0x10f8] sm:$0xff] }
 0x513   :  { %11836 = vmatprep.mubr.msk.f32.mxu0 %vm4664_vm0, %v3702_v24  ;;  %v4627_v24 = vld [vmem:[%s19458_s3 + $0xd8] sm:$0xff] }
 0x514   :  { %v3706_v9 = vpop.f32.mrb[184].mxu1 }
 0x515   :  { %v3707_v7 = vadd.f32 %v3706_v9, %v19570_v25  ;;  %v3708_v62 = vpop.f32.mrb[185].mxu1  ;;  %3970 = vmatmul.mubr.f32.gmra.mrb[184].mxu1 %v1408_v63  ;;  %v17276_v63 = vpop.f32.mrb[34].mxu0 }
 0x516   :  { %3974 = vmatprep.mubr.f32.mxu1 %v1413_v1  ;;  %v2543_v9 = vpop.f32.mrb[35].mxu0  ;;  %v12845_v62 = vpack.c.bf16 %v4627_v24, %v4626_v52  ;;  %v1445_v52 = vld [vmem:[%s19457_s2 + $0x1178] sm:$0xff] }
 0x517   :  { %11837 = vmatmul.mubr.msk.f32.gmra.mrb[76].mxu0 %vm4664_vm0, %v3707_v7 }
 0x518   :  { %v3711_v27 = vpop.f32.mrb[186].mxu1 }
 0x519   :  { %v3712_v30 = vadd.f32 %v3711_v27, %v19571_v32  ;;  %v3713_v61 = vpop.f32.mrb[187].mxu1  ;;  %3975 = vmatmul.mubr.f32.gmra.mrb[186].mxu1 %v1412_v5  ;;  %v1428_v5 = vld [vmem:[%s19457_s2 + $0x10f0] sm:$0xff]  ;;  %v4629_v27 = vld [vmem:[%s19458_s3 + $0xe8] sm:$0xff]  ;;  %v17292_v32 = vpop.f32.mrb[36].mxu0 }
 0x51a   :  { %3979 = vmatprep.mubr.f32.mxu1 %v1417_v47  ;;  %v4628_v47 = vld [vmem:[%s19458_s3 + $0xe0] sm:$0xff]  ;;  %v2548_v61 = vpop.f32.mrb[37].mxu0 }
 0x51b   :  { %11839 = vmatprep.mubr.msk.f32.mxu0 %vm4664_vm0, %v3712_v30 }
 0x51c   :  { %v3716_v33 = vpop.f32.mrb[188].mxu1 }
 0x51d   :  { %v3717_v56 = vadd.f32 %v3716_v33, %v19572_v2  ;;  %v3718_v36 = vpop.f32.mrb[189].mxu1  ;;  %3980 = vmatmul.mubr.f32.gmra.mrb[188].mxu1 %v1416_v0  ;;  %v17296_v33 = vpack.c.bf16 %v4629_v27, %v4628_v47  ;;  %v1437_v2 = vld [vmem:[%s19457_s2 + $0x1138] sm:$0xff]  ;;  %v1448_v27 = vld [vmem:[%s19457_s2 + $0x1190] sm:$0xff] }
 0x51e   :  { %3984 = vmatprep.mubr.f32.mxu1 %v1421_v53 }
 0x51f   :  { %11840 = vmatmul.mubr.msk.f32.gmra.mrb[78].mxu0 %vm4664_vm0, %v3717_v56 }
 0x520   :  { %v3721_v60 = vpop.f32.mrb[190].mxu1 }
 0x521   :  { %v3722_v15 = vadd.f32 %v3721_v60, %v19573_v42  ;;  %v3723_v45 = vpop.f32.mrb[191].mxu1  ;;  %3985 = vmatmul.mubr.f32.gmra.mrb[190].mxu1 %v1420_v46  ;;  %v1441_v60 = vld [vmem:[%s19457_s2 + $0x1158] sm:$0xff] }
 0x522   :  { %3989 = vmatprep.mubr.f32.mxu1 %v1425_v8  ;;  %v1436_v8 = vld [vmem:[%s19457_s2 + $0x1130] sm:$0xff] }
 0x523   :  { %11850 = vmatprep.mubr.msk.f32.mxu0 %vm4664_vm0, %v3722_v15 }
 0x524   :  { %v3726_v1 = vpop.f32.mrb[192].mxu1 }
 0x525   :  { %v3727_v25 = vadd.f32 %v3726_v1, %v19574_v12  ;;  %v3728_v7 = vpop.f32.mrb[193].mxu1  ;;  %3990 = vmatmul.mubr.f32.gmra.mrb[192].mxu1 %v1424_v3  ;;  %v1440_v3 = vld [vmem:[%s19457_s2 + $0x1150] sm:$0xff] }
 0x526   :  { %3994 = vmatprep.mubr.f32.mxu1 %v1429_v35  ;;  %v1444_v12 = vld [vmem:[%s19457_s2 + $0x1170] sm:$0xff] }
 0x527   :  { %11851 = vmatmul.mubr.msk.f32.vlgmr.msra.gmra.mrb[64].mxu0 %vm4664_vm0, %v3727_v25  ;;  %v1449_v25 = vld [vmem:[%s19457_s2 + $0x1198] sm:$0xff] }
 0x528   :  { %v3731_v30 = vpop.f32.mrb[194].mxu1  ;;  %12844 = vmatpush3.bf16.msra.mxu0 %v17120_v20  ;;  %v17305_v20 = vpop.f32.mrb[38].mxu0 }
 0x529   :  { %v3732_v0 = vadd.f32 %v3731_v30, %v16940_v44  ;;  %v3733_v53 = vpop.f32.mrb[195].mxu1  ;;  %3995 = vmatmul.mubr.f32.gmra.mrb[0].mxu1 %v1428_v5  ;;  %12846 = vmatprep.subr.bf16.mxu0 %v12845_v62  ;;  %v2553_v44 = vpop.f32.mrb[39].mxu0 }
 0x52a   :  { %3999 = vmatprep.mubr.f32.mxu1 %v1433_v22  ;;  %v17316_v18 = vpop.f32.mrb[40].mxu0  ;;  %v1453_v22 = vld [vmem:[%s19457_s2 + $0x11b8] sm:$0xff] }
 0x52b   :  { %11853 = vmatprep.mubr.msk.f32.mxu0 %vm4664_vm0, %v3732_v0  ;;  %v2558_v15 = vpop.f32.mrb[41].mxu0 }
 0x52c   :  { %v3736_v56 = vpop.f32.mrb[196].mxu1  ;;  %12848 = vmatpush3.bf16.msra.mxu0 %v12845_v62  ;;  %v17326_v24 = vpop.f32.mrb[42].mxu0 }
 0x52d   :  { %v3737_v36 = vadd.f32 %v3736_v56, %v16953_v10  ;;  %v3738_v46 = vpop.f32.mrb[197].mxu1  ;;  %4000 = vmatmul.mubr.f32.gmra.mrb[2].mxu1 %v1432_v31  ;;  %12850 = vmatprep.subr.bf16.mxu0 %v17296_v33  ;;  %v2563_v1 = vpop.f32.mrb[43].mxu0  ;;  %v1452_v31 = vld [vmem:[%s19457_s2 + $0x11b0] sm:$0xff] }
 0x52e   :  { %4004 = vmatprep.mubr.f32.mxu1 %v1437_v2  ;;  %v17336_v7 = vpop.f32.mrb[44].mxu0  ;;  %v1457_v2 = vld [vmem:[%s19457_s2 + $0x11d8] sm:$0xff] }
 0x52f   :  { %11854 = vmatmul.mubr.msk.f32.gmra.mrb[66].mxu0 %vm4664_vm0, %v3737_v36  ;;  %v2568_v5 = vpop.f32.mrb[45].mxu0 }
 0x530   :  { %v3741_v42 = vpop.f32.mrb[198].mxu1  ;;  %v17346_v30 = vpop.f32.mrb[46].mxu0 }
 0x531   :  { %v3742_v10 = vadd.f32 %v3741_v42, %v16964_v14  ;;  %v3743_v45 = vpop.f32.mrb[199].mxu1  ;;  %4005 = vmatmul.mubr.f32.gmra.mrb[4].mxu1 %v1436_v8  ;;  %v2573_v0 = vpop.f32.mrb[47].mxu0  ;;  %v1456_v8 = vld [vmem:[%s19457_s2 + $0x11d0] sm:$0xff] }
 0x532   :  { %4009 = vmatprep.mubr.f32.mxu1 %v1441_v60  ;;  %v17356_v56 = vpop.f32.mrb[48].mxu0  ;;  %v1461_v60 = vld [vmem:[%s19457_s2 + $0x11f8] sm:$0xff] }
 0x533   :  { %11856 = vmatprep.mubr.msk.f32.mxu0 %vm4664_vm0, %v3742_v10  ;;  %v2578_v36 = vpop.f32.mrb[49].mxu0 }
 0x534   :  { %v3746_v35 = vpop.f32.mrb[200].mxu1  ;;  %v17366_v42 = vpop.f32.mrb[50].mxu0 }
 0x535   :  { %v3747_v9 = vadd.f32 %v3746_v35, %v16974_v57  ;;  %v3748_v14 = vpop.f32.mrb[201].mxu1  ;;  %4010 = vmatmul.mubr.f32.gmra.mrb[6].mxu1 %v1440_v3  ;;  %v2583_v10 = vpop.f32.mrb[51].mxu0  ;;  %v1460_v3 = vld [vmem:[%s19457_s2 + $0x11f0] sm:$0xff] }
 0x536   :  { %4014 = vmatprep.mubr.f32.mxu1 %v1445_v52  ;;  %v1465_v52 = vld [vmem:[%s19457_s2 + $0x1218] sm:$0xff]  ;;  %v17376_v35 = vpop.f32.mrb[52].mxu0 }
 0x537   :  { %11857 = vmatmul.mubr.msk.f32.gmra.mrb[68].mxu0 %vm4664_vm0, %v3747_v9  ;;  %v2588_v9 = vpop.f32.mrb[53].mxu0 }
 0x538   :  { %v3751_v62 = vpop.f32.mrb[202].mxu1 }
 0x539   :  { %v3752_v47 = vadd.f32 %v3751_v62, %v16984_v13  ;;  %v3753_v57 = vpop.f32.mrb[203].mxu1  ;;  %4015 = vmatmul.mubr.f32.gmra.mrb[8].mxu1 %v1444_v12  ;;  %v1464_v12 = vld [vmem:[%s19457_s2 + $0x1210] sm:$0xff]  ;;  %v17386_v62 = vpop.f32.mrb[54].mxu0 }
 0x53a   :  { %4019 = vmatprep.mubr.f32.mxu1 %v1449_v25  ;;  %v1469_v25 = vld [vmem:[%s19457_s2 + $0x1238] sm:$0xff] }
 0x53b   :  { %11859 = vmatprep.mubr.msk.f32.mxu0 %vm4664_vm0, %v3752_v47  ;;  %v2593_v47 = vpop.f32.mrb[55].mxu0 }
 0x53c   :  { %v3756_v61 = vpop.f32.mrb[204].mxu1 }
 0x53d   :  { %v3757_v53 = vadd.f32 %v3756_v61, %v16994_v23  ;;  %v3758_v13 = vpop.f32.mrb[205].mxu1  ;;  %4020 = vmatmul.mubr.f32.gmra.mrb[10].mxu1 %v1448_v27  ;;  %v1468_v27 = vld [vmem:[%s19457_s2 + $0x1230] sm:$0xff]  ;;  %v17396_v61 = vpop.f32.mrb[56].mxu0 }
 0x53e   :  { %4024 = vmatprep.mubr.f32.mxu1 %v1453_v22  ;;  %v1473_v22 = vld [vmem:[%s19457_s2 + $0x1258] sm:$0xff] }
 0x53f   :  { %11860 = vmatmul.mubr.msk.f32.gmra.mrb[70].mxu0 %vm4664_vm0, %v3757_v53  ;;  %v2598_v53 = vpop.f32.mrb[57].mxu0 }
 0x540   :  { %v3761_v44 = vpop.f32.mrb[206].mxu1 }
 0x541   :  { %v3762_v46 = vadd.f32 %v3761_v44, %v17004_v43  ;;  %v3763_v23 = vpop.f32.mrb[207].mxu1  ;;  %4025 = vmatmul.mubr.f32.gmra.mrb[12].mxu1 %v1452_v31  ;;  %v1472_v31 = vld [vmem:[%s19457_s2 + $0x1250] sm:$0xff]  ;;  %v17406_v44 = vpop.f32.mrb[58].mxu0 }
 0x542   :  { %4029 = vmatprep.mubr.f32.mxu1 %v1457_v2  ;;  %v1477_v2 = vld [vmem:[%s19457_s2 + $0x1278] sm:$0xff] }
 0x543   :  { %11862 = vmatprep.mubr.msk.f32.mxu0 %vm4664_vm0, %v3762_v46  ;;  %v2603_v46 = vpop.f32.mrb[59].mxu0 }
 0x544   :  { %v3766_v15 = vpop.f32.mrb[208].mxu1  ;;  %v1492_v46 = vld [vmem:[%s19457_s2 + $0x12f0] sm:$0xff] }
 0x545   :  { %v3767_v45 = vadd.f32 %v3766_v15, %v17014_v26  ;;  %v3768_v43 = vpop.f32.mrb[209].mxu1  ;;  %4030 = vmatmul.mubr.f32.gmra.mrb[14].mxu1 %v1456_v8  ;;  %v1476_v8 = vld [vmem:[%s19457_s2 + $0x1270] sm:$0xff]  ;;  %v17416_v15 = vpop.f32.mrb[60].mxu0 }
 0x546   :  { %4034 = vmatprep.mubr.f32.mxu1 %v1461_v60  ;;  %v1481_v60 = vld [vmem:[%s19457_s2 + $0x1298] sm:$0xff] }
 0x547   :  { %11863 = vmatmul.mubr.msk.f32.gmra.mrb[72].mxu0 %vm4664_vm0, %v3767_v45  ;;  %v2608_v45 = vpop.f32.mrb[61].mxu0 }
 0x548   :  { %v3771_v1 = vpop.f32.mrb[210].mxu1 }
 0x549   :  { %v3772_v14 = vadd.f32 %v3771_v1, %v17024_v37  ;;  %v3773_v26 = vpop.f32.mrb[211].mxu1  ;;  %4035 = vmatmul.mubr.f32.gmra.mrb[16].mxu1 %v1460_v3  ;;  %v1480_v3 = vld [vmem:[%s19457_s2 + $0x1290] sm:$0xff]  ;;  %v17426_v1 = vpop.f32.mrb[62].mxu0 }
 0x54a   :  { %4039 = vmatprep.mubr.f32.mxu1 %v1465_v52  ;;  %v1485_v52 = vld [vmem:[%s19457_s2 + $0x12b8] sm:$0xff] }
 0x54b   :  { %11865 = vmatprep.mubr.msk.f32.mxu0 %vm4664_vm0, %v3772_v14  ;;  %v2613_v14 = vpop.f32.mrb[63].mxu0 }
 0x54c   :  { %v3776_v5 = vpop.f32.mrb[212].mxu1 }
 0x54d   :  { %v3777_v57 = vadd.f32 %v3776_v5, %v17034_v39  ;;  %v3778_v37 = vpop.f32.mrb[213].mxu1  ;;  %4040 = vmatmul.mubr.f32.gmra.mrb[18].mxu1 %v1464_v12  ;;  %v1484_v12 = vld [vmem:[%s19457_s2 + $0x12b0] sm:$0xff]  ;;  %v17436_v5 = vpop.f32.mrb[214].mxu0 }
 0x54e   :  { %4044 = vmatprep.mubr.f32.mxu1 %v1469_v25  ;;  %v1489_v25 = vld [vmem:[%s19457_s2 + $0x12d8] sm:$0xff] }
 0x54f   :  { %11866 = vmatmul.mubr.msk.f32.gmra.mrb[74].mxu0 %vm4664_vm0, %v3777_v57  ;;  %v2618_v57 = vpop.f32.mrb[215].mxu0 }
 0x550   :  { %v3781_v0 = vpop.f32.mrb[214].mxu1  ;;  %v17452_v53 = vpop.f32.mrb[216].mxu0 }
 0x551   :  { %v3782_v13 = vadd.f32 %v3781_v0, %v17044_v38  ;;  %v3783_v39 = vpop.f32.mrb[215].mxu1  ;;  %4045 = vmatmul.mubr.f32.gmra.mrb[20].mxu1 %v1468_v27  ;;  %v1488_v27 = vld [vmem:[%s19457_s2 + $0x12d0] sm:$0xff]  ;;  %v4631_v0 = vld [vmem:[%s19458_s3 + $0xf8] sm:$0xff] }
 0x552   :  { %4049 = vmatprep.mubr.f32.mxu1 %v1473_v22  ;;  %v4630_v22 = vld [vmem:[%s19458_s3 + $0xf0] sm:$0xff]  ;;  %v2623_v39 = vpop.f32.mrb[217].mxu0 }
 0x553   :  { %11868 = vmatprep.mubr.msk.f32.mxu0 %vm4664_vm0, %v3782_v13  ;;  %v1508_v39 = vld [vmem:[%s19457_s2 + $0x1370] sm:$0xff] }
 0x554   :  { %v3786_v36 = vpop.f32.mrb[216].mxu1 }
 0x555   :  { %v3787_v23 = vadd.f32 %v3786_v36, %v17054_v55  ;;  %v3788_v38 = vpop.f32.mrb[217].mxu1  ;;  %4050 = vmatmul.mubr.f32.gmra.mrb[22].mxu1 %v1472_v31  ;;  %v12853_v36 = vpack.c.bf16 %v4631_v0, %v4630_v22 }
 0x556   :  { %4054 = vmatprep.mubr.f32.mxu1 %v1477_v2  ;;  %v4633_v38 = vld [vmem:[%s19458_s3 + $0x108] sm:$0xff] }
 0x557   :  { %11869 = vmatmul.mubr.msk.f32.gmra.mrb[76].mxu0 %vm4664_vm0, %v3787_v23  ;;  %v4632_v23 = vld [vmem:[%s19458_s3 + $0x100] sm:$0xff] }
 0x558   :  { %v3791_v10 = vpop.f32.mrb[218].mxu1 }
 0x559   :  { %v3792_v43 = vadd.f32 %v3791_v10, %v17064_v41  ;;  %v3793_v55 = vpop.f32.mrb[219].mxu1  ;;  %4055 = vmatmul.mubr.f32.gmra.mrb[24].mxu1 %v1476_v8  ;;  %v17468_v8 = vpop.f32.mrb[218].mxu0 }
 0x55a   :  { %4059 = vmatprep.mubr.f32.mxu1 %v1481_v60  ;;  %v2628_v10 = vpop.f32.mrb[219].mxu0  ;;  %v17472_v55 = vpack.c.bf16 %v4633_v38, %v4632_v23  ;;  %v1512_v38 = vld [vmem:[%s19457_s2 + $0x1390] sm:$0xff] }
 0x55b   :  { %11871 = vmatprep.mubr.msk.f32.mxu0 %vm4664_vm0, %v3792_v43 }
 0x55c   :  { %v3796_v9 = vpop.f32.mrb[220].mxu1 }
 0x55d   :  { %v3797_v26 = vadd.f32 %v3796_v9, %v17074_v11  ;;  %v3798_v41 = vpop.f32.mrb[221].mxu1  ;;  %4060 = vmatmul.mubr.f32.gmra.mrb[26].mxu1 %v1480_v3  ;;  %v1496_v3 = vld [vmem:[%s19457_s2 + $0x1310] sm:$0xff] }
 0x55e   :  { %4064 = vmatprep.mubr.f32.mxu1 %v1485_v52  ;;  %v1501_v52 = vld [vmem:[%s19457_s2 + $0x1338] sm:$0xff]  ;;  %v1500_v41 = vld [vmem:[%s19457_s2 + $0x1330] sm:$0xff] }
 0x55f   :  { %11872 = vmatmul.mubr.msk.f32.gmra.mrb[78].mxu0 %vm4664_vm0, %v3797_v26 }
 0x560   :  { %v3801_v47 = vpop.f32.mrb[222].mxu1 }
 0x561   :  { %v3802_v37 = vadd.f32 %v3801_v47, %v17084_v40  ;;  %v3803_v11 = vpop.f32.mrb[223].mxu1  ;;  %4065 = vmatmul.mubr.f32.gmra.mrb[28].mxu1 %v1484_v12  ;;  %v1493_v40 = vld [vmem:[%s19457_s2 + $0x12f8] sm:$0xff] }
 0x562   :  { %4069 = vmatprep.mubr.f32.mxu1 %v1489_v25  ;;  %v1505_v12 = vld [vmem:[%s19457_s2 + $0x1358] sm:$0xff]  ;;  %v1504_v11 = vld [vmem:[%s19457_s2 + $0x1350] sm:$0xff] }
 0x563   :  { %11882 = vmatprep.mubr.msk.f32.mxu0 %vm4664_vm0, %v3802_v37 }
 0x564   :  { %v3806_v13 = vpop.f32.mrb[224].mxu1 }
 0x565   :  { %v3807_v31 = vadd.f32 %v3806_v13, %v17100_v59  ;;  %v3808_v2 = vpop.f32.mrb[225].mxu1  ;;  %4070 = vmatmul.mubr.f32.gmra.mrb[30].mxu1 %v1488_v27  ;;  %v1497_v59 = vld [vmem:[%s19457_s2 + $0x1318] sm:$0xff] }
 0x566   :  { %4074 = vmatprep.mubr.f32.mxu1 %v1493_v40  ;;  %v1509_v27 = vld [vmem:[%s19457_s2 + $0x1378] sm:$0xff] }
 0x567   :  { %11883 = vmatmul.mubr.msk.f32.vlgmr.msra.gmra.mrb[64].mxu0 %vm4664_vm0, %v3807_v31  ;;  %v1513_v31 = vld [vmem:[%s19457_s2 + $0x1398] sm:$0xff] }
 0x568   :  { %v3811_v60 = vpop.f32.mrb[226].mxu1  ;;  %12852 = vmatpush3.bf16.msra.mxu0 %v17296_v33  ;;  %v17481_v33 = vpop.f32.mrb[220].mxu0 }
 0x569   :  { %v3812_v45 = vadd.f32 %v3811_v60, %v17116_v58  ;;  %v3813_v43 = vpop.f32.mrb[227].mxu1  ;;  %4075 = vmatmul.mubr.f32.gmra.mrb[32].mxu1 %v1492_v46  ;;  %12854 = vmatprep.subr.bf16.mxu0 %v12853_v36  ;;  %v2633_v58 = vpop.f32.mrb[221].mxu0 }
 0x56a   :  { %4079 = vmatprep.mubr.f32.mxu1 %v1497_v59  ;;  %v17492_v25 = vpop.f32.mrb[222].mxu0  ;;  %v1517_v59 = vld [vmem:[%s19457_s2 + $0x13b8] sm:$0xff] }
 0x56b   :  { %11885 = vmatprep.mubr.msk.f32.mxu0 %vm4664_vm0, %v3812_v45  ;;  %v2638_v57 = vpop.f32.mrb[223].mxu0  ;;  %v1521_v43 = vld [vmem:[%s19457_s2 + $0x13d8] sm:$0xff] }
 0x56c   :  { %v3816_v9 = vpop.f32.mrb[228].mxu1  ;;  %12856 = vmatpush3.bf16.msra.mxu0 %v12853_v36  ;;  %v17502_v22 = vpop.f32.mrb[224].mxu0  ;;  %v1525_v58 = vld [vmem:[%s19457_s2 + $0x13f8] sm:$0xff] }
 0x56d   :  { %v3817_v14 = vadd.f32 %v3816_v9, %v17129_v51  ;;  %v3818_v26 = vpop.f32.mrb[229].mxu1  ;;  %4080 = vmatmul.mubr.f32.gmra.mrb[34].mxu1 %v1496_v3  ;;  %12858 = vmatprep.subr.bf16.mxu0 %v17472_v55  ;;  %v2643_v40 = vpop.f32.mrb[225].mxu0 }
 0x56e   :  { %4084 = vmatprep.mubr.f32.mxu1 %v1501_v52  ;;  %v17512_v2 = vpop.f32.mrb[226].mxu0  ;;  %v1537_v40 = vld [vmem:[%s19457_s2 + $0x1458] sm:$0xff] }
 0x56f   :  { %11886 = vmatmul.mubr.msk.f32.gmra.mrb[66].mxu0 %vm4664_vm0, %v3817_v14  ;;  %v2648_v46 = vpop.f32.mrb[227].mxu0 }
 0x570   :  { %v3821_v47 = vpop.f32.mrb[230].mxu1 }
 0x571   :  { %v3822_v51 = vadd.f32 %v3821_v47, %v17140_v28  ;;  %v3823_v37 = vpop.f32.mrb[231].mxu1  ;;  %4085 = vmatmul.mubr.f32.gmra.mrb[36].mxu1 %v1500_v41 }
 0x572   :  { %4089 = vmatprep.mubr.f32.mxu1 %v1505_v12  ;;  %v1529_v12 = vld [vmem:[%s19457_s2 + $0x1418] sm:$0xff] }
 0x573   :  { %11888 = vmatprep.mubr.msk.f32.mxu0 %vm4664_vm0, %v3822_v51  ;;  %v1533_v37 = vld [vmem:[%s19457_s2 + $0x1438] sm:$0xff] }
 0x574   :  { %v3826_v0 = vpop.f32.mrb[232].mxu1 }
 0x575   :  { %v3827_v13 = vadd.f32 %v3826_v0, %v17150_v21  ;;  %v3828_v28 = vpop.f32.mrb[233].mxu1  ;;  %4090 = vmatmul.mubr.f32.gmra.mrb[38].mxu1 %v1504_v11 }
 0x576   :  { %4094 = vmatprep.mubr.f32.mxu1 %v1509_v27 }
 0x577   :  { %11889 = vmatmul.mubr.msk.f32.gmra.mrb[68].mxu0 %vm4664_vm0, %v3827_v13 }
 0x578   :  { %v3831_v36 = vpop.f32.mrb[234].mxu1 }
 0x579   :  { %v3832_v23 = vadd.f32 %v3831_v36, %v17160_v34  ;;  %v3833_v21 = vpop.f32.mrb[235].mxu1  ;;  %4095 = vmatmul.mubr.f32.gmra.mrb[40].mxu1 %v1508_v39  ;;  %v1516_v34 = vld [vmem:[%s19457_s2 + $0x13b0] sm:$0xff] }
 0x57a   :  { %4099 = vmatprep.mubr.f32.mxu1 %v1513_v31  ;;  %v1541_v31 = vld [vmem:[%s19457_s2 + $0x1478] sm:$0xff] }
 0x57b   :  { %11891 = vmatprep.mubr.msk.f32.mxu0 %vm4664_vm0, %v3832_v23  ;;  %v1545_v21 = vld [vmem:[%s19457_s2 + $0x1498] sm:$0xff] }
 0x57c   :  { %v3836_v60 = vpop.f32.mrb[236].mxu1 }
 0x57d   :  { %v3837_v10 = vadd.f32 %v3836_v60, %v17170_v48  ;;  %v3838_v45 = vpop.f32.mrb[237].mxu1  ;;  %4100 = vmatmul.mubr.f32.gmra.mrb[42].mxu1 %v1512_v38  ;;  %v1520_v48 = vld [vmem:[%s19457_s2 + $0x13d0] sm:$0xff] }
 0x57e   :  { %4104 = vmatprep.mubr.f32.mxu1 %v1517_v59 }
 0x57f   :  { %11892 = vmatmul.mubr.msk.f32.gmra.mrb[70].mxu0 %vm4664_vm0, %v3837_v10  ;;  %v1549_v10 = vld [vmem:[%s19457_s2 + $0x14b8] sm:$0xff] }
 0x580   :  { %v3841_v3 = vpop.f32.mrb[238].mxu1 }
 0x581   :  { %v3842_v52 = vadd.f32 %v3841_v3, %v17180_v6  ;;  %v3843_v9 = vpop.f32.mrb[239].mxu1  ;;  %4105 = vmatmul.mubr.f32.gmra.mrb[44].mxu1 %v1516_v34  ;;  %v1524_v6 = vld [vmem:[%s19457_s2 + $0x13f0] sm:$0xff]  ;;  %v1553_v3 = vld [vmem:[%s19457_s2 + $0x14d8] sm:$0xff] }
 0x582   :  { %4109 = vmatprep.mubr.f32.mxu1 %v1521_v43 }
 0x583   :  { %11894 = vmatprep.mubr.msk.f32.mxu0 %vm4664_vm0, %v3842_v52 }
 0x584   :  { %v3846_v14 = vpop.f32.mrb[240].mxu1 }
 0x585   :  { %v3847_v26 = vadd.f32 %v3846_v14, %v17190_v54  ;;  %v3848_v41 = vpop.f32.mrb[241].mxu1  ;;  %4110 = vmatmul.mubr.f32.gmra.mrb[46].mxu1 %v1520_v48  ;;  %v1528_v54 = vld [vmem:[%s19457_s2 + $0x1410] sm:$0xff]  ;;  %v4635_v14 = vld [vmem:[%s19458_s3 + $0x118] sm:$0xff] }
 0x586   :  { %4114 = vmatprep.mubr.f32.mxu1 %v1525_v58  ;;  %v4634_v58 = vld [vmem:[%s19458_s3 + $0x110] sm:$0xff] }
 0x587   :  { %11895 = vmatmul.mubr.msk.f32.gmra.mrb[72].mxu0 %vm4664_vm0, %v3847_v26 }
 0x588   :  { %v3851_v47 = vpop.f32.mrb[242].mxu1 }
 0x589   :  { %v3852_v57 = vadd.f32 %v3851_v47, %v17200_v49  ;;  %v3853_v51 = vpop.f32.mrb[243].mxu1  ;;  %4115 = vmatmul.mubr.f32.gmra.mrb[48].mxu1 %v1524_v6  ;;  %v1532_v49 = vld [vmem:[%s19457_s2 + $0x1430] sm:$0xff] }
 0x58a   :  { %4119 = vmatprep.mubr.f32.mxu1 %v1529_v12  ;;  %v12861_v12 = vpack.c.bf16 %v4635_v14, %v4634_v58  ;;  %v1556_v47 = vld [vmem:[%s19457_s2 + $0x14f0] sm:$0xff]  ;;  %v4637_v51 = vld [vmem:[%s19458_s3 + $0x128] sm:$0xff]  ;;  %v1593_v14 = vld [vmem:[%s19457_s2 + $0x1618] sm:$0xff] }
 0x58b   :  { %11897 = vmatprep.mubr.msk.f32.mxu0 %vm4664_vm0, %v3852_v57  ;;  %v4636_v57 = vld [vmem:[%s19458_s3 + $0x120] sm:$0xff] }
 0x58c   :  { %v3856_v11 = vpop.f32.mrb[244].mxu1 }
 0x58d   :  { %v3857_v27 = vadd.f32 %v3856_v11, %v17210_v29  ;;  %v3858_v0 = vpop.f32.mrb[245].mxu1  ;;  %4120 = vmatmul.mubr.f32.gmra.mrb[50].mxu1 %v1528_v54  ;;  %v1536_v29 = vld [vmem:[%s19457_s2 + $0x1450] sm:$0xff] }
 0x58e   :  { %4124 = vmatprep.mubr.f32.mxu1 %v1533_v37  ;;  %v1560_v0 = vld [vmem:[%s19457_s2 + $0x1510] sm:$0xff] }
 0x58f   :  { %11898 = vmatmul.mubr.msk.f32.gmra.mrb[74].mxu0 %vm4664_vm0, %v3857_v27  ;;  %v17624_v27 = vpack.c.bf16 %v4637_v51, %v4636_v57  ;;  %v1601_v51 = vld [vmem:[%s19457_s2 + $0x1658] sm:$0xff] }
 0x590   :  { %v3861_v13 = vpop.f32.mrb[246].mxu1 }
 0x591   :  { %v3862_v28 = vadd.f32 %v3861_v13, %v17220_v50  ;;  %v3863_v39 = vpop.f32.mrb[247].mxu1  ;;  %4125 = vmatmul.mubr.f32.gmra.mrb[52].mxu1 %v1532_v49  ;;  %v1540_v50 = vld [vmem:[%s19457_s2 + $0x1470] sm:$0xff]  ;;  %v1565_v49 = vld [vmem:[%s19457_s2 + $0x1538] sm:$0xff] }
 0x592   :  { %4129 = vmatprep.mubr.f32.mxu1 %v1537_v40  ;;  %v1564_v13 = vld [vmem:[%s19457_s2 + $0x1530] sm:$0xff] }
 0x593   :  { %11900 = vmatprep.mubr.msk.f32.mxu0 %vm4664_vm0, %v3862_v28  ;;  %v1569_v28 = vld [vmem:[%s19457_s2 + $0x1558] sm:$0xff] }
 0x594   :  { %v3866_v36 = vpop.f32.mrb[248].mxu1 }
 0x595   :  { %v3867_v46 = vadd.f32 %v3866_v36, %v17230_v16  ;;  %v3868_v23 = vpop.f32.mrb[249].mxu1  ;;  %4130 = vmatmul.mubr.f32.gmra.mrb[54].mxu1 %v1536_v29  ;;  %v1544_v16 = vld [vmem:[%s19457_s2 + $0x1490] sm:$0xff]  ;;  %v1573_v36 = vld [vmem:[%s19457_s2 + $0x1578] sm:$0xff] }
 0x596   :  { %4134 = vmatprep.mubr.f32.mxu1 %v1541_v31 }
 0x597   :  { %11901 = vmatmul.mubr.msk.f32.gmra.mrb[76].mxu0 %vm4664_vm0, %v3867_v46 }
 0x598   :  { %v3871_v38 = vpop.f32.mrb[250].mxu1 }
 0x599   :  { %v3872_v59 = vadd.f32 %v3871_v38, %v17240_v19  ;;  %v3873_v60 = vpop.f32.mrb[251].mxu1  ;;  %4135 = vmatmul.mubr.f32.gmra.mrb[56].mxu1 %v1540_v50  ;;  %v1548_v19 = vld [vmem:[%s19457_s2 + $0x14b0] sm:$0xff] }
 0x59a   :  { %4139 = vmatprep.mubr.f32.mxu1 %v1545_v21  ;;  %v1577_v21 = vld [vmem:[%s19457_s2 + $0x1598] sm:$0xff] }
 0x59b   :  { %11903 = vmatprep.mubr.msk.f32.mxu0 %vm4664_vm0, %v3872_v59 }
 0x59c   :  { %v3876_v45 = vpop.f32.mrb[252].mxu1 }
 0x59d   :  { %v3877_v34 = vadd.f32 %v3876_v45, %v17250_v17  ;;  %v3878_v43 = vpop.f32.mrb[253].mxu1  ;;  %4140 = vmatmul.mubr.f32.gmra.mrb[58].mxu1 %v1544_v16  ;;  %v1552_v17 = vld [vmem:[%s19457_s2 + $0x14d0] sm:$0xff]  ;;  %v1581_v16 = vld [vmem:[%s19457_s2 + $0x15b8] sm:$0xff] }
 0x59e   :  { %4144 = vmatprep.mubr.f32.mxu1 %v1549_v10  ;;  %v1585_v43 = vld [vmem:[%s19457_s2 + $0x15d8] sm:$0xff] }
 0x59f   :  { %11904 = vmatmul.mubr.msk.f32.gmra.mrb[78].mxu0 %vm4664_vm0, %v3877_v34 }
 0x5a0   :  { %v3881_v52 = vpop.f32.mrb[254].mxu1 }
 0x5a1   :  { %v3882_v9 = vadd.f32 %v3881_v52, %v17260_v4  ;;  %v3883_v48 = vpop.f32.mrb[255].mxu1  ;;  %4145 = vmatmul.mubr.f32.gmra.mrb[60].mxu1 %v1548_v19  ;;  %v1557_v4 = vld [vmem:[%s19457_s2 + $0x14f8] sm:$0xff] }
 0x5a2   :  { %4149 = vmatprep.mubr.f32.mxu1 %v1553_v3 }
 0x5a3   :  { %11914 = vmatprep.mubr.msk.f32.mxu0 %vm4664_vm0, %v3882_v9  ;;  %v1589_v9 = vld [vmem:[%s19457_s2 + $0x15f8] sm:$0xff] }
 0x5a4   :  { %v3886_v26 = vpop.f32.mrb[150].mxu1 }
 0x5a5   :  { %v3887_v41 = vadd.f32 %v3886_v26, %v17276_v63  ;;  %v3888_v6 = vpop.f32.mrb[151].mxu1  ;;  %4150 = vmatmul.mubr.f32.gmra.mrb[62].mxu1 %v1552_v17  ;;  %v1561_v63 = vld [vmem:[%s19457_s2 + $0x1518] sm:$0xff] }
 0x5a6   :  { %4154 = vmatprep.mubr.f32.mxu1 %v1557_v4  ;;  %v1597_v6 = vld [vmem:[%s19457_s2 + $0x1638] sm:$0xff] }
 0x5a7   :  { %11915 = vmatmul.mubr.msk.f32.vlgmr.msra.gmra.mrb[64].mxu0 %vm4664_vm0, %v3887_v41 }
 0x5a8   :  { %v3891_v54 = vpop.f32.mrb[152].mxu1  ;;  %12860 = vmatpush3.bf16.msra.mxu0 %v17472_v55 }
 0x5a9   :  { %v3892_v37 = vadd.f32 %v3891_v54, %v17292_v32  ;;  %v3893_v11 = vpop.f32.mrb[153].mxu1  ;;  %4155 = vmatmul.mubr.f32.gmra.mrb[64].mxu1 %v1556_v47  ;;  %12862 = vmatprep.subr.bf16.mxu0 %v12861_v12 }
 0x5aa   :  { %4159 = vmatprep.mubr.f32.mxu1 %v1561_v63  ;;  %v1605_v11 = vld [vmem:[%s19457_s2 + $0x1678] sm:$0xff] }
 0x5ab   :  { %11917 = vmatprep.mubr.msk.f32.mxu0 %vm4664_vm0, %v3892_v37 }
 0x5ac   :  { %v3896_v40 = vpop.f32.mrb[154].mxu1  ;;  %12864 = vmatpush3.bf16.msra.mxu0 %v12861_v12 }
 0x5ad   :  { %v3897_v32 = vadd.f32 %v3896_v40, %v17305_v20  ;;  %v3898_v55 = vpop.f32.mrb[155].mxu1  ;;  %4160 = vmatmul.mubr.f32.gmra.mrb[66].mxu1 %v1560_v0  ;;  %12866 = vmatprep.subr.bf16.mxu0 %v17624_v27  ;;  %v1568_v20 = vld [vmem:[%s19457_s2 + $0x1550] sm:$0xff] }
 0x5ae   :  { %4164 = vmatprep.mubr.f32.mxu1 %v1565_v49 }
 0x5af   :  { %11918 = vmatmul.mubr.msk.f32.gmra.mrb[66].mxu0 %vm4664_vm0, %v3897_v32  ;;  %v1609_v32 = vld [vmem:[%s19457_s2 + $0x1698] sm:$0xff] }
 0x5b0   :  { %v3901_v39 = vpop.f32.mrb[156].mxu1 }
 0x5b1   :  { %v3902_v29 = vadd.f32 %v3901_v39, %v17316_v18  ;;  %v3903_v31 = vpop.f32.mrb[157].mxu1  ;;  %4165 = vmatmul.mubr.f32.gmra.mrb[68].mxu1 %v1564_v13  ;;  %v1572_v18 = vld [vmem:[%s19457_s2 + $0x1570] sm:$0xff]  ;;  %v1613_v39 = vld [vmem:[%s19457_s2 + $0x16b8] sm:$0xff] }
 0x5b2   :  { %4169 = vmatprep.mubr.f32.mxu1 %v1569_v28 }
 0x5b3   :  { %11920 = vmatprep.mubr.msk.f32.mxu0 %vm4664_vm0, %v3902_v29 }
 0x5b4   :  { %v3906_v46 = vpop.f32.mrb[158].mxu1 }
 0x5b5   :  { %v3907_v23 = vadd.f32 %v3906_v46, %v17326_v24  ;;  %v3908_v50 = vpop.f32.mrb[159].mxu1  ;;  %4170 = vmatmul.mubr.f32.gmra.mrb[70].mxu1 %v1568_v20  ;;  %v1576_v24 = vld [vmem:[%s19457_s2 + $0x1590] sm:$0xff] }
 0x5b6   :  { %4174 = vmatprep.mubr.f32.mxu1 %v1573_v36  ;;  %v1617_v36 = vld [vmem:[%s19457_s2 + $0x16d8] sm:$0xff] }
 0x5b7   :  { %11921 = vmatmul.mubr.msk.f32.gmra.mrb[68].mxu0 %vm4664_vm0, %v3907_v23 }
 0x5b8   :  { %v3911_v38 = vpop.f32.mrb[160].mxu1 }
 0x5b9   :  { %v3912_v59 = vadd.f32 %v3911_v38, %v17336_v7  ;;  %v3913_v60 = vpop.f32.mrb[161].mxu1  ;;  %4175 = vmatmul.mubr.f32.gmra.mrb[72].mxu1 %v1572_v18  ;;  %v1580_v7 = vld [vmem:[%s19457_s2 + $0x15b0] sm:$0xff] }
 0x5ba   :  { %4179 = vmatprep.mubr.f32.mxu1 %v1577_v21  ;;  %v4638_v18 = vld [vmem:[%s19458_s3 + $0x130] sm:$0xff]  ;;  %v4639_v21 = vld [vmem:[%s19458_s3 + $0x138] sm:$0xff] }
 0x5bb   :  { %11923 = vmatprep.mubr.msk.f32.mxu0 %vm4664_vm0, %v3912_v59 }
 0x5bc   :  { %v3916_v10 = vpop.f32.mrb[162].mxu1 }
 0x5bd   :  { %v3917_v45 = vadd.f32 %v3916_v10, %v17346_v30  ;;  %v3918_v34 = vpop.f32.mrb[163].mxu1  ;;  %4180 = vmatmul.mubr.f32.gmra.mrb[74].mxu1 %v1576_v24  ;;  %v1584_v30 = vld [vmem:[%s19457_s2 + $0x15d0] sm:$0xff]  ;;  %v12869_v24 = vpack.c.bf16 %v4639_v21, %v4638_v18  ;;  %v4640_v10 = vld [vmem:[%s19458_s3 + $0x140] sm:$0xff]  ;;  %v1673_v18 = vld [vmem:[%s19457_s2 + $0x1898] sm:$0xff] }
 0x5be   :  { %4184 = vmatprep.mubr.f32.mxu1 %v1581_v16  ;;  %v1620_v16 = vld [vmem:[%s19457_s2 + $0x16f0] sm:$0xff] }
 0x5bf   :  { %11924 = vmatmul.mubr.msk.f32.gmra.mrb[70].mxu0 %vm4664_vm0, %v3917_v45  ;;  %v4641_v45 = vld [vmem:[%s19458_s3 + $0x148] sm:$0xff] }
 0x5c0   :  { %v3921_v19 = vpop.f32.mrb[164].mxu1 }
 0x5c1   :  { %v3922_v3 = vadd.f32 %v3921_v19, %v17356_v56  ;;  %v3923_v52 = vpop.f32.mrb[165].mxu1  ;;  %4185 = vmatmul.mubr.f32.gmra.mrb[76].mxu1 %v1580_v7  ;;  %v1588_v56 = vld [vmem:[%s19457_s2 + $0x15f0] sm:$0xff]  ;;  %v17768_v19 = vpack.c.bf16 %v4641_v45, %v4640_v10  ;;  %v1681_v10 = vld [vmem:[%s19457_s2 + $0x18d8] sm:$0xff] }
 0x5c2   :  { %4189 = vmatprep.mubr.f32.mxu1 %v1585_v43  ;;  %v1629_v52 = vld [vmem:[%s19457_s2 + $0x1738] sm:$0xff] }
 0x5c3   :  { %11926 = vmatprep.mubr.msk.f32.mxu0 %vm4664_vm0, %v3922_v3  ;;  %v1624_v3 = vld [vmem:[%s19457_s2 + $0x1710] sm:$0xff] }
 0x5c4   :  { %v3926_v48 = vpop.f32.mrb[166].mxu1 }
 0x5c5   :  { %v3927_v17 = vadd.f32 %v3926_v48, %v17366_v42  ;;  %v3928_v58 = vpop.f32.mrb[167].mxu1  ;;  %4190 = vmatmul.mubr.f32.gmra.mrb[78].mxu1 %v1584_v30  ;;  %v1592_v42 = vld [vmem:[%s19457_s2 + $0x1610] sm:$0xff]  ;;  %v1633_v48 = vld [vmem:[%s19457_s2 + $0x1758] sm:$0xff] }
 0x5c6   :  { %4194 = vmatprep.mubr.f32.mxu1 %v1589_v9  ;;  %v1628_v9 = vld [vmem:[%s19457_s2 + $0x1730] sm:$0xff] }
 0x5c7   :  { %11927 = vmatmul.mubr.msk.f32.gmra.mrb[72].mxu0 %vm4664_vm0, %v3927_v17 }
 0x5c8   :  { %v3931_v4 = vpop.f32.mrb[168].mxu1 }
 0x5c9   :  { %v3932_v26 = vadd.f32 %v3931_v4, %v17376_v35  ;;  %v3933_v41 = vpop.f32.mrb[169].mxu1  ;;  %4195 = vmatmul.mubr.f32.gmra.mrb[80].mxu1 %v1588_v56  ;;  %v1596_v35 = vld [vmem:[%s19457_s2 + $0x1630] sm:$0xff] }
 0x5ca   :  { %4199 = vmatprep.mubr.f32.mxu1 %v1593_v14  ;;  %v1637_v14 = vld [vmem:[%s19457_s2 + $0x1778] sm:$0xff] }
 0x5cb   :  { %11929 = vmatprep.mubr.msk.f32.mxu0 %vm4664_vm0, %v3932_v26 }
 0x5cc   :  { %v3936_v12 = vpop.f32.mrb[170].mxu1 }
 0x5cd   :  { %v3937_v47 = vadd.f32 %v3936_v12, %v17386_v62  ;;  %v3938_v57 = vpop.f32.mrb[171].mxu1  ;;  %4200 = vmatmul.mubr.f32.gmra.mrb[82].mxu1 %v1592_v42  ;;  %v1600_v62 = vld [vmem:[%s19457_s2 + $0x1650] sm:$0xff]  ;;  %v1641_v42 = vld [vmem:[%s19457_s2 + $0x1798] sm:$0xff] }
 0x5ce   :  { %4204 = vmatprep.mubr.f32.mxu1 %v1597_v6  ;;  %v1645_v57 = vld [vmem:[%s19457_s2 + $0x17b8] sm:$0xff] }
 0x5cf   :  { %11930 = vmatmul.mubr.msk.f32.gmra.mrb[74].mxu0 %vm4664_vm0, %v3937_v47 }
 0x5d0   :  { %v3941_v63 = vpop.f32.mrb[172].mxu1 }
 0x5d1   :  { %v3942_v54 = vadd.f32 %v3941_v63, %v17396_v61  ;;  %v3943_v37 = vpop.f32.mrb[173].mxu1  ;;  %4205 = vmatmul.mubr.f32.gmra.mrb[84].mxu1 %v1596_v35  ;;  %v1604_v61 = vld [vmem:[%s19457_s2 + $0x1670] sm:$0xff]  ;;  %v1649_v63 = vld [vmem:[%s19457_s2 + $0x17d8] sm:$0xff] }
 0x5d2   :  { %4209 = vmatprep.mubr.f32.mxu1 %v1601_v51 }
 0x5d3   :  { %11932 = vmatprep.mubr.msk.f32.mxu0 %vm4664_vm0, %v3942_v54 }
 0x5d4   :  { %v3946_v0 = vpop.f32.mrb[174].mxu1 }
 0x5d5   :  { %v3947_v49 = vadd.f32 %v3946_v0, %v17406_v44  ;;  %v3948_v40 = vpop.f32.mrb[175].mxu1  ;;  %4210 = vmatmul.mubr.f32.gmra.mrb[86].mxu1 %v1600_v62  ;;  %v1608_v44 = vld [vmem:[%s19457_s2 + $0x1690] sm:$0xff] }
 0x5d6   :  { %4214 = vmatprep.mubr.f32.mxu1 %v1605_v11  ;;  %v1648_v62 = vld [vmem:[%s19457_s2 + $0x17d0] sm:$0xff]  ;;  %v1653_v11 = vld [vmem:[%s19457_s2 + $0x17f8] sm:$0xff] }
 0x5d7   :  { %11933 = vmatmul.mubr.msk.f32.gmra.mrb[76].mxu0 %vm4664_vm0, %v3947_v49  ;;  %v1652_v40 = vld [vmem:[%s19457_s2 + $0x17f0] sm:$0xff] }
 0x5d8   :  { %v3951_v55 = vpop.f32.mrb[176].mxu1 }
 0x5d9   :  { %v3952_v13 = vadd.f32 %v3951_v55, %v17416_v15  ;;  %v3953_v28 = vpop.f32.mrb[177].mxu1  ;;  %4215 = vmatmul.mubr.f32.gmra.mrb[88].mxu1 %v1604_v61  ;;  %v1612_v15 = vld [vmem:[%s19457_s2 + $0x16b0] sm:$0xff]  ;;  %v1657_v61 = vld [vmem:[%s19457_s2 + $0x1818] sm:$0xff] }
 0x5da   :  { %4219 = vmatprep.mubr.f32.mxu1 %v1609_v32  ;;  %v1661_v28 = vld [vmem:[%s19457_s2 + $0x1838] sm:$0xff] }
 0x5db   :  { %11935 = vmatprep.mubr.msk.f32.mxu0 %vm4664_vm0, %v3952_v13  ;;  %v1656_v13 = vld [vmem:[%s19457_s2 + $0x1810] sm:$0xff] }
 0x5dc   :  { %v3956_v29 = vpop.f32.mrb[178].mxu1 }
 0x5dd   :  { %v3957_v31 = vadd.f32 %v3956_v29, %v17426_v1  ;;  %v3958_v20 = vpop.f32.mrb[179].mxu1  ;;  %4220 = vmatmul.mubr.f32.gmra.mrb[90].mxu1 %v1608_v44  ;;  %v1616_v1 = vld [vmem:[%s19457_s2 + $0x16d0] sm:$0xff] }
 0x5de   :  { %4224 = vmatprep.mubr.f32.mxu1 %v1613_v39  ;;  %v1660_v29 = vld [vmem:[%s19457_s2 + $0x1830] sm:$0xff] }
 0x5df   :  { %11936 = vmatmul.mubr.msk.f32.gmra.mrb[78].mxu0 %vm4664_vm0, %v3957_v31  ;;  %v1665_v31 = vld [vmem:[%s19457_s2 + $0x1858] sm:$0xff] }
 0x5e0   :  { %v3961_v46 = vpop.f32.mrb[180].mxu1 }
 0x5e1   :  { %v3962_v23 = vadd.f32 %v3961_v46, %v17436_v5  ;;  %v3963_v50 = vpop.f32.mrb[181].mxu1  ;;  %4225 = vmatmul.mubr.f32.gmra.mrb[92].mxu1 %v1612_v15  ;;  %v1621_v5 = vld [vmem:[%s19457_s2 + $0x16f8] sm:$0xff] }
 0x5e2   :  { %4229 = vmatprep.mubr.f32.mxu1 %v1617_v36  ;;  %v1664_v36 = vld [vmem:[%s19457_s2 + $0x1850] sm:$0xff]  ;;  %v1669_v46 = vld [vmem:[%s19457_s2 + $0x1878] sm:$0xff] }
 0x5e3   :  { %11946 = vmatprep.mubr.msk.f32.mxu0 %vm4664_vm0, %v3962_v23 }
 0x5e4   :  { %v3966_v38 = vpop.f32.mrb[182].mxu1 }
 0x5e5   :  { %v3967_v59 = vadd.f32 %v3966_v38, %v17452_v53  ;;  %v3968_v60 = vpop.f32.mrb[183].mxu1  ;;  %4230 = vmatmul.mubr.f32.gmra.mrb[94].mxu1 %v1616_v1  ;;  %v1625_v53 = vld [vmem:[%s19457_s2 + $0x1718] sm:$0xff]  ;;  %v1668_v1 = vld [vmem:[%s19457_s2 + $0x1870] sm:$0xff] }
 0x5e6   :  { %4234 = vmatprep.mubr.f32.mxu1 %v1621_v5  ;;  %v1672_v38 = vld [vmem:[%s19457_s2 + $0x1890] sm:$0xff] }
 0x5e7   :  { %11947 = vmatmul.mubr.msk.f32.vlgmr.msra.gmra.mrb[64].mxu0 %vm4664_vm0, %v3967_v59  ;;  %v1677_v59 = vld [vmem:[%s19457_s2 + $0x18b8] sm:$0xff] }
 0x5e8   :  { %v3971_v34 = vpop.f32.mrb[184].mxu1  ;;  %12868 = vmatpush3.bf16.msra.mxu0 %v17624_v27 }
 0x5e9   :  { %v3972_v7 = vadd.f32 %v3971_v34, %v17468_v8  ;;  %v3973_v43 = vpop.f32.mrb[185].mxu1  ;;  %4235 = vmatmul.mubr.f32.gmra.mrb[96].mxu1 %v1620_v16  ;;  %12870 = vmatprep.subr.bf16.mxu0 %v12869_v24  ;;  %v1676_v16 = vld [vmem:[%s19457_s2 + $0x18b0] sm:$0xff]  ;;  %v4643_v34 = vld [vmem:[%s19458_s3 + $0x158] sm:$0xff] }
 0x5ea   :  { %4239 = vmatprep.mubr.f32.mxu1 %v1625_v53  ;;  %v4642_v53 = vld [vmem:[%s19458_s3 + $0x150] sm:$0xff] }
 0x5eb   :  { %11949 = vmatprep.mubr.msk.f32.mxu0 %vm4664_vm0, %v3972_v7  ;;  %v1680_v43 = vld [vmem:[%s19457_s2 + $0x18d0] sm:$0xff] }
 0x5ec   :  { %v3976_v30 = vpop.f32.mrb[186].mxu1  ;;  %12872 = vmatpush3.bf16.msra.mxu0 %v12869_v24 }
 0x5ed   :  { %v3977_v8 = vadd.f32 %v3976_v30, %v17481_v33  ;;  %v3978_v27 = vpop.f32.mrb[187].mxu1  ;;  %4240 = vmatmul.mubr.f32.gmra.mrb[98].mxu1 %v1624_v3  ;;  %12874 = vmatprep.subr.bf16.mxu0 %v17768_v19  ;;  %v1632_v33 = vld [vmem:[%s19457_s2 + $0x1750] sm:$0xff]  ;;  %v1685_v3 = vld [vmem:[%s19457_s2 + $0x18f8] sm:$0xff] }
 0x5ee   :  { %4244 = vmatprep.mubr.f32.mxu1 %v1629_v52  ;;  %v12877_v52 = vpack.c.bf16 %v4643_v34, %v4642_v53  ;;  %v4645_v27 = vld [vmem:[%s19458_s3 + $0x168] sm:$0xff]  ;;  %v1741_v53 = vld [vmem:[%s19457_s2 + $0x1ab8] sm:$0xff] }
 0x5ef   :  { %11950 = vmatmul.mubr.msk.f32.gmra.mrb[66].mxu0 %vm4664_vm0, %v3977_v8  ;;  %v4644_v8 = vld [vmem:[%s19458_s3 + $0x160] sm:$0xff] }
 0x5f0   :  { %v3981_v17 = vpop.f32.mrb[188].mxu1 }
 0x5f1   :  { %v3982_v58 = vadd.f32 %v3981_v17, %v17492_v25  ;;  %v3983_v56 = vpop.f32.mrb[189].mxu1  ;;  %4245 = vmatmul.mubr.f32.gmra.mrb[100].mxu1 %v1628_v9  ;;  %v1636_v25 = vld [vmem:[%s19457_s2 + $0x1770] sm:$0xff]  ;;  %v1689_v17 = vld [vmem:[%s19457_s2 + $0x1918] sm:$0xff] }
 0x5f2   :  { %4249 = vmatprep.mubr.f32.mxu1 %v1633_v48  ;;  %v1684_v48 = vld [vmem:[%s19457_s2 + $0x18f0] sm:$0xff] }
 0x5f3   :  { %11952 = vmatprep.mubr.msk.f32.mxu0 %vm4664_vm0, %v3982_v58  ;;  %v17900_v58 = vpack.c.bf16 %v4645_v27, %v4644_v8  ;;  %v4647_v8 = vld [vmem:[%s19458_s3 + $0x178] sm:$0xff] }
 0x5f4   :  { %v3986_v4 = vpop.f32.mrb[190].mxu1 }
 0x5f5   :  { %v3987_v26 = vadd.f32 %v3986_v4, %v17502_v22  ;;  %v3988_v41 = vpop.f32.mrb[191].mxu1  ;;  %4250 = vmatmul.mubr.f32.gmra.mrb[102].mxu1 %v1632_v33  ;;  %v1640_v22 = vld [vmem:[%s19457_s2 + $0x1790] sm:$0xff] }
 0x5f6   :  { %4254 = vmatprep.mubr.f32.mxu1 %v1637_v14  ;;  %v1688_v14 = vld [vmem:[%s19457_s2 + $0x1910] sm:$0xff] }
 0x5f7   :  { %11953 = vmatmul.mubr.msk.f32.gmra.mrb[68].mxu0 %vm4664_vm0, %v3987_v26  ;;  %v1692_v41 = vld [vmem:[%s19457_s2 + $0x1930] sm:$0xff] }
 0x5f8   :  { %v3991_v6 = vpop.f32.mrb[192].mxu1 }
 0x5f9   :  { %v3992_v12 = vadd.f32 %v3991_v6, %v17512_v2  ;;  %v3993_v47 = vpop.f32.mrb[193].mxu1  ;;  %4255 = vmatmul.mubr.f32.gmra.mrb[104].mxu1 %v1636_v25  ;;  %v1644_v2 = vld [vmem:[%s19457_s2 + $0x17b0] sm:$0xff]  ;;  %v1697_v25 = vld [vmem:[%s19457_s2 + $0x1958] sm:$0xff] }
 0x5fa   :  { %4259 = vmatprep.mubr.f32.mxu1 %v1641_v42  ;;  %v1701_v47 = vld [vmem:[%s19457_s2 + $0x1978] sm:$0xff] }
 0x5fb   :  { %11955 = vmatprep.mubr.msk.f32.mxu0 %vm4664_vm0, %v3992_v12  ;;  %v1696_v12 = vld [vmem:[%s19457_s2 + $0x1950] sm:$0xff] }
 0x5fc   :  { %v3996_v35 = vpop.f32.mrb[0].mxu1 }
 0x5fd   :  { %v3998_v51 = vpop.f32.mrb[1].mxu1  ;;  %4260 = vmatmul.mubr.f32.gmra.mrb[106].mxu1 %v1640_v22  ;;  %11956 = vmatmul.mubr.msk.f32.gmra.mrb[70].mxu0 %vm4664_vm0, %v3996_v35  ;;  %v1700_v35 = vld [vmem:[%s19457_s2 + $0x1970] sm:$0xff] }
 0x5fe   :  { %4264 = vmatprep.mubr.f32.mxu1 %v1645_v57  ;;  %v1705_v51 = vld [vmem:[%s19457_s2 + $0x1998] sm:$0xff] }
 0x600   :  { %v4001_v54 = vpop.f32.mrb[2].mxu1 }
 0x601   :  { %v4003_v37 = vpop.f32.mrb[3].mxu1  ;;  %4265 = vmatmul.mubr.f32.gmra.mrb[108].mxu1 %v1644_v2  ;;  %11958 = vmatprep.mubr.msk.f32.mxu0 %vm4664_vm0, %v4001_v54  ;;  %v1704_v54 = vld [vmem:[%s19457_s2 + $0x1990] sm:$0xff] }
 0x602   :  { %4269 = vmatprep.mubr.f32.mxu1 %v1649_v63  ;;  %v1709_v37 = vld [vmem:[%s19457_s2 + $0x19b8] sm:$0xff] }
 0x604   :  { %v4006_v0 = vpop.f32.mrb[4].mxu1 }
 0x605   :  { %v4008_v49 = vpop.f32.mrb[5].mxu1  ;;  %4270 = vmatmul.mubr.f32.gmra.mrb[110].mxu1 %v1648_v62  ;;  %11959 = vmatmul.mubr.msk.f32.gmra.mrb[72].mxu0 %vm4664_vm0, %v4006_v0  ;;  %v1708_v0 = vld [vmem:[%s19457_s2 + $0x19b0] sm:$0xff] }
 0x606   :  { %4274 = vmatprep.mubr.f32.mxu1 %v1653_v11  ;;  %v1713_v49 = vld [vmem:[%s19457_s2 + $0x19d8] sm:$0xff] }
 0x608   :  { %v4011_v32 = vpop.f32.mrb[6].mxu1 }
 0x609   :  { %v4013_v55 = vpop.f32.mrb[7].mxu1  ;;  %4275 = vmatmul.mubr.f32.gmra.mrb[112].mxu1 %v1652_v40  ;;  %11961 = vmatprep.mubr.msk.f32.mxu0 %vm4664_vm0, %v4011_v32  ;;  %v1712_v32 = vld [vmem:[%s19457_s2 + $0x19d0] sm:$0xff] }
 0x60a   :  { %4279 = vmatprep.mubr.f32.mxu1 %v1657_v61  ;;  %v1717_v55 = vld [vmem:[%s19457_s2 + $0x19f8] sm:$0xff] }
 0x60c   :  { %v4016_v44 = vpop.f32.mrb[8].mxu1 }
 0x60d   :  { %v4018_v39 = vpop.f32.mrb[9].mxu1  ;;  %4280 = vmatmul.mubr.f32.gmra.mrb[114].mxu1 %v1656_v13  ;;  %11962 = vmatmul.mubr.msk.f32.gmra.mrb[74].mxu0 %vm4664_vm0, %v4016_v44  ;;  %v1716_v44 = vld [vmem:[%s19457_s2 + $0x19f0] sm:$0xff] }
 0x60e   :  { %4284 = vmatprep.mubr.f32.mxu1 %v1661_v28  ;;  %v1721_v39 = vld [vmem:[%s19457_s2 + $0x1a18] sm:$0xff] }
 0x610   :  { %v4021_v20 = vpop.f32.mrb[10].mxu1 }
 0x611   :  { %v4023_v15 = vpop.f32.mrb[11].mxu1  ;;  %4285 = vmatmul.mubr.f32.gmra.mrb[116].mxu1 %v1660_v29  ;;  %11964 = vmatprep.mubr.msk.f32.mxu0 %vm4664_vm0, %v4021_v20  ;;  %v1720_v20 = vld [vmem:[%s19457_s2 + $0x1a10] sm:$0xff] }
 0x612   :  { %4289 = vmatprep.mubr.f32.mxu1 %v1665_v31  ;;  %v1725_v15 = vld [vmem:[%s19457_s2 + $0x1a38] sm:$0xff] }
 0x614   :  { %v4026_v23 = vpop.f32.mrb[12].mxu1 }
 0x615   :  { %v4028_v50 = vpop.f32.mrb[13].mxu1  ;;  %4290 = vmatmul.mubr.f32.gmra.mrb[118].mxu1 %v1664_v36  ;;  %11965 = vmatmul.mubr.msk.f32.gmra.mrb[76].mxu0 %vm4664_vm0, %v4026_v23  ;;  %v1724_v23 = vld [vmem:[%s19457_s2 + $0x1a30] sm:$0xff] }
 0x616   :  { %4294 = vmatprep.mubr.f32.mxu1 %v1669_v46  ;;  %v1729_v50 = vld [vmem:[%s19457_s2 + $0x1a58] sm:$0xff] }
 0x618   :  { %v4031_v21 = vpop.f32.mrb[14].mxu1 }
 0x619   :  { %v4033_v5 = vpop.f32.mrb[15].mxu1  ;;  %4295 = vmatmul.mubr.f32.gmra.mrb[120].mxu1 %v1668_v1  ;;  %11967 = vmatprep.mubr.msk.f32.mxu0 %vm4664_vm0, %v4031_v21  ;;  %v1728_v21 = vld [vmem:[%s19457_s2 + $0x1a50] sm:$0xff] }
 0x61a   :  { %4299 = vmatprep.mubr.f32.mxu1 %v1673_v18  ;;  %v1733_v5 = vld [vmem:[%s19457_s2 + $0x1a78] sm:$0xff] }
 0x61c   :  { %v4036_v60 = vpop.f32.mrb[16].mxu1 }
 0x61d   :  { %v4038_v24 = vpop.f32.mrb[17].mxu1  ;;  %4300 = vmatmul.mubr.f32.gmra.mrb[122].mxu1 %v1672_v38  ;;  %11968 = vmatmul.mubr.msk.f32.gmra.mrb[78].mxu0 %vm4664_vm0, %v4036_v60  ;;  %v1732_v60 = vld [vmem:[%s19457_s2 + $0x1a70] sm:$0xff] }
 0x61e   :  { %4304 = vmatprep.mubr.f32.mxu1 %v1677_v59  ;;  %v1737_v24 = vld [vmem:[%s19457_s2 + $0x1a98] sm:$0xff] }
 0x620   :  { %v4041_v45 = vpop.f32.mrb[18].mxu1 }
 0x621   :  { %v4043_v7 = vpop.f32.mrb[19].mxu1  ;;  %4305 = vmatmul.mubr.f32.gmra.mrb[124].mxu1 %v1676_v16  ;;  %11978 = vmatprep.mubr.msk.f32.mxu0 %vm4664_vm0, %v4041_v45  ;;  %v1736_v45 = vld [vmem:[%s19457_s2 + $0x1a90] sm:$0xff] }
 0x622   :  { %4309 = vmatprep.mubr.f32.mxu1 %v1681_v10 }
 0x624   :  { %v4046_v30 = vpop.f32.mrb[20].mxu1 }
 0x625   :  { %v4048_v9 = vpop.f32.mrb[21].mxu1  ;;  %4310 = vmatmul.mubr.f32.gmra.mrb[126].mxu1 %v1680_v43  ;;  %11979 = vmatmul.mubr.msk.f32.vlgmr.msra.gmra.mrb[64].mxu0 %vm4664_vm0, %v4046_v30  ;;  %v1740_v43 = vld [vmem:[%s19457_s2 + $0x1ab0] sm:$0xff] }
 0x626   :  { %4314 = vmatprep.mubr.f32.mxu1 %v1685_v3  ;;  %12876 = vmatpush3.bf16.msra.mxu0 %v17768_v19  ;;  %v1693_v19 = vld [vmem:[%s19457_s2 + $0x1938] sm:$0xff]  ;;  %v4646_v30 = vld [vmem:[%s19458_s3 + $0x170] sm:$0xff] }
 0x627   :  { %12878 = vmatprep.subr.bf16.mxu0 %v12877_v52  ;;  %v1745_v3 = vld [vmem:[%s19457_s2 + $0x1ad8] sm:$0xff]  ;;  %v1744_v9 = vld [vmem:[%s19457_s2 + $0x1ad0] sm:$0xff] }
 0x628   :  { %v4051_v56 = vpop.f32.mrb[22].mxu1 }
 0x629   :  { %v4053_v33 = vpop.f32.mrb[23].mxu1  ;;  %4315 = vmatmul.mubr.f32.gmra.mrb[128].mxu1 %v1684_v48  ;;  %11981 = vmatprep.mubr.msk.f32.mxu0 %vm4664_vm0, %v4051_v56  ;;  %v1749_v48 = vld [vmem:[%s19457_s2 + $0x1af8] sm:$0xff] }
 0x62a   :  { %4319 = vmatprep.mubr.f32.mxu1 %v1689_v17  ;;  %12880 = vmatpush3.bf16.msra.mxu0 %v12877_v52  ;;  %v12885_v17 = vpack.c.bf16 %v4647_v8, %v4646_v30  ;;  %v4648_v33 = vld [vmem:[%s19458_s3 + $0x180] sm:$0xff]  ;;  %v1805_v30 = vld [vmem:[%s19457_s2 + $0x1cb8] sm:$0xff] }
 0x62b   :  { %12882 = vmatprep.subr.bf16.mxu0 %v17900_v58 }
 0x62c   :  { %v4056_v4 = vpop.f32.mrb[24].mxu1 }
 0x62d   :  { %v4058_v26 = vpop.f32.mrb[25].mxu1  ;;  %4320 = vmatmul.mubr.f32.gmra.mrb[130].mxu1 %v1688_v14  ;;  %11982 = vmatmul.mubr.msk.f32.gmra.mrb[66].mxu0 %vm4664_vm0, %v4056_v4  ;;  %v4649_v14 = vld [vmem:[%s19458_s3 + $0x188] sm:$0xff]  ;;  %v1748_v4 = vld [vmem:[%s19457_s2 + $0x1af0] sm:$0xff] }
 0x62e   :  { %4324 = vmatprep.mubr.f32.mxu1 %v1693_v19  ;;  %v1753_v26 = vld [vmem:[%s19457_s2 + $0x1b18] sm:$0xff] }
 0x630   :  { %v4061_v42 = vpop.f32.mrb[26].mxu1 }
 0x631   :  { %v4063_v6 = vpop.f32.mrb[27].mxu1  ;;  %4325 = vmatmul.mubr.f32.gmra.mrb[132].mxu1 %v1692_v41  ;;  %11984 = vmatprep.mubr.msk.f32.mxu0 %vm4664_vm0, %v4061_v42  ;;  %v18028_v41 = vpack.c.bf16 %v4649_v14, %v4648_v33  ;;  %v4651_v33 = vld [vmem:[%s19458_s3 + $0x198] sm:$0xff] }
 0x632   :  { %4329 = vmatprep.mubr.f32.mxu1 %v1697_v25  ;;  %v1752_v6 = vld [vmem:[%s19457_s2 + $0x1b10] sm:$0xff] }
 0x634   :  { %v4066_v22 = vpop.f32.mrb[28].mxu1 }
 0x635   :  { %v4068_v57 = vpop.f32.mrb[29].mxu1  ;;  %4330 = vmatmul.mubr.f32.gmra.mrb[134].mxu1 %v1696_v12  ;;  %11985 = vmatmul.mubr.msk.f32.gmra.mrb[68].mxu0 %vm4664_vm0, %v4066_v22  ;;  %v1756_v22 = vld [vmem:[%s19457_s2 + $0x1b30] sm:$0xff] }
 0x636   :  { %4334 = vmatprep.mubr.f32.mxu1 %v1701_v47  ;;  %v1761_v57 = vld [vmem:[%s19457_s2 + $0x1b58] sm:$0xff] }
 0x638   :  { %v4071_v2 = vpop.f32.mrb[30].mxu1 }
 0x639   :  { %v4073_v63 = vpop.f32.mrb[31].mxu1  ;;  %4335 = vmatmul.mubr.f32.gmra.mrb[136].mxu1 %v1700_v35  ;;  %11987 = vmatprep.mubr.msk.f32.mxu0 %vm4664_vm0, %v4071_v2  ;;  %v1760_v2 = vld [vmem:[%s19457_s2 + $0x1b50] sm:$0xff] }
 0x63a   :  { %4339 = vmatprep.mubr.f32.mxu1 %v1705_v51  ;;  %v1765_v63 = vld [vmem:[%s19457_s2 + $0x1b78] sm:$0xff] }
 0x63c   :  { %v4076_v62 = vpop.f32.mrb[32].mxu1 }
 0x63d   :  { %v4078_v11 = vpop.f32.mrb[33].mxu1  ;;  %4340 = vmatmul.mubr.f32.gmra.mrb[138].mxu1 %v1704_v54  ;;  %11988 = vmatmul.mubr.msk.f32.gmra.mrb[70].mxu0 %vm4664_vm0, %v4076_v62  ;;  %v1764_v62 = vld [vmem:[%s19457_s2 + $0x1b70] sm:$0xff] }
 0x63e   :  { %4344 = vmatprep.mubr.f32.mxu1 %v1709_v37  ;;  %v1769_v11 = vld [vmem:[%s19457_s2 + $0x1b98] sm:$0xff] }
 0x640   :  { %v4081_v40 = vpop.f32.mrb[34].mxu1 }
 0x641   :  { %v4083_v61 = vpop.f32.mrb[35].mxu1  ;;  %4345 = vmatmul.mubr.f32.gmra.mrb[140].mxu1 %v1708_v0  ;;  %11990 = vmatprep.mubr.msk.f32.mxu0 %vm4664_vm0, %v4081_v40  ;;  %v1768_v40 = vld [vmem:[%s19457_s2 + $0x1b90] sm:$0xff] }
 0x642   :  { %4349 = vmatprep.mubr.f32.mxu1 %v1713_v49  ;;  %v1773_v61 = vld [vmem:[%s19457_s2 + $0x1bb8] sm:$0xff] }
 0x644   :  { %v4086_v13 = vpop.f32.mrb[36].mxu1 }
 0x645   :  { %v4088_v28 = vpop.f32.mrb[37].mxu1  ;;  %4350 = vmatmul.mubr.f32.gmra.mrb[142].mxu1 %v1712_v32  ;;  %11991 = vmatmul.mubr.msk.f32.gmra.mrb[72].mxu0 %vm4664_vm0, %v4086_v13  ;;  %v1772_v13 = vld [vmem:[%s19457_s2 + $0x1bb0] sm:$0xff] }
 0x646   :  { %4354 = vmatprep.mubr.f32.mxu1 %v1717_v55  ;;  %v1777_v28 = vld [vmem:[%s19457_s2 + $0x1bd8] sm:$0xff] }
 0x648   :  { %v4091_v29 = vpop.f32.mrb[38].mxu1 }
 0x649   :  { %v4093_v31 = vpop.f32.mrb[39].mxu1  ;;  %4355 = vmatmul.mubr.f32.gmra.mrb[144].mxu1 %v1716_v44  ;;  %11993 = vmatprep.mubr.msk.f32.mxu0 %vm4664_vm0, %v4091_v29  ;;  %v1776_v29 = vld [vmem:[%s19457_s2 + $0x1bd0] sm:$0xff] }
 0x64a   :  { %4359 = vmatprep.mubr.f32.mxu1 %v1721_v39  ;;  %v1781_v31 = vld [vmem:[%s19457_s2 + $0x1bf8] sm:$0xff] }
 0x64c   :  { %v4096_v36 = vpop.f32.mrb[40].mxu1 }
 0x64d   :  { %v4098_v46 = vpop.f32.mrb[41].mxu1  ;;  %4360 = vmatmul.mubr.f32.gmra.mrb[146].mxu1 %v1720_v20  ;;  %11994 = vmatmul.mubr.msk.f32.gmra.mrb[74].mxu0 %vm4664_vm0, %v4096_v36  ;;  %v1780_v36 = vld [vmem:[%s19457_s2 + $0x1bf0] sm:$0xff] }
 0x64e   :  { %4364 = vmatprep.mubr.f32.mxu1 %v1725_v15  ;;  %v1785_v46 = vld [vmem:[%s19457_s2 + $0x1c18] sm:$0xff] }
 0x650   :  { %v4101_v1 = vpop.f32.mrb[42].mxu1 }
 0x651   :  { %v4103_v18 = vpop.f32.mrb[43].mxu1  ;;  %4365 = vmatmul.mubr.f32.gmra.mrb[148].mxu1 %v1724_v23  ;;  %11996 = vmatprep.mubr.msk.f32.mxu0 %vm4664_vm0, %v4101_v1  ;;  %v1784_v1 = vld [vmem:[%s19457_s2 + $0x1c10] sm:$0xff] }
 0x652   :  { %4369 = vmatprep.mubr.f32.mxu1 %v1729_v50  ;;  %v1789_v18 = vld [vmem:[%s19457_s2 + $0x1c38] sm:$0xff] }
 0x654   :  { %v4106_v38 = vpop.f32.mrb[44].mxu1 }
 0x655   :  { %v4108_v59 = vpop.f32.mrb[45].mxu1  ;;  %4370 = vmatmul.mubr.f32.gmra.mrb[194].mxu1 %v1728_v21  ;;  %11997 = vmatmul.mubr.msk.f32.gmra.mrb[76].mxu0 %vm4664_vm0, %v4106_v38  ;;  %v1788_v38 = vld [vmem:[%s19457_s2 + $0x1c30] sm:$0xff] }
 0x656   :  { %4374 = vmatprep.mubr.f32.mxu1 %v1733_v5  ;;  %v1793_v59 = vld [vmem:[%s19457_s2 + $0x1c58] sm:$0xff] }
 0x658   :  { %v4111_v16 = vpop.f32.mrb[46].mxu1 }
 0x659   :  { %v4113_v10 = vpop.f32.mrb[47].mxu1  ;;  %4375 = vmatmul.mubr.f32.gmra.mrb[196].mxu1 %v1732_v60  ;;  %11999 = vmatprep.mubr.msk.f32.mxu0 %vm4664_vm0, %v4111_v16  ;;  %v1792_v16 = vld [vmem:[%s19457_s2 + $0x1c50] sm:$0xff] }
 0x65a   :  { %4379 = vmatprep.mubr.f32.mxu1 %v1737_v24  ;;  %v1797_v10 = vld [vmem:[%s19457_s2 + $0x1c78] sm:$0xff] }
 0x65c   :  { %v4116_v34 = vpop.f32.mrb[48].mxu1 }
 0x65d   :  { %v4118_v7 = vpop.f32.mrb[49].mxu1  ;;  %4380 = vmatmul.mubr.f32.gmra.mrb[198].mxu1 %v1736_v45  ;;  %12000 = vmatmul.mubr.msk.f32.gmra.mrb[78].mxu0 %vm4664_vm0, %v4116_v34  ;;  %v1796_v34 = vld [vmem:[%s19457_s2 + $0x1c70] sm:$0xff] }
 0x65e   :  { %4384 = vmatprep.mubr.f32.mxu1 %v1741_v53  ;;  %v1801_v7 = vld [vmem:[%s19457_s2 + $0x1c98] sm:$0xff] }
 0x660   :  { %v4121_v52 = vpop.f32.mrb[50].mxu1 }
 0x661   :  { %v4123_v27 = vpop.f32.mrb[51].mxu1  ;;  %4385 = vmatmul.mubr.f32.gmra.mrb[200].mxu1 %v1740_v43  ;;  %12010 = vmatprep.mubr.msk.f32.mxu0 %vm4664_vm0, %v4121_v52  ;;  %v1800_v52 = vld [vmem:[%s19457_s2 + $0x1c90] sm:$0xff] }
 0x662   :  { %4389 = vmatprep.mubr.f32.mxu1 %v1745_v3 }
 0x664   :  { %v4126_v56 = vpop.f32.mrb[52].mxu1 }
 0x665   :  { %v4128_v19 = vpop.f32.mrb[53].mxu1  ;;  %4390 = vmatmul.mubr.f32.gmra.mrb[202].mxu1 %v1744_v9  ;;  %12011 = vmatmul.mubr.msk.f32.vlgmr.msra.gmra.mrb[64].mxu0 %vm4664_vm0, %v4126_v56  ;;  %v1804_v9 = vld [vmem:[%s19457_s2 + $0x1cb0] sm:$0xff] }
 0x666   :  { %4394 = vmatprep.mubr.f32.mxu1 %v1749_v48  ;;  %12884 = vmatpush3.bf16.msra.mxu0 %v17900_v58  ;;  %v1757_v58 = vld [vmem:[%s19457_s2 + $0x1b38] sm:$0xff]  ;;  %v4650_v56 = vld [vmem:[%s19458_s3 + $0x190] sm:$0xff] }
 0x667   :  { %12886 = vmatprep.subr.bf16.mxu0 %v12885_v17  ;;  %v1809_v48 = vld [vmem:[%s19457_s2 + $0x1cd8] sm:$0xff]  ;;  %v1808_v19 = vld [vmem:[%s19457_s2 + $0x1cd0] sm:$0xff] }
 0x668   :  { %v4131_v25 = vpop.f32.mrb[54].mxu1 }
 0x669   :  { %v4133_v42 = vpop.f32.mrb[55].mxu1  ;;  %4395 = vmatmul.mubr.f32.gmra.mrb[204].mxu1 %v1748_v4  ;;  %12013 = vmatprep.mubr.msk.f32.mxu0 %vm4664_vm0, %v4131_v25  ;;  %v1813_v4 = vld [vmem:[%s19457_s2 + $0x1cf8] sm:$0xff] }
 0x66a   :  { %4399 = vmatprep.mubr.f32.mxu1 %v1753_v26  ;;  %12888 = vmatpush3.bf16.msra.mxu0 %v12885_v17  ;;  %v12893_v26 = vpack.c.bf16 %v4651_v33, %v4650_v56  ;;  %v4652_v42 = vld [vmem:[%s19458_s3 + $0x1a0] sm:$0xff]  ;;  %v1869_v56 = vld [vmem:[%s19457_s2 + $0x1eb8] sm:$0xff] }
 0x66b   :  { %12890 = vmatprep.subr.bf16.mxu0 %v18028_v41 }
 0x66c   :  { %v4136_v12 = vpop.f32.mrb[56].mxu1 }
 0x66d   :  { %v4138_v47 = vpop.f32.mrb[57].mxu1  ;;  %4400 = vmatmul.mubr.f32.gmra.mrb[206].mxu1 %v1752_v6  ;;  %12014 = vmatmul.mubr.msk.f32.gmra.mrb[66].mxu0 %vm4664_vm0, %v4136_v12  ;;  %v4653_v6 = vld [vmem:[%s19458_s3 + $0x1a8] sm:$0xff]  ;;  %v1812_v12 = vld [vmem:[%s19457_s2 + $0x1cf0] sm:$0xff] }
 0x66e   :  { %4404 = vmatprep.mubr.f32.mxu1 %v1757_v58  ;;  %v1817_v47 = vld [vmem:[%s19457_s2 + $0x1d18] sm:$0xff] }
 0x670   :  { %v4141_v35 = vpop.f32.mrb[58].mxu1 }
 0x671   :  { %v4143_v51 = vpop.f32.mrb[59].mxu1  ;;  %4405 = vmatmul.mubr.f32.gmra.mrb[208].mxu1 %v1756_v22  ;;  %12016 = vmatprep.mubr.msk.f32.mxu0 %vm4664_vm0, %v4141_v35  ;;  %v18156_v22 = vpack.c.bf16 %v4653_v6, %v4652_v42  ;;  %v4655_v42 = vld [vmem:[%s19458_s3 + $0x1b8] sm:$0xff] }
 0x672   :  { %4409 = vmatprep.mubr.f32.mxu1 %v1761_v57  ;;  %v1816_v51 = vld [vmem:[%s19457_s2 + $0x1d10] sm:$0xff] }
 0x674   :  { %v4146_v54 = vpop.f32.mrb[60].mxu1 }
 0x675   :  { %v4148_v37 = vpop.f32.mrb[61].mxu1  ;;  %4410 = vmatmul.mubr.f32.gmra.mrb[210].mxu1 %v1760_v2  ;;  %12017 = vmatmul.mubr.msk.f32.gmra.mrb[68].mxu0 %vm4664_vm0, %v4146_v54  ;;  %v1820_v54 = vld [vmem:[%s19457_s2 + $0x1d30] sm:$0xff] }
 0x676   :  { %4414 = vmatprep.mubr.f32.mxu1 %v1765_v63  ;;  %v1825_v37 = vld [vmem:[%s19457_s2 + $0x1d58] sm:$0xff] }
 0x678   :  { %v4151_v0 = vpop.f32.mrb[62].mxu1 }
 0x679   :  { %v4153_v49 = vpop.f32.mrb[63].mxu1  ;;  %4415 = vmatmul.mubr.f32.gmra.mrb[212].mxu1 %v1764_v62  ;;  %12019 = vmatprep.mubr.msk.f32.mxu0 %vm4664_vm0, %v4151_v0  ;;  %v1824_v0 = vld [vmem:[%s19457_s2 + $0x1d50] sm:$0xff] }
 0x67a   :  { %4419 = vmatprep.mubr.f32.mxu1 %v1769_v11  ;;  %v1829_v49 = vld [vmem:[%s19457_s2 + $0x1d78] sm:$0xff] }
 0x67c   :  { %v4156_v32 = vpop.f32.mrb[64].mxu1 }
 0x67d   :  { %v4158_v55 = vpop.f32.mrb[65].mxu1  ;;  %4420 = vmatmul.mubr.f32.gmra.mrb[214].mxu1 %v1768_v40  ;;  %12020 = vmatmul.mubr.msk.f32.gmra.mrb[70].mxu0 %vm4664_vm0, %v4156_v32  ;;  %v1828_v32 = vld [vmem:[%s19457_s2 + $0x1d70] sm:$0xff] }
 0x67e   :  { %4424 = vmatprep.mubr.f32.mxu1 %v1773_v61  ;;  %v1833_v55 = vld [vmem:[%s19457_s2 + $0x1d98] sm:$0xff] }
 0x680   :  { %v4161_v44 = vpop.f32.mrb[66].mxu1 }
 0x681   :  { %v4163_v39 = vpop.f32.mrb[67].mxu1  ;;  %4425 = vmatmul.mubr.f32.gmra.mrb[216].mxu1 %v1772_v13  ;;  %12022 = vmatprep.mubr.msk.f32.mxu0 %vm4664_vm0, %v4161_v44  ;;  %v1832_v44 = vld [vmem:[%s19457_s2 + $0x1d90] sm:$0xff] }
 0x682   :  { %4429 = vmatprep.mubr.f32.mxu1 %v1777_v28  ;;  %v1837_v39 = vld [vmem:[%s19457_s2 + $0x1db8] sm:$0xff] }
 0x684   :  { %v4166_v20 = vpop.f32.mrb[68].mxu1 }
 0x685   :  { %v4168_v15 = vpop.f32.mrb[69].mxu1  ;;  %4430 = vmatmul.mubr.f32.gmra.mrb[218].mxu1 %v1776_v29  ;;  %12023 = vmatmul.mubr.msk.f32.gmra.mrb[72].mxu0 %vm4664_vm0, %v4166_v20  ;;  %v1836_v20 = vld [vmem:[%s19457_s2 + $0x1db0] sm:$0xff] }
 0x686   :  { %4434 = vmatprep.mubr.f32.mxu1 %v1781_v31  ;;  %v1841_v15 = vld [vmem:[%s19457_s2 + $0x1dd8] sm:$0xff] }
 0x688   :  { %v4171_v23 = vpop.f32.mrb[70].mxu1 }
 0x689   :  { %v4173_v50 = vpop.f32.mrb[71].mxu1  ;;  %4435 = vmatmul.mubr.f32.gmra.mrb[220].mxu1 %v1780_v36  ;;  %12025 = vmatprep.mubr.msk.f32.mxu0 %vm4664_vm0, %v4171_v23  ;;  %v1840_v23 = vld [vmem:[%s19457_s2 + $0x1dd0] sm:$0xff] }
 0x68a   :  { %4439 = vmatprep.mubr.f32.mxu1 %v1785_v46  ;;  %v1845_v50 = vld [vmem:[%s19457_s2 + $0x1df8] sm:$0xff] }
 0x68c   :  { %v4176_v21 = vpop.f32.mrb[72].mxu1 }
 0x68d   :  { %v4178_v5 = vpop.f32.mrb[73].mxu1  ;;  %4440 = vmatmul.mubr.f32.gmra.mrb[222].mxu1 %v1784_v1  ;;  %12026 = vmatmul.mubr.msk.f32.gmra.mrb[74].mxu0 %vm4664_vm0, %v4176_v21  ;;  %v1844_v21 = vld [vmem:[%s19457_s2 + $0x1df0] sm:$0xff] }
 0x68e   :  { %4444 = vmatprep.mubr.f32.mxu1 %v1789_v18  ;;  %v1849_v5 = vld [vmem:[%s19457_s2 + $0x1e18] sm:$0xff] }
 0x690   :  { %v4181_v60 = vpop.f32.mrb[74].mxu1 }
 0x691   :  { %v4183_v24 = vpop.f32.mrb[75].mxu1  ;;  %4445 = vmatmul.mubr.f32.gmra.mrb[224].mxu1 %v1788_v38  ;;  %12028 = vmatprep.mubr.msk.f32.mxu0 %vm4664_vm0, %v4181_v60  ;;  %v1848_v60 = vld [vmem:[%s19457_s2 + $0x1e10] sm:$0xff] }
 0x692   :  { %4449 = vmatprep.mubr.f32.mxu1 %v1793_v59  ;;  %v1853_v24 = vld [vmem:[%s19457_s2 + $0x1e38] sm:$0xff] }
 0x694   :  { %v4186_v45 = vpop.f32.mrb[76].mxu1 }
 0x695   :  { %v4188_v53 = vpop.f32.mrb[77].mxu1  ;;  %4450 = vmatmul.mubr.f32.gmra.mrb[226].mxu1 %v1792_v16  ;;  %12029 = vmatmul.mubr.msk.f32.gmra.mrb[76].mxu0 %vm4664_vm0, %v4186_v45  ;;  %v1852_v45 = vld [vmem:[%s19457_s2 + $0x1e30] sm:$0xff] }
 0x696   :  { %4454 = vmatprep.mubr.f32.mxu1 %v1797_v10  ;;  %v1857_v53 = vld [vmem:[%s19457_s2 + $0x1e58] sm:$0xff] }
 0x698   :  { %v4191_v43 = vpop.f32.mrb[78].mxu1 }
 0x699   :  { %v4193_v3 = vpop.f32.mrb[79].mxu1  ;;  %4455 = vmatmul.mubr.f32.gmra.mrb[228].mxu1 %v1796_v34  ;;  %12031 = vmatprep.mubr.msk.f32.mxu0 %vm4664_vm0, %v4191_v43  ;;  %v1856_v43 = vld [vmem:[%s19457_s2 + $0x1e50] sm:$0xff] }
 0x69a   :  { %4459 = vmatprep.mubr.f32.mxu1 %v1801_v7  ;;  %v1861_v3 = vld [vmem:[%s19457_s2 + $0x1e78] sm:$0xff] }
 0x69c   :  { %v4196_v8 = vpop.f32.mrb[80].mxu1 }
 0x69d   :  { %v4198_v27 = vpop.f32.mrb[81].mxu1  ;;  %4460 = vmatmul.mubr.f32.gmra.mrb[230].mxu1 %v1800_v52  ;;  %12032 = vmatmul.mubr.msk.f32.gmra.mrb[78].mxu0 %vm4664_vm0, %v4196_v8  ;;  %v1860_v8 = vld [vmem:[%s19457_s2 + $0x1e70] sm:$0xff] }
 0x69e   :  { %4464 = vmatprep.mubr.f32.mxu1 %v1805_v30  ;;  %v1865_v27 = vld [vmem:[%s19457_s2 + $0x1e98] sm:$0xff] }
 0x6a0   :  { %v4201_v17 = vpop.f32.mrb[82].mxu1 }
 0x6a1   :  { %v4203_v14 = vpop.f32.mrb[83].mxu1  ;;  %4465 = vmatmul.mubr.f32.gmra.mrb[232].mxu1 %v1804_v9  ;;  %12042 = vmatprep.mubr.msk.f32.mxu0 %vm4664_vm0, %v4201_v17  ;;  %v1864_v17 = vld [vmem:[%s19457_s2 + $0x1e90] sm:$0xff] }
 0x6a2   :  { %4469 = vmatprep.mubr.f32.mxu1 %v1809_v48 }
 0x6a4   :  { %v4206_v25 = vpop.f32.mrb[84].mxu1 }
 0x6a5   :  { %v4208_v58 = vpop.f32.mrb[85].mxu1  ;;  %4470 = vmatmul.mubr.f32.gmra.mrb[234].mxu1 %v1808_v19  ;;  %12043 = vmatmul.mubr.msk.f32.vlgmr.msra.gmra.mrb[64].mxu0 %vm4664_vm0, %v4206_v25  ;;  %v1868_v19 = vld [vmem:[%s19457_s2 + $0x1eb0] sm:$0xff] }
 0x6a6   :  { %4474 = vmatprep.mubr.f32.mxu1 %v1813_v4  ;;  %12892 = vmatpush3.bf16.msra.mxu0 %v18028_v41  ;;  %v1821_v41 = vld [vmem:[%s19457_s2 + $0x1d38] sm:$0xff]  ;;  %v4654_v25 = vld [vmem:[%s19458_s3 + $0x1b0] sm:$0xff] }
 0x6a7   :  { %12894 = vmatprep.subr.bf16.mxu0 %v12893_v26  ;;  %v1873_v4 = vld [vmem:[%s19457_s2 + $0x1ed8] sm:$0xff]  ;;  %v1872_v58 = vld [vmem:[%s19457_s2 + $0x1ed0] sm:$0xff] }
 0x6a8   :  { %v4211_v57 = vpop.f32.mrb[86].mxu1 }
 0x6a9   :  { %v4213_v35 = vpop.f32.mrb[87].mxu1  ;;  %4475 = vmatmul.mubr.f32.gmra.mrb[236].mxu1 %v1812_v12  ;;  %12045 = vmatprep.mubr.msk.f32.mxu0 %vm4664_vm0, %v4211_v57  ;;  %v1877_v12 = vld [vmem:[%s19457_s2 + $0x1ef8] sm:$0xff] }
 0x6aa   :  { %4479 = vmatprep.mubr.f32.mxu1 %v1817_v47  ;;  %12896 = vmatpush3.bf16.msra.mxu0 %v12893_v26  ;;  %v12901_v47 = vpack.c.bf16 %v4655_v42, %v4654_v25  ;;  %v4656_v35 = vld [vmem:[%s19458_s3 + $0x1c0] sm:$0xff] }
 0x6ab   :  { %12898 = vmatprep.subr.bf16.mxu0 %v18156_v22 }
 0x6ac   :  { %v4216_v2 = vpop.f32.mrb[88].mxu1 }
 0x6ad   :  { %v4218_v63 = vpop.f32.mrb[89].mxu1  ;;  %4480 = vmatmul.mubr.f32.gmra.mrb[238].mxu1 %v1816_v51  ;;  %12046 = vmatmul.mubr.msk.f32.gmra.mrb[66].mxu0 %vm4664_vm0, %v4216_v2  ;;  %v4657_v51 = vld [vmem:[%s19458_s3 + $0x1c8] sm:$0xff]  ;;  %v1876_v2 = vld [vmem:[%s19457_s2 + $0x1ef0] sm:$0xff] }
 0x6ae   :  { %4484 = vmatprep.mubr.f32.mxu1 %v1821_v41  ;;  %v1881_v63 = vld [vmem:[%s19457_s2 + $0x1f18] sm:$0xff] }
 0x6b0   :  { %v4221_v62 = vpop.f32.mrb[90].mxu1 }
 0x6b1   :  { %v4223_v11 = vpop.f32.mrb[91].mxu1  ;;  %4485 = vmatmul.mubr.f32.gmra.mrb[240].mxu1 %v1820_v54  ;;  %12048 = vmatprep.mubr.msk.f32.mxu0 %vm4664_vm0, %v4221_v62  ;;  %v18284_v54 = vpack.c.bf16 %v4657_v51, %v4656_v35  ;;  %v19576_v35 = vld [vmem:[#allocation4_spill] sm:$0xff] }
 0x6b2   :  { %4489 = vmatprep.mubr.f32.mxu1 %v1825_v37  ;;  %v1880_v11 = vld [vmem:[%s19457_s2 + $0x1f10] sm:$0xff] }
 0x6b4   :  { %v4226_v40 = vpop.f32.mrb[92].mxu1 }
 0x6b5   :  { %v4228_v61 = vpop.f32.mrb[93].mxu1  ;;  %4490 = vmatmul.mubr.f32.gmra.mrb[242].mxu1 %v1824_v0  ;;  %12049 = vmatmul.mubr.msk.f32.gmra.mrb[68].mxu0 %vm4664_vm0, %v4226_v40  ;;  %v1884_v40 = vld [vmem:[%s19457_s2 + $0x1f30] sm:$0xff] }
 0x6b6   :  { %4494 = vmatprep.mubr.f32.mxu1 %v1829_v49  ;;  %v1889_v61 = vld [vmem:[%s19457_s2 + $0x1f58] sm:$0xff] }
 0x6b8   :  { %v4231_v13 = vpop.f32.mrb[94].mxu1 }
 0x6b9   :  { %v4233_v28 = vpop.f32.mrb[95].mxu1  ;;  %4495 = vmatmul.mubr.f32.gmra.mrb[244].mxu1 %v1828_v32  ;;  %12051 = vmatprep.mubr.msk.f32.mxu0 %vm4664_vm0, %v4231_v13  ;;  %v1888_v13 = vld [vmem:[%s19457_s2 + $0x1f50] sm:$0xff] }
 0x6ba   :  { %4499 = vmatprep.mubr.f32.mxu1 %v1833_v55  ;;  %v1893_v28 = vld [vmem:[%s19457_s2 + $0x1f78] sm:$0xff] }
 0x6bc   :  { %v4236_v29 = vpop.f32.mrb[96].mxu1 }
 0x6bd   :  { %v4238_v31 = vpop.f32.mrb[97].mxu1  ;;  %4500 = vmatmul.mubr.f32.gmra.mrb[246].mxu1 %v1832_v44  ;;  %12052 = vmatmul.mubr.msk.f32.gmra.mrb[70].mxu0 %vm4664_vm0, %v4236_v29  ;;  %v1892_v29 = vld [vmem:[%s19457_s2 + $0x1f70] sm:$0xff] }
 0x6be   :  { %4504 = vmatprep.mubr.f32.mxu1 %v1837_v39  ;;  %v1897_v31 = vld [vmem:[%s19457_s2 + $0x1f98] sm:$0xff] }
 0x6c0   :  { %v4241_v36 = vpop.f32.mrb[98].mxu1 }
 0x6c1   :  { %v4243_v46 = vpop.f32.mrb[99].mxu1  ;;  %4505 = vmatmul.mubr.f32.gmra.mrb[248].mxu1 %v1836_v20  ;;  %12054 = vmatprep.mubr.msk.f32.mxu0 %vm4664_vm0, %v4241_v36  ;;  %v1896_v36 = vld [vmem:[%s19457_s2 + $0x1f90] sm:$0xff] }
 0x6c2   :  { %4509 = vmatprep.mubr.f32.mxu1 %v1841_v15  ;;  %v1901_v46 = vld [vmem:[%s19457_s2 + $0x1fb8] sm:$0xff] }
 0x6c4   :  { %v4246_v1 = vpop.f32.mrb[100].mxu1 }
 0x6c5   :  { %v4248_v18 = vpop.f32.mrb[101].mxu1  ;;  %4510 = vmatmul.mubr.f32.gmra.mrb[250].mxu1 %v1840_v23  ;;  %12055 = vmatmul.mubr.msk.f32.gmra.mrb[72].mxu0 %vm4664_vm0, %v4246_v1  ;;  %v1900_v1 = vld [vmem:[%s19457_s2 + $0x1fb0] sm:$0xff] }
 0x6c6   :  { %4514 = vmatprep.mubr.f32.mxu1 %v1845_v50  ;;  %v1905_v18 = vld [vmem:[%s19457_s2 + $0x1fd8] sm:$0xff] }
 0x6c8   :  { %v4251_v38 = vpop.f32.mrb[102].mxu1 }
 0x6c9   :  { %v4253_v59 = vpop.f32.mrb[103].mxu1  ;;  %4515 = vmatmul.mubr.f32.gmra.mrb[252].mxu1 %v1844_v21  ;;  %12057 = vmatprep.mubr.msk.f32.mxu0 %vm4664_vm0, %v4251_v38  ;;  %v1904_v38 = vld [vmem:[%s19457_s2 + $0x1fd0] sm:$0xff] }
 0x6ca   :  { %4519 = vmatprep.mubr.f32.mxu1 %v1849_v5  ;;  %v1909_v59 = vld [vmem:[%s19457_s2 + $0x1ff8] sm:$0xff] }
 0x6cc   :  { %v4256_v16 = vpop.f32.mrb[104].mxu1 }
 0x6cd   :  { %v4258_v10 = vpop.f32.mrb[105].mxu1  ;;  %4520 = vmatmul.mubr.f32.gmra.mrb[254].mxu1 %v1848_v60  ;;  %12058 = vmatmul.mubr.msk.f32.gmra.mrb[74].mxu0 %vm4664_vm0, %v4256_v16  ;;  %v1908_v16 = vld [vmem:[%s19457_s2 + $0x1ff0] sm:$0xff] }
 0x6ce   :  { %4524 = vmatprep.mubr.f32.mxu1 %v1853_v24 }
 0x6d0   :  { %v4261_v34 = vpop.f32.mrb[106].mxu1 }
 0x6d1   :  { %v4263_v7 = vpop.f32.mrb[107].mxu1  ;;  %4525 = vmatmul.mubr.f32.gmra.mrb[150].mxu1 %v1852_v45  ;;  %12060 = vmatprep.mubr.msk.f32.mxu0 %vm4664_vm0, %v4261_v34 }
 0x6d2   :  { %4529 = vmatprep.mubr.f32.mxu1 %v1857_v53 }
 0x6d4   :  { %v4266_v52 = vpop.f32.mrb[108].mxu1 }
 0x6d5   :  { %v4268_v30 = vpop.f32.mrb[109].mxu1  ;;  %4530 = vmatmul.mubr.f32.gmra.mrb[152].mxu1 %v1856_v43  ;;  %12061 = vmatmul.mubr.msk.f32.gmra.mrb[76].mxu0 %vm4664_vm0, %v4266_v52 }
 0x6d6   :  { %4534 = vmatprep.mubr.f32.mxu1 %v1861_v3 }
 0x6d8   :  { %v4271_v9 = vpop.f32.mrb[110].mxu1 }
 0x6d9   :  { %v4273_v48 = vpop.f32.mrb[111].mxu1  ;;  %4535 = vmatmul.mubr.f32.gmra.mrb[154].mxu1 %v1860_v8  ;;  %12063 = vmatprep.mubr.msk.f32.mxu0 %vm4664_vm0, %v4271_v9 }
 0x6da   :  { %4539 = vmatprep.mubr.f32.mxu1 %v1865_v27 }
 0x6dc   :  { %v4276_v33 = vpop.f32.mrb[112].mxu1 }
 0x6dd   :  { %v4278_v14 = vpop.f32.mrb[113].mxu1  ;;  %4540 = vmatmul.mubr.f32.gmra.mrb[156].mxu1 %v1864_v17  ;;  %12064 = vmatmul.mubr.msk.f32.gmra.mrb[78].mxu0 %vm4664_vm0, %v4276_v33  ;;  %v4658_v17 = vld [vmem:[%s19458_s3 + $0x1d0] sm:$0xff] }
 0x6de   :  { %4544 = vmatprep.mubr.f32.mxu1 %v1869_v56  ;;  %v4659_v56 = vld [vmem:[%s19458_s3 + $0x1d8] sm:$0xff] }
 0x6df   :  { %v12909_v14 = vpack.c.bf16 %v4659_v56, %v4658_v17 }
 0x6e0   :  { %v4281_v26 = vpop.f32.mrb[114].mxu1 }
 0x6e1   :  { %v4283_v6 = vpop.f32.mrb[115].mxu1  ;;  %4545 = vmatmul.mubr.f32.gmra.mrb[158].mxu1 %v1868_v19  ;;  %12074 = vmatprep.mubr.msk.f32.mxu0 %vm4664_vm0, %v4281_v26  ;;  %v4661_v26 = vld [vmem:[%s19458_s3 + $0x1e8] sm:$0xff] }
 0x6e2   :  { %4549 = vmatprep.mubr.f32.mxu1 %v1873_v4  ;;  %v4660_v4 = vld [vmem:[%s19458_s3 + $0x1e0] sm:$0xff] }
 0x6e3   :  { %v18361_v42 = vpack.c.bf16 %v4661_v26, %v4660_v4  ;;  %v4662_v4 = vld [vmem:[%s19458_s3 + $0x1f0] sm:$0xff]  ;;  %v4663_v26 = vld [vmem:[%s19458_s3 + $0x1f8] sm:$0xff] }
 0x6e4   :  { %v4286_v57 = vpop.f32.mrb[116].mxu1 }
 0x6e5   :  { %v4288_v41 = vpop.f32.mrb[117].mxu1  ;;  %4550 = vmatmul.mubr.f32.gmra.mrb[160].mxu1 %v1872_v58  ;;  %12075 = vmatmul.mubr.msk.f32.vlgmr.msra.gmra.mrb[64].mxu0 %vm4664_vm0, %v4286_v57  ;;  %v19575_v58 = vld [vmem:[#allocation3_spill] sm:$0xff] }
 0x6e6   :  { %4554 = vmatprep.mubr.f32.mxu1 %v1877_v12  ;;  %12900 = vmatpush3.bf16.msra.mxu0 %v18156_v22  ;;  %v1885_v22 = vld [vmem:[%s19457_s2 + $0x1f38] sm:$0xff] }
 0x6e7   :  { %12902 = vmatprep.subr.bf16.mxu0 %v12901_v47 }
 0x6e8   :  { %v4291_v37 = vpop.f32.mrb[118].mxu1 }
 0x6e9   :  { %v4293_v62 = vpop.f32.mrb[119].mxu1  ;;  %4555 = vmatmul.mubr.f32.gmra.mrb[162].mxu1 %v1876_v2  ;;  %12077 = vmatprep.mubr.msk.f32.mxu0 %vm4664_vm0, %v4291_v37 }
 0x6ea   :  { %4559 = vmatprep.mubr.f32.mxu1 %v1881_v63  ;;  %12904 = vmatpush3.bf16.msra.mxu0 %v12901_v47  ;;  %v19577_v63 = vld [vmem:[#allocation5_spill] sm:$0xff] }
 0x6eb   :  { %12906 = vmatprep.subr.bf16.mxu0 %v18284_v54 }
 0x6ec   :  { %v4296_v0 = vpop.f32.mrb[120].mxu1 }
 0x6ed   :  { %v4298_v49 = vpop.f32.mrb[121].mxu1  ;;  %4560 = vmatmul.mubr.f32.gmra.mrb[164].mxu1 %v1880_v11  ;;  %12078 = vmatmul.mubr.msk.f32.gmra.mrb[66].mxu0 %vm4664_vm0, %v4296_v0  ;;  %v19578_v11 = vld [vmem:[#allocation6_spill] sm:$0xff] }
 0x6ee   :  { %4564 = vmatprep.mubr.f32.mxu1 %v1885_v22 }
 0x6f0   :  { %v4301_v32 = vpop.f32.mrb[122].mxu1 }
 0x6f1   :  { %v4303_v55 = vpop.f32.mrb[123].mxu1  ;;  %4565 = vmatmul.mubr.f32.gmra.mrb[166].mxu1 %v1884_v40  ;;  %12080 = vmatprep.mubr.msk.f32.mxu0 %vm4664_vm0, %v4301_v32  ;;  %v19579_v40 = vld [vmem:[#allocation7_spill] sm:$0xff] }
 0x6f2   :  { %4569 = vmatprep.mubr.f32.mxu1 %v1889_v61 }
 0x6f4   :  { %v4306_v44 = vpop.f32.mrb[124].mxu1 }
 0x6f5   :  { %v4308_v39 = vpop.f32.mrb[125].mxu1  ;;  %4570 = vmatmul.mubr.f32.gmra.mrb[168].mxu1 %v1888_v13  ;;  %12081 = vmatmul.mubr.msk.f32.gmra.mrb[68].mxu0 %vm4664_vm0, %v4306_v44  ;;  %v19580_v13 = vld [vmem:[#allocation8_spill] sm:$0xff] }
 0x6f6   :  { %4574 = vmatprep.mubr.f32.mxu1 %v1893_v28 }
 0x6f8   :  { %v4311_v20 = vpop.f32.mrb[126].mxu1 }
 0x6f9   :  { %v4313_v15 = vpop.f32.mrb[127].mxu1  ;;  %4575 = vmatmul.mubr.f32.gmra.mrb[170].mxu1 %v1892_v29  ;;  %12083 = vmatprep.mubr.msk.f32.mxu0 %vm4664_vm0, %v4311_v20  ;;  %v19581_v29 = vld [vmem:[#allocation9_spill] sm:$0xff] }
 0x6fa   :  { %4579 = vmatprep.mubr.f32.mxu1 %v1897_v31 }
 0x6fc   :  { %v4316_v23 = vpop.f32.mrb[128].mxu1 }
 0x6fd   :  { %v4318_v50 = vpop.f32.mrb[129].mxu1  ;;  %4580 = vmatmul.mubr.f32.gmra.mrb[172].mxu1 %v1896_v36  ;;  %12084 = vmatmul.mubr.msk.f32.gmra.mrb[70].mxu0 %vm4664_vm0, %v4316_v23  ;;  %v19582_v36 = vld [vmem:[#allocation10_spill] sm:$0xff] }
 0x6fe   :  { %4584 = vmatprep.mubr.f32.mxu1 %v1901_v46 }
 0x700   :  { %v4321_v21 = vpop.f32.mrb[130].mxu1 }
 0x701   :  { %v4323_v5 = vpop.f32.mrb[131].mxu1  ;;  %4585 = vmatmul.mubr.f32.gmra.mrb[174].mxu1 %v1900_v1  ;;  %12086 = vmatprep.mubr.msk.f32.mxu0 %vm4664_vm0, %v4321_v21  ;;  %v19583_v1 = vld [vmem:[#allocation11_spill] sm:$0xff] }
 0x702   :  { %4589 = vmatprep.mubr.f32.mxu1 %v1905_v18 }
 0x704   :  { %v4326_v60 = vpop.f32.mrb[132].mxu1 }
 0x705   :  { %v4328_v24 = vpop.f32.mrb[133].mxu1  ;;  %4590 = vmatmul.mubr.f32.gmra.mrb[176].mxu1 %v1904_v38  ;;  %12087 = vmatmul.mubr.msk.f32.gmra.mrb[72].mxu0 %vm4664_vm0, %v4326_v60  ;;  %v19584_v38 = vld [vmem:[#allocation12_spill] sm:$0xff] }
 0x706   :  { %4594 = vmatprep.mubr.f32.mxu1 %v1909_v59 }
 0x708   :  { %v4331_v10 = vpop.f32.mrb[134].mxu1 }
 0x709   :  { %v4333_v45 = vpop.f32.mrb[135].mxu1  ;;  %4595 = vmatmul.mubr.f32.gmra.mrb[178].mxu1 %v1908_v16  ;;  %12089 = vmatprep.mubr.msk.f32.mxu0 %vm4664_vm0, %v4331_v10  ;;  %v19585_v16 = vld [vmem:[#allocation13_spill] sm:$0xff] }
 0x70c   :  { %v4336_v53 = vpop.f32.mrb[136].mxu1 }
 0x70d   :  { %v4338_v34 = vpop.f32.mrb[137].mxu1  ;;  %12090 = vmatmul.mubr.msk.f32.gmra.mrb[74].mxu0 %vm4664_vm0, %v4336_v53 }
 0x70e   :  { %v19586_v34 = vld [vmem:[#allocation14_spill] sm:$0xff] }
 0x710   :  { %v4341_v7 = vpop.f32.mrb[138].mxu1 }
 0x711   :  { %v4343_v43 = vpop.f32.mrb[139].mxu1  ;;  %12092 = vmatprep.mubr.msk.f32.mxu0 %vm4664_vm0, %v4341_v7 }
 0x714   :  { %v4346_v3 = vpop.f32.mrb[140].mxu1 }
 0x715   :  { %v4348_v52 = vpop.f32.mrb[141].mxu1  ;;  %12093 = vmatmul.mubr.msk.f32.gmra.mrb[76].mxu0 %vm4664_vm0, %v4346_v3 }
 0x716   :  { %v19587_v52 = vld [vmem:[#allocation15_spill] sm:$0xff] }
 0x718   :  { %v4351_v30 = vpop.f32.mrb[142].mxu1 }
 0x719   :  { %v4353_v8 = vpop.f32.mrb[143].mxu1  ;;  %12095 = vmatprep.mubr.msk.f32.mxu0 %vm4664_vm0, %v4351_v30 }
 0x71c   :  { %v4356_v27 = vpop.f32.mrb[144].mxu1 }
 0x71d   :  { %v4358_v9 = vpop.f32.mrb[145].mxu1  ;;  %12096 = vmatmul.mubr.msk.f32.gmra.mrb[78].mxu0 %vm4664_vm0, %v4356_v27 }
 0x71e   :  { %v19588_v9 = vld [vmem:[#allocation16_spill] sm:$0xff] }
 0x720   :  { %v4361_v48 = vpop.f32.mrb[146].mxu1 }
 0x721   :  { %v4363_v33 = vpop.f32.mrb[147].mxu1  ;;  %12106 = vmatprep.mubr.msk.f32.mxu0 %vm4664_vm0, %v4361_v48 }
 0x722   :  { %v19589_v33 = vld [vmem:[#allocation19_spill] sm:$0xff] }
 0x724   :  { %v4366_v19 = vpop.f32.mrb[148].mxu1 }
 0x725   :  { %v4368_v25 = vpop.f32.mrb[149].mxu1  ;;  %12107 = vmatmul.mubr.msk.f32.vlgmr.msra.gmra.mrb[64].mxu0 %vm4664_vm0, %v4366_v19 }
 0x726   :  { %12908 = vmatpush3.bf16.msra.mxu0 %v18284_v54 }
 0x727   :  { %12910 = vmatprep.subr.bf16.mxu0 %v12909_v14 }
 0x728   :  { %v4371_v6 = vpop.f32.mrb[194].mxu1 }
 0x729   :  { %v4372_v12 = vadd.f32 %v4371_v6, %v19575_v58  ;;  %v4373_v47 = vpop.f32.mrb[195].mxu1  ;;  %v19590_v6 = vld [vmem:[#allocation22_spill] sm:$0xff] }
 0x72a   :  { %12912 = vmatpush3.bf16.msra.mxu0 %v12909_v14  ;;  %v12917_v47 = vpack.c.bf16 %v4663_v26, %v4662_v4  ;;  %v19605_v4 = vld [vmem:[#allocation61_spill] sm:$0xff] }
 0x72b   :  { %12109 = vmatprep.mubr.msk.f32.mxu0 %vm4664_vm0, %v4372_v12  ;;  %12914 = vmatprep.subr.bf16.mxu0 %v18361_v42 }
 0x72c   :  { %v4376_v57 = vpop.f32.mrb[196].mxu1 }
 0x72d   :  { %v4377_v51 = vadd.f32 %v4376_v57, %v19576_v35  ;;  %v4378_v41 = vpop.f32.mrb[197].mxu1  ;;  %v19591_v35 = vld [vmem:[#allocation25_spill] sm:$0xff] }
 0x72f   :  { %12110 = vmatmul.mubr.msk.f32.gmra.mrb[66].mxu0 %vm4664_vm0, %v4377_v51 }
 0x730   :  { %v4381_v2 = vpop.f32.mrb[198].mxu1 }
 0x731   :  { %v4382_v54 = vadd.f32 %v4381_v2, %v19577_v63  ;;  %v4383_v37 = vpop.f32.mrb[199].mxu1  ;;  %v19592_v63 = vld [vmem:[#allocation28_spill] sm:$0xff] }
 0x733   :  { %12112 = vmatprep.mubr.msk.f32.mxu0 %vm4664_vm0, %v4382_v54 }
 0x734   :  { %v4386_v62 = vpop.f32.mrb[200].mxu1 }
 0x735   :  { %v4387_v22 = vadd.f32 %v4386_v62, %v19578_v11  ;;  %v4388_v0 = vpop.f32.mrb[201].mxu1  ;;  %v19593_v11 = vld [vmem:[#allocation31_spill] sm:$0xff] }
 0x737   :  { %12113 = vmatmul.mubr.msk.f32.gmra.mrb[68].mxu0 %vm4664_vm0, %v4387_v22 }
 0x738   :  { %v4391_v49 = vpop.f32.mrb[202].mxu1 }
 0x739   :  { %v4392_v61 = vadd.f32 %v4391_v49, %v19579_v40  ;;  %v4393_v32 = vpop.f32.mrb[203].mxu1  ;;  %v19594_v49 = vld [vmem:[#allocation34_spill] sm:$0xff] }
 0x73b   :  { %12115 = vmatprep.mubr.msk.f32.mxu0 %vm4664_vm0, %v4392_v61 }
 0x73c   :  { %v4396_v55 = vpop.f32.mrb[204].mxu1 }
 0x73d   :  { %v4397_v28 = vadd.f32 %v4396_v55, %v19580_v13  ;;  %v4398_v44 = vpop.f32.mrb[205].mxu1  ;;  %v19595_v55 = vld [vmem:[#allocation37_spill] sm:$0xff] }
 0x73f   :  { %12116 = vmatmul.mubr.msk.f32.gmra.mrb[70].mxu0 %vm4664_vm0, %v4397_v28 }
 0x740   :  { %v4401_v39 = vpop.f32.mrb[206].mxu1 }
 0x741   :  { %v4402_v31 = vadd.f32 %v4401_v39, %v19581_v29  ;;  %v4403_v20 = vpop.f32.mrb[207].mxu1  ;;  %v19596_v39 = vld [vmem:[#allocation40_spill] sm:$0xff] }
 0x743   :  { %12118 = vmatprep.mubr.msk.f32.mxu0 %vm4664_vm0, %v4402_v31 }
 0x744   :  { %v4406_v15 = vpop.f32.mrb[208].mxu1 }
 0x745   :  { %v4407_v46 = vadd.f32 %v4406_v15, %v19582_v36  ;;  %v4408_v23 = vpop.f32.mrb[209].mxu1  ;;  %v19597_v15 = vld [vmem:[#allocation43_spill] sm:$0xff] }
 0x747   :  { %12119 = vmatmul.mubr.msk.f32.gmra.mrb[72].mxu0 %vm4664_vm0, %v4407_v46 }
 0x748   :  { %v4411_v50 = vpop.f32.mrb[210].mxu1 }
 0x749   :  { %v4412_v18 = vadd.f32 %v4411_v50, %v19583_v1  ;;  %v4413_v21 = vpop.f32.mrb[211].mxu1  ;;  %v19598_v50 = vld [vmem:[#allocation46_spill] sm:$0xff] }
 0x74b   :  { %12121 = vmatprep.mubr.msk.f32.mxu0 %vm4664_vm0, %v4412_v18 }
 0x74c   :  { %v4416_v5 = vpop.f32.mrb[212].mxu1 }
 0x74d   :  { %v4417_v59 = vadd.f32 %v4416_v5, %v19584_v38  ;;  %v4418_v60 = vpop.f32.mrb[213].mxu1  ;;  %v19599_v5 = vld [vmem:[#allocation49_spill] sm:$0xff] }
 0x74f   :  { %12122 = vmatmul.mubr.msk.f32.gmra.mrb[74].mxu0 %vm4664_vm0, %v4417_v59 }
 0x750   :  { %v4421_v24 = vpop.f32.mrb[214].mxu1 }
 0x751   :  { %v4422_v10 = vadd.f32 %v4421_v24, %v19585_v16  ;;  %v4423_v45 = vpop.f32.mrb[215].mxu1  ;;  %v19600_v24 = vld [vmem:[#allocation51_spill] sm:$0xff] }
 0x753   :  { %12124 = vmatprep.mubr.msk.f32.mxu0 %vm4664_vm0, %v4422_v10 }
 0x754   :  { %v4426_v53 = vpop.f32.mrb[216].mxu1 }
 0x755   :  { %v4427_v7 = vadd.f32 %v4426_v53, %v19586_v34  ;;  %v4428_v43 = vpop.f32.mrb[217].mxu1  ;;  %v19601_v53 = vld [vmem:[#allocation53_spill] sm:$0xff] }
 0x757   :  { %12125 = vmatmul.mubr.msk.f32.gmra.mrb[76].mxu0 %vm4664_vm0, %v4427_v7 }
 0x758   :  { %v4431_v3 = vpop.f32.mrb[218].mxu1 }
 0x759   :  { %v4432_v30 = vadd.f32 %v4431_v3, %v19587_v52  ;;  %v4433_v8 = vpop.f32.mrb[219].mxu1  ;;  %v19602_v3 = vld [vmem:[#allocation55_spill] sm:$0xff] }
 0x75b   :  { %12127 = vmatprep.mubr.msk.f32.mxu0 %vm4664_vm0, %v4432_v30 }
 0x75c   :  { %v4436_v27 = vpop.f32.mrb[220].mxu1 }
 0x75d   :  { %v4437_v48 = vadd.f32 %v4436_v27, %v19588_v9  ;;  %v4438_v17 = vpop.f32.mrb[221].mxu1  ;;  %v19603_v27 = vld [vmem:[#allocation57_spill] sm:$0xff] }
 0x75f   :  { %12128 = vmatmul.mubr.msk.f32.gmra.mrb[78].mxu0 %vm4664_vm0, %v4437_v48 }
 0x760   :  { %v4441_v56 = vpop.f32.mrb[222].mxu1 }
 0x761   :  { %v4442_v14 = vadd.f32 %v4441_v56, %v19589_v33  ;;  %v4443_v19 = vpop.f32.mrb[223].mxu1  ;;  %v19604_v56 = vld [vmem:[#allocation59_spill] sm:$0xff] }
 0x763   :  { %12138 = vmatprep.mubr.msk.f32.mxu0 %vm4664_vm0, %v4442_v14 }
 0x764   :  { %v4446_v25 = vpop.f32.mrb[224].mxu1 }
 0x765   :  { %v4447_v58 = vadd.f32 %v4446_v25, %v19590_v6  ;;  %v4448_v12 = vpop.f32.mrb[225].mxu1 }
 0x767   :  { %12139 = vmatmul.mubr.msk.f32.vlgmr.msra.gmra.mrb[64].mxu0 %vm4664_vm0, %v4447_v58  ;;  %v19606_v58 = vld [vmem:[#allocation63_spill] sm:$0xff] }
 0x768   :  { %v4451_v57 = vpop.f32.mrb[226].mxu1  ;;  %12916 = vmatpush3.bf16.msra.mxu0 %v18361_v42 }
 0x769   :  { %v4452_v51 = vadd.f32 %v4451_v57, %v19591_v35  ;;  %v4453_v41 = vpop.f32.mrb[227].mxu1  ;;  %12918 = vmatprep.subr.bf16.mxu0 %v12917_v47  ;;  %v19607_v35 = vld [vmem:[#allocation64_spill] sm:$0xff] }
 0x76b   :  { %12141 = vmatprep.mubr.msk.f32.mxu0 %vm4664_vm0, %v4452_v51 }
 0x76c   :  { %v4456_v2 = vpop.f32.mrb[228].mxu1  ;;  %12920 = vmatpush3.bf16.msra.mxu0 %v12917_v47 }
 0x76d   :  { %v4457_v54 = vadd.f32 %v4456_v2, %v19592_v63  ;;  %v4458_v37 = vpop.f32.mrb[229].mxu1  ;;  %v19608_v63 = vld [vmem:[#allocation65_spill] sm:$0xff] }
 0x76f   :  { %12142 = vmatmul.mubr.msk.f32.gmra.mrb[66].mxu0 %vm4664_vm0, %v4457_v54 }
 0x770   :  { %v4461_v62 = vpop.f32.mrb[230].mxu1 }
 0x771   :  { %v4462_v22 = vadd.f32 %v4461_v62, %v19593_v11  ;;  %v4463_v0 = vpop.f32.mrb[231].mxu1  ;;  %v19609_v11 = vld [vmem:[#allocation66_spill] sm:$0xff] }
 0x773   :  { %12144 = vmatprep.mubr.msk.f32.mxu0 %vm4664_vm0, %v4462_v22 }
 0x774   :  { %v4466_v42 = vpop.f32.mrb[232].mxu1 }
 0x775   :  { %v4467_v40 = vadd.f32 %v4466_v42, %v19594_v49  ;;  %v4468_v61 = vpop.f32.mrb[233].mxu1  ;;  %v19610_v49 = vld [vmem:[#allocation67_spill] sm:$0xff] }
 0x777   :  { %12145 = vmatmul.mubr.msk.f32.gmra.mrb[68].mxu0 %vm4664_vm0, %v4467_v40 }
 0x778   :  { %v4471_v32 = vpop.f32.mrb[234].mxu1 }
 0x779   :  { %v4472_v13 = vadd.f32 %v4471_v32, %v19595_v55  ;;  %v4473_v28 = vpop.f32.mrb[235].mxu1  ;;  %v19611_v55 = vld [vmem:[#allocation68_spill] sm:$0xff] }
 0x77b   :  { %12147 = vmatprep.mubr.msk.f32.mxu0 %vm4664_vm0, %v4472_v13 }
 0x77c   :  { %v4476_v44 = vpop.f32.mrb[236].mxu1 }
 0x77d   :  { %v4477_v29 = vadd.f32 %v4476_v44, %v19596_v39  ;;  %v4478_v31 = vpop.f32.mrb[237].mxu1  ;;  %v19612_v39 = vld [vmem:[#allocation69_spill] sm:$0xff] }
 0x77f   :  { %12148 = vmatmul.mubr.msk.f32.gmra.mrb[70].mxu0 %vm4664_vm0, %v4477_v29 }
 0x780   :  { %v4481_v20 = vpop.f32.mrb[238].mxu1 }
 0x781   :  { %v4482_v36 = vadd.f32 %v4481_v20, %v19597_v15  ;;  %v4483_v46 = vpop.f32.mrb[239].mxu1  ;;  %v19613_v15 = vld [vmem:[#allocation70_spill] sm:$0xff] }
 0x783   :  { %12150 = vmatprep.mubr.msk.f32.mxu0 %vm4664_vm0, %v4482_v36 }
 0x784   :  { %v4486_v23 = vpop.f32.mrb[240].mxu1 }
 0x785   :  { %v4487_v1 = vadd.f32 %v4486_v23, %v19598_v50  ;;  %v4488_v18 = vpop.f32.mrb[241].mxu1  ;;  %v19614_v50 = vld [vmem:[#allocation71_spill] sm:$0xff] }
 0x787   :  { %12151 = vmatmul.mubr.msk.f32.gmra.mrb[72].mxu0 %vm4664_vm0, %v4487_v1 }
 0x788   :  { %v4491_v21 = vpop.f32.mrb[242].mxu1 }
 0x789   :  { %v4492_v38 = vadd.f32 %v4491_v21, %v19599_v5  ;;  %v4493_v59 = vpop.f32.mrb[243].mxu1  ;;  %v19615_v5 = vld [vmem:[#allocation72_spill] sm:$0xff] }
 0x78b   :  { %12153 = vmatprep.mubr.msk.f32.mxu0 %vm4664_vm0, %v4492_v38 }
 0x78c   :  { %v4496_v60 = vpop.f32.mrb[244].mxu1 }
 0x78d   :  { %v4497_v16 = vadd.f32 %v4496_v60, %v19600_v24  ;;  %v4498_v10 = vpop.f32.mrb[245].mxu1  ;;  %v19616_v24 = vld [vmem:[#allocation73_spill] sm:$0xff] }
 0x78f   :  { %12154 = vmatmul.mubr.msk.f32.gmra.mrb[74].mxu0 %vm4664_vm0, %v4497_v16 }
 0x790   :  { %v4501_v45 = vpop.f32.mrb[246].mxu1 }
 0x791   :  { %v4502_v34 = vadd.f32 %v4501_v45, %v19601_v53  ;;  %v4503_v7 = vpop.f32.mrb[247].mxu1  ;;  %v19617_v53 = vld [vmem:[#allocation74_spill] sm:$0xff] }
 0x793   :  { %12156 = vmatprep.mubr.msk.f32.mxu0 %vm4664_vm0, %v4502_v34 }
 0x794   :  { %v4506_v43 = vpop.f32.mrb[248].mxu1 }
 0x795   :  { %v4507_v52 = vadd.f32 %v4506_v43, %v19602_v3  ;;  %v4508_v30 = vpop.f32.mrb[249].mxu1  ;;  %v19618_v3 = vld [vmem:[#allocation75_spill] sm:$0xff] }
 0x797   :  { %12157 = vmatmul.mubr.msk.f32.gmra.mrb[76].mxu0 %vm4664_vm0, %v4507_v52 }
 0x798   :  { %v4511_v8 = vpop.f32.mrb[250].mxu1 }
 0x799   :  { %v4512_v9 = vadd.f32 %v4511_v8, %v19603_v27  ;;  %v4513_v48 = vpop.f32.mrb[251].mxu1  ;;  %v19619_v27 = vld [vmem:[#allocation76_spill] sm:$0xff] }
 0x79b   :  { %12159 = vmatprep.mubr.msk.f32.mxu0 %vm4664_vm0, %v4512_v9 }
 0x79c   :  { %v4516_v17 = vpop.f32.mrb[252].mxu1 }
 0x79d   :  { %v4517_v33 = vadd.f32 %v4516_v17, %v19604_v56  ;;  %v4518_v14 = vpop.f32.mrb[253].mxu1  ;;  %v19620_v56 = vld [vmem:[#allocation77_spill] sm:$0xff] }
 0x79f   :  { %12160 = vmatmul.mubr.msk.f32.gmra.mrb[78].mxu0 %vm4664_vm0, %v4517_v33 }
 0x7a0   :  { %v4521_v19 = vpop.f32.mrb[254].mxu1 }
 0x7a1   :  { %v4522_v26 = vadd.f32 %v4521_v19, %v19605_v4  ;;  %v4523_v25 = vpop.f32.mrb[255].mxu1 }
 0x7a3   :  { %12170 = vmatprep.mubr.msk.f32.mxu0 %vm4664_vm0, %v4522_v26 }
 0x7a4   :  { %v4526_v6 = vpop.f32.mrb[150].mxu1 }
 0x7a5   :  { %v4527_v12 = vadd.f32 %v4526_v6, %v19606_v58  ;;  %v4528_v47 = vpop.f32.mrb[151].mxu1 }
 0x7a7   :  { %12171 = vmatmul.mubr.msk.f32.vlgmr.msra.gmra.mrb[64].mxu0 %vm4664_vm0, %v4527_v12 }
 0x7a8   :  { %v4531_v57 = vpop.f32.mrb[152].mxu1 }
 0x7a9   :  { %v4532_v51 = vadd.f32 %v4531_v57, %v19607_v35  ;;  %v4533_v41 = vpop.f32.mrb[153].mxu1 }
 0x7ab   :  { %12173 = vmatprep.mubr.msk.f32.mxu0 %vm4664_vm0, %v4532_v51 }
 0x7ac   :  { %v4536_v2 = vpop.f32.mrb[154].mxu1 }
 0x7ad   :  { %v4537_v54 = vadd.f32 %v4536_v2, %v19608_v63  ;;  %v4538_v37 = vpop.f32.mrb[155].mxu1 }
 0x7af   :  { %12174 = vmatmul.mubr.msk.f32.gmra.mrb[66].mxu0 %vm4664_vm0, %v4537_v54 }
 0x7b0   :  { %v4541_v62 = vpop.f32.mrb[156].mxu1 }
 0x7b1   :  { %v4542_v22 = vadd.f32 %v4541_v62, %v19609_v11  ;;  %v4543_v0 = vpop.f32.mrb[157].mxu1  ;;  %v8171_v62 = vld [vmem:[%s19459_s6] sm:$0xff] }
 0x7b3   :  { %12176 = vmatprep.mubr.msk.f32.mxu0 %vm4664_vm0, %v4542_v22 }
 0x7b4   :  { %v4546_v42 = vpop.f32.mrb[158].mxu1 }
 0x7b5   :  { %v4547_v40 = vadd.f32 %v4546_v42, %v19610_v49  ;;  %v4548_v61 = vpop.f32.mrb[159].mxu1 }
 0x7b7   :  { %12177 = vmatmul.mubr.msk.f32.gmra.mrb[68].mxu0 %vm4664_vm0, %v4547_v40 }
 0x7b8   :  { %v4551_v32 = vpop.f32.mrb[160].mxu1 }
 0x7b9   :  { %v4552_v13 = vadd.f32 %v4551_v32, %v19611_v55  ;;  %v4553_v28 = vpop.f32.mrb[161].mxu1 }
 0x7bb   :  { %12179 = vmatprep.mubr.msk.f32.mxu0 %vm4664_vm0, %v4552_v13 }
 0x7bc   :  { %v4556_v44 = vpop.f32.mrb[162].mxu1 }
 0x7bd   :  { %v4557_v29 = vadd.f32 %v4556_v44, %v19612_v39  ;;  %v4558_v31 = vpop.f32.mrb[163].mxu1 }
 0x7bf   :  { %12180 = vmatmul.mubr.msk.f32.gmra.mrb[70].mxu0 %vm4664_vm0, %v4557_v29 }
 0x7c0   :  { %v4561_v20 = vpop.f32.mrb[164].mxu1 }
 0x7c1   :  { %v4562_v36 = vadd.f32 %v4561_v20, %v19613_v15  ;;  %v4563_v46 = vpop.f32.mrb[165].mxu1 }
 0x7c3   :  { %12182 = vmatprep.mubr.msk.f32.mxu0 %vm4664_vm0, %v4562_v36 }
 0x7c4   :  { %v4566_v23 = vpop.f32.mrb[166].mxu1 }
 0x7c5   :  { %v4567_v1 = vadd.f32 %v4566_v23, %v19614_v50  ;;  %v4568_v18 = vpop.f32.mrb[167].mxu1 }
 0x7c7   :  { %12183 = vmatmul.mubr.msk.f32.gmra.mrb[72].mxu0 %vm4664_vm0, %v4567_v1 }
 0x7c8   :  { %v4571_v21 = vpop.f32.mrb[168].mxu1 }
 0x7c9   :  { %v4572_v38 = vadd.f32 %v4571_v21, %v19615_v5  ;;  %v4573_v59 = vpop.f32.mrb[169].mxu1 }
 0x7cb   :  { %12185 = vmatprep.mubr.msk.f32.mxu0 %vm4664_vm0, %v4572_v38 }
 0x7cc   :  { %v4576_v60 = vpop.f32.mrb[170].mxu1 }
 0x7cd   :  { %v4577_v16 = vadd.f32 %v4576_v60, %v19616_v24  ;;  %v4578_v10 = vpop.f32.mrb[171].mxu1 }
 0x7cf   :  { %12186 = vmatmul.mubr.msk.f32.gmra.mrb[74].mxu0 %vm4664_vm0, %v4577_v16 }
 0x7d0   :  { %v4581_v45 = vpop.f32.mrb[172].mxu1 }
 0x7d1   :  { %v4582_v34 = vadd.f32 %v4581_v45, %v19617_v53  ;;  %v4583_v7 = vpop.f32.mrb[173].mxu1 }
 0x7d3   :  { %12188 = vmatprep.mubr.msk.f32.mxu0 %vm4664_vm0, %v4582_v34 }
 0x7d4   :  { %v4586_v43 = vpop.f32.mrb[174].mxu1 }
 0x7d5   :  { %v4587_v52 = vadd.f32 %v4586_v43, %v19618_v3  ;;  %v4588_v30 = vpop.f32.mrb[175].mxu1 }
 0x7d7   :  { %12189 = vmatmul.mubr.msk.f32.gmra.mrb[76].mxu0 %vm4664_vm0, %v4587_v52 }
 0x7d8   :  { %v4591_v8 = vpop.f32.mrb[176].mxu1 }
 0x7d9   :  { %v4592_v9 = vadd.f32 %v4591_v8, %v19619_v27  ;;  %v4593_v48 = vpop.f32.mrb[177].mxu1 }
 0x7db   :  { %12191 = vmatprep.mubr.msk.f32.mxu0 %vm4664_vm0, %v4592_v9 }
 0x7dc   :  { %v4596_v17 = vpop.f32.mrb[178].mxu1 }
 0x7dd   :  { %v4597_v33 = vadd.f32 %v4596_v17, %v19620_v56  ;;  %v4598_v14 = vpop.f32.mrb[179].mxu1 }
 0x7df   :  { %12192 = vmatmul.mubr.msk.f32.gmra.mrb[78].mxu0 %vm4664_vm0, %v4597_v33 }
 0x7e0   :  { %12226 = vmatprep.mubr.f32.mxu0 %v8171_v62 }
 0x87a   :  { %v18463_v19 = vpop.f32.mrb[64].mxu0 }
 0x87b   :  { %v7979_v4 = vsel %vm7977_vm4, %v18463_v19, 0.0  ;;  %v8017_v26 = vmul.f32 %v18463_v19, %v18463_v19  ;;  %v18469_v25 = vpop.f32.mrb[65].mxu0 }
 0x87c   :  { %v7978_v6 = vsel %vm7977_vm4, %v18469_v25, 0.0  ;;  %v8016_v58 = vmul.f32 %v18469_v25, %v18469_v25 }
 0x87d   :  { %v8033_v12 = vsel %vm7977_vm4, %v8017_v26, 0.0  ;;  %v7980_v47 = vadd.f32 %v7979_v4, %v7978_v6 }
 0x87e   :  { %v8032_v57 = vsel %vm7977_vm4, %v8016_v58, 0.0 }
 0x87f   :  { %v8034_v35 = vadd.f32 %v8033_v12, %v8032_v57 }
 0x882   :  { %v18477_v51 = vpop.f32.mrb[66].mxu0 }
 0x883   :  { %v18479_v41 = vpop.f32.mrb[67].mxu0  ;;  %v8019_v2 = vmul.f32 %v18477_v51, %v18477_v51  ;;  %v7983_v11 = vsel %vm7977_vm4, %v18477_v51, 0.0 }
 0x884   :  { %v7981_v63 = vsel %vm7977_vm4, %v18479_v41, 0.0  ;;  %v8018_v54 = vmul.f32 %v18479_v41, %v18479_v41 }
 0x885   :  { %v7982_v37 = vadd.f32 %v7981_v63, %v7980_v47  ;;  %v8037_v49 = vsel %vm7977_vm4, %v8019_v2, 0.0 }
 0x886   :  { %v8035_v22 = vsel %vm7977_vm4, %v8018_v54, 0.0 }
 0x887   :  { %v8036_v0 = vadd.f32 %v8035_v22, %v8034_v35  ;;  %v7984_v42 = vadd.f32 %v7983_v11, %v7982_v37 }
 0x889   :  { %v8038_v40 = vadd.f32 %v8037_v49, %v8036_v0 }
 0x88a   :  { %v18494_v61 = vpop.f32.mrb[68].mxu0 }
 0x88b   :  { %v18496_v32 = vpop.f32.mrb[69].mxu0  ;;  %v8021_v55 = vmul.f32 %v18494_v61, %v18494_v61  ;;  %v7987_v39 = vsel %vm7977_vm4, %v18494_v61, 0.0 }
 0x88c   :  { %v7985_v13 = vsel %vm7977_vm4, %v18496_v32, 0.0  ;;  %v8020_v28 = vmul.f32 %v18496_v32, %v18496_v32 }
 0x88d   :  { %v7986_v44 = vadd.f32 %v7985_v13, %v7984_v42  ;;  %v8041_v15 = vsel %vm7977_vm4, %v8021_v55, 0.0 }
 0x88e   :  { %v8039_v29 = vsel %vm7977_vm4, %v8020_v28, 0.0 }
 0x88f   :  { %v8040_v31 = vadd.f32 %v8039_v29, %v8038_v40  ;;  %v7988_v20 = vadd.f32 %v7987_v39, %v7986_v44 }
 0x891   :  { %v8042_v36 = vadd.f32 %v8041_v15, %v8040_v31 }
 0x892   :  { %v18508_v46 = vpop.f32.mrb[70].mxu0 }
 0x893   :  { %v18510_v23 = vpop.f32.mrb[71].mxu0  ;;  %v8023_v50 = vmul.f32 %v18508_v46, %v18508_v46  ;;  %v7991_v5 = vsel %vm7977_vm4, %v18508_v46, 0.0 }
 0x894   :  { %v7989_v1 = vsel %vm7977_vm4, %v18510_v23, 0.0  ;;  %v8022_v18 = vmul.f32 %v18510_v23, %v18510_v23 }
 0x895   :  { %v7990_v21 = vadd.f32 %v7989_v1, %v7988_v20  ;;  %v8045_v24 = vsel %vm7977_vm4, %v8023_v50, 0.0 }
 0x896   :  { %v8043_v38 = vsel %vm7977_vm4, %v8022_v18, 0.0 }
 0x897   :  { %v8044_v59 = vadd.f32 %v8043_v38, %v8042_v36  ;;  %v7992_v60 = vadd.f32 %v7991_v5, %v7990_v21 }
 0x899   :  { %v8046_v16 = vadd.f32 %v8045_v24, %v8044_v59 }
 0x89a   :  { %v18522_v10 = vpop.f32.mrb[72].mxu0 }
 0x89b   :  { %v18524_v45 = vpop.f32.mrb[73].mxu0  ;;  %v8025_v53 = vmul.f32 %v18522_v10, %v18522_v10  ;;  %v7995_v3 = vsel %vm7977_vm4, %v18522_v10, 0.0 }
 0x89c   :  { %v7993_v34 = vsel %vm7977_vm4, %v18524_v45, 0.0  ;;  %v8024_v7 = vmul.f32 %v18524_v45, %v18524_v45 }
 0x89d   :  { %v7994_v43 = vadd.f32 %v7993_v34, %v7992_v60  ;;  %v8049_v27 = vsel %vm7977_vm4, %v8025_v53, 0.0 }
 0x89e   :  { %v8047_v52 = vsel %vm7977_vm4, %v8024_v7, 0.0 }
 0x89f   :  { %v8048_v30 = vadd.f32 %v8047_v52, %v8046_v16  ;;  %v7996_v8 = vadd.f32 %v7995_v3, %v7994_v43 }
 0x8a1   :  { %v8050_v9 = vadd.f32 %v8049_v27, %v8048_v30 }
 0x8a2   :  { %v18536_v48 = vpop.f32.mrb[74].mxu0 }
 0x8a3   :  { %v18538_v17 = vpop.f32.mrb[75].mxu0  ;;  %v8027_v56 = vmul.f32 %v18536_v48, %v18536_v48  ;;  %v7999_v26 = vsel %vm7977_vm4, %v18536_v48, 0.0 }
 0x8a4   :  { %v7997_v33 = vsel %vm7977_vm4, %v18538_v17, 0.0  ;;  %v8026_v14 = vmul.f32 %v18538_v17, %v18538_v17 }
 0x8a5   :  { %v7998_v4 = vadd.f32 %v7997_v33, %v7996_v8  ;;  %v8053_v47 = vsel %vm7977_vm4, %v8027_v56, 0.0  ;;  %v8072_v33 = vld [vmem:[%s19460_s4] sm:$0x1] }
 0x8a6   :  { %v8051_v6 = vsel %vm7977_vm4, %v8026_v14, 0.0 }
 0x8a7   :  { %v8052_v58 = vadd.f32 %v8051_v6, %v8050_v9  ;;  %v8000_v12 = vadd.f32 %v7999_v26, %v7998_v4  ;;  %v8080_v9 = vlaneseq  ;;  %v8076_v6 = vld [vmem:[%s19461_s5] sm:$0x1] }
 0x8a9   :  { %v8054_v57 = vadd.f32 %v8053_v47, %v8052_v58  ;;  %v8081_v56 = vshrl.u32 %v8080_v9, 7 }
 0x8aa   :  { %v18550_v35 = vpop.f32.mrb[76].mxu0 }
 0x8ab   :  { %v18552_v2 = vpop.f32.mrb[77].mxu0  ;;  %v8029_v63 = vmul.f32 %v18550_v35, %v18550_v35  ;;  %v8003_v11 = vsel %vm7977_vm4, %v18550_v35, 0.0  ;;  %v18576_v14 = vsub.s32 0, %v8081_v56 }
 0x8ac   :  { %v8001_v54 = vsel %vm7977_vm4, %v18552_v2, 0.0  ;;  %v8028_v37 = vmul.f32 %v18552_v2, %v18552_v2 }
 0x8ad   :  { %v8002_v62 = vadd.f32 %v8001_v54, %v8000_v12  ;;  %v8057_v49 = vsel %vm7977_vm4, %v8029_v63, 0.0 }
 0x8ae   :  { %v8055_v22 = vsel %vm7977_vm4, %v8028_v37, 0.0 }
 0x8af   :  { %v8056_v0 = vadd.f32 %v8055_v22, %v8054_v57  ;;  %v8004_v42 = vadd.f32 %v8003_v11, %v8002_v62 }
 0x8b1   :  { %v8058_v40 = vadd.f32 %v8057_v49, %v8056_v0 }
 0x8b2   :  { %v18564_v55 = vpop.f32.mrb[78].mxu0 }
 0x8b3   :  { %v7952_v13 = vpop.f32.mrb[79].mxu0  ;;  %v8031_v28 = vmul.f32 %v18564_v55, %v18564_v55  ;;  %v8007_v31 = vsel %vm7977_vm4, %v18564_v55, 0.0 }
 0x8b4   :  { %v8005_v44 = vsel %vm7977_vm4, %v7952_v13, 0.0  ;;  %v8030_v39 = vmul.f32 %v7952_v13, %v7952_v13 }
 0x8b5   :  { %v8006_v29 = vadd.f32 %v8005_v44, %v8004_v42  ;;  %v8061_v50 = vsel %vm7977_vm4, %v8031_v28, 0.0 }
 0x8b6   :  { %v8059_v20 = vsel %vm7977_vm4, %v8030_v39, 0.0 }
 0x8b7   :  { %v8008_v15 = vadd.f32 %v8007_v31, %v8006_v29  ;;  %v8060_v36 = vadd.f32 %v8059_v20, %v8058_v40 }
 0x8b9   :  { %v8009_v1 = vrot.slane %v8008_v15, 4  ;;  %v8062_v18 = vadd.f32 %v8061_v50, %v8060_v36 }
 0x8bb   :  { %v8010_v21 = vadd.f32 %v8009_v1, %v8008_v15  ;;  %v8063_v5 = vrot.slane %v8062_v18, 4 }
 0x8bd   :  { %v8011_v38 = vrot.slane %v8010_v21, 2  ;;  %v8064_v59 = vadd.f32 %v8063_v5, %v8062_v18 }
 0x8bf   :  { %v8012_v60 = vadd.f32 %v8011_v38, %v8010_v21  ;;  %v8065_v24 = vrot.slane %v8064_v59, 2 }
 0x8c1   :  { %v8013_v16 = vrot.slane %v8012_v60, 1  ;;  %v8066_v53 = vadd.f32 %v8065_v24, %v8064_v59 }
 0x8c3   :  { %v8014_v34 = vadd.f32 %v8013_v16, %v8012_v60  ;;  %v8067_v7 = vrot.slane %v8066_v53, 1 }
 0x8c5   :  { %v8015_v43 = vmul.f32 0.0078125, %v8014_v34  ;;  %v8068_v3 = vadd.f32 %v8067_v7, %v8066_v53 }
 0x8c7   :  { %v8069_v52 = vmul.f32 0.0078125, %v8068_v3  ;;  %v8070_v30 = vmul.f32 %v8015_v43, %v8015_v43 }
 0x8c9   :  { %v8071_v8 = vsub.f32 %v8069_v52, %v8070_v30 }
 0x8cb   :  { %v8073_v27 = vadd.f32 1e-05, %v8071_v8 }
 0x8cd   :  { %13881 = vrsqrt.f32 %v8073_v27 }
 0x8d7   :  { %v13882_v4 = vpop.eup %13881 }
 0x8d8   :  { %v8075_v26 = vmul.f32 %v13882_v4, %v8072_v33 }
 0x8da   :  { %v8077_v58 = vmul.f32 %v8075_v26, %v8015_v43  ;;  %v18582_v12 = vrot.slane %v8075_v26, %v18576_v14 }
 0x8dc   :  { %v8078_v47 = vsub.f32 %v8076_v6, %v8077_v58  ;;  %v8099_v57 = vmul.f32 %v18582_v12, %v7952_v13  ;;  %v8085_v63 = vmul.f32 %v18582_v12, %v18469_v25  ;;  %v8086_v54 = vmul.f32 %v18463_v19, %v18582_v12 }
 0x8dd   :  { %v8087_v37 = vmul.f32 %v18582_v12, %v18479_v41  ;;  %v8088_v62 = vmul.f32 %v18477_v51, %v18582_v12  ;;  %v8089_v11 = vmul.f32 %v18582_v12, %v18496_v32  ;;  %v8090_v22 = vmul.f32 %v18494_v61, %v18582_v12 }
 0x8de   :  { %v18598_v0 = vrot.slane %v8078_v47, %v18576_v14  ;;  %v8091_v25 = vmul.f32 %v18582_v12, %v18510_v23  ;;  %v8092_v19 = vmul.f32 %v18508_v46, %v18582_v12  ;;  %v8093_v41 = vmul.f32 %v18582_v12, %v18524_v45 }
 0x8df   :  { %v8094_v51 = vmul.f32 %v18522_v10, %v18582_v12  ;;  %v8095_v32 = vmul.f32 %v18582_v12, %v18538_v17  ;;  %v8096_v61 = vmul.f32 %v18536_v48, %v18582_v12  ;;  %v8097_v42 = vmul.f32 %v18582_v12, %v18552_v2 }
 0x8e0   :  { %v18615_v23 = vadd.f32 %v18598_v0, %v8099_v57  ;;  %v8107_v46 = vadd.f32 %v18598_v0, %v8085_v63  ;;  %v8108_v49 = vadd.f32 %v18598_v0, %v8086_v54  ;;  %v8109_v45 = vadd.f32 %v18598_v0, %v8087_v37 }
 0x8e1   :  { %v8110_v10 = vadd.f32 %v18598_v0, %v8088_v62  ;;  %v8111_v40 = vadd.f32 %v18598_v0, %v8089_v11  ;;  %v8112_v17 = vadd.f32 %v18598_v0, %v8090_v22  ;;  %v8113_v48 = vadd.f32 %v18598_v0, %v8091_v25 }
 0x8e2   :  { %vm8123_vm5 = vcmp.gt.f32.partialorder %v8107_v46, 0.0  ;;  %vm8124_vm6 = vcmp.gt.f32.partialorder %v8108_v49, 0.0  ;;  %v8139_v2 = vmul.f32 0.2, %v8107_v46  ;;  %v8140_v13 = vmul.f32 0.2, %v8108_v49 }
 0x8e3   :  { %vm8125_vm7 = vcmp.gt.f32.partialorder %v8109_v45, 0.0  ;;  %vm8126_vm8 = vcmp.gt.f32.partialorder %v8110_v10, 0.0  ;;  %v8141_v28 = vmul.f32 0.2, %v8109_v45  ;;  %v8142_v44 = vmul.f32 0.2, %v8110_v10 }
 0x8e4   :  { %v8155_v39 = vsel %vm8123_vm5, %v8107_v46, %v8139_v2  ;;  %v8156_v29 = vsel %vm8124_vm6, %v8108_v49, %v8140_v13  ;;  %vm8127_vm9 = vcmp.gt.f32.partialorder %v8111_v40, 0.0  ;;  %vm8128_vm10 = vcmp.gt.f32.partialorder %v8112_v17, 0.0  ;;  %v8173_v46 = vld [vmem:[%s19459_s6 + $0x10] sm:$0xff]  ;;  %v8635_v13 = vld [vmem:[%s19462_s7 + $0x78] sm:$0xff] }
 0x8e5   :  { %v12921_v31 = vpack.c.bf16 %v8156_v29, %v8155_v39  ;;  %v8157_v20 = vsel %vm8125_vm7, %v8109_v45, %v8141_v28  ;;  %v8158_v15 = vsel %vm8126_vm8, %v8110_v10, %v8142_v44  ;;  %v8143_v36 = vmul.f32 0.2, %v8111_v40  ;;  %v8632_v45 = vld [vmem:[%s19462_s7 + $0x60] sm:$0xff]  ;;  %v8633_v10 = vld [vmem:[%s19462_s7 + $0x68] sm:$0xff]  ;;  %v8634_v2 = vld [vmem:[%s19462_s7 + $0x70] sm:$0xff] }
 0x8e6   :  { %v12925_v50 = vpack.c.bf16 %v8158_v15, %v8157_v20  ;;  %v8144_v1 = vmul.f32 0.2, %v8112_v17  ;;  %v8114_v18 = vadd.f32 %v18598_v0, %v8092_v19  ;;  %vm8129_vm11 = vcmp.gt.f32.partialorder %v8113_v48, 0.0  ;;  %v8176_v28 = vld [vmem:[%s19459_s6 + $0x28] sm:$0xff]  ;;  %v8177_v44 = vld [vmem:[%s19459_s6 + $0x30] sm:$0xff]  ;;  %v8178_v29 = vld [vmem:[%s19459_s6 + $0x38] sm:$0xff] }
 0x8e7   :  { %12922 = vmatprep.subr.bf16.mxu0 %v12921_v31  ;;  %v8159_v21 = vsel %vm8127_vm9, %v8111_v40, %v8143_v36  ;;  %v8145_v5 = vmul.f32 0.2, %v8113_v48  ;;  %v8115_v38 = vadd.f32 %v18598_v0, %v8093_v41  ;;  %v8116_v59 = vadd.f32 %v18598_v0, %v8094_v51  ;;  %v8629_v51 = vld [vmem:[%s19462_s7 + $0x48] sm:$0xff]  ;;  %v8174_v40 = vld [vmem:[%s19459_s6 + $0x18] sm:$0xff]  ;;  %v8181_v15 = vld [vmem:[%s19459_s6 + $0x50] sm:$0xff] }
 0x8e8   :  { %12924 = vmatpush3.bf16.msra.mxu0 %v12921_v31  ;;  %v8160_v60 = vsel %vm8128_vm10, %v8112_v17, %v8144_v1  ;;  %vm8130_vm12 = vcmp.gt.f32.partialorder %v8114_v18, 0.0  ;;  %v8146_v24 = vmul.f32 0.2, %v8114_v18  ;;  %v8117_v16 = vadd.f32 %v18598_v0, %v8095_v32  ;;  %v8175_v17 = vld [vmem:[%s19459_s6 + $0x20] sm:$0xff]  ;;  %v8180_v20 = vld [vmem:[%s19459_s6 + $0x48] sm:$0xff]  ;;  %v8182_v36 = vld [vmem:[%s19459_s6 + $0x58] sm:$0xff] }
 0x8e9   :  { %12926 = vmatprep.subr.bf16.mxu0 %v12925_v50  ;;  %v12929_v53 = vpack.c.bf16 %v8160_v60, %v8159_v21  ;;  %v8161_v34 = vsel %vm8129_vm11, %v8113_v48, %v8145_v5  ;;  %vm8131_vm13 = vcmp.gt.f32.partialorder %v8115_v38, 0.0  ;;  %vm8132_vm14 = vcmp.gt.f32.partialorder %v8116_v59, 0.0  ;;  %v8179_v31 = vld [vmem:[%s19459_s6 + $0x40] sm:$0xff]  ;;  %v8184_v1 = vld [vmem:[%s19459_s6 + $0x68] sm:$0xff]  ;;  %v8186_v21 = vld [vmem:[%s19459_s6 + $0x78] sm:$0xff] }
 0x8ea   :  { %v8162_v7 = vsel %vm8130_vm12, %v8114_v18, %v8146_v24  ;;  %v8147_v43 = vmul.f32 0.2, %v8115_v38  ;;  %v8148_v3 = vmul.f32 0.2, %v8116_v59  ;;  %v8118_v52 = vadd.f32 %v18598_v0, %v8096_v61  ;;  %v8630_v61 = vld [vmem:[%s19462_s7 + $0x50] sm:$0xff]  ;;  %v8187_v5 = vld [vmem:[%s19459_s6 + $0x80] sm:$0xff] }
 0x8eb   :  { %v12933_v30 = vpack.c.bf16 %v8162_v7, %v8161_v34  ;;  %vm8133_vm15 = vcmp.gt.f32.partialorder %v8117_v16, 0.0  ;;  %v8149_v8 = vmul.f32 0.2, %v8117_v16  ;;  %v8098_v27 = vmul.f32 %v18550_v35, %v18582_v12  ;;  %v8185_v18 = vld [vmem:[%s19459_s6 + $0x70] sm:$0xff]  ;;  %v8190_v60 = vld [vmem:[%s19459_s6 + $0x98] sm:$0xff]  ;;  %v8191_v24 = vld [vmem:[%s19459_s6 + $0xa0] sm:$0xff] }
 0x8ec   :  { %12928 = vmatpush3.bf16.msra.mxu0 %v12925_v50  ;;  %v8163_v9 = vsel %vm8131_vm13, %v8115_v38, %v8147_v43  ;;  %v8164_v56 = vsel %vm8132_vm14, %v8116_v59, %v8148_v3  ;;  %vm8134_vm1 = vcmp.gt.f32.partialorder %v8118_v52, 0.0  ;;  %v8150_v33 = vmul.f32 0.2, %v8118_v52  ;;  %v8183_v50 = vld [vmem:[%s19459_s6 + $0x60] sm:$0xff]  ;;  %v8188_v38 = vld [vmem:[%s19459_s6 + $0x88] sm:$0xff]  ;;  %v8189_v59 = vld [vmem:[%s19459_s6 + $0x90] sm:$0xff] }
 0x8ed   :  { %12930 = vmatprep.subr.bf16.mxu0 %v12929_v53  ;;  %v12937_v4 = vpack.c.bf16 %v8164_v56, %v8163_v9  ;;  %v8165_v26 = vsel %vm8133_vm15, %v8117_v16, %v8149_v8  ;;  %v8119_v6 = vadd.f32 %v18598_v0, %v8097_v42  ;;  %v8120_v58 = vadd.f32 %v18598_v0, %v8098_v27  ;;  %v8631_v42 = vld [vmem:[%s19462_s7 + $0x58] sm:$0xff]  ;;  %v8192_v16 = vld [vmem:[%s19459_s6 + $0xa8] sm:$0xff]  ;;  %v8195_v7 = vld [vmem:[%s19459_s6 + $0xc0] sm:$0xff] }
 0x8ee   :  { %v8166_v47 = vsel %vm8134_vm1, %v8118_v52, %v8150_v33  ;;  %v8100_v57 = vmul.f32 %v18564_v55, %v18582_v12  ;;  %vm8137_vm2 = vcmp.gt.f32.partialorder %v18615_v23, 0.0  ;;  %v8153_v35 = vmul.f32 0.2, %v18615_v23  ;;  %v8194_v34 = vld [vmem:[%s19459_s6 + $0xb8] sm:$0xff]  ;;  %v8196_v43 = vld [vmem:[%s19459_s6 + $0xc8] sm:$0xff]  ;;  %v8197_v3 = vld [vmem:[%s19459_s6 + $0xd0] sm:$0xff] }
 0x8ef   :  { %v12941_v63 = vpack.c.bf16 %v8166_v47, %v8165_v26  ;;  %vm8135_vm3 = vcmp.gt.f32.partialorder %v8119_v6, 0.0  ;;  %vm8136_vm5 = vcmp.gt.f32.partialorder %v8120_v58, 0.0  ;;  %v8151_v54 = vmul.f32 0.2, %v8119_v6  ;;  %v8198_v52 = vld [vmem:[%s19459_s6 + $0xd8] sm:$0xff]  ;;  %v8200_v8 = vld [vmem:[%s19459_s6 + $0xe8] sm:$0xff] }
 0x8f0   :  { %12932 = vmatpush3.bf16.msra.mxu0 %v12929_v53  ;;  %v8152_v37 = vmul.f32 0.2, %v8120_v58  ;;  %v8122_v62 = vadd.f32 %v18598_v0, %v8100_v57  ;;  %v8169_v19 = vsel %vm8137_vm2, %v18615_v23, %v8153_v35  ;;  %v8628_v0 = vld [vmem:[%s19462_s7 + $0x40] sm:$0xff]  ;;  %v8172_v23 = vld [vmem:[%s19459_s6 + $0x8] sm:$0xff]  ;;  %v12957_v49 = vpack.c.bf16 %v8631_v42, %v8630_v61  ;;  %v8193_v53 = vld [vmem:[%s19459_s6 + $0xb0] sm:$0xff] }
 0x8f1   :  { %12934 = vmatprep.subr.bf16.mxu0 %v12933_v30  ;;  %v8167_v11 = vsel %vm8135_vm3, %v8119_v6, %v8151_v54  ;;  %v12953_v32 = vpack.c.bf16 %v8629_v51, %v8628_v0  ;;  %v12961_v48 = vpack.c.bf16 %v8633_v10, %v8632_v45  ;;  %v12965_v39 = vpack.c.bf16 %v8635_v13, %v8634_v2  ;;  %v8201_v27 = vld [vmem:[%s19459_s6 + $0xf0] sm:$0xff]  ;;  %v8202_v9 = vld [vmem:[%s19459_s6 + $0xf8] sm:$0xff]  ;;  %v8203_v56 = vld [vmem:[%s19459_s6 + $0x100] sm:$0xff] }
 0x8f2   :  { %v8168_v22 = vsel %vm8136_vm5, %v8120_v58, %v8152_v37  ;;  %vm8138_vm6 = vcmp.gt.f32.partialorder %v8122_v62, 0.0  ;;  %v8154_v25 = vmul.f32 0.2, %v8122_v62  ;;  %v8204_v33 = vld [vmem:[%s19459_s6 + $0x108] sm:$0xff]  ;;  %v8206_v26 = vld [vmem:[%s19459_s6 + $0x118] sm:$0xff]  ;;  %v8207_v6 = vld [vmem:[%s19459_s6 + $0x120] sm:$0xff] }
 0x8f3   :  { %v12945_v55 = vpack.c.bf16 %v8168_v22, %v8167_v11  ;;  %v8208_v58 = vld [vmem:[%s19459_s6 + $0x128] sm:$0xff]  ;;  %v8209_v47 = vld [vmem:[%s19459_s6 + $0x130] sm:$0xff]  ;;  %v8210_v57 = vld [vmem:[%s19459_s6 + $0x138] sm:$0xff]  ;;  %vm13886_vm7 = vmmov 0   ;;  %vm10503_vm11 = vcmask 1041408   ;;  %vm10515_vm12 = vcmask 1024  }
 0x8f4   :  { %12936 = vmatpush3.bf16.msra.mxu0 %v12933_v30  ;;  %v8170_v12 = vsel %vm8138_vm6, %v8122_v62, %v8154_v25  ;;  %v8199_v30 = vld [vmem:[%s19459_s6 + $0xe0] sm:$0xff]  ;;  %v8213_v54 = vld [vmem:[%s19459_s6 + $0x150] sm:$0xff]  ;;  %v8214_v37 = vld [vmem:[%s19459_s6 + $0x158] sm:$0xff] }
 0x8f5   :  { %12938 = vmatprep.subr.bf16.mxu0 %v12937_v4  ;;  %v12949_v41 = vpack.c.bf16 %v8170_v12, %v8169_v19  ;;  %v8211_v35 = vld [vmem:[%s19459_s6 + $0x140] sm:$0xff]  ;;  %v8216_v11 = vld [vmem:[%s19459_s6 + $0x168] sm:$0xff]  ;;  %v8217_v22 = vld [vmem:[%s19459_s6 + $0x170] sm:$0xff] }
 0x8f6   :  { %v8215_v62 = vld [vmem:[%s19459_s6 + $0x160] sm:$0xff]  ;;  %v8218_v25 = vld [vmem:[%s19459_s6 + $0x178] sm:$0xff]  ;;  %v8221_v0 = vld [vmem:[%s19459_s6 + $0x190] sm:$0xff] }
 0x8f7   :  { %v8219_v19 = vld [vmem:[%s19459_s6 + $0x180] sm:$0xff]  ;;  %v8224_v42 = vld [vmem:[%s19459_s6 + $0x1a8] sm:$0xff]  ;;  %v8229_v10 = vld [vmem:[%s19459_s6 + $0x1d0] sm:$0xff] }
 0x8f8   :  { %12940 = vmatpush3.bf16.msra.mxu0 %v12937_v4  ;;  %v8205_v4 = vld [vmem:[%s19459_s6 + $0x110] sm:$0xff]  ;;  %v8620_v12 = vld [vmem:[%s19462_s7] sm:$0xff]  ;;  %v8228_v45 = vld [vmem:[%s19459_s6 + $0x1c8] sm:$0xff] }
 0x8f9   :  { %12942 = vmatprep.subr.bf16.mxu0 %v12941_v63  ;;  %v8223_v61 = vld [vmem:[%s19459_s6 + $0x1a0] sm:$0xff]  ;;  %v8233_v2 = vld [vmem:[%s19459_s6 + $0x1f0] sm:$0xff]  ;;  %v8234_v13 = vld [vmem:[%s19459_s6 + $0x1f8] sm:$0xff] }
 0x8fc   :  { %12944 = vmatpush3.bf16.msra.mxu0 %v12941_v63  ;;  %v8212_v63 = vld [vmem:[%s19459_s6 + $0x148] sm:$0xff] }
 0x8fd   :  { %12946 = vmatprep.subr.bf16.mxu0 %v12945_v55 }
 0x900   :  { %12948 = vmatpush3.bf16.msra.mxu0 %v12945_v55  ;;  %v8220_v55 = vld [vmem:[%s19459_s6 + $0x188] sm:$0xff] }
 0x901   :  { %12950 = vmatprep.subr.bf16.mxu0 %v12949_v41 }
 0x904   :  { %12952 = vmatpush3.bf16.msra.mxu0 %v12949_v41  ;;  %v8621_v41 = vld [vmem:[%s19462_s7 + $0x8] sm:$0xff] }
 0x905   :  { %12954 = vmatprep.subr.bf16.mxu0 %v12953_v32  ;;  %v12969_v51 = vpack.c.bf16 %v8621_v41, %v8620_v12 }
 0x907   :  { %12227 = vmatmul.mubr.f32.vlgmr.msra.gmra.mrb[80].mxu0 %v8172_v23  ;;  %v8225_v23 = vld [vmem:[%s19459_s6 + $0x1b0] sm:$0xff] }
 0x908   :  { %12229 = vmatprep.mubr.f32.mxu0 %v8173_v46  ;;  %12956 = vmatpush3.bf16.msra.mxu0 %v12953_v32  ;;  %v8222_v32 = vld [vmem:[%s19459_s6 + $0x198] sm:$0xff] }
 0x909   :  { %12958 = vmatprep.subr.bf16.mxu0 %v12957_v49  ;;  %v8226_v46 = vld [vmem:[%s19459_s6 + $0x1b8] sm:$0xff] }
 0x90b   :  { %12230 = vmatmul.mubr.f32.gmra.mrb[82].mxu0 %v8174_v40  ;;  %v8230_v40 = vld [vmem:[%s19459_s6 + $0x1d8] sm:$0xff] }
 0x90c   :  { %12232 = vmatprep.mubr.f32.mxu0 %v8175_v17  ;;  %12960 = vmatpush3.bf16.msra.mxu0 %v12957_v49  ;;  %v8227_v49 = vld [vmem:[%s19459_s6 + $0x1c0] sm:$0xff] }
 0x90d   :  { %12962 = vmatprep.subr.bf16.mxu0 %v12961_v48  ;;  %v8231_v17 = vld [vmem:[%s19459_s6 + $0x1e0] sm:$0xff] }
 0x90f   :  { %12233 = vmatmul.mubr.f32.gmra.mrb[84].mxu0 %v8176_v28 }
 0x910   :  { %12235 = vmatprep.mubr.f32.mxu0 %v8177_v44  ;;  %12964 = vmatpush3.bf16.msra.mxu0 %v12961_v48  ;;  %v8232_v48 = vld [vmem:[%s19459_s6 + $0x1e8] sm:$0xff] }
 0x911   :  { %12966 = vmatprep.subr.bf16.mxu0 %v12965_v39 }
 0x913   :  { %12236 = vmatmul.mubr.f32.gmra.mrb[86].mxu0 %v8178_v29 }
 0x914   :  { %12238 = vmatprep.mubr.f32.mxu0 %v8179_v31  ;;  %12968 = vmatpush3.bf16.msra.mxu0 %v12965_v39  ;;  %v8622_v31 = vld [vmem:[%s19462_s7 + $0x10] sm:$0xff] }
 0x915   :  { %12970 = vmatprep.subr.bf16.mxu0 %v12969_v51 }
 0x917   :  { %12239 = vmatmul.mubr.f32.gmra.mrb[88].mxu0 %v8180_v20  ;;  %v8623_v20 = vld [vmem:[%s19462_s7 + $0x18] sm:$0xff] }
 0x918   :  { %12241 = vmatprep.mubr.f32.mxu0 %v8181_v15 }
 0x91b   :  { %12242 = vmatmul.mubr.f32.gmra.mrb[90].mxu0 %v8182_v36 }
 0x91c   :  { %12244 = vmatprep.mubr.f32.mxu0 %v8183_v50  ;;  %v12973_v50 = vpack.c.bf16 %v8623_v20, %v8622_v31 }
 0x91f   :  { %12245 = vmatmul.mubr.f32.gmra.mrb[92].mxu0 %v8184_v1  ;;  %v8624_v1 = vld [vmem:[%s19462_s7 + $0x20] sm:$0xff] }
 0x920   :  { %12247 = vmatprep.mubr.f32.mxu0 %v8185_v18  ;;  %v8625_v18 = vld [vmem:[%s19462_s7 + $0x28] sm:$0xff] }
 0x923   :  { %12248 = vmatmul.mubr.f32.gmra.mrb[94].mxu0 %v8186_v21 }
 0x924   :  { %12250 = vmatprep.mubr.f32.mxu0 %v8187_v5 }
 0x927   :  { %12251 = vmatmul.mubr.f32.gmra.mrb[96].mxu0 %v8188_v38  ;;  %v12977_v38 = vpack.c.bf16 %v8625_v18, %v8624_v1 }
 0x928   :  { %12253 = vmatprep.mubr.f32.mxu0 %v8189_v59  ;;  %v8626_v59 = vld [vmem:[%s19462_s7 + $0x30] sm:$0xff] }
 0x92b   :  { %12254 = vmatmul.mubr.f32.gmra.mrb[98].mxu0 %v8190_v60  ;;  %v8627_v60 = vld [vmem:[%s19462_s7 + $0x38] sm:$0xff] }
 0x92c   :  { %12256 = vmatprep.mubr.f32.mxu0 %v8191_v24 }
 0x92f   :  { %12257 = vmatmul.mubr.f32.gmra.mrb[100].mxu0 %v8192_v16  ;;  %v12981_v16 = vpack.c.bf16 %v8627_v60, %v8626_v59 }
 0x930   :  { %12259 = vmatprep.mubr.f32.mxu0 %v8193_v53 }
 0x933   :  { %12260 = vmatmul.mubr.f32.gmra.mrb[102].mxu0 %v8194_v34  ;;  %v8636_v34 = vld [vmem:[%s19462_s7 + $0x80] sm:$0xff] }
 0x934   :  { %12262 = vmatprep.mubr.f32.mxu0 %v8195_v7  ;;  %v8637_v7 = vld [vmem:[%s19462_s7 + $0x88] sm:$0xff] }
 0x937   :  { %12263 = vmatmul.mubr.f32.gmra.mrb[104].mxu0 %v8196_v43 }
 0x938   :  { %12265 = vmatprep.mubr.f32.mxu0 %v8197_v3  ;;  %v12985_v3 = vpack.c.bf16 %v8637_v7, %v8636_v34 }
 0x93b   :  { %12266 = vmatmul.mubr.f32.gmra.mrb[106].mxu0 %v8198_v52 }
 0x93c   :  { %12268 = vmatprep.mubr.f32.mxu0 %v8199_v30  ;;  %v8638_v30 = vld [vmem:[%s19462_s7 + $0x90] sm:$0xff] }
 0x93f   :  { %12269 = vmatmul.mubr.f32.gmra.mrb[108].mxu0 %v8200_v8  ;;  %v8639_v8 = vld [vmem:[%s19462_s7 + $0x98] sm:$0xff] }
 0x940   :  { %12271 = vmatprep.mubr.f32.mxu0 %v8201_v27 }
 0x943   :  { %12272 = vmatmul.mubr.f32.gmra.mrb[110].mxu0 %v8202_v9  ;;  %v12989_v9 = vpack.c.bf16 %v8639_v8, %v8638_v30 }
 0x944   :  { %12274 = vmatprep.mubr.f32.mxu0 %v8203_v56 }
 0x947   :  { %12275 = vmatmul.mubr.f32.gmra.mrb[112].mxu0 %v8204_v33  ;;  %v8640_v33 = vld [vmem:[%s19462_s7 + $0xa0] sm:$0xff] }
 0x948   :  { %12277 = vmatprep.mubr.f32.mxu0 %v8205_v4  ;;  %v8641_v4 = vld [vmem:[%s19462_s7 + $0xa8] sm:$0xff] }
 0x94b   :  { %12278 = vmatmul.mubr.f32.gmra.mrb[114].mxu0 %v8206_v26 }
 0x94c   :  { %12280 = vmatprep.mubr.f32.mxu0 %v8207_v6  ;;  %v12993_v6 = vpack.c.bf16 %v8641_v4, %v8640_v33 }
 0x94f   :  { %12281 = vmatmul.mubr.f32.gmra.mrb[116].mxu0 %v8208_v58 }
 0x950   :  { %12283 = vmatprep.mubr.f32.mxu0 %v8209_v47  ;;  %v8642_v47 = vld [vmem:[%s19462_s7 + $0xb0] sm:$0xff] }
 0x953   :  { %12284 = vmatmul.mubr.f32.gmra.mrb[118].mxu0 %v8210_v57  ;;  %v8643_v57 = vld [vmem:[%s19462_s7 + $0xb8] sm:$0xff] }
 0x954   :  { %12286 = vmatprep.mubr.f32.mxu0 %v8211_v35 }
 0x957   :  { %12287 = vmatmul.mubr.f32.gmra.mrb[120].mxu0 %v8212_v63  ;;  %v12997_v63 = vpack.c.bf16 %v8643_v57, %v8642_v47 }
 0x958   :  { %12289 = vmatprep.mubr.f32.mxu0 %v8213_v54 }
 0x95b   :  { %12290 = vmatmul.mubr.f32.gmra.mrb[122].mxu0 %v8214_v37  ;;  %v8644_v37 = vld [vmem:[%s19462_s7 + $0xc0] sm:$0xff] }
 0x95c   :  { %12292 = vmatprep.mubr.f32.mxu0 %v8215_v62  ;;  %v8645_v62 = vld [vmem:[%s19462_s7 + $0xc8] sm:$0xff] }
 0x95f   :  { %12293 = vmatmul.mubr.f32.gmra.mrb[124].mxu0 %v8216_v11 }
 0x960   :  { %12295 = vmatprep.mubr.f32.mxu0 %v8217_v22  ;;  %v13001_v22 = vpack.c.bf16 %v8645_v62, %v8644_v37 }
 0x963   :  { %12296 = vmatmul.mubr.f32.gmra.mrb[126].mxu0 %v8218_v25 }
 0x964   :  { %12298 = vmatprep.mubr.f32.mxu0 %v8219_v19  ;;  %v8646_v19 = vld [vmem:[%s19462_s7 + $0xd0] sm:$0xff] }
 0x967   :  { %12299 = vmatmul.mubr.f32.gmra.mrb[128].mxu0 %v8220_v55  ;;  %v8647_v55 = vld [vmem:[%s19462_s7 + $0xd8] sm:$0xff] }
 0x968   :  { %12301 = vmatprep.mubr.f32.mxu0 %v8221_v0  ;;  %v13005_v41 = vpack.c.bf16 %v8647_v55, %v8646_v19 }
 0x96b   :  { %12302 = vmatmul.mubr.f32.gmra.mrb[130].mxu0 %v8222_v32  ;;  %v8649_v32 = vld [vmem:[%s19462_s7 + $0xe8] sm:$0xff] }
 0x96c   :  { %12304 = vmatprep.mubr.f32.mxu0 %v8223_v61 }
 0x96f   :  { %12305 = vmatmul.mubr.f32.gmra.mrb[132].mxu0 %v8224_v42 }
 0x970   :  { %12307 = vmatprep.mubr.f32.mxu0 %v8225_v23 }
 0x973   :  { %12308 = vmatmul.mubr.f32.gmra.mrb[134].mxu0 %v8226_v46  ;;  %v8650_v46 = vld [vmem:[%s19462_s7 + $0xf0] sm:$0xff] }
 0x974   :  { %12310 = vmatprep.mubr.f32.mxu0 %v8227_v49  ;;  %v8651_v49 = vld [vmem:[%s19462_s7 + $0xf8] sm:$0xff] }
 0x977   :  { %12311 = vmatmul.mubr.f32.gmra.mrb[136].mxu0 %v8228_v45 }
 0x978   :  { %12313 = vmatprep.mubr.f32.mxu0 %v8229_v10  ;;  %v13013_v10 = vpack.c.bf16 %v8651_v49, %v8650_v46  ;;  %v8674_v46 = vld [vmem:[%s19462_s7 + $0x1b0] sm:$0xff]  ;;  %v8675_v49 = vld [vmem:[%s19462_s7 + $0x1b8] sm:$0xff] }
 0x97b   :  { %12314 = vmatmul.mubr.f32.gmra.mrb[138].mxu0 %v8230_v40 }
 0x97c   :  { %12316 = vmatprep.mubr.f32.mxu0 %v8231_v17  ;;  %v8652_v17 = vld [vmem:[%s19462_s7 + $0x100] sm:$0xff] }
 0x97f   :  { %12317 = vmatmul.mubr.f32.gmra.mrb[140].mxu0 %v8232_v48  ;;  %v8653_v48 = vld [vmem:[%s19462_s7 + $0x108] sm:$0xff] }
 0x980   :  { %12319 = vmatprep.mubr.f32.mxu0 %v8233_v2 }
 0x983   :  { %12320 = vmatmul.mubr.f32.gmra.mrb[142].mxu0 %v8234_v13  ;;  %v13017_v13 = vpack.c.bf16 %v8653_v48, %v8652_v17  ;;  %v8676_v17 = vld [vmem:[%s19462_s7 + $0x1c0] sm:$0xff]  ;;  %v8677_v48 = vld [vmem:[%s19462_s7 + $0x1c8] sm:$0xff] }
 0x9da   :  { %v12228_v28 = vpop.f32.mrb[80].mxu0 }
 0x9db   :  { %v8301_v44 = vpop.f32.mrb[81].mxu0 }
 0x9de   :  { %v12231_v39 = vpop.f32.mrb[82].mxu0 }
 0x9df   :  { %v8311_v29 = vpop.f32.mrb[83].mxu0 }
 0x9e2   :  { %v12234_v15 = vpop.f32.mrb[84].mxu0 }
 0x9e3   :  { %v8321_v36 = vpop.f32.mrb[85].mxu0 }
 0x9e4   :  { %12338 = vmatprep.mubr.msk.f32.mxu0 %vm7977_vm4, %v8321_v36  ;;  %v8657_v36 = vld [vmem:[%s19462_s7 + $0x128] sm:$0xff] }
 0x9e5   :  { %12339 = vmatmul.mubr.msk.f32.vlgmr.msra.gmra.mrb[144].mxu0 %vm7977_vm4, %v12234_v15  ;;  %v8656_v15 = vld [vmem:[%s19462_s7 + $0x120] sm:$0xff] }
 0x9e6   :  { %12972 = vmatpush3.bf16.msra.mxu0 %v12969_v51  ;;  %v12237_v21 = vpop.f32.mrb[86].mxu0  ;;  %v8648_v51 = vld [vmem:[%s19462_s7 + $0xe0] sm:$0xff]  ;;  %v13025_v1 = vpack.c.bf16 %v8657_v36, %v8656_v15 }
 0x9e7   :  { %v8331_v5 = vpop.f32.mrb[87].mxu0  ;;  %12974 = vmatprep.subr.bf16.mxu0 %v12973_v50  ;;  %v13009_v42 = vpack.c.bf16 %v8649_v32, %v8648_v51 }
 0x9e8   :  { %12341 = vmatprep.mubr.msk.f32.mxu0 %vm7977_vm4, %v8331_v5  ;;  %v8659_v5 = vld [vmem:[%s19462_s7 + $0x138] sm:$0xff] }
 0x9e9   :  { %12342 = vmatmul.mubr.msk.f32.gmra.mrb[146].mxu0 %vm7977_vm4, %v12237_v21  ;;  %v8658_v21 = vld [vmem:[%s19462_s7 + $0x130] sm:$0xff] }
 0x9ea   :  { %12976 = vmatpush3.bf16.msra.mxu0 %v12973_v50  ;;  %12360 = vmatprep.mubr.msk.f32.mxu0 %vm7977_vm4, %v8301_v44  ;;  %v12240_v24 = vpop.f32.mrb[88].mxu0  ;;  %v8654_v44 = vld [vmem:[%s19462_s7 + $0x110] sm:$0xff]  ;;  %v13029_v59 = vpack.c.bf16 %v8659_v5, %v8658_v21  ;;  %v8681_v21 = vld [vmem:[%s19462_s7 + $0x1e8] sm:$0xff] }
 0x9eb   :  { %12978 = vmatprep.subr.bf16.mxu0 %v12977_v38  ;;  %v8341_v53 = vpop.f32.mrb[89].mxu0 }
 0x9ee   :  { %12980 = vmatpush3.bf16.msra.mxu0 %v12977_v38  ;;  %v12243_v43 = vpop.f32.mrb[90].mxu0 }
 0x9ef   :  { %12982 = vmatprep.subr.bf16.mxu0 %v12981_v16  ;;  %v8351_v52 = vpop.f32.mrb[91].mxu0 }
 0x9f2   :  { %12984 = vmatpush3.bf16.msra.mxu0 %v12981_v16  ;;  %v18893_v27 = vpop.f32.mrb[92].mxu0  ;;  %v8661_v16 = vld [vmem:[%s19462_s7 + $0x148] sm:$0xff] }
 0x9f3   :  { %12986 = vmatprep.subr.bf16.mxu0 %v12985_v3  ;;  %v8361_v56 = vpop.f32.mrb[93].mxu0 }
 0x9f5   :  { %12361 = vmatmul.mubr.msk.f32.vlgmr.msra.gmra.mrb[144].mxu0 %vm7977_vm4, %v12228_v28 }
 0x9f6   :  { %12363 = vmatprep.mubr.msk.f32.mxu0 %vm7977_vm4, %v8311_v29  ;;  %12988 = vmatpush3.bf16.msra.mxu0 %v12985_v3  ;;  %v18903_v26 = vpop.f32.mrb[94].mxu0  ;;  %v8663_v3 = vld [vmem:[%s19462_s7 + $0x158] sm:$0xff] }
 0x9f7   :  { %12990 = vmatprep.subr.bf16.mxu0 %v12989_v9  ;;  %v8371_v58 = vpop.f32.mrb[95].mxu0 }
 0x9f9   :  { %12364 = vmatmul.mubr.msk.f32.gmra.mrb[146].mxu0 %vm7977_vm4, %v12231_v39  ;;  %v8655_v39 = vld [vmem:[%s19462_s7 + $0x118] sm:$0xff] }
 0x9fa   :  { %12992 = vmatpush3.bf16.msra.mxu0 %v12989_v9  ;;  %12382 = vmatprep.mubr.msk.f32.mxu0 %vm7977_vm4, %v8341_v53  ;;  %v18913_v35 = vpop.f32.mrb[96].mxu0  ;;  %v13021_v31 = vpack.c.bf16 %v8655_v39, %v8654_v44  ;;  %v8665_v9 = vld [vmem:[%s19462_s7 + $0x168] sm:$0xff]  ;;  %v8678_v44 = vld [vmem:[%s19462_s7 + $0x1d0] sm:$0xff]  ;;  %v8679_v39 = vld [vmem:[%s19462_s7 + $0x1d8] sm:$0xff] }
 0x9fb   :  { %12994 = vmatprep.subr.bf16.mxu0 %v12993_v6  ;;  %v8381_v54 = vpop.f32.mrb[97].mxu0  ;;  %v13069_v15 = vpack.c.bf16 %v8679_v39, %v8678_v44  ;;  %v8701_v44 = vld [vmem:[%s19462_s7 + $0x288] sm:$0xff] }
 0x9fe   :  { %12996 = vmatpush3.bf16.msra.mxu0 %v12993_v6  ;;  %v18921_v11 = vpop.f32.mrb[98].mxu0  ;;  %v8667_v6 = vld [vmem:[%s19462_s7 + $0x178] sm:$0xff] }
 0x9ff   :  { %12998 = vmatprep.subr.bf16.mxu0 %v12997_v63  ;;  %v18923_v25 = vpop.f32.mrb[99].mxu0 }
 0xa02   :  { %13000 = vmatpush3.bf16.msra.mxu0 %v12997_v63  ;;  %v18931_v12 = vpop.f32.mrb[100].mxu0  ;;  %v8669_v63 = vld [vmem:[%s19462_s7 + $0x188] sm:$0xff] }
 0xa03   :  { %13002 = vmatprep.subr.bf16.mxu0 %v13001_v22  ;;  %v18933_v0 = vpop.f32.mrb[101].mxu0 }
 0xa05   :  { %12383 = vmatmul.mubr.msk.f32.vlgmr.msra.gmra.mrb[144].mxu0 %vm7977_vm4, %v12240_v24  ;;  %v8660_v24 = vld [vmem:[%s19462_s7 + $0x140] sm:$0xff] }
 0xa06   :  { %13004 = vmatpush3.bf16.msra.mxu0 %v13001_v22  ;;  %12385 = vmatprep.mubr.msk.f32.mxu0 %vm7977_vm4, %v8351_v52  ;;  %v18943_v61 = vpop.f32.mrb[102].mxu0  ;;  %v13033_v34 = vpack.c.bf16 %v8661_v16, %v8660_v24  ;;  %v8671_v22 = vld [vmem:[%s19462_s7 + $0x198] sm:$0xff]  ;;  %v8682_v16 = vld [vmem:[%s19462_s7 + $0x1f0] sm:$0xff] }
 0xa07   :  { %13006 = vmatprep.subr.bf16.mxu0 %v13005_v41  ;;  %v18945_v23 = vpop.f32.mrb[103].mxu0 }
 0xa09   :  { %12386 = vmatmul.mubr.msk.f32.gmra.mrb[146].mxu0 %vm7977_vm4, %v12243_v43  ;;  %v8662_v43 = vld [vmem:[%s19462_s7 + $0x150] sm:$0xff] }
 0xa0a   :  { %13008 = vmatpush3.bf16.msra.mxu0 %v13005_v41  ;;  %12404 = vmatprep.mubr.msk.f32.mxu0 %vm7977_vm4, %v8361_v56  ;;  %v18955_v45 = vpop.f32.mrb[104].mxu0  ;;  %v13037_v30 = vpack.c.bf16 %v8663_v3, %v8662_v43  ;;  %v8672_v41 = vld [vmem:[%s19462_s7 + $0x1a0] sm:$0xff] }
 0xa0b   :  { %13010 = vmatprep.subr.bf16.mxu0 %v13009_v42  ;;  %v18957_v40 = vpop.f32.mrb[105].mxu0  ;;  %v8684_v3 = vld [vmem:[%s19462_s7 + $0x200] sm:$0xff] }
 0xa0e   :  { %13012 = vmatpush3.bf16.msra.mxu0 %v13009_v42  ;;  %v18965_v2 = vpop.f32.mrb[106].mxu0 }
 0xa0f   :  { %13014 = vmatprep.subr.bf16.mxu0 %v13013_v10  ;;  %v18967_v28 = vpop.f32.mrb[107].mxu0 }
 0xa12   :  { %13016 = vmatpush3.bf16.msra.mxu0 %v13013_v10  ;;  %v18975_v29 = vpop.f32.mrb[108].mxu0 }
 0xa13   :  { %13018 = vmatprep.subr.bf16.mxu0 %v13017_v13  ;;  %v18977_v20 = vpop.f32.mrb[109].mxu0 }
 0xa15   :  { %12405 = vmatmul.mubr.msk.f32.vlgmr.msra.gmra.mrb[144].mxu0 %vm7977_vm4, %v18893_v27  ;;  %v8664_v27 = vld [vmem:[%s19462_s7 + $0x160] sm:$0xff] }
 0xa16   :  { %13020 = vmatpush3.bf16.msra.mxu0 %v13017_v13  ;;  %12407 = vmatprep.mubr.msk.f32.mxu0 %vm7977_vm4, %v8371_v58  ;;  %v18988_v50 = vpop.f32.mrb[110].mxu0  ;;  %v13041_v33 = vpack.c.bf16 %v8665_v9, %v8664_v27  ;;  %v13065_v13 = vpack.c.bf16 %v8677_v48, %v8676_v17  ;;  %v8686_v9 = vld [vmem:[%s19462_s7 + $0x210] sm:$0xff] }
 0xa17   :  { %13022 = vmatprep.subr.bf16.mxu0 %v13021_v31  ;;  %v18990_v18 = vpop.f32.mrb[111].mxu0  ;;  %v8698_v48 = vld [vmem:[%s19462_s7 + $0x270] sm:$0xff] }
 0xa19   :  { %12408 = vmatmul.mubr.msk.f32.gmra.mrb[146].mxu0 %vm7977_vm4, %v18903_v26  ;;  %v8666_v26 = vld [vmem:[%s19462_s7 + $0x170] sm:$0xff] }
 0xa1a   :  { %13024 = vmatpush3.bf16.msra.mxu0 %v13021_v31  ;;  %12426 = vmatprep.mubr.msk.f32.mxu0 %vm7977_vm4, %v8381_v54  ;;  %v19001_v38 = vpop.f32.mrb[112].mxu0  ;;  %v13045_v47 = vpack.c.bf16 %v8667_v6, %v8666_v26 }
 0xa1b   :  { %13026 = vmatprep.subr.bf16.mxu0 %v13025_v1  ;;  %v19003_v60 = vpop.f32.mrb[113].mxu0 }
 0xa1e   :  { %13028 = vmatpush3.bf16.msra.mxu0 %v13025_v1  ;;  %v19011_v53 = vpop.f32.mrb[114].mxu0  ;;  %v8680_v1 = vld [vmem:[%s19462_s7 + $0x1e0] sm:$0xff] }
 0xa1f   :  { %13030 = vmatprep.subr.bf16.mxu0 %v13029_v59  ;;  %v19013_v7 = vpop.f32.mrb[115].mxu0 }
 0xa22   :  { %13032 = vmatpush3.bf16.msra.mxu0 %v13029_v59  ;;  %v19021_v52 = vpop.f32.mrb[116].mxu0  ;;  %v13073_v59 = vpack.c.bf16 %v8681_v21, %v8680_v1  ;;  %v8704_v1 = vld [vmem:[%s19462_s7 + $0x2a0] sm:$0xff]  ;;  %v8705_v21 = vld [vmem:[%s19462_s7 + $0x2a8] sm:$0xff] }
 0xa23   :  { %13034 = vmatprep.subr.bf16.mxu0 %v13033_v34  ;;  %v19023_v8 = vpop.f32.mrb[117].mxu0 }
 0xa25   :  { %12427 = vmatmul.mubr.msk.f32.vlgmr.msra.gmra.mrb[144].mxu0 %vm7977_vm4, %v18913_v35  ;;  %v8668_v35 = vld [vmem:[%s19462_s7 + $0x180] sm:$0xff] }
 0xa26   :  { %13036 = vmatpush3.bf16.msra.mxu0 %v13033_v34  ;;  %12429 = vmatprep.mubr.msk.f32.mxu0 %vm7977_vm4, %v18923_v25  ;;  %v19035_v56 = vpop.f32.mrb[118].mxu0  ;;  %v13049_v37 = vpack.c.bf16 %v8669_v63, %v8668_v35  ;;  %v8683_v34 = vld [vmem:[%s19462_s7 + $0x1f8] sm:$0xff]  ;;  %v8688_v35 = vld [vmem:[%s19462_s7 + $0x220] sm:$0xff]  ;;  %v8689_v63 = vld [vmem:[%s19462_s7 + $0x228] sm:$0xff] }
 0xa27   :  { %13038 = vmatprep.subr.bf16.mxu0 %v13037_v30  ;;  %v19037_v4 = vpop.f32.mrb[119].mxu0 }
 0xa29   :  { %12430 = vmatmul.mubr.msk.f32.gmra.mrb[146].mxu0 %vm7977_vm4, %v18921_v11  ;;  %v8670_v11 = vld [vmem:[%s19462_s7 + $0x190] sm:$0xff] }
 0xa2a   :  { %13040 = vmatpush3.bf16.msra.mxu0 %v13037_v30  ;;  %12448 = vmatprep.mubr.msk.f32.mxu0 %vm7977_vm4, %v18933_v0  ;;  %v19049_v58 = vpop.f32.mrb[120].mxu0  ;;  %v13053_v19 = vpack.c.bf16 %v8671_v22, %v8670_v11  ;;  %v8673_v0 = vld [vmem:[%s19462_s7 + $0x1a8] sm:$0xff]  ;;  %v13089_v11 = vpack.c.bf16 %v8689_v63, %v8688_v35  ;;  %v8715_v35 = vld [vmem:[%s19462_s7 + $0x2f8] sm:$0xff] }
 0xa2b   :  { %13042 = vmatprep.subr.bf16.mxu0 %v13041_v33  ;;  %v19051_v57 = vpop.f32.mrb[121].mxu0  ;;  %v13057_v32 = vpack.c.bf16 %v8673_v0, %v8672_v41  ;;  %v8685_v30 = vld [vmem:[%s19462_s7 + $0x208] sm:$0xff]  ;;  %v8691_v41 = vld [vmem:[%s19462_s7 + $0x238] sm:$0xff] }
 0xa2c   :  { %v13081_v27 = vpack.c.bf16 %v8685_v30, %v8684_v3  ;;  %v8693_v0 = vld [vmem:[%s19462_s7 + $0x248] sm:$0xff] }
 0xa2d   :  { %v8717_v63 = vld [vmem:[%s19462_s7 + $0x308] sm:$0xff] }
 0xa2e   :  { %13044 = vmatpush3.bf16.msra.mxu0 %v13041_v33  ;;  %v19059_v54 = vpop.f32.mrb[122].mxu0  ;;  %v8687_v33 = vld [vmem:[%s19462_s7 + $0x218] sm:$0xff] }
 0xa2f   :  { %13046 = vmatprep.subr.bf16.mxu0 %v13045_v47  ;;  %v19061_v62 = vpop.f32.mrb[123].mxu0  ;;  %v13085_v6 = vpack.c.bf16 %v8687_v33, %v8686_v9  ;;  %v8713_v9 = vld [vmem:[%s19462_s7 + $0x2e8] sm:$0xff] }
 0xa32   :  { %13048 = vmatpush3.bf16.msra.mxu0 %v13045_v47  ;;  %v19069_v25 = vpop.f32.mrb[124].mxu0 }
 0xa33   :  { %13050 = vmatprep.subr.bf16.mxu0 %v13049_v37  ;;  %v19071_v55 = vpop.f32.mrb[125].mxu0 }
 0xa35   :  { %12449 = vmatmul.mubr.msk.f32.vlgmr.msra.gmra.mrb[144].mxu0 %vm7977_vm4, %v18931_v12 }
 0xa36   :  { %13052 = vmatpush3.bf16.msra.mxu0 %v13049_v37  ;;  %12451 = vmatprep.mubr.msk.f32.mxu0 %vm7977_vm4, %v18945_v23  ;;  %v19083_v51 = vpop.f32.mrb[126].mxu0  ;;  %v13061_v23 = vpack.c.bf16 %v8675_v49, %v8674_v46  ;;  %v8696_v49 = vld [vmem:[%s19462_s7 + $0x260] sm:$0xff] }
 0xa37   :  { %13054 = vmatprep.subr.bf16.mxu0 %v13053_v19  ;;  %v19085_v42 = vpop.f32.mrb[127].mxu0 }
 0xa39   :  { %12452 = vmatmul.mubr.msk.f32.gmra.mrb[146].mxu0 %vm7977_vm4, %v18943_v61 }
 0xa3a   :  { %13056 = vmatpush3.bf16.msra.mxu0 %v13053_v19  ;;  %12470 = vmatprep.mubr.msk.f32.mxu0 %vm7977_vm4, %v18957_v40  ;;  %v19097_v12 = vpop.f32.mrb[128].mxu0  ;;  %v8690_v19 = vld [vmem:[%s19462_s7 + $0x230] sm:$0xff] }
 0xa3b   :  { %13058 = vmatprep.subr.bf16.mxu0 %v13057_v32  ;;  %v19099_v10 = vpop.f32.mrb[129].mxu0 }
 0xa3e   :  { %13060 = vmatpush3.bf16.msra.mxu0 %v13057_v32  ;;  %v19107_v61 = vpop.f32.mrb[130].mxu0 }
 0xa3f   :  { %13062 = vmatprep.subr.bf16.mxu0 %v13061_v23  ;;  %v19109_v40 = vpop.f32.mrb[131].mxu0 }
 0xa42   :  { %13064 = vmatpush3.bf16.msra.mxu0 %v13061_v23  ;;  %v19117_v31 = vpop.f32.mrb[132].mxu0  ;;  %v8697_v23 = vld [vmem:[%s19462_s7 + $0x268] sm:$0xff] }
 0xa43   :  { %13066 = vmatprep.subr.bf16.mxu0 %v13065_v13  ;;  %v19119_v36 = vpop.f32.mrb[133].mxu0  ;;  %v13105_v17 = vpack.c.bf16 %v8697_v23, %v8696_v49  ;;  %v8728_v49 = vld [vmem:[%s19462_s7 + $0x360] sm:$0xff]  ;;  %v8729_v23 = vld [vmem:[%s19462_s7 + $0x368] sm:$0xff] }
 0xa45   :  { %12471 = vmatmul.mubr.msk.f32.vlgmr.msra.gmra.mrb[144].mxu0 %vm7977_vm4, %v18955_v45 }
 0xa46   :  { %13068 = vmatpush3.bf16.msra.mxu0 %v13065_v13  ;;  %12473 = vmatprep.mubr.msk.f32.mxu0 %vm7977_vm4, %v18967_v28  ;;  %v19131_v5 = vpop.f32.mrb[134].mxu0  ;;  %v13077_v28 = vpack.c.bf16 %v8683_v34, %v8682_v16  ;;  %v8699_v13 = vld [vmem:[%s19462_s7 + $0x278] sm:$0xff]  ;;  %v8706_v16 = vld [vmem:[%s19462_s7 + $0x2b0] sm:$0xff] }
 0xa47   :  { %13070 = vmatprep.subr.bf16.mxu0 %v13069_v15  ;;  %v19133_v24 = vpop.f32.mrb[135].mxu0  ;;  %v8707_v34 = vld [vmem:[%s19462_s7 + $0x2b8] sm:$0xff] }
 0xa49   :  { %12474 = vmatmul.mubr.msk.f32.gmra.mrb[146].mxu0 %vm7977_vm4, %v18965_v2 }
 0xa4a   :  { %13072 = vmatpush3.bf16.msra.mxu0 %v13069_v15  ;;  %12492 = vmatprep.mubr.msk.f32.mxu0 %vm7977_vm4, %v18977_v20  ;;  %v19145_v45 = vpop.f32.mrb[136].mxu0 }
 0xa4b   :  { %13074 = vmatprep.subr.bf16.mxu0 %v13073_v59  ;;  %v19147_v43 = vpop.f32.mrb[137].mxu0 }
 0xa4e   :  { %13076 = vmatpush3.bf16.msra.mxu0 %v13073_v59  ;;  %v19155_v2 = vpop.f32.mrb[138].mxu0  ;;  %v13121_v59 = vpack.c.bf16 %v8705_v21, %v8704_v1  ;;  %v8739_v1 = vld [vmem:[%s19462_s7 + $0x3b8] sm:$0xff]  ;;  %v8741_v21 = vld [vmem:[%s19462_s7 + $0x3c8] sm:$0xff] }
 0xa4f   :  { %13078 = vmatprep.subr.bf16.mxu0 %v13077_v28  ;;  %v19157_v20 = vpop.f32.mrb[139].mxu0 }
 0xa52   :  { %13080 = vmatpush3.bf16.msra.mxu0 %v13077_v28  ;;  %v19165_v26 = vpop.f32.mrb[140].mxu0  ;;  %v8709_v28 = vld [vmem:[%s19462_s7 + $0x2c8] sm:$0xff] }
 0xa53   :  { %13082 = vmatprep.subr.bf16.mxu0 %v13081_v27  ;;  %v19167_v47 = vpop.f32.mrb[141].mxu0 }
 0xa55   :  { %12493 = vmatmul.mubr.msk.f32.vlgmr.msra.gmra.mrb[144].mxu0 %vm7977_vm4, %v18975_v29  ;;  %v13093_v29 = vpack.c.bf16 %v8691_v41, %v8690_v19  ;;  %v8720_v41 = vld [vmem:[%s19462_s7 + $0x320] sm:$0xff] }
 0xa56   :  { %13084 = vmatpush3.bf16.msra.mxu0 %v13081_v27  ;;  %12495 = vmatprep.mubr.msk.f32.mxu0 %vm7977_vm4, %v18990_v18  ;;  %v19179_v37 = vpop.f32.mrb[142].mxu0  ;;  %v8692_v18 = vld [vmem:[%s19462_s7 + $0x240] sm:$0xff] }
 0xa57   :  { %13086 = vmatprep.subr.bf16.mxu0 %v13085_v6  ;;  %v19181_v22 = vpop.f32.mrb[143].mxu0  ;;  %v13097_v32 = vpack.c.bf16 %v8693_v0, %v8692_v18  ;;  %v8712_v27 = vld [vmem:[%s19462_s7 + $0x2e0] sm:$0xff]  ;;  %v8722_v0 = vld [vmem:[%s19462_s7 + $0x330] sm:$0xff] }
 0xa58   :  { %v13137_v33 = vpack.c.bf16 %v8713_v9, %v8712_v27 }
 0xa59   :  { %12496 = vmatmul.mubr.msk.f32.gmra.mrb[146].mxu0 %vm7977_vm4, %v18988_v50  ;;  %v8694_v50 = vld [vmem:[%s19462_s7 + $0x250] sm:$0xff] }
 0xa5a   :  { %13088 = vmatpush3.bf16.msra.mxu0 %v13085_v6  ;;  %12514 = vmatprep.mubr.msk.f32.mxu0 %vm7977_vm4, %v19003_v60  ;;  %v8695_v60 = vld [vmem:[%s19462_s7 + $0x258] sm:$0xff]  ;;  %v8714_v6 = vld [vmem:[%s19462_s7 + $0x2f0] sm:$0xff] }
 0xa5b   :  { %13090 = vmatprep.subr.bf16.mxu0 %v13089_v11  ;;  %v13101_v46 = vpack.c.bf16 %v8695_v60, %v8694_v50  ;;  %v8725_v50 = vld [vmem:[%s19462_s7 + $0x348] sm:$0xff] }
 0xa5e   :  { %13092 = vmatpush3.bf16.msra.mxu0 %v13089_v11 }
 0xa5f   :  { %13094 = vmatprep.subr.bf16.mxu0 %v13093_v29 }
 0xa62   :  { %13096 = vmatpush3.bf16.msra.mxu0 %v13093_v29  ;;  %v8721_v29 = vld [vmem:[%s19462_s7 + $0x328] sm:$0xff] }
 0xa63   :  { %13098 = vmatprep.subr.bf16.mxu0 %v13097_v32  ;;  %v13153_v18 = vpack.c.bf16 %v8721_v29, %v8720_v41 }
 0xa65   :  { %12515 = vmatmul.mubr.msk.f32.vlgmr.msra.gmra.mrb[144].mxu0 %vm7977_vm4, %v19001_v38  ;;  %v13109_v38 = vpack.c.bf16 %v8699_v13, %v8698_v48  ;;  %v8730_v48 = vld [vmem:[%s19462_s7 + $0x370] sm:$0xff]  ;;  %v8731_v13 = vld [vmem:[%s19462_s7 + $0x378] sm:$0xff] }
 0xa66   :  { %13100 = vmatpush3.bf16.msra.mxu0 %v13097_v32  ;;  %12517 = vmatprep.mubr.msk.f32.mxu0 %vm7977_vm4, %v19013_v7  ;;  %v8700_v7 = vld [vmem:[%s19462_s7 + $0x280] sm:$0xff]  ;;  %v8723_v32 = vld [vmem:[%s19462_s7 + $0x338] sm:$0xff] }
 0xa67   :  { %13102 = vmatprep.subr.bf16.mxu0 %v13101_v46  ;;  %v13113_v39 = vpack.c.bf16 %v8701_v44, %v8700_v7 }
 0xa69   :  { %12518 = vmatmul.mubr.msk.f32.gmra.mrb[146].mxu0 %vm7977_vm4, %v19011_v53  ;;  %v8702_v53 = vld [vmem:[%s19462_s7 + $0x290] sm:$0xff] }
 0xa6a   :  { %13104 = vmatpush3.bf16.msra.mxu0 %v13101_v46  ;;  %12536 = vmatprep.mubr.msk.f32.mxu0 %vm7977_vm4, %v19023_v8  ;;  %v8703_v8 = vld [vmem:[%s19462_s7 + $0x298] sm:$0xff] }
 0xa6b   :  { %13106 = vmatprep.subr.bf16.mxu0 %v13105_v17  ;;  %v13117_v15 = vpack.c.bf16 %v8703_v8, %v8702_v53  ;;  %v8737_v53 = vld [vmem:[%s19462_s7 + $0x3a8] sm:$0xff] }
 0xa6e   :  { %13108 = vmatpush3.bf16.msra.mxu0 %v13105_v17  ;;  %v13169_v17 = vpack.c.bf16 %v8729_v23, %v8728_v49  ;;  %v10382_v49 = vld [vmem:[%s19463_s8] sm:$0x1] }
 0xa6f   :  { %13110 = vmatprep.subr.bf16.mxu0 %v13109_v38 }
 0xa72   :  { %13112 = vmatpush3.bf16.msra.mxu0 %v13109_v38  ;;  %v8733_v38 = vld [vmem:[%s19462_s7 + $0x388] sm:$0xff] }
 0xa73   :  { %13114 = vmatprep.subr.bf16.mxu0 %v13113_v39 }
 0xa75   :  { %12537 = vmatmul.mubr.msk.f32.vlgmr.msra.gmra.mrb[144].mxu0 %vm7977_vm4, %v19021_v52  ;;  %v13125_v52 = vpack.c.bf16 %v8707_v34, %v8706_v16  ;;  %v8744_v34 = vld [vmem:[%s19462_s7 + $0x3e0] sm:$0xff] }
 0xa76   :  { %13116 = vmatpush3.bf16.msra.mxu0 %v13113_v39  ;;  %12539 = vmatprep.mubr.msk.f32.mxu0 %vm7977_vm4, %v19037_v4  ;;  %v8708_v4 = vld [vmem:[%s19462_s7 + $0x2c0] sm:$0xff] }
 0xa77   :  { %13118 = vmatprep.subr.bf16.mxu0 %v13117_v15  ;;  %v13129_v3 = vpack.c.bf16 %v8709_v28, %v8708_v4  ;;  %v8736_v39 = vld [vmem:[%s19462_s7 + $0x3a0] sm:$0xff]  ;;  %v8746_v28 = vld [vmem:[%s19462_s7 + $0x3f0] sm:$0xff] }
 0xa78   :  { %v13185_v8 = vpack.c.bf16 %v8737_v53, %v8736_v39 }
 0xa79   :  { %12540 = vmatmul.mubr.msk.f32.gmra.mrb[146].mxu0 %vm7977_vm4, %v19035_v56  ;;  %v8710_v56 = vld [vmem:[%s19462_s7 + $0x2d0] sm:$0xff] }
 0xa7a   :  { %13120 = vmatpush3.bf16.msra.mxu0 %v13117_v15  ;;  %12558 = vmatprep.mubr.msk.f32.mxu0 %vm7977_vm4, %v19051_v57  ;;  %v8711_v57 = vld [vmem:[%s19462_s7 + $0x2d8] sm:$0xff]  ;;  %v8738_v15 = vld [vmem:[%s19462_s7 + $0x3b0] sm:$0xff] }
 0xa7b   :  { %13122 = vmatprep.subr.bf16.mxu0 %v13121_v59  ;;  %v13133_v30 = vpack.c.bf16 %v8711_v57, %v8710_v56 }
 0xa7e   :  { %13124 = vmatpush3.bf16.msra.mxu0 %v13121_v59 }
 0xa7f   :  { %13126 = vmatprep.subr.bf16.mxu0 %v13125_v52 }
 0xa82   :  { %13128 = vmatpush3.bf16.msra.mxu0 %v13125_v52  ;;  %v8745_v52 = vld [vmem:[%s19462_s7 + $0x3e8] sm:$0xff] }
 0xa83   :  { %13130 = vmatprep.subr.bf16.mxu0 %v13129_v3  ;;  %v13201_v4 = vpack.c.bf16 %v8745_v52, %v8744_v34 }
 0xa85   :  { %12559 = vmatmul.mubr.msk.f32.vlgmr.msra.gmra.mrb[144].mxu0 %vm7977_vm4, %v19049_v58  ;;  %v13141_v58 = vpack.c.bf16 %v8715_v35, %v8714_v6 }
 0xa86   :  { %13132 = vmatpush3.bf16.msra.mxu0 %v13129_v3  ;;  %12561 = vmatprep.mubr.msk.f32.mxu0 %vm7977_vm4, %v19061_v62  ;;  %v8716_v62 = vld [vmem:[%s19462_s7 + $0x300] sm:$0xff]  ;;  %v8747_v3 = vld [vmem:[%s19462_s7 + $0x3f8] sm:$0xff] }
 0xa87   :  { %13134 = vmatprep.subr.bf16.mxu0 %v13133_v30  ;;  %v13145_v11 = vpack.c.bf16 %v8717_v63, %v8716_v62 }
 0xa89   :  { %12562 = vmatmul.mubr.msk.f32.gmra.mrb[146].mxu0 %vm7977_vm4, %v19059_v54  ;;  %v8718_v54 = vld [vmem:[%s19462_s7 + $0x310] sm:$0xff] }
 0xa8a   :  { %13136 = vmatpush3.bf16.msra.mxu0 %v13133_v30  ;;  %12580 = vmatprep.mubr.msk.f32.mxu0 %vm7977_vm4, %v19071_v55  ;;  %v8719_v55 = vld [vmem:[%s19462_s7 + $0x318] sm:$0xff] }
 0xa8b   :  { %13138 = vmatprep.subr.bf16.mxu0 %v13137_v33  ;;  %v13149_v19 = vpack.c.bf16 %v8719_v55, %v8718_v54 }
 0xa8e   :  { %13140 = vmatpush3.bf16.msra.mxu0 %v13137_v33 }
 0xa8f   :  { %13142 = vmatprep.subr.bf16.mxu0 %v13141_v58 }
 0xa92   :  { %13144 = vmatpush3.bf16.msra.mxu0 %v13141_v58 }
 0xa93   :  { %13146 = vmatprep.subr.bf16.mxu0 %v13145_v11 }
 0xa95   :  { %12581 = vmatmul.mubr.msk.f32.vlgmr.msra.gmra.mrb[144].mxu0 %vm7977_vm4, %v19069_v25  ;;  %v13157_v25 = vpack.c.bf16 %v8723_v32, %v8722_v0 }
 0xa96   :  { %12583 = vmatprep.mubr.msk.f32.mxu0 %vm7977_vm4, %v19085_v42  ;;  %13148 = vmatpush3.bf16.msra.mxu0 %v13145_v11  ;;  %v8724_v42 = vld [vmem:[%s19462_s7 + $0x340] sm:$0xff] }
 0xa97   :  { %13150 = vmatprep.subr.bf16.mxu0 %v13149_v19  ;;  %v13161_v60 = vpack.c.bf16 %v8725_v50, %v8724_v42 }
 0xa99   :  { %12584 = vmatmul.mubr.msk.f32.gmra.mrb[146].mxu0 %vm7977_vm4, %v19083_v51  ;;  %v8726_v51 = vld [vmem:[%s19462_s7 + $0x350] sm:$0xff] }
 0xa9a   :  { %13152 = vmatpush3.bf16.msra.mxu0 %v13149_v19  ;;  %12602 = vmatprep.mubr.msk.f32.mxu0 %vm7977_vm4, %v19099_v10  ;;  %v8727_v10 = vld [vmem:[%s19462_s7 + $0x358] sm:$0xff] }
 0xa9b   :  { %13154 = vmatprep.subr.bf16.mxu0 %v13153_v18  ;;  %v13165_v46 = vpack.c.bf16 %v8727_v10, %v8726_v51 }
 0xa9e   :  { %13156 = vmatpush3.bf16.msra.mxu0 %v13153_v18 }
 0xa9f   :  { %13158 = vmatprep.subr.bf16.mxu0 %v13157_v25 }
 0xaa2   :  { %13160 = vmatpush3.bf16.msra.mxu0 %v13157_v25 }
 0xaa3   :  { %13162 = vmatprep.subr.bf16.mxu0 %v13161_v60 }
 0xaa5   :  { %12603 = vmatmul.mubr.msk.f32.vlgmr.msra.gmra.mrb[144].mxu0 %vm7977_vm4, %v19097_v12  ;;  %v13173_v12 = vpack.c.bf16 %v8731_v13, %v8730_v48  ;;  %v10386_v48 = vld [vmem:[%s19464_s9] sm:$0x1] }
 0xaa6   :  { %12605 = vmatprep.mubr.msk.f32.mxu0 %vm7977_vm4, %v19109_v40  ;;  %13164 = vmatpush3.bf16.msra.mxu0 %v13161_v60  ;;  %v8732_v40 = vld [vmem:[%s19462_s7 + $0x380] sm:$0xff] }
 0xaa7   :  { %13166 = vmatprep.subr.bf16.mxu0 %v13165_v46  ;;  %v13177_v7 = vpack.c.bf16 %v8733_v38, %v8732_v40 }
 0xaa9   :  { %12606 = vmatmul.mubr.msk.f32.gmra.mrb[146].mxu0 %vm7977_vm4, %v19107_v61  ;;  %v8734_v61 = vld [vmem:[%s19462_s7 + $0x390] sm:$0xff] }
 0xaaa   :  { %13168 = vmatpush3.bf16.msra.mxu0 %v13165_v46  ;;  %12624 = vmatprep.mubr.msk.f32.mxu0 %vm7977_vm4, %v19119_v36  ;;  %v8735_v36 = vld [vmem:[%s19462_s7 + $0x398] sm:$0xff] }
 0xaab   :  { %13170 = vmatprep.subr.bf16.mxu0 %v13169_v17  ;;  %v13181_v44 = vpack.c.bf16 %v8735_v36, %v8734_v61 }
 0xaae   :  { %13172 = vmatpush3.bf16.msra.mxu0 %v13169_v17 }
 0xaaf   :  { %13174 = vmatprep.subr.bf16.mxu0 %v13173_v12 }
 0xab2   :  { %13176 = vmatpush3.bf16.msra.mxu0 %v13173_v12 }
 0xab3   :  { %13178 = vmatprep.subr.bf16.mxu0 %v13177_v7 }
 0xab5   :  { %12625 = vmatmul.mubr.msk.f32.vlgmr.msra.gmra.mrb[144].mxu0 %vm7977_vm4, %v19117_v31  ;;  %v13189_v31 = vpack.c.bf16 %v8739_v1, %v8738_v15  ;;  %v10421_v1 = vld [vmem:[%s19465_s10] sm:$0xff] }
 0xab6   :  { %12627 = vmatprep.mubr.msk.f32.mxu0 %vm7977_vm4, %v19133_v24  ;;  %13180 = vmatpush3.bf16.msra.mxu0 %v13177_v7  ;;  %v8740_v24 = vld [vmem:[%s19462_s7 + $0x3c0] sm:$0xff] }
 0xab7   :  { %13182 = vmatprep.subr.bf16.mxu0 %v13181_v44  ;;  %v13193_v59 = vpack.c.bf16 %v8741_v21, %v8740_v24  ;;  %v10423_v24 = vld [vmem:[%s19465_s10 + $0x10] sm:$0xff] }
 0xab9   :  { %12628 = vmatmul.mubr.msk.f32.gmra.mrb[146].mxu0 %vm7977_vm4, %v19131_v5  ;;  %v8742_v5 = vld [vmem:[%s19462_s7 + $0x3d0] sm:$0xff] }
 0xaba   :  { %13184 = vmatpush3.bf16.msra.mxu0 %v13181_v44  ;;  %12646 = vmatprep.mubr.msk.f32.mxu0 %vm7977_vm4, %v19147_v43  ;;  %v8743_v43 = vld [vmem:[%s19462_s7 + $0x3d8] sm:$0xff] }
 0xabb   :  { %13186 = vmatprep.subr.bf16.mxu0 %v13185_v8  ;;  %v13197_v16 = vpack.c.bf16 %v8743_v43, %v8742_v5 }
 0xabe   :  { %13188 = vmatpush3.bf16.msra.mxu0 %v13185_v8 }
 0xabf   :  { %13190 = vmatprep.subr.bf16.mxu0 %v13189_v31 }
 0xac2   :  { %13192 = vmatpush3.bf16.msra.mxu0 %v13189_v31 }
 0xac3   :  { %13194 = vmatprep.subr.bf16.mxu0 %v13193_v59 }
 0xac5   :  { %12647 = vmatmul.mubr.msk.f32.vlgmr.msra.gmra.mrb[144].mxu0 %vm7977_vm4, %v19145_v45  ;;  %v13205_v45 = vpack.c.bf16 %v8747_v3, %v8746_v28 }
 0xac6   :  { %12649 = vmatprep.mubr.msk.f32.mxu0 %vm7977_vm4, %v19157_v20  ;;  %13196 = vmatpush3.bf16.msra.mxu0 %v13193_v59  ;;  %v19621_v20 = vmov 0.0|0.0  }
 0xac7   :  { %13198 = vmatprep.subr.bf16.mxu0 %v13197_v16 }
 0xac9   :  { %12650 = vmatmul.mubr.msk.f32.gmra.mrb[146].mxu0 %vm7977_vm4, %v19155_v2  ;;  %v13887_v2 = vmov 0.0  }
 0xaca   :  { %13200 = vmatpush3.bf16.msra.mxu0 %v13197_v16  ;;  %12668 = vmatprep.mubr.msk.f32.mxu0 %vm7977_vm4, %v19167_v47  ;;  %v10424_v16 = vld [vmem:[%s19465_s10 + $0x18] sm:$0xff] }
 0xacb   :  { %13202 = vmatprep.subr.bf16.mxu0 %v13201_v4 }
 0xace   :  { %13204 = vmatpush3.bf16.msra.mxu0 %v13201_v4 }
 0xacf   :  { %13206 = vmatprep.subr.bf16.mxu0 %v13205_v45 }
 0xad2   :  { %13208 = vmatpush3.bf16.msra.mxu0 %v13205_v45 }
 0xad3   :  { %13209 = vmatprep.subr.bf16.mxu0 %v19621_v20 }
 0xad5   :  { %12669 = vmatmul.mubr.msk.f32.vlgmr.msra.gmra.mrb[144].mxu0 %vm7977_vm4, %v19165_v26 }
 0xad6   :  { %12671 = vmatprep.mubr.msk.f32.mxu0 %vm7977_vm4, %v19181_v22 }
 0xad9   :  { %12672 = vmatmul.mubr.msk.f32.gmra.mrb[146].mxu0 %vm7977_vm4, %v19179_v37 }
 0xada   :  { %12682 = vmatprep.mubr.msk.f32.mxu0 %vm13886_vm7, %v13887_v2 }
 0xba8   :  { %v12670_v47 = vpop.f32.mrb[144].mxu0 }
 0xba9   :  { %v10367_v56 = vmul.f32 %v12670_v47, %v12670_v47  ;;  %v10333_v57 = vpop.f32.mrb[145].mxu0 }
 0xbaa   :  { %v10356_v30 = vadd.f32 %v12670_v47, %v10333_v57  ;;  %v10366_v27 = vmul.f32 %v10333_v57, %v10333_v57 }
 0xbac   :  { %v10370_v9 = vadd.f32 %v10367_v56, %v10366_v27  ;;  %v12673_v33 = vpop.f32.mrb[146].mxu0 }
 0xbad   :  { %v10343_v6 = vpop.f32.mrb[147].mxu0  ;;  %v10369_v26 = vmul.f32 %v12673_v33, %v12673_v33 }
 0xbae   :  { %v10357_v35 = vadd.f32 %v10356_v30, %v10343_v6  ;;  %v10368_v58 = vmul.f32 %v10343_v6, %v10343_v6  ;;  %v18_v30 = vstv %s19467_s12 }
 0xbaf   :  { %19 = vst [vmem:[#allocation2] sm:$0x1] %v18_v30 }
 0xbb0   :  { %v10358_v62 = vadd.f32 %v12673_v33, %v10357_v35  ;;  %v10371_v63 = vadd.f32 %v10370_v9, %v10368_v58 }
 0xbb2   :  { %v10359_v22 = vrot.slane %v10358_v62, 4  ;;  %v10372_v11 = vadd.f32 %v10371_v63, %v10369_v26 }
 0xbb4   :  { %v10360_v54 = vadd.f32 %v10359_v22, %v10358_v62  ;;  %v10373_v37 = vrot.slane %v10372_v11, 4 }
 0xbb6   :  { %v10361_v55 = vrot.slane %v10360_v54, 2  ;;  %v10374_v19 = vadd.f32 %v10373_v37, %v10372_v11 }
 0xbb8   :  { %v10362_v41 = vadd.f32 %v10361_v55, %v10360_v54  ;;  %v10375_v29 = vrot.slane %v10374_v19, 2 }
 0xbba   :  { %v10363_v18 = vrot.slane %v10362_v41, 1  ;;  %v10376_v0 = vadd.f32 %v10375_v29, %v10374_v19 }
 0xbbc   :  { %v10364_v32 = vadd.f32 %v10363_v18, %v10362_v41  ;;  %v10377_v25 = vrot.slane %v10376_v0, 1 }
 0xbbe   :  { %v10365_v42 = vmul.f32 0.03125, %v10364_v32  ;;  %v10378_v50 = vadd.f32 %v10377_v25, %v10376_v0 }
 0xbc0   :  { %v10379_v60 = vmul.f32 0.03125, %v10378_v50  ;;  %v10380_v51 = vmul.f32 %v10365_v42, %v10365_v42 }
 0xbc2   :  { %v10381_v10 = vsub.f32 %v10379_v60, %v10380_v51 }
 0xbc4   :  { %v10383_v46 = vadd.f32 1e-05, %v10381_v10 }
 0xbc6   :  { %13883 = vrsqrt.f32 %v10383_v46 }
 0xbd0   :  { %v13884_v23 = vpop.eup %13883 }
 0xbd1   :  { %v10385_v17 = vmul.f32 %v13884_v23, %v10382_v49 }
 0xbd3   :  { %v10387_v13 = vmul.f32 %v10385_v17, %v10365_v42  ;;  %v10393_v12 = vrot.slane %v10385_v17, %v18576_v14 }
 0xbd5   :  { %v10388_v40 = vsub.f32 %v10386_v48, %v10387_v13  ;;  %v10397_v38 = vmul.f32 %v10393_v12, %v10343_v6  ;;  %v10395_v7 = vmul.f32 %v10393_v12, %v10333_v57  ;;  %v10396_v61 = vmul.f32 %v12670_v47, %v10393_v12  ;;  %v10429_v57 = vld [vmem:[%s19466_s11] sm:$0x3] }
 0xbd6   :  { %v10398_v36 = vmul.f32 %v12673_v33, %v10393_v12  ;;  %v10906_v6 = vld [vmem:[#allocation2] ss:$0 sm:$0xff] }
 0xbd7   :  { %v10403_v44 = vrot.slane %v10388_v40, %v18576_v14  ;;  %v10422_v14 = vld [vmem:[%s19465_s10 + $0x8] sm:$0xff] }
 0xbd9   :  { %v10407_v39 = vadd.f32 %v10403_v44, %v10397_v38  ;;  %v10405_v53 = vadd.f32 %v10403_v44, %v10395_v7  ;;  %v10406_v8 = vadd.f32 %v10403_v44, %v10396_v61  ;;  %v10408_v15 = vadd.f32 %v10403_v44, %v10398_v36 }
 0xbdb   :  { %vm10411_vm4 = vcmp.gt.f32.partialorder %v10407_v39, 0.0  ;;  %v10415_v31 = vmul.f32 0.2, %v10407_v39  ;;  %vm10409_vm8 = vcmp.gt.f32.partialorder %v10405_v53, 0.0  ;;  %vm10410_vm9 = vcmp.gt.f32.partialorder %v10406_v8, 0.0 }
 0xbdc   :  { %v10413_v21 = vmul.f32 0.2, %v10405_v53  ;;  %v10414_v59 = vmul.f32 0.2, %v10406_v8  ;;  %vm10412_vm10 = vcmp.gt.f32.partialorder %v10408_v15, 0.0 }
 0xbdd   :  { %v10419_v5 = vsel %vm10411_vm4, %v10407_v39, %v10415_v31  ;;  %v10416_v43 = vmul.f32 0.2, %v10408_v15 }
 0xbde   :  { %v10417_v34 = vsel %vm10409_vm8, %v10405_v53, %v10413_v21  ;;  %v10418_v52 = vsel %vm10410_vm9, %v10406_v8, %v10414_v59  ;;  %v10427_v4 = vmul.f32 %v10423_v24, %v10419_v5 }
 0xbdf   :  { %v10425_v28 = vmul.f32 %v10421_v1, %v10417_v34  ;;  %v10426_v3 = vmul.f32 %v10422_v14, %v10418_v52  ;;  %v10420_v45 = vsel %vm10412_vm10, %v10408_v15, %v10416_v43 }
 0xbe0   :  { %v10428_v2 = vmul.f32 %v10424_v16, %v10420_v45 }
 0xbe1   :  { %v13210_v47 = vpack.c.bf16 %v10426_v3, %v10425_v28 }
 0xbe2   :  { %v13213_v56 = vpack.c.bf16 %v10428_v2, %v10427_v4 }
 0xbe3   :  { %13211 = vmatpush3.bf16.msra.mxu0 %v13210_v47 }
 0xbe4   :  { %13212 = vmatprep.subr.bf16.mxu0 %v19621_v20 }
 0xbe7   :  { %13214 = vmatpush3.bf16.msra.mxu0 %v13213_v56 }
 0xbea   :  { %12683 = vmatmul.mubr.msk.f32.vlgmr.msra.gmra.mrb[148].mxu0 %vm4664_vm0, %v10429_v57 }
 0xcbd   :  { %v10499_v27 = vpop.f32.mrb[148].mxu0 }
 0xcbe   :  { %v12684_v9 = vpop.f32.mrb[149].mxu0  ;;  %v10504_v33 = vsel %vm10503_vm11, %v10499_v27, 0.0 }
 0xcbf   :  { %10505 = vadd.xlane.f32.xlu0 %v10504_v33 }
 0xd4c   :  { %v10506_v35 = vpop.xlane.xlu0 %10505 }
 0xd4d   :  { %v10514_v20 = vadd.f32 %v10906_v6, %v10506_v35 }
 0xd4f   :  { %10516 = vst.msk [vmem:[%s19468_s13] sm:$0x3] %vm10515_vm12, %v10514_v20 }

</bundles_post_ra>
